<compile_context>
chip_gen: v7x
topology: tpu7x:2x2x1
jax: 0.10.0
libtpu: 0.0.40
codegen_flags: <defaults>
</compile_context>

<pallas_src>
import functools

import jax
import jax.numpy as jnp
from jax.experimental import pallas as pl
from jax.experimental.pallas import tpu as pltpu


def _convlstm_cell_kernel(comb_in_ref, c_ref, w_ref, b_ref,
                          h_out_ref, c_out_ref,
                          comb_ref, patch_ref):
    # comb_in_ref : (B, H, W, Cc)       concat([x, h_cur]) in NHWC, f32
    # c_ref       : (B, H, W, hid)      current cell state, f32
    # w_ref       : (KH*KW*Cp, 4*hid)   tap-major, channel-padded conv weight
    # b_ref       : (1, 4*hid)          conv bias, f32
    # h_out_ref   : (B, H, W, hid)
    # c_out_ref   : (B, H, W, hid)
    # comb_ref    : VMEM scratch (B, Hp, Wp, Cp), f32 (zero-padded slab)
    # patch_ref   : VMEM scratch (B*H*W, KH*KW*Cp), matmul operand dtype
    B, H, W, Cc = comb_in_ref.shape
    hid = c_ref.shape[3]
    _, Hp, Wp, Cp = comb_ref.shape
    KH = Hp - H + 1
    KW = Wp - W + 1
    ph = (Hp - H) // 2
    pw = (Wp - W) // 2
    M = B * H * W

    # ---- zero-padded activation slab built entirely in VMEM (no HBM pad) ----
    comb_ref[...] = jnp.zeros(comb_ref.shape, comb_ref.dtype)
    comb_ref[:, ph:ph + H, pw:pw + W, 0:Cc] = comb_in_ref[...]

    # ---- im2col: one lane-aligned (M, KH*KW*Cp) patch matrix ----------------
    for ky in range(KH):
        for kx in range(KW):
            t = ky * KW + kx
            tap = comb_ref[:, ky:ky + H, kx:kx + W, :]          # (B, H, W, Cp)
            patch_ref[:, t * Cp:(t + 1) * Cp] = (
                tap.reshape(M, Cp).astype(patch_ref.dtype))

    # ---- single MXU matmul for all taps / all batch rows, f32 accumulation --
    gates = jnp.dot(patch_ref[...], w_ref[...],
                    preferred_element_type=jnp.float32)          # (M, 4*hid)
    gates = gates + b_ref[...]                                   # (1, 4*hid)

    # ---- LSTM gate math (f32 everywhere) ------------------------------------
    # One wide sigmoid over the contiguous i|f|o lanes, tanh only on g.
    sig = jax.nn.sigmoid(gates[:, 0:3 * hid])
    i = sig[:, 0 * hid:1 * hid]
    f = sig[:, 1 * hid:2 * hid]
    o = sig[:, 2 * hid:3 * hid]
    g = jnp.tanh(gates[:, 3 * hid:4 * hid])

    c_cur = c_ref[...].reshape(M, hid).astype(jnp.float32)
    c_next = f * c_cur + i * g
    h_next = o * jnp.tanh(c_next)

    h_out_ref[...] = h_next.reshape(B, H, W, hid).astype(h_out_ref.dtype)
    c_out_ref[...] = c_next.reshape(B, H, W, hid).astype(c_out_ref.dtype)


@functools.partial(jax.jit, static_argnames=("mxu_dtype", "num_batch_blocks"))
def conv_lstm_forward(x_nchw, weight, bias, hidden_state=None,
                      mxu_dtype=jnp.float32, num_batch_blocks=1):
    """Pallas ConvLSTM forward (one ConvLSTMCell step).

    x_nchw : (B, Cin, H, W) f32
    weight : (4*hid, Cin+hid, KH, KW)  (PyTorch Conv2d layout)
    bias   : (4*hid,)
    hidden_state: optional (h, c), each (B, hid, H, W); zeros if None.
    mxu_dtype: dtype of the matmul operands (bf16 recommended on v6e/v7x).
    num_batch_blocks: grid split over batch (set to 2 on v7x to use both TCs).
    Returns (h_next, c_next), each (B, hid, H, W) f32.
    """
    B, Cin, H, W = x_nchw.shape
    G4, Cc, KH, KW = weight.shape
    hid = G4 // 4
    assert Cc == Cin + hid
    assert B % num_batch_blocks == 0
    Bb = B // num_batch_blocks

    if hidden_state is None:
        h_cur = jnp.zeros((B, hid, H, W), x_nchw.dtype)
        c_cur = jnp.zeros((B, hid, H, W), x_nchw.dtype)
    else:
        h_cur, c_cur = hidden_state

    # Unavoidable layout glue: NCHW -> NHWC.  The channel concat fuses with
    # the transposes; no spatially padded slab is written to HBM.
    x_nhwc = jnp.transpose(x_nchw, (0, 2, 3, 1)).astype(jnp.float32)
    h_nhwc = jnp.transpose(h_cur, (0, 2, 3, 1)).astype(jnp.float32)
    c_nhwc = jnp.transpose(c_cur, (0, 2, 3, 1)).astype(jnp.float32)
    comb_nhwc = jnp.concatenate([x_nhwc, h_nhwc], axis=-1)       # (B, H, W, Cc)

    ph, pw = KH // 2, KW // 2
    Hp, Wp = H + 2 * ph, W + 2 * pw
    Cp = ((Cc + 127) // 128) * 128        # per-tap channel block, lane-aligned
    K = KH * KW * Cp
    M = Bb * H * W

    # Conv weight: (4*hid, Cc, KH, KW) -> (KH*KW*Cp, 4*hid), tap-major with
    # zero rows for the channel padding (so the padded patch lanes are inert).
    w_taps = jnp.transpose(weight, (2, 3, 1, 0))                 # (KH,KW,Cc,G4)
    w_taps = jnp.pad(w_taps, ((0, 0), (0, 0), (0, Cp - Cc), (0, 0)))
    w2 = w_taps.reshape(K, G4).astype(mxu_dtype)
    b2 = bias.reshape(1, G4).astype(jnp.float32)

    grid = (num_batch_blocks,)
    h_next_nhwc, c_next_nhwc = pl.pallas_call(
        _convlstm_cell_kernel,
        out_shape=(
            jax.ShapeDtypeStruct((B, H, W, hid), jnp.float32),
            jax.ShapeDtypeStruct((B, H, W, hid), jnp.float32),
        ),
        grid=grid,
        in_specs=[
            pl.BlockSpec((Bb, H, W, Cc), lambda i: (i, 0, 0, 0)),
            pl.BlockSpec((Bb, H, W, hid), lambda i: (i, 0, 0, 0)),
            pl.BlockSpec((K, G4), lambda i: (0, 0)),
            pl.BlockSpec((1, G4), lambda i: (0, 0)),
        ],
        out_specs=[
            pl.BlockSpec((Bb, H, W, hid), lambda i: (i, 0, 0, 0)),
            pl.BlockSpec((Bb, H, W, hid), lambda i: (i, 0, 0, 0)),
        ],
        scratch_shapes=[
            pltpu.VMEM((Bb, Hp, Wp, Cp), jnp.float32),   # padded concat slab
            pltpu.VMEM((M, K), mxu_dtype),               # im2col patch matrix
        ],
        compiler_params=pltpu.CompilerParams(
            dimension_semantics=("parallel",)),
    )(comb_nhwc, c_nhwc, w2, b2)

    # NHWC -> NCHW for the public (PyTorch-matching) interface.
    h_next = jnp.transpose(h_next_nhwc, (0, 3, 1, 2))
    c_next = jnp.transpose(c_next_nhwc, (0, 3, 1, 2))
    return h_next, c_next


def _reference_forward(x_nchw, weight, bias, hidden_state=None):
    """Pure-JAX reference matching the PyTorch ConvLSTMCell semantics."""
    B, Cin, H, W = x_nchw.shape
    G4 = weight.shape[0]
    hid = G4 // 4
    if hidden_state is None:
        h_cur = jnp.zeros((B, hid, H, W), x_nchw.dtype)
        c_cur = jnp.zeros((B, hid, H, W), x_nchw.dtype)
    else:
        h_cur, c_cur = hidden_state
    comb = jnp.concatenate([x_nchw, h_cur], axis=1)
    out = jax.lax.conv_general_dilated(
        comb, weight, window_strides=(1, 1), padding="SAME",
        dimension_numbers=("NCHW", "OIHW", "NCHW"))
    out = out + bias[None, :, None, None]
    cc_i, cc_f, cc_o, cc_g = jnp.split(out, 4, axis=1)
    i = jax.nn.sigmoid(cc_i)
    f = jax.nn.sigmoid(cc_f)
    o = jax.nn.sigmoid(cc_o)
    g = jnp.tanh(cc_g)
    c_next = f * c_cur + i * g
    h_next = o * jnp.tanh(c_next)
    return h_next, c_next


if __name__ == "__main__":
    # Small shapes consistent with the module's forward.
    B, Cin, H, W = 2, 4, 16, 16
    hid = 32
    KH, KW = 3, 3
    Cc = Cin + hid
    G4 = 4 * hid

    key = jax.random.PRNGKey(0)
    k_x, k_w, k_b, k_h, k_c = jax.random.split(key, 5)

    x = jax.random.normal(k_x, (B, Cin, H, W), jnp.float32)
    fan_in = Cc * KH * KW
    bound = 1.0 / (fan_in ** 0.5)
    weight = jax.random.uniform(k_w, (G4, Cc, KH, KW), jnp.float32,
                                minval=-bound, maxval=bound)
    bias = jax.random.uniform(k_b, (G4,), jnp.float32,
                              minval=-bound, maxval=bound)
    h0 = 0.5 * jax.random.normal(k_h, (B, hid, H, W), jnp.float32)
    c0 = 0.5 * jax.random.normal(k_c, (B, hid, H, W), jnp.float32)

    # 1) f32 path, zero initial state (matches ConvLSTM.forward(hidden_state=None)).
    h1, c1 = conv_lstm_forward(x, weight, bias, hidden_state=None)
    jax.block_until_ready((h1, c1))
    h1r, c1r = _reference_forward(x, weight, bias, hidden_state=None)
    assert h1.shape == (B, hid, H, W) and c1.shape == (B, hid, H, W)
    assert jnp.allclose(h1, h1r, atol=1e-5, rtol=1e-5)
    assert jnp.allclose(c1, c1r, atol=1e-5, rtol=1e-5)

    # 2) f32 path, non-trivial carried state.
    h2, c2 = conv_lstm_forward(x, weight, bias, hidden_state=(h0, c0))
    jax.block_until_ready((h2, c2))
    h2r, c2r = _reference_forward(x, weight, bias, hidden_state=(h0, c0))
    assert jnp.allclose(h2, h2r, atol=1e-5, rtol=1e-5)
    assert jnp.allclose(c2, c2r, atol=1e-5, rtol=1e-5)

    # 3) bf16 MXU operands (v6e/v7x optimization) + 2-way batch grid (v7x TCs).
    #    f32 accumulation / gate math, so only a relaxed tolerance is needed.
    h3, c3 = conv_lstm_forward(x, weight, bias, hidden_state=(h0, c0),
                               mxu_dtype=jnp.bfloat16, num_batch_blocks=2)
    jax.block_until_ready((h3, c3))
    assert jnp.allclose(h3, h2r, atol=5e-2, rtol=5e-2)
    assert jnp.allclose(c3, c2r, atol=5e-2, rtol=5e-2)

    print("KERNEL_OK")
</pallas_src>

<mosaic_0001>
module attributes {stable_mosaic.version = 11 : i64} {
  func.func @_convlstm_cell_kernel(%arg0: i32, %arg1: memref<2x16x16x36xf32, #tpu.memory_space<vmem>>, %arg2: memref<2x16x16x32xf32, #tpu.memory_space<vmem>>, %arg3: memref<1152x128xf32, #tpu.memory_space<vmem>>, %arg4: memref<1x128xf32, #tpu.memory_space<vmem>>, %arg5: memref<2x16x16x32xf32, #tpu.memory_space<vmem>>, %arg6: memref<2x16x16x32xf32, #tpu.memory_space<vmem>>, %arg7: memref<2x18x18x128xf32, #tpu.memory_space<vmem>>, %arg8: memref<512x1152xf32, #tpu.memory_space<vmem>>) attributes {dimension_semantics = [#tpu.dimension_semantics<parallel>], iteration_bounds = array<i64: 1>, scalar_prefetch = 0 : i64, scratch_operands = 2 : i64, tpu.core_type = #tpu.core_type<tc>, window_params = [{transform_indices = @transform_0, window_bounds = array<i64: 2, 16, 16, 36>}, {transform_indices = @transform_1, window_bounds = array<i64: 2, 16, 16, 32>}, {pipeline_mode = #tpu.pipeline_mode<synchronous>, transform_indices = @transform_2, window_bounds = array<i64: 1152, 128>}, {pipeline_mode = #tpu.pipeline_mode<synchronous>, transform_indices = @transform_3, window_bounds = array<i64: 1, 128>}, {transform_indices = @transform_4, window_bounds = array<i64: 2, 16, 16, 32>}, {transform_indices = @transform_5, window_bounds = array<i64: 2, 16, 16, 32>}]} {
    %cst = arith.constant 0.000000e+00 : f32
    %0 = vector.broadcast %cst : f32 to vector<2x18x18x128xf32>
    %c0 = arith.constant 0 : index
    %c0_0 = arith.constant 0 : index
    %c0_1 = arith.constant 0 : index
    %c0_2 = arith.constant 0 : index
    %1 = vector.load %arg7[%c0, %c0_0, %c0_1, %c0_2] : memref<2x18x18x128xf32, #tpu.memory_space<vmem>>, vector<2x18x18x128xf32>
    tpu.vector_store %arg7[%c0, %c0_0, %c0_1, %c0_2], %0 {strides = array<i32>} : memref<2x18x18x128xf32, #tpu.memory_space<vmem>>, vector<2x18x18x128xf32>,
    %c0_3 = arith.constant 0 : index
    %c0_4 = arith.constant 0 : index
    %c0_5 = arith.constant 0 : index
    %c0_6 = arith.constant 0 : index
    %2 = vector.load %arg1[%c0_3, %c0_4, %c0_5, %c0_6] : memref<2x16x16x36xf32, #tpu.memory_space<vmem>>, vector<2x16x16x36xf32>
    %c0_7 = arith.constant 0 : index
    %c1 = arith.constant 1 : index
    %c1_8 = arith.constant 1 : index
    %c0_9 = arith.constant 0 : index
    %3 = vector.load %arg7[%c0_7, %c1, %c1_8, %c0_9] : memref<2x18x18x128xf32, #tpu.memory_space<vmem>>, vector<2x16x16x36xf32>
    tpu.vector_store %arg7[%c0_7, %c1, %c1_8, %c0_9], %2 {strides = array<i32>} : memref<2x18x18x128xf32, #tpu.memory_space<vmem>>, vector<2x16x16x36xf32>,
    %c0_10 = arith.constant 0 : index
    %c0_11 = arith.constant 0 : index
    %c0_12 = arith.constant 0 : index
    %c0_13 = arith.constant 0 : index
    %4 = vector.load %arg7[%c0_10, %c0_11, %c0_12, %c0_13] : memref<2x18x18x128xf32, #tpu.memory_space<vmem>>, vector<2x16x16x128xf32>
    %5 = vector.shape_cast %4 : vector<2x16x16x128xf32> to vector<512x128xf32>
    %c0_14 = arith.constant 0 : index
    %c0_15 = arith.constant 0 : index
    %6 = vector.load %arg8[%c0_14, %c0_15] : memref<512x1152xf32, #tpu.memory_space<vmem>>, vector<512x128xf32>
    tpu.vector_store %arg8[%c0_14, %c0_15], %5 {strides = array<i32>} : memref<512x1152xf32, #tpu.memory_space<vmem>>, vector<512x128xf32>,
    %c0_16 = arith.constant 0 : index
    %c0_17 = arith.constant 0 : index
    %c1_18 = arith.constant 1 : index
    %c0_19 = arith.constant 0 : index
    %7 = vector.load %arg7[%c0_16, %c0_17, %c1_18, %c0_19] : memref<2x18x18x128xf32, #tpu.memory_space<vmem>>, vector<2x16x16x128xf32>
    %8 = vector.shape_cast %7 : vector<2x16x16x128xf32> to vector<512x128xf32>
    %c0_20 = arith.constant 0 : index
    %c128 = arith.constant 128 : index
    %9 = vector.load %arg8[%c0_20, %c128] : memref<512x1152xf32, #tpu.memory_space<vmem>>, vector<512x128xf32>
    tpu.vector_store %arg8[%c0_20, %c128], %8 {strides = array<i32>} : memref<512x1152xf32, #tpu.memory_space<vmem>>, vector<512x128xf32>,
    %c0_21 = arith.constant 0 : index
    %c0_22 = arith.constant 0 : index
    %c2 = arith.constant 2 : index
    %c0_23 = arith.constant 0 : index
    %10 = vector.load %arg7[%c0_21, %c0_22, %c2, %c0_23] : memref<2x18x18x128xf32, #tpu.memory_space<vmem>>, vector<2x16x16x128xf32>
    %11 = vector.shape_cast %10 : vector<2x16x16x128xf32> to vector<512x128xf32>
    %c0_24 = arith.constant 0 : index
    %c256 = arith.constant 256 : index
    %12 = vector.load %arg8[%c0_24, %c256] : memref<512x1152xf32, #tpu.memory_space<vmem>>, vector<512x128xf32>
    tpu.vector_store %arg8[%c0_24, %c256], %11 {strides = array<i32>} : memref<512x1152xf32, #tpu.memory_space<vmem>>, vector<512x128xf32>,
    %c0_25 = arith.constant 0 : index
    %c1_26 = arith.constant 1 : index
    %c0_27 = arith.constant 0 : index
    %c0_28 = arith.constant 0 : index
    %13 = vector.load %arg7[%c0_25, %c1_26, %c0_27, %c0_28] : memref<2x18x18x128xf32, #tpu.memory_space<vmem>>, vector<2x16x16x128xf32>
    %14 = vector.shape_cast %13 : vector<2x16x16x128xf32> to vector<512x128xf32>
    %c0_29 = arith.constant 0 : index
    %c384 = arith.constant 384 : index
    %15 = vector.load %arg8[%c0_29, %c384] : memref<512x1152xf32, #tpu.memory_space<vmem>>, vector<512x128xf32>
    tpu.vector_store %arg8[%c0_29, %c384], %14 {strides = array<i32>} : memref<512x1152xf32, #tpu.memory_space<vmem>>, vector<512x128xf32>,
    %c0_30 = arith.constant 0 : index
    %c1_31 = arith.constant 1 : index
    %c1_32 = arith.constant 1 : index
    %c0_33 = arith.constant 0 : index
    %16 = vector.load %arg7[%c0_30, %c1_31, %c1_32, %c0_33] : memref<2x18x18x128xf32, #tpu.memory_space<vmem>>, vector<2x16x16x128xf32>
    %17 = vector.shape_cast %16 : vector<2x16x16x128xf32> to vector<512x128xf32>
    %c0_34 = arith.constant 0 : index
    %c512 = arith.constant 512 : index
    %18 = vector.load %arg8[%c0_34, %c512] : memref<512x1152xf32, #tpu.memory_space<vmem>>, vector<512x128xf32>
    tpu.vector_store %arg8[%c0_34, %c512], %17 {strides = array<i32>} : memref<512x1152xf32, #tpu.memory_space<vmem>>, vector<512x128xf32>,
    %c0_35 = arith.constant 0 : index
    %c1_36 = arith.constant 1 : index
    %c2_37 = arith.constant 2 : index
    %c0_38 = arith.constant 0 : index
    %19 = vector.load %arg7[%c0_35, %c1_36, %c2_37, %c0_38] : memref<2x18x18x128xf32, #tpu.memory_space<vmem>>, vector<2x16x16x128xf32>
    %20 = vector.shape_cast %19 : vector<2x16x16x128xf32> to vector<512x128xf32>
    %c0_39 = arith.constant 0 : index
    %c640 = arith.constant 640 : index
    %21 = vector.load %arg8[%c0_39, %c640] : memref<512x1152xf32, #tpu.memory_space<vmem>>, vector<512x128xf32>
    tpu.vector_store %arg8[%c0_39, %c640], %20 {strides = array<i32>} : memref<512x1152xf32, #tpu.memory_space<vmem>>, vector<512x128xf32>,
    %c0_40 = arith.constant 0 : index
    %c2_41 = arith.constant 2 : index
    %c0_42 = arith.constant 0 : index
    %c0_43 = arith.constant 0 : index
    %22 = vector.load %arg7[%c0_40, %c2_41, %c0_42, %c0_43] : memref<2x18x18x128xf32, #tpu.memory_space<vmem>>, vector<2x16x16x128xf32>
    %23 = vector.shape_cast %22 : vector<2x16x16x128xf32> to vector<512x128xf32>
    %c0_44 = arith.constant 0 : index
    %c768 = arith.constant 768 : index
    %24 = vector.load %arg8[%c0_44, %c768] : memref<512x1152xf32, #tpu.memory_space<vmem>>, vector<512x128xf32>
    tpu.vector_store %arg8[%c0_44, %c768], %23 {strides = array<i32>} : memref<512x1152xf32, #tpu.memory_space<vmem>>, vector<512x128xf32>,
    %c0_45 = arith.constant 0 : index
    %c2_46 = arith.constant 2 : index
    %c1_47 = arith.constant 1 : index
    %c0_48 = arith.constant 0 : index
    %25 = vector.load %arg7[%c0_45, %c2_46, %c1_47, %c0_48] : memref<2x18x18x128xf32, #tpu.memory_space<vmem>>, vector<2x16x16x128xf32>
    %26 = vector.shape_cast %25 : vector<2x16x16x128xf32> to vector<512x128xf32>
    %c0_49 = arith.constant 0 : index
    %c896 = arith.constant 896 : index
    %27 = vector.load %arg8[%c0_49, %c896] : memref<512x1152xf32, #tpu.memory_space<vmem>>, vector<512x128xf32>
    tpu.vector_store %arg8[%c0_49, %c896], %26 {strides = array<i32>} : memref<512x1152xf32, #tpu.memory_space<vmem>>, vector<512x128xf32>,
    %c0_50 = arith.constant 0 : index
    %c2_51 = arith.constant 2 : index
    %c2_52 = arith.constant 2 : index
    %c0_53 = arith.constant 0 : index
    %28 = vector.load %arg7[%c0_50, %c2_51, %c2_52, %c0_53] : memref<2x18x18x128xf32, #tpu.memory_space<vmem>>, vector<2x16x16x128xf32>
    %29 = vector.shape_cast %28 : vector<2x16x16x128xf32> to vector<512x128xf32>
    %c0_54 = arith.constant 0 : index
    %c1024 = arith.constant 1024 : index
    %30 = vector.load %arg8[%c0_54, %c1024] : memref<512x1152xf32, #tpu.memory_space<vmem>>, vector<512x128xf32>
    tpu.vector_store %arg8[%c0_54, %c1024], %29 {strides = array<i32>} : memref<512x1152xf32, #tpu.memory_space<vmem>>, vector<512x128xf32>,
    %c0_55 = arith.constant 0 : index
    %c0_56 = arith.constant 0 : index
    %31 = vector.load %arg8[%c0_55, %c0_56] : memref<512x1152xf32, #tpu.memory_space<vmem>>, vector<512x1152xf32>
    %c0_57 = arith.constant 0 : index
    %c0_58 = arith.constant 0 : index
    %32 = vector.load %arg3[%c0_57, %c0_58] : memref<1152x128xf32, #tpu.memory_space<vmem>>, vector<1152x128xf32>
    %cst_59 = arith.constant dense<0.000000e+00> : vector<512x128xf32>
    %33 = tpu.matmul %31, %32, %cst_59 {dimension_numbers = #tpu.dot_dimension_numbers<[1], [0], [0], [1], [0, 0, 1, 1], [], []>} : vector<512x1152xf32>, vector<1152x128xf32>, vector<512x128xf32> -> vector<512x128xf32>
    %c0_60 = arith.constant 0 : index
    %c0_61 = arith.constant 0 : index
    %34 = vector.load %arg4[%c0_60, %c0_61] : memref<1x128xf32, #tpu.memory_space<vmem>>, vector<1x128xf32>
    %35 = vector.broadcast %34 : vector<1x128xf32> to vector<512x128xf32>
    %36 = arith.addf %33, %35 : vector<512x128xf32>
    %37 = vector.extract_strided_slice %36 {offsets = [0, 0], sizes = [512, 96], strides = [1, 1]} : vector<512x128xf32> to vector<512x96xf32>
    %38 = arith.negf %37 : vector<512x96xf32>
    %39 = math.exp %38 : vector<512x96xf32>
    %cst_62 = arith.constant 1.000000e+00 : f32
    %40 = vector.broadcast %cst_62 : f32 to vector<512x96xf32>
    %41 = arith.addf %40, %39 : vector<512x96xf32>
    %42 = arith.divf %40, %41 : vector<512x96xf32>
    %43 = vector.extract_strided_slice %42 {offsets = [0, 0], sizes = [512, 32], strides = [1, 1]} : vector<512x96xf32> to vector<512x32xf32>
    %44 = vector.extract_strided_slice %42 {offsets = [0, 32], sizes = [512, 32], strides = [1, 1]} : vector<512x96xf32> to vector<512x32xf32>
    %45 = vector.extract_strided_slice %42 {offsets = [0, 64], sizes = [512, 32], strides = [1, 1]} : vector<512x96xf32> to vector<512x32xf32>
    %46 = vector.extract_strided_slice %36 {offsets = [0, 96], sizes = [512, 32], strides = [1, 1]} : vector<512x128xf32> to vector<512x32xf32>
    %47 = math.tanh %46 : vector<512x32xf32>
    %c0_63 = arith.constant 0 : index
    %c0_64 = arith.constant 0 : index
    %c0_65 = arith.constant 0 : index
    %c0_66 = arith.constant 0 : index
    %48 = vector.load %arg2[%c0_63, %c0_64, %c0_65, %c0_66] : memref<2x16x16x32xf32, #tpu.memory_space<vmem>>, vector<2x16x16x32xf32>
    %49 = vector.shape_cast %48 : vector<2x16x16x32xf32> to vector<512x32xf32>
    %50 = arith.mulf %44, %49 : vector<512x32xf32>
    %51 = arith.mulf %43, %47 : vector<512x32xf32>
    %52 = arith.addf %50, %51 : vector<512x32xf32>
    %53 = math.tanh %52 : vector<512x32xf32>
    %54 = arith.mulf %45, %53 : vector<512x32xf32>
    %55 = vector.shape_cast %54 : vector<512x32xf32> to vector<2x16x16x32xf32>
    %c0_67 = arith.constant 0 : index
    %c0_68 = arith.constant 0 : index
    %c0_69 = arith.constant 0 : index
    %c0_70 = arith.constant 0 : index
    %56 = vector.load %arg5[%c0_67, %c0_68, %c0_69, %c0_70] : memref<2x16x16x32xf32, #tpu.memory_space<vmem>>, vector<2x16x16x32xf32>
    tpu.vector_store %arg5[%c0_67, %c0_68, %c0_69, %c0_70], %55 {strides = array<i32>} : memref<2x16x16x32xf32, #tpu.memory_space<vmem>>, vector<2x16x16x32xf32>,
    %57 = vector.shape_cast %52 : vector<512x32xf32> to vector<2x16x16x32xf32>
    %c0_71 = arith.constant 0 : index
    %c0_72 = arith.constant 0 : index
    %c0_73 = arith.constant 0 : index
    %c0_74 = arith.constant 0 : index
    %58 = vector.load %arg6[%c0_71, %c0_72, %c0_73, %c0_74] : memref<2x16x16x32xf32, #tpu.memory_space<vmem>>, vector<2x16x16x32xf32>
    tpu.vector_store %arg6[%c0_71, %c0_72, %c0_73, %c0_74], %57 {strides = array<i32>} : memref<2x16x16x32xf32, #tpu.memory_space<vmem>>, vector<2x16x16x32xf32>,
    return
  }
  func.func @transform_0(%arg0: i32) -> (i32, i32, i32, i32) {
    %c0_i32 = arith.constant 0 : i32
    %c0_i32_0 = arith.constant 0 : i32
    %c0_i32_1 = arith.constant 0 : i32
    %c0_i32_2 = arith.constant 0 : i32
    return %arg0, %c0_i32, %c0_i32_0, %c0_i32_1 : i32, i32, i32, i32
  }
  func.func @transform_1(%arg0: i32) -> (i32, i32, i32, i32) {
    %c0_i32 = arith.constant 0 : i32
    %c0_i32_0 = arith.constant 0 : i32
    %c0_i32_1 = arith.constant 0 : i32
    %c0_i32_2 = arith.constant 0 : i32
    return %arg0, %c0_i32, %c0_i32_0, %c0_i32_1 : i32, i32, i32, i32
  }
  func.func @transform_2(%arg0: i32) -> (i32, i32) {
    %c0_i32 = arith.constant 0 : i32
    %c0_i32_0 = arith.constant 0 : i32
    %c0_i32_1 = arith.constant 0 : i32
    return %c0_i32, %c0_i32_0 : i32, i32
  }
  func.func @transform_3(%arg0: i32) -> (i32, i32) {
    %c0_i32 = arith.constant 0 : i32
    %c0_i32_0 = arith.constant 0 : i32
    %c0_i32_1 = arith.constant 0 : i32
    return %c0_i32, %c0_i32_0 : i32, i32
  }
  func.func @transform_4(%arg0: i32) -> (i32, i32, i32, i32) {
    %c0_i32 = arith.constant 0 : i32
    %c0_i32_0 = arith.constant 0 : i32
    %c0_i32_1 = arith.constant 0 : i32
    %c0_i32_2 = arith.constant 0 : i32
    return %arg0, %c0_i32, %c0_i32_0, %c0_i32_1 : i32, i32, i32, i32
  }
  func.func @transform_5(%arg0: i32) -> (i32, i32, i32, i32) {
    %c0_i32 = arith.constant 0 : i32
    %c0_i32_0 = arith.constant 0 : i32
    %c0_i32_1 = arith.constant 0 : i32
    %c0_i32_2 = arith.constant 0 : i32
    return %arg0, %c0_i32, %c0_i32_0, %c0_i32_1 : i32, i32, i32, i32
  }
}

</mosaic_0001>

<bundles_post_ra>
// kernel: conv_lstm_forward.1
= control target key start
LH: loop header
LB: loop body
LE: loop exit
PB: predicated region body
PF: predicated region fallthrough
CT: control target
= control target key end

     0   :  { %11 = vsyncpa [#allocation5], 0  ;;  %v8078_v3 = vmov 0.0|0.0   ;;  %v8079_v8 = vmov 0.0   ;;  %vm194_vm0 = vcmask 293888   ;;  %s12137_s0 = inlined_call_operand.vmem [shape: f32[2,16,16,36], index: 0, kind: input, shape index: {}]   ;;  %s12138_s1 = inlined_call_operand.vmem [shape: f32[2,16,16,32], index: 1, kind: input, shape index: {}]   ;;  %s12139_s2 = inlined_call_operand.vmem [shape: f32[1152,128], index: 2, kind: input, shape index: {}]   ;;  %s12140_s3 = inlined_call_operand.vmem [shape: f32[1,128], index: 3, kind: input, shape index: {}]   ;;  %s12141_s4 = inlined_call_operand.hbm [shape: f32[2,16,16,32], index: 4, kind: output, shape index: {0}]   ;;  %s12142_s5 = inlined_call_operand.hbm [shape: f32[2,16,16,32], index: 5, kind: output, shape index: {1}]  }
   0x1   :  { %v8120_v0 = vld [vmem:[%s12139_s2] sm:$0xff]  ;;  %v8125_v1 = vld [vmem:[%s12139_s2 + $0x8] sm:$0xff]  ;;  %6866 = vmatprep.subr.bf16.mxu1 %v8078_v3  ;;  %6914 = vmatprep.subr.bf16.mxu0 %v8078_v3  ;;  %v8144_v6 = vld [vmem:[%s12139_s2 + $0x10] sm:$0xff]  ;;  %21 = vst [vmem:[#allocation2] sm:$0xff] %v8079_v8 }
   0x2   :  { %v8130_v2 = vld [vmem:[%s12139_s2 + $0x100] sm:$0xff]  ;;  %v6867_v4 = vpack.c.bf16 %v8125_v1, %v8120_v0  ;;  %v8139_v5 = vld [vmem:[%s12139_s2 + $0x108] sm:$0xff]  ;;  %v8149_v7 = vld [vmem:[%s12139_s2 + $0x18] sm:$0xff]  ;;  %22 = vst [vmem:[#allocation2 + $0x8] sm:$0xff] %v8079_v8 }
   0x3   :  { %23 = vst [vmem:[#allocation2 + $0x10] sm:$0x3] %v8079_v8  ;;  %24 = vst [vmem:[#allocation2 + $0x18] sm:$0xff] %v8079_v8  ;;  %v8261_v9 = vpack.c.bf16 %v8139_v5, %v8130_v2  ;;  %v2022_v10 = vld [vmem:[%s12139_s2 + $0x110] sm:$0xff]  ;;  %v2023_v11 = vld [vmem:[%s12139_s2 + $0x118] sm:$0xff]  ;;  %v6870_v12 = vpack.c.bf16 %v8149_v7, %v8144_v6 }
   0x4   :  { %25 = vst [vmem:[#allocation2 + $0x20] sm:$0xff] %v8079_v8  ;;  %26 = vst [vmem:[#allocation2 + $0x28] sm:$0x3] %v8079_v8  ;;  %6868 = vmatpush1.bf16.msra.mxu1 %v6867_v4  ;;  %v8276_v13 = vpack.c.bf16 %v2023_v11, %v2022_v10  ;;  %v1992_v14 = vld [vmem:[%s12139_s2 + $0x20] sm:$0xff]  ;;  %v1993_v15 = vld [vmem:[%s12139_s2 + $0x28] sm:$0xff] }
   0x5   :  { %27 = vst [vmem:[#allocation2 + $0x30] sm:$0xff] %v8079_v8  ;;  %28 = vst [vmem:[#allocation2 + $0x38] sm:$0xff] %v8079_v8  ;;  %6916 = vmatpush1.bf16.msra.mxu0 %v8261_v9  ;;  %6869 = vmatprep.subr.bf16.mxu1 %v8078_v3  ;;  %v2024_v16 = vld [vmem:[%s12139_s2 + $0x120] sm:$0xff]  ;;  %v2025_v17 = vld [vmem:[%s12139_s2 + $0x128] sm:$0xff]  ;;  %v6873_v18 = vpack.c.bf16 %v1993_v15, %v1992_v14 }
   0x6   :  { %29 = vst [vmem:[#allocation2 + $0x40] sm:$0x3] %v8079_v8  ;;  %30 = vst [vmem:[#allocation2 + $0x48] sm:$0xff] %v8079_v8  ;;  %6917 = vmatprep.subr.bf16.mxu0 %v8078_v3  ;;  %v8293_v19 = vpack.c.bf16 %v2025_v17, %v2024_v16  ;;  %v1994_v20 = vld [vmem:[%s12139_s2 + $0x30] sm:$0xff]  ;;  %v1995_v21 = vld [vmem:[%s12139_s2 + $0x38] sm:$0xff] }
   0x7   :  { %31 = vst [vmem:[#allocation2 + $0x50] sm:$0xff] %v8079_v8  ;;  %32 = vst [vmem:[#allocation2 + $0x58] sm:$0x3] %v8079_v8  ;;  %v2026_v22 = vld [vmem:[%s12139_s2 + $0x130] sm:$0xff]  ;;  %v2027_v23 = vld [vmem:[%s12139_s2 + $0x138] sm:$0xff]  ;;  %v6876_v24 = vpack.c.bf16 %v1995_v21, %v1994_v20 }
   0x8   :  { %33 = vst [vmem:[#allocation2 + $0x60] sm:$0xff] %v8079_v8  ;;  %34 = vst [vmem:[#allocation2 + $0x68] sm:$0xff] %v8079_v8  ;;  %6871 = vmatpush1.bf16.msra.mxu1 %v6870_v12  ;;  %v8310_v25 = vpack.c.bf16 %v2027_v23, %v2026_v22  ;;  %v1996_v26 = vld [vmem:[%s12139_s2 + $0x40] sm:$0xff]  ;;  %v1997_v27 = vld [vmem:[%s12139_s2 + $0x48] sm:$0xff] }
   0x9   :  { %35 = vst [vmem:[#allocation2 + $0x70] sm:$0x3] %v8079_v8  ;;  %36 = vst [vmem:[#allocation2 + $0x78] sm:$0xff] %v8079_v8  ;;  %6919 = vmatpush1.bf16.msra.mxu0 %v8276_v13  ;;  %6872 = vmatprep.subr.bf16.mxu1 %v8078_v3  ;;  %v2028_v28 = vld [vmem:[%s12139_s2 + $0x140] sm:$0xff]  ;;  %v2029_v29 = vld [vmem:[%s12139_s2 + $0x148] sm:$0xff]  ;;  %v6879_v30 = vpack.c.bf16 %v1997_v27, %v1996_v26 }
   0xa   :  { %37 = vst [vmem:[#allocation2 + $0x80] sm:$0xff] %v8079_v8  ;;  %38 = vst [vmem:[#allocation2 + $0x88] sm:$0x3] %v8079_v8  ;;  %6920 = vmatprep.subr.bf16.mxu0 %v8078_v3  ;;  %v8327_v31 = vpack.c.bf16 %v2029_v29, %v2028_v28  ;;  %v1998_v32 = vld [vmem:[%s12139_s2 + $0x50] sm:$0xff]  ;;  %v1999_v33 = vld [vmem:[%s12139_s2 + $0x58] sm:$0xff] }
   0xb   :  { %39 = vst [vmem:[#allocation2 + $0x90] sm:$0xff] %v8079_v8  ;;  %40 = vst [vmem:[#allocation2 + $0x98] sm:$0xff] %v8079_v8  ;;  %v2030_v34 = vld [vmem:[%s12139_s2 + $0x150] sm:$0xff]  ;;  %v2031_v35 = vld [vmem:[%s12139_s2 + $0x158] sm:$0xff]  ;;  %v6882_v36 = vpack.c.bf16 %v1999_v33, %v1998_v32 }
   0xc   :  { %41 = vst [vmem:[#allocation2 + $0xa0] sm:$0x3] %v8079_v8  ;;  %42 = vst [vmem:[#allocation2 + $0xa8] sm:$0xff] %v8079_v8  ;;  %6874 = vmatpush1.bf16.msra.mxu1 %v6873_v18  ;;  %v8344_v37 = vpack.c.bf16 %v2031_v35, %v2030_v34  ;;  %v2000_v38 = vld [vmem:[%s12139_s2 + $0x60] sm:$0xff]  ;;  %v2001_v39 = vld [vmem:[%s12139_s2 + $0x68] sm:$0xff] }
   0xd   :  { %43 = vst [vmem:[#allocation2 + $0xb0] sm:$0xff] %v8079_v8  ;;  %44 = vst [vmem:[#allocation2 + $0xb8] sm:$0x3] %v8079_v8  ;;  %6922 = vmatpush1.bf16.msra.mxu0 %v8293_v19  ;;  %6875 = vmatprep.subr.bf16.mxu1 %v8078_v3  ;;  %v2032_v40 = vld [vmem:[%s12139_s2 + $0x160] sm:$0xff]  ;;  %v2033_v41 = vld [vmem:[%s12139_s2 + $0x168] sm:$0xff]  ;;  %v6885_v44 = vpack.c.bf16 %v2001_v39, %v2000_v38 }
   0xe   :  { %45 = vst [vmem:[#allocation2 + $0xc0] sm:$0xff] %v8079_v8  ;;  %46 = vst [vmem:[#allocation2 + $0xc8] sm:$0xff] %v8079_v8  ;;  %6923 = vmatprep.subr.bf16.mxu0 %v8078_v3  ;;  %v387_v42 = vld [vmem:[#allocation2 + $0x1] sm:$0xff]  ;;  %v8368_v46 = vpack.c.bf16 %v2033_v41, %v2032_v40  ;;  %v2002_v47 = vld [vmem:[%s12139_s2 + $0x70] sm:$0xff] }
   0xf   :  { %47 = vst [vmem:[#allocation2 + $0xd0] sm:$0x3] %v8079_v8  ;;  %48 = vst [vmem:[#allocation2 + $0xd8] sm:$0xff] %v8079_v8  ;;  %v129_v43 = vld [vmem:[%s12137_s0] sm:$0xff]  ;;  %2203 = vmatprep.mubr.f32.mxu1 %v387_v42  ;;  %v130_v45 = vld [vmem:[%s12137_s0 + $0x8] sm:$0xff] }
  0x10   :  { %49 = vst [vmem:[#allocation2 + $0xe0] sm:$0xff] %v8079_v8  ;;  %50 = vst [vmem:[#allocation2 + $0xe8] sm:$0x3] %v8079_v8  ;;  %6877 = vmatpush1.bf16.msra.mxu1 %v6876_v24  ;;  %v2003_v48 = vld [vmem:[%s12139_s2 + $0x78] sm:$0xff]  ;;  %v131_v49 = vld [vmem:[%s12137_s0 + $0x10] sm:$0xff] }
  0x11   :  { %51 = vst [vmem:[#allocation2 + $0xf0] sm:$0xff] %v8079_v8  ;;  %52 = vst [vmem:[#allocation2 + $0xf8] sm:$0xff] %v8079_v8  ;;  %6925 = vmatpush1.bf16.msra.mxu0 %v8310_v25  ;;  %6878 = vmatprep.subr.bf16.mxu1 %v8078_v3  ;;  %v2034_v50 = vld [vmem:[%s12139_s2 + $0x170] sm:$0xff]  ;;  %v2035_v51 = vld [vmem:[%s12139_s2 + $0x178] sm:$0xff]  ;;  %v6888_v54 = vpack.c.bf16 %v2003_v48, %v2002_v47 }
  0x12   :  { %53 = vst [vmem:[#allocation2 + $0x100] sm:$0x3] %v8079_v8  ;;  %54 = vst [vmem:[#allocation2 + $0x108] sm:$0xff] %v8079_v8  ;;  %6926 = vmatprep.subr.bf16.mxu0 %v8078_v3  ;;  %v132_v52 = vld [vmem:[%s12137_s0 + $0x18] sm:$0xff]  ;;  %v133_v53 = vld [vmem:[%s12137_s0 + $0x20] sm:$0xff]  ;;  %v8401_v56 = vpack.c.bf16 %v2035_v51, %v2034_v50 }
  0x13   :  { %55 = vst [vmem:[#allocation2 + $0x110] sm:$0xff] %v8079_v8  ;;  %56 = vst [vmem:[#allocation2 + $0x118] sm:$0x3] %v8079_v8  ;;  %v134_v55 = vld [vmem:[%s12137_s0 + $0x28] sm:$0xff]  ;;  %v2004_v57 = vld [vmem:[%s12139_s2 + $0x80] sm:$0xff] }
  0x14   :  { %57 = vst [vmem:[#allocation2 + $0x120] sm:$0xff] %v8079_v8  ;;  %58 = vst [vmem:[#allocation2 + $0x128] sm:$0xff] %v8079_v8  ;;  %6880 = vmatpush1.bf16.msra.mxu1 %v6879_v30  ;;  %v2005_v58 = vld [vmem:[%s12139_s2 + $0x88] sm:$0xff]  ;;  %v135_v59 = vld [vmem:[%s12137_s0 + $0x30] sm:$0xff] }
  0x15   :  { %59 = vst [vmem:[#allocation2 + $0x130] sm:$0x3] %v8079_v8  ;;  %60 = vst [vmem:[#allocation2 + $0x138] sm:$0xff] %v8079_v8  ;;  %6928 = vmatpush1.bf16.msra.mxu0 %v8327_v31  ;;  %6881 = vmatprep.subr.bf16.mxu1 %v8078_v3  ;;  %v2036_v60 = vld [vmem:[%s12139_s2 + $0x180] sm:$0xff]  ;;  %v2037_v61 = vld [vmem:[%s12139_s2 + $0x188] sm:$0xff]  ;;  %v6891_v0 = vpack.c.bf16 %v2005_v58, %v2004_v57 }
  0x16   :  { %61 = vst [vmem:[#allocation2 + $0x140] sm:$0xff] %v8079_v8  ;;  %62 = vst [vmem:[#allocation2 + $0x148] sm:$0x3] %v8079_v8  ;;  %6929 = vmatprep.subr.bf16.mxu0 %v8078_v3  ;;  %v136_v63 = vld [vmem:[%s12137_s0 + $0x38] sm:$0xff]  ;;  %v8430_v1 = vpack.c.bf16 %v2037_v61, %v2036_v60  ;;  %v2006_v2 = vld [vmem:[%s12139_s2 + $0x90] sm:$0xff] }
  0x17   :  { %63 = vst [vmem:[#allocation2 + $0x150] sm:$0xff] %v8079_v8  ;;  %64 = vst [vmem:[#allocation2 + $0x158] sm:$0xff] %v8079_v8  ;;  %v2007_v4 = vld [vmem:[%s12139_s2 + $0x98] sm:$0xff]  ;;  %v2038_v5 = vld [vmem:[%s12139_s2 + $0x190] sm:$0xff] }
  0x18   :  { %65 = vst [vmem:[#allocation2 + $0x160] sm:$0x3] %v8079_v8  ;;  %66 = vst [vmem:[#allocation2 + $0x168] sm:$0xff] %v8079_v8  ;;  %6883 = vmatpush1.bf16.msra.mxu1 %v6882_v36  ;;  %v2039_v6 = vld [vmem:[%s12139_s2 + $0x198] sm:$0xff]  ;;  %v6894_v7 = vpack.c.bf16 %v2007_v4, %v2006_v2  ;;  %v2008_v11 = vld [vmem:[%s12139_s2 + $0xa0] sm:$0xff] }
  0x19   :  { %67 = vst [vmem:[#allocation2 + $0x170] sm:$0xff] %v8079_v8  ;;  %68 = vst [vmem:[#allocation2 + $0x178] sm:$0x3] %v8079_v8  ;;  %6931 = vmatpush1.bf16.msra.mxu0 %v8344_v37  ;;  %6884 = vmatprep.subr.bf16.mxu1 %v8078_v3  ;;  %v8447_v10 = vpack.c.bf16 %v2039_v6, %v2038_v5  ;;  %v2009_v12 = vld [vmem:[%s12139_s2 + $0xa8] sm:$0xff]  ;;  %v2040_v14 = vld [vmem:[%s12139_s2 + $0x1a0] sm:$0xff] }
  0x1a   :  { %69 = vst [vmem:[#allocation2 + $0x180] sm:$0xff] %v8079_v8  ;;  %70 = vst [vmem:[#allocation2 + $0x188] sm:$0xff] %v8079_v8  ;;  %6932 = vmatprep.subr.bf16.mxu0 %v8078_v3  ;;  %v2041_v15 = vld [vmem:[%s12139_s2 + $0x1a8] sm:$0xff]  ;;  %v137_v16 = vld [vmem:[%s12137_s0 + $0x40] sm:$0xff]  ;;  %v6897_v17 = vpack.c.bf16 %v2009_v12, %v2008_v11 }
  0x1b   :  { %71 = vst [vmem:[#allocation2 + $0x190] sm:$0x3] %v8079_v8  ;;  %72 = vst [vmem:[#allocation2 + $0x198] sm:$0xff] %v8079_v8  ;;  %v138_v18 = vld [vmem:[%s12137_s0 + $0x48] sm:$0xff]  ;;  %v8471_v20 = vpack.c.bf16 %v2041_v15, %v2040_v14  ;;  %v2010_v21 = vld [vmem:[%s12139_s2 + $0xb0] sm:$0xff] }
  0x1c   :  { %73 = vst [vmem:[#allocation2 + $0x1a0] sm:$0xff] %v8079_v8  ;;  %74 = vst [vmem:[#allocation2 + $0x1a8] sm:$0x3] %v8079_v8  ;;  %6886 = vmatpush1.bf16.msra.mxu1 %v6885_v44  ;;  %v2011_v22 = vld [vmem:[%s12139_s2 + $0xb8] sm:$0xff]  ;;  %v139_v23 = vld [vmem:[%s12137_s0 + $0x50] sm:$0xff] }
  0x1d   :  { %75 = vst [vmem:[#allocation2 + $0x1b0] sm:$0xff] %v8079_v8  ;;  %76 = vst [vmem:[#allocation2 + $0x1b8] sm:$0xff] %v8079_v8  ;;  %6934 = vmatpush1.bf16.msra.mxu0 %v8368_v46  ;;  %6887 = vmatprep.subr.bf16.mxu1 %v8078_v3  ;;  %v2042_v24 = vld [vmem:[%s12139_s2 + $0x1b0] sm:$0xff]  ;;  %v2043_v26 = vld [vmem:[%s12139_s2 + $0x1b8] sm:$0xff]  ;;  %v6900_v29 = vpack.c.bf16 %v2011_v22, %v2010_v21 }
  0x1e   :  { %77 = vst [vmem:[#allocation2 + $0x1c0] sm:$0x3] %v8079_v8  ;;  %78 = vst [vmem:[#allocation2 + $0x1c8] sm:$0xff] %v8079_v8  ;;  %6935 = vmatprep.subr.bf16.mxu0 %v8078_v3  ;;  %v140_v27 = vld [vmem:[%s12137_s0 + $0x58] sm:$0xff]  ;;  %v141_v28 = vld [vmem:[%s12137_s0 + $0x60] sm:$0xff]  ;;  %v8504_v32 = vpack.c.bf16 %v2043_v26, %v2042_v24 }
  0x1f   :  { %79 = vst [vmem:[#allocation2 + $0x1d0] sm:$0xff] %v8079_v8  ;;  %80 = vst [vmem:[#allocation2 + $0x1d8] sm:$0x3] %v8079_v8  ;;  %v142_v30 = vld [vmem:[%s12137_s0 + $0x68] sm:$0xff]  ;;  %v2012_v33 = vld [vmem:[%s12139_s2 + $0xc0] sm:$0xff] }
  0x20   :  { %81 = vst [vmem:[#allocation2 + $0x1e0] sm:$0xff] %v8079_v8  ;;  %82 = vst [vmem:[#allocation2 + $0x1e8] sm:$0xff] %v8079_v8  ;;  %6889 = vmatpush1.bf16.msra.mxu1 %v6888_v54  ;;  %v2013_v34 = vld [vmem:[%s12139_s2 + $0xc8] sm:$0xff]  ;;  %v143_v35 = vld [vmem:[%s12137_s0 + $0x70] sm:$0xff] }
  0x21   :  { %83 = vst [vmem:[#allocation2 + $0x1f0] sm:$0x3] %v8079_v8  ;;  %84 = vst [vmem:[#allocation2 + $0x1f8] sm:$0xff] %v8079_v8  ;;  %6937 = vmatpush1.bf16.msra.mxu0 %v8401_v56  ;;  %6890 = vmatprep.subr.bf16.mxu1 %v8078_v3  ;;  %v2044_v36 = vld [vmem:[%s12139_s2 + $0x1c0] sm:$0xff]  ;;  %v2045_v38 = vld [vmem:[%s12139_s2 + $0x1c8] sm:$0xff]  ;;  %v6903_v40 = vpack.c.bf16 %v2013_v34, %v2012_v33 }
  0x22   :  { %85 = vst [vmem:[#allocation2 + $0x200] sm:$0xff] %v8079_v8  ;;  %86 = vst [vmem:[#allocation2 + $0x208] sm:$0x3] %v8079_v8  ;;  %6938 = vmatprep.subr.bf16.mxu0 %v8078_v3  ;;  %v144_v39 = vld [vmem:[%s12137_s0 + $0x78] sm:$0xff]  ;;  %v8530_v41 = vpack.c.bf16 %v2045_v38, %v2044_v36  ;;  %v2014_v42 = vld [vmem:[%s12139_s2 + $0xd0] sm:$0xff] }
  0x23   :  { %87 = vst [vmem:[#allocation2 + $0x210] sm:$0xff] %v8079_v8  ;;  %88 = vst [vmem:[#allocation2 + $0x218] sm:$0xff] %v8079_v8  ;;  %v2046_v44 = vld [vmem:[%s12139_s2 + $0x1d0] sm:$0xff]  ;;  %v2017_v50 = vld [vmem:[%s12139_s2 + $0xe8] sm:$0xff] }
  0x24   :  { %89 = vst [vmem:[#allocation2 + $0x220] sm:$0x3] %v8079_v8  ;;  %90 = vst [vmem:[#allocation2 + $0x228] sm:$0xff] %v8079_v8  ;;  %6892 = vmatpush1.bf16.msra.mxu1 %v6891_v0  ;;  %v2048_v51 = vld [vmem:[%s12139_s2 + $0x1e0] sm:$0xff]  ;;  %v2018_v54 = vld [vmem:[%s12139_s2 + $0xf0] sm:$0xff] }
  0x25   :  { %91 = vst [vmem:[#allocation2 + $0x230] sm:$0xff] %v8079_v8  ;;  %92 = vst [vmem:[#allocation2 + $0x238] sm:$0x3] %v8079_v8  ;;  %6940 = vmatpush1.bf16.msra.mxu0 %v8430_v1  ;;  %6893 = vmatprep.subr.bf16.mxu1 %v8078_v3  ;;  %v146_v58 = vld [vmem:[%s12137_s0 + $0x88] sm:$0xff]  ;;  %v148_v60 = vld [vmem:[%s12137_s0 + $0x98] sm:$0xff] }
  0x26   :  { %93 = vst [vmem:[#allocation2 + $0x240] sm:$0xff] %v8079_v8  ;;  %94 = vst [vmem:[#allocation2 + $0x248] sm:$0xff] %v8079_v8  ;;  %6941 = vmatprep.subr.bf16.mxu0 %v8078_v3  ;;  %v2051_v0 = vld [vmem:[%s12139_s2 + $0x1f8] sm:$0xff]  ;;  %v149_v2 = vld [vmem:[%s12137_s0 + $0xa0] sm:$0xff] }
  0x27   :  { %95 = vst [vmem:[#allocation2 + $0x250] sm:$0x3] %v8079_v8  ;;  %96 = vst [vmem:[#allocation2 + $0x258] sm:$0xff] %v8079_v8  ;;  %v150_v4 = vld [vmem:[%s12137_s0 + $0xa8] sm:$0xff]  ;;  %v151_v5 = vld [vmem:[%s12137_s0 + $0xb0] sm:$0xff] }
  0x28   :  { %97 = vst [vmem:[#allocation2 + $0x260] sm:$0xff] %v8079_v8  ;;  %98 = vst [vmem:[#allocation2 + $0x268] sm:$0x3] %v8079_v8  ;;  %6895 = vmatpush1.bf16.msra.mxu1 %v6894_v7  ;;  %v152_v6 = vld [vmem:[%s12137_s0 + $0xb8] sm:$0xff]  ;;  %v153_v7 = vld [vmem:[%s12137_s0 + $0xc0] sm:$0xff] }
  0x29   :  { %99 = vst [vmem:[#allocation2 + $0x270] sm:$0xff] %v8079_v8  ;;  %100 = vst [vmem:[#allocation2 + $0x278] sm:$0xff] %v8079_v8  ;;  %6943 = vmatpush1.bf16.msra.mxu0 %v8447_v10  ;;  %6896 = vmatprep.subr.bf16.mxu1 %v8078_v3  ;;  %v154_v12 = vld [vmem:[%s12137_s0 + $0xc8] sm:$0xff]  ;;  %v155_v14 = vld [vmem:[%s12137_s0 + $0xd0] sm:$0xff] }
  0x2a   :  { %101 = vst [vmem:[#allocation2 + $0x280] sm:$0x3] %v8079_v8  ;;  %102 = vst [vmem:[#allocation2 + $0x288] sm:$0xff] %v8079_v8  ;;  %6944 = vmatprep.subr.bf16.mxu0 %v8078_v3  ;;  %v156_v15 = vld [vmem:[%s12137_s0 + $0xd8] sm:$0xff]  ;;  %v2053_v21 = vld [vmem:[%s12139_s2 + $0x208] sm:$0xff] }
  0x2b   :  { %103 = vst [vmem:[#allocation2 + $0x290] sm:$0xff] %v8079_v8  ;;  %104 = vst [vmem:[#allocation2 + $0x298] sm:$0x3] %v8079_v8  ;;  %v158_v22 = vld [vmem:[%s12137_s0 + $0xe8] sm:$0xff] }
  0x2c   :  { %105 = vst [vmem:[#allocation2 + $0x2a0] sm:$0xff] %v8079_v8  ;;  %106 = vst [vmem:[#allocation2 + $0x2a8] sm:$0xff] %v8079_v8  ;;  %6898 = vmatpush1.bf16.msra.mxu1 %v6897_v17  ;;  %v157_v17 = vld [vmem:[%s12137_s0 + $0xe0] sm:$0xff] }
  0x2d   :  { %107 = vst [vmem:[#allocation2 + $0x2b0] sm:$0x3] %v8079_v8  ;;  %108 = vst [vmem:[#allocation2 + $0x2b8] sm:$0xff] %v8079_v8  ;;  %6946 = vmatpush1.bf16.msra.mxu0 %v8471_v20  ;;  %6899 = vmatprep.subr.bf16.mxu1 %v8078_v3 }
  0x2e   :  { %109 = vst [vmem:[#allocation2 + $0x2c0] sm:$0xff] %v8079_v8  ;;  %110 = vst [vmem:[#allocation2 + $0x2c8] sm:$0x3] %v8079_v8  ;;  %6947 = vmatprep.subr.bf16.mxu0 %v8078_v3 }
  0x2f   :  { %111 = vst [vmem:[#allocation2 + $0x2d0] sm:$0xff] %v8079_v8  ;;  %112 = vst [vmem:[#allocation2 + $0x2d8] sm:$0xff] %v8079_v8 }
  0x30   :  { %113 = vst [vmem:[#allocation2 + $0x2e0] sm:$0x3] %v8079_v8  ;;  %114 = vst [vmem:[#allocation2 + $0x2e8] sm:$0xff] %v8079_v8  ;;  %6901 = vmatpush1.bf16.msra.mxu1 %v6900_v29 }
  0x31   :  { %115 = vst [vmem:[#allocation2 + $0x2f0] sm:$0xff] %v8079_v8  ;;  %116 = vst [vmem:[#allocation2 + $0x2f8] sm:$0x3] %v8079_v8  ;;  %6949 = vmatpush1.bf16.msra.mxu0 %v8504_v32  ;;  %6902 = vmatprep.subr.bf16.mxu1 %v8078_v3 }
  0x32   :  { %117 = vst [vmem:[#allocation2 + $0x300] sm:$0xff] %v8079_v8  ;;  %118 = vst [vmem:[#allocation2 + $0x308] sm:$0xff] %v8079_v8  ;;  %6950 = vmatprep.subr.bf16.mxu0 %v8078_v3 }
  0x33   :  { %119 = vst [vmem:[#allocation2 + $0x310] sm:$0x3] %v8079_v8  ;;  %120 = vst [vmem:[#allocation2 + $0x318] sm:$0xff] %v8079_v8 }
  0x34   :  { %121 = vst [vmem:[#allocation2 + $0x320] sm:$0xff] %v8079_v8  ;;  %122 = vst [vmem:[#allocation2 + $0x328] sm:$0x3] %v8079_v8  ;;  %6904 = vmatpush1.bf16.msra.mxu1 %v6903_v40 }
  0x35   :  { %123 = vst [vmem:[#allocation2 + $0x330] sm:$0xff] %v8079_v8  ;;  %124 = vst [vmem:[#allocation2 + $0x338] sm:$0xff] %v8079_v8  ;;  %6952 = vmatpush1.bf16.msra.mxu0 %v8530_v41  ;;  %6905 = vmatprep.subr.bf16.mxu1 %v8078_v3 }
  0x36   :  { %125 = vst [vmem:[#allocation2 + $0x340] sm:$0x3] %v8079_v8  ;;  %126 = vst [vmem:[#allocation2 + $0x348] sm:$0xff] %v8079_v8  ;;  %6953 = vmatprep.subr.bf16.mxu0 %v8078_v3 }
  0x37   :  { %127 = vst [vmem:[#allocation2 + $0x350] sm:$0xff] %v8079_v8  ;;  %128 = vst [vmem:[#allocation2 + $0x358] sm:$0x3] %v8079_v8 }
  0x38   :  { %195 = vst.msk [vmem:[#allocation2 + $0x19] sm:$0xff] %vm194_vm0, %v129_v43  ;;  %196 = vst.msk [vmem:[#allocation2 + $0x21] sm:$0xff] %vm194_vm0, %v130_v45  ;;  %v2015_v43 = vld [vmem:[%s12139_s2 + $0xd8] sm:$0xff] }
  0x39   :  { %197 = vst.msk [vmem:[#allocation2 + $0x31] sm:$0xff] %vm194_vm0, %v131_v49  ;;  %198 = vst.msk [vmem:[#allocation2 + $0x39] sm:$0xff] %vm194_vm0, %v132_v52  ;;  %v2047_v45 = vld [vmem:[%s12139_s2 + $0x1d8] sm:$0xff]  ;;  %v6906_v47 = vpack.c.bf16 %v2015_v43, %v2014_v42  ;;  %v2016_v49 = vld [vmem:[%s12139_s2 + $0xe0] sm:$0xff] }
  0x3a   :  { %199 = vst.msk [vmem:[#allocation2 + $0x49] sm:$0xff] %vm194_vm0, %v133_v53  ;;  %200 = vst.msk [vmem:[#allocation2 + $0x51] sm:$0xff] %vm194_vm0, %v134_v55  ;;  %v8547_v48 = vpack.c.bf16 %v2047_v45, %v2046_v44  ;;  %v2049_v52 = vld [vmem:[%s12139_s2 + $0x1e8] sm:$0xff]  ;;  %v145_v53 = vld [vmem:[%s12137_s0 + $0x80] sm:$0xff]  ;;  %v6909_v57 = vpack.c.bf16 %v2017_v50, %v2016_v49 }
  0x3b   :  { %201 = vst.msk [vmem:[#allocation2 + $0x61] sm:$0xff] %vm194_vm0, %v135_v59  ;;  %202 = vst.msk [vmem:[#allocation2 + $0x69] sm:$0xff] %vm194_vm0, %v136_v63  ;;  %v2019_v55 = vld [vmem:[%s12139_s2 + $0xf8] sm:$0xff]  ;;  %6907 = vmatpush1.bf16.msra.mxu1 %v6906_v47  ;;  %v147_v59 = vld [vmem:[%s12137_s0 + $0x90] sm:$0xff]  ;;  %v8583_v61 = vpack.c.bf16 %v2049_v52, %v2048_v51 }
  0x3c   :  { %203 = vst.msk [vmem:[#allocation2 + $0x79] sm:$0xff] %vm194_vm0, %v137_v16  ;;  %204 = vst.msk [vmem:[#allocation2 + $0x81] sm:$0xff] %vm194_vm0, %v138_v18  ;;  %6955 = vmatpush1.bf16.msra.mxu0 %v8547_v48  ;;  %6908 = vmatprep.subr.bf16.mxu1 %v8078_v3  ;;  %v2050_v63 = vld [vmem:[%s12139_s2 + $0x1f0] sm:$0xff]  ;;  %v6912_v11 = vpack.c.bf16 %v2019_v55, %v2018_v54  ;;  %v2052_v18 = vld [vmem:[%s12139_s2 + $0x200] sm:$0xff] }
  0x3d   :  { %205 = vst.msk [vmem:[#allocation2 + $0x91] sm:$0xff] %vm194_vm0, %v139_v23  ;;  %206 = vst.msk [vmem:[#allocation2 + $0x99] sm:$0xff] %vm194_vm0, %v140_v27  ;;  %6956 = vmatprep.subr.bf16.mxu0 %v8078_v3  ;;  %v8626_v16 = vpack.c.bf16 %v2051_v0, %v2050_v63 }
  0x3e   :  { %207 = vst.msk [vmem:[#allocation2 + $0xa9] sm:$0xff] %vm194_vm0, %v141_v28  ;;  %208 = vst.msk [vmem:[#allocation2 + $0xb1] sm:$0xff] %vm194_vm0, %v142_v30 }
  0x3f   :  { %v8420_v62 = vld [vmem:[#allocation2 + $0x18] sm:$0xff]  ;;  %209 = vst.msk [vmem:[#allocation2 + $0xc1] sm:$0xff] %vm194_vm0, %v143_v35  ;;  %210 = vst.msk [vmem:[#allocation2 + $0xc9] sm:$0xff] %vm194_vm0, %v144_v39  ;;  %6910 = vmatpush1.bf16.msra.mxu1 %v6909_v57 }
  0x40   :  { %2588 = vmatprep.mubr.f32.mxu0 %v8420_v62  ;;  %211 = vst.msk [vmem:[#allocation2 + $0xd9] sm:$0xff] %vm194_vm0, %v145_v53  ;;  %212 = vst.msk [vmem:[#allocation2 + $0xe1] sm:$0xff] %vm194_vm0, %v146_v58  ;;  %6958 = vmatpush1.bf16.msra.mxu0 %v8583_v61 }
  0x41   :  { %213 = vst.msk [vmem:[#allocation2 + $0xf1] sm:$0xff] %vm194_vm0, %v147_v59  ;;  %214 = vst.msk [vmem:[#allocation2 + $0xf9] sm:$0xff] %vm194_vm0, %v148_v60  ;;  %6911 = vmatprep.subr.bf16.mxu1 %v8078_v3  ;;  %6959 = vmatprep.subr.bf16.mxu0 %v8078_v3 }
  0x42   :  { %215 = vst.msk [vmem:[#allocation2 + $0x109] sm:$0xff] %vm194_vm0, %v149_v2  ;;  %216 = vst.msk [vmem:[#allocation2 + $0x111] sm:$0xff] %vm194_vm0, %v150_v4 }
  0x43   :  { %217 = vst.msk [vmem:[#allocation2 + $0x121] sm:$0xff] %vm194_vm0, %v151_v5  ;;  %218 = vst.msk [vmem:[#allocation2 + $0x129] sm:$0xff] %vm194_vm0, %v152_v6 }
  0x44   :  { %219 = vst.msk [vmem:[#allocation2 + $0x139] sm:$0xff] %vm194_vm0, %v153_v7  ;;  %220 = vst.msk [vmem:[#allocation2 + $0x141] sm:$0xff] %vm194_vm0, %v154_v12 }
  0x45   :  { %221 = vst.msk [vmem:[#allocation2 + $0x151] sm:$0xff] %vm194_vm0, %v155_v14  ;;  %222 = vst.msk [vmem:[#allocation2 + $0x159] sm:$0xff] %vm194_vm0, %v156_v15 }
  0x46   :  { %223 = vst.msk [vmem:[#allocation2 + $0x169] sm:$0xff] %vm194_vm0, %v157_v17 }
  0x47   :  { %12 = vsyncpa [#allocation7], 0  ;;  %6913 = vmatpush1.bf16.msra.mxu1 %v6912_v11  ;;  %224 = vst.msk [vmem:[#allocation2 + $0x171] sm:$0xff] %vm194_vm0, %v158_v22  ;;  %6961 = vmatpush1.bf16.msra.mxu0 %v8626_v16  ;;  %v515_v23 = vld [vmem:[#allocation2 + $0x2] sm:$0xff]  ;;  %v6963_v24 = vpack.c.bf16 %v2053_v21, %v2052_v18  ;;  %v2054_v27 = vld [vmem:[%s12139_s2 + $0x210] sm:$0xff]  ;;  %s8080_s10 = smov 32  }
  0x48   :  { %7090 = vmatprep.subr.bf16.mxu1 %v8078_v3  ;;  %6962 = vmatprep.subr.bf16.mxu0 %v8078_v3  ;;  %v388_v26 = vld [vmem:[#allocation2 + $0x9] sm:$0xff]  ;;  %v2055_v28 = vld [vmem:[%s12139_s2 + $0x218] sm:$0xff]  ;;  %v644_v29 = vld [vmem:[#allocation2 + $0x20] sm:$0xff]  ;;  %vm6176_vm1 = vcmask 261120   ;;  %s8082_s7 = smov 64   ;;  %s8084_s9 = smov [#allocation6]  }
  0x49   :  { %v516_v30 = vld [vmem:[#allocation2 + $0xa] sm:$0xff]  ;;  %v6966_v33 = vpack.c.bf16 %v2055_v28, %v2054_v27  ;;  %v8657_v34 = vld [vmem:[#allocation2 + $0x19] sm:$0xff]  ;;  %v8671_v40 = vld [vmem:[#allocation2 + $0x21] sm:$0xff]  ;;  %s6578_s11 = sshll.u32 %s8084_s9, 4  ;;  %s6579_s11 = int_to_ptr.vmem [resolvable:$true] %s6578_s11 }
  0x4a   :  { %2204 = vmatmul.mubr.f32.vlgmr.msra.gmra.mrb[0].mxu1 %v8079_v8  ;;  %2589 = vmatmul.mubr.f32.vlgmr.msra.gmra.mrb[0].mxu0 %v515_v23  ;;  %v645_v35 = vld [vmem:[#allocation2 + $0x30] sm:$0xff]  ;;  %v2056_v36 = vld [vmem:[%s12139_s2 + $0x220] sm:$0xff]  ;;  %v2057_v38 = vld [vmem:[%s12139_s2 + $0x228] sm:$0xff] }
  0x4b   :  { %7106 = vmatpush1.bf16.msra.mxu1 %v8261_v9  ;;  %6964 = vmatpush1.bf16.msra.mxu0 %v6963_v24  ;;  %v8669_v9 = vld [vmem:[#allocation2 + $0x1a] sm:$0xff]  ;;  %v6969_v39 = vpack.c.bf16 %v2057_v38, %v2056_v36  ;;  %v2058_v42 = vld [vmem:[%s12139_s2 + $0x230] sm:$0xff]  ;;  %v162_v45 = vld [vmem:[%s12137_s0 + $0x108] sm:$0xff] }
  0x4c   :  { %2208 = vmatprep.mubr.f32.mxu1 %v388_v26  ;;  %2593 = vmatprep.mubr.f32.mxu0 %v644_v29  ;;  %v646_v43 = vld [vmem:[#allocation2 + $0x38] sm:$0xff]  ;;  %v161_v44 = vld [vmem:[%s12137_s0 + $0x100] sm:$0xff]  ;;  %v163_v47 = vld [vmem:[%s12137_s0 + $0x110] sm:$0xff]  ;;  %228 = vst.msk [vmem:[#allocation2 + $0x1d1] sm:$0xff] %vm194_vm0, %v162_v45 }
  0x4d   :  { %6965 = vmatprep.subr.bf16.mxu0 %v8078_v3  ;;  %7091 = vmatprep.subr.bf16.mxu1 %v8078_v3  ;;  %227 = vst.msk [vmem:[#allocation2 + $0x1c9] sm:$0xff] %vm194_vm0, %v161_v44  ;;  %229 = vst.msk [vmem:[#allocation2 + $0x1e1] sm:$0xff] %vm194_vm0, %v163_v47  ;;  %v8699_v49 = vld [vmem:[#allocation2 + $0x31] sm:$0xff]  ;;  %v2060_v50 = vld [vmem:[%s12139_s2 + $0x240] sm:$0xff] }
  0x4e   :  { %2209 = vmatmul.mubr.f32.gmra.mrb[2].mxu1 %v8079_v8  ;;  %2594 = vmatmul.mubr.f32.gmra.mrb[2].mxu0 %v516_v30  ;;  %v2059_v8 = vld [vmem:[%s12139_s2 + $0x238] sm:$0xff]  ;;  %v647_v51 = vld [vmem:[#allocation2 + $0x48] sm:$0xff]  ;;  %v648_v58 = vld [vmem:[#allocation2 + $0x50] sm:$0xff] }
  0x4f   :  { %2213 = vmatprep.mubr.f32.mxu1 %v8657_v34  ;;  %6967 = vmatpush1.bf16.msra.mxu0 %v6966_v33  ;;  %v2061_v52 = vld [vmem:[%s12139_s2 + $0x248] sm:$0xff]  ;;  %v164_v53 = vld [vmem:[%s12137_s0 + $0x118] sm:$0xff]  ;;  %v165_v60 = vld [vmem:[%s12137_s0 + $0x120] sm:$0xff] }
  0x50   :  { %2598 = vmatprep.mubr.f32.mxu0 %v645_v35  ;;  %6968 = vmatprep.subr.bf16.mxu0 %v8078_v3  ;;  %230 = vst.msk [vmem:[#allocation2 + $0x1e9] sm:$0xff] %vm194_vm0, %v164_v53  ;;  %v8716_v54 = vld [vmem:[#allocation2 + $0x32] sm:$0xff]  ;;  %v6975_v55 = vpack.c.bf16 %v2061_v52, %v2060_v50  ;;  %231 = vst.msk [vmem:[#allocation2 + $0x1f9] sm:$0xff] %vm194_vm0, %v165_v60  ;;  %v8735_v63 = vld [vmem:[#allocation2 + $0x3a] sm:$0xff] }
  0x51   :  { %7107 = vmatpush1.bf16.msra.mxu1 %v8276_v13  ;;  %v8697_v13 = vld [vmem:[#allocation2 + $0x22] sm:$0xff]  ;;  %v8718_v57 = vld [vmem:[#allocation2 + $0x39] sm:$0xff]  ;;  %v8754_v7 = vld [vmem:[#allocation2 + $0x4a] sm:$0xff] }
  0x52   :  { %2214 = vmatmul.mubr.f32.gmra.mrb[4].mxu1 %v8420_v62  ;;  %7092 = vmatprep.subr.bf16.mxu1 %v8078_v3  ;;  %v6972_v62 = vpack.c.bf16 %v2059_v8, %v2058_v42  ;;  %v2063_v59 = vld [vmem:[%s12139_s2 + $0x258] sm:$0xff]  ;;  %v8737_v2 = vld [vmem:[#allocation2 + $0x49] sm:$0xff]  ;;  %v649_v4 = vld [vmem:[#allocation2 + $0x60] sm:$0xff] }
  0x53   :  { %2599 = vmatmul.mubr.f32.gmra.mrb[4].mxu0 %v8669_v9  ;;  %2218 = vmatprep.mubr.f32.mxu1 %v8671_v40  ;;  %v2065_v5 = vld [vmem:[%s12139_s2 + $0x268] sm:$0xff]  ;;  %v8756_v12 = vld [vmem:[#allocation2 + $0x51] sm:$0xff]  ;;  %v652_v30 = vld [vmem:[#allocation2 + $0x80] sm:$0xff] }
  0x54   :  { %6970 = vmatpush1.bf16.msra.mxu0 %v6969_v39  ;;  %2603 = vmatprep.mubr.f32.mxu0 %v646_v43  ;;  %v166_v6 = vld [vmem:[%s12137_s0 + $0x128] sm:$0xff]  ;;  %v2067_v15 = vld [vmem:[%s12139_s2 + $0x278] sm:$0xff]  ;;  %v167_v17 = vld [vmem:[%s12137_s0 + $0x130] sm:$0xff] }
  0x55   :  { %6971 = vmatprep.subr.bf16.mxu0 %v8078_v3  ;;  %7108 = vmatpush1.bf16.msra.mxu1 %v8293_v19  ;;  %v2062_v19 = vld [vmem:[%s12139_s2 + $0x250] sm:$0xff]  ;;  %232 = vst.msk [vmem:[#allocation2 + $0x201] sm:$0xff] %vm194_vm0, %v166_v6  ;;  %v650_v14 = vld [vmem:[#allocation2 + $0x68] sm:$0xff]  ;;  %233 = vst.msk [vmem:[#allocation2 + $0x211] sm:$0xff] %vm194_vm0, %v167_v17 }
  0x56   :  { %2219 = vmatmul.mubr.f32.gmra.mrb[6].mxu1 %v644_v29  ;;  %7093 = vmatprep.subr.bf16.mxu1 %v8078_v3  ;;  %v6978_v0 = vpack.c.bf16 %v2063_v59, %v2062_v19  ;;  %v8773_v18 = vld [vmem:[#allocation2 + $0x52] sm:$0xff]  ;;  %v8775_v22 = vld [vmem:[#allocation2 + $0x61] sm:$0xff]  ;;  %v8794_v29 = vld [vmem:[#allocation2 + $0x69] sm:$0xff] }
  0x57   :  { %2604 = vmatmul.mubr.f32.gmra.mrb[6].mxu0 %v8697_v13  ;;  %2223 = vmatprep.mubr.f32.mxu1 %v8699_v49  ;;  %v651_v23 = vld [vmem:[#allocation2 + $0x78] sm:$0xff]  ;;  %v2069_v24 = vld [vmem:[%s12139_s2 + $0x288] sm:$0xff]  ;;  %v653_v42 = vld [vmem:[#allocation2 + $0x90] sm:$0xff] }
  0x58   :  { %6973 = vmatpush1.bf16.msra.mxu0 %v6972_v62  ;;  %2608 = vmatprep.mubr.f32.mxu0 %v647_v51  ;;  %v168_v26 = vld [vmem:[%s12137_s0 + $0x138] sm:$0xff]  ;;  %v8792_v27 = vld [vmem:[#allocation2 + $0x62] sm:$0xff]  ;;  %v8811_v36 = vld [vmem:[#allocation2 + $0x6a] sm:$0xff] }
  0x59   :  { %6974 = vmatprep.subr.bf16.mxu0 %v8078_v3  ;;  %7109 = vmatpush1.bf16.msra.mxu1 %v8310_v25  ;;  %v2064_v25 = vld [vmem:[%s12139_s2 + $0x260] sm:$0xff]  ;;  %234 = vst.msk [vmem:[#allocation2 + $0x219] sm:$0xff] %vm194_vm0, %v168_v26  ;;  %v2071_v33 = vld [vmem:[%s12139_s2 + $0x298] sm:$0xff]  ;;  %v170_v8 = vld [vmem:[%s12137_s0 + $0x148] sm:$0xff] }
  0x5a   :  { %2224 = vmatmul.mubr.f32.gmra.mrb[8].mxu1 %v645_v35  ;;  %7094 = vmatprep.subr.bf16.mxu1 %v8078_v3  ;;  %v6981_v11 = vpack.c.bf16 %v2065_v5, %v2064_v25  ;;  %v169_v35 = vld [vmem:[%s12137_s0 + $0x140] sm:$0xff]  ;;  %236 = vst.msk [vmem:[#allocation2 + $0x231] sm:$0xff] %vm194_vm0, %v170_v8  ;;  %v654_v62 = vld [vmem:[#allocation2 + $0x98] sm:$0xff]  ;;  %v655_v19 = vld [vmem:[#allocation2 + $0xa8] sm:$0xff] }
  0x5b   :  { %2609 = vmatmul.mubr.f32.gmra.mrb[8].mxu0 %v8716_v54  ;;  %2228 = vmatprep.mubr.f32.mxu1 %v8718_v57  ;;  %235 = vst.msk [vmem:[#allocation2 + $0x229] sm:$0xff] %vm194_vm0, %v169_v35  ;;  %v8813_v39 = vld [vmem:[#allocation2 + $0x79] sm:$0xff]  ;;  %v8832_v47 = vld [vmem:[#allocation2 + $0x81] sm:$0xff]  ;;  %v8953_v8 = vld [vmem:[#allocation2 + $0xc9] sm:$0xff] }
  0x5c   :  { %6976 = vmatpush1.bf16.msra.mxu0 %v6975_v55  ;;  %2613 = vmatprep.mubr.f32.mxu0 %v648_v58  ;;  %v8830_v44 = vld [vmem:[#allocation2 + $0x7a] sm:$0xff]  ;;  %v8849_v52 = vld [vmem:[#allocation2 + $0x82] sm:$0xff]  ;;  %v8851_v55 = vld [vmem:[#allocation2 + $0x91] sm:$0xff] }
  0x5d   :  { %6977 = vmatprep.subr.bf16.mxu0 %v8078_v3  ;;  %7110 = vmatpush1.bf16.msra.mxu1 %v8327_v31  ;;  %v2066_v31 = vld [vmem:[%s12139_s2 + $0x270] sm:$0xff]  ;;  %v2075_v50 = vld [vmem:[%s12139_s2 + $0x2b8] sm:$0xff]  ;;  %v173_v6 = vld [vmem:[%s12137_s0 + $0x160] sm:$0xff] }
  0x5e   :  { %2229 = vmatmul.mubr.f32.gmra.mrb[10].mxu1 %v646_v43  ;;  %7095 = vmatprep.subr.bf16.mxu1 %v8078_v3  ;;  %v6984_v21 = vpack.c.bf16 %v2067_v15, %v2066_v31  ;;  %v2073_v43 = vld [vmem:[%s12139_s2 + $0x2a8] sm:$0xff]  ;;  %v172_v59 = vld [vmem:[%s12137_s0 + $0x158] sm:$0xff]  ;;  %239 = vst.msk [vmem:[#allocation2 + $0x259] sm:$0xff] %vm194_vm0, %v173_v6  ;;  %v2080_v17 = vld [vmem:[%s12139_s2 + $0x2e0] sm:$0xff] }
  0x5f   :  { %2614 = vmatmul.mubr.f32.gmra.mrb[10].mxu0 %v8735_v63  ;;  %2233 = vmatprep.mubr.f32.mxu1 %v8737_v2  ;;  %238 = vst.msk [vmem:[#allocation2 + $0x249] sm:$0xff] %vm194_vm0, %v172_v59  ;;  %v8868_v60 = vld [vmem:[#allocation2 + $0x92] sm:$0xff]  ;;  %v8897_v15 = vld [vmem:[#allocation2 + $0xa9] sm:$0xff] }
  0x60   :  { %6979 = vmatpush1.bf16.msra.mxu0 %v6978_v0  ;;  %2618 = vmatprep.mubr.f32.mxu0 %v649_v4  ;;  %v8870_v25 = vld [vmem:[#allocation2 + $0x99] sm:$0xff]  ;;  %v9002_v59 = vld [vmem:[#allocation2 + $0xf1] sm:$0xff] }
  0x61   :  { %6980 = vmatprep.subr.bf16.mxu0 %v8078_v3  ;;  %7111 = vmatpush1.bf16.msra.mxu1 %v8344_v37  ;;  %v2068_v37 = vld [vmem:[%s12139_s2 + $0x280] sm:$0xff]  ;;  %v2079_v5 = vld [vmem:[%s12139_s2 + $0x2d8] sm:$0xff] }
  0x62   :  { %2234 = vmatmul.mubr.f32.gmra.mrb[12].mxu1 %v647_v51  ;;  %7096 = vmatprep.subr.bf16.mxu1 %v8078_v3  ;;  %v6987_v28 = vpack.c.bf16 %v2069_v24, %v2068_v37  ;;  %v171_v51 = vld [vmem:[%s12137_s0 + $0x150] sm:$0xff]  ;;  %v160_v31 = vld [vmem:[%s12137_s0 + $0xf8] sm:$0xff]  ;;  %v2081_v37 = vld [vmem:[%s12139_s2 + $0x2e8] sm:$0xff] }
  0x63   :  { %2619 = vmatmul.mubr.f32.gmra.mrb[12].mxu0 %v8754_v7  ;;  %2238 = vmatprep.mubr.f32.mxu1 %v8756_v12  ;;  %237 = vst.msk [vmem:[#allocation2 + $0x241] sm:$0xff] %vm194_vm0, %v171_v51  ;;  %226 = vst.msk [vmem:[#allocation2 + $0x189] sm:$0xff] %vm194_vm0, %v160_v31  ;;  %v8914_v24 = vld [vmem:[#allocation2 + $0xaa] sm:$0xff]  ;;  %v7005_v26 = vpack.c.bf16 %v2081_v37, %v2080_v17  ;;  %v8933_v35 = vld [vmem:[#allocation2 + $0xb2] sm:$0xff] }
  0x64   :  { %6982 = vmatpush1.bf16.msra.mxu0 %v6981_v11  ;;  %2623 = vmatprep.mubr.f32.mxu0 %v650_v14  ;;  %v159_v11 = vld [vmem:[%s12137_s0 + $0xf0] sm:$0xff]  ;;  %v2088_v51 = vld [vmem:[%s12139_s2 + $0x320] sm:$0xff]  ;;  %v2095_v31 = vld [vmem:[%s12139_s2 + $0x358] sm:$0xff] }
  0x65   :  { %6983 = vmatprep.subr.bf16.mxu0 %v8078_v3  ;;  %7112 = vmatpush1.bf16.msra.mxu1 %v8368_v46  ;;  %v2070_v46 = vld [vmem:[%s12139_s2 + $0x290] sm:$0xff]  ;;  %225 = vst.msk [vmem:[#allocation2 + $0x181] sm:$0xff] %vm194_vm0, %v159_v11  ;;  %v2097_v37 = vld [vmem:[%s12139_s2 + $0x368] sm:$0xff] }
  0x66   :  { %2239 = vmatmul.mubr.f32.gmra.mrb[14].mxu1 %v648_v58  ;;  %7097 = vmatprep.subr.bf16.mxu1 %v8078_v3  ;;  %v6990_v38 = vpack.c.bf16 %v2071_v33, %v2070_v46  ;;  %v2077_v58 = vld [vmem:[%s12139_s2 + $0x2c8] sm:$0xff]  ;;  %v175_v33 = vld [vmem:[%s12137_s0 + $0x170] sm:$0xff] }
  0x67   :  { %2624 = vmatmul.mubr.f32.gmra.mrb[14].mxu0 %v8773_v18  ;;  %2243 = vmatprep.mubr.f32.mxu1 %v8775_v22  ;;  %v658_v46 = vld [vmem:[#allocation2 + $0xc8] sm:$0xff]  ;;  %241 = vst.msk [vmem:[#allocation2 + $0x271] sm:$0xff] %vm194_vm0, %v175_v33  ;;  %v2094_v11 = vld [vmem:[%s12139_s2 + $0x350] sm:$0xff] }
  0x68   :  { %6985 = vmatpush1.bf16.msra.mxu0 %v6984_v21  ;;  %2628 = vmatprep.mubr.f32.mxu0 %v651_v23  ;;  %v657_v21 = vld [vmem:[#allocation2 + $0xc0] sm:$0xff]  ;;  %v7026_v17 = vpack.c.bf16 %v2095_v31, %v2094_v11 }
  0x69   :  { %6986 = vmatprep.subr.bf16.mxu0 %v8078_v3  ;;  %7113 = vmatpush1.bf16.msra.mxu1 %v8401_v56  ;;  %v2072_v56 = vld [vmem:[%s12139_s2 + $0x2a0] sm:$0xff] }
  0x6a   :  { %2244 = vmatmul.mubr.f32.gmra.mrb[16].mxu1 %v649_v4  ;;  %7098 = vmatprep.subr.bf16.mxu1 %v8078_v3  ;;  %v6993_v45 = vpack.c.bf16 %v2073_v43, %v2072_v56  ;;  %v656_v4 = vld [vmem:[#allocation2 + $0xb0] sm:$0xff]  ;;  %v8935_v56 = vld [vmem:[#allocation2 + $0xc1] sm:$0xff]  ;;  %v176_v43 = vld [vmem:[%s12137_s0 + $0x178] sm:$0xff] }
  0x6b   :  { %2629 = vmatmul.mubr.f32.gmra.mrb[16].mxu0 %v8792_v27  ;;  %2248 = vmatprep.mubr.f32.mxu1 %v8794_v29  ;;  %242 = vst.msk [vmem:[#allocation2 + $0x279] sm:$0xff] %vm194_vm0, %v176_v43  ;;  %v8027_v11 = vld [vmem:[#allocation2] sm:$0xff] }
  0x6c   :  { %6988 = vmatpush1.bf16.msra.mxu0 %v6987_v28  ;;  %2633 = vmatprep.mubr.f32.mxu0 %v652_v30  ;;  %v8916_v28 = vld [vmem:[#allocation2 + $0xb1] sm:$0xff]  ;;  %v2116_v31 = vld [vmem:[%s12139_s2 + $0x400] sm:$0xff] }
  0x6d   :  { %6989 = vmatprep.subr.bf16.mxu0 %v8078_v3  ;;  %7114 = vmatpush1.bf16.msra.mxu1 %v8430_v1  ;;  %v2074_v1 = vld [vmem:[%s12139_s2 + $0x2b0] sm:$0xff] }
  0x6e   :  { %2249 = vmatmul.mubr.f32.gmra.mrb[18].mxu1 %v650_v14  ;;  %7099 = vmatprep.subr.bf16.mxu1 %v8078_v3  ;;  %v6996_v53 = vpack.c.bf16 %v2075_v50, %v2074_v1  ;;  %v2087_v1 = vld [vmem:[%s12139_s2 + $0x318] sm:$0xff] }
  0x6f   :  { %2634 = vmatmul.mubr.f32.gmra.mrb[18].mxu0 %v8811_v36  ;;  %2253 = vmatprep.mubr.f32.mxu1 %v8813_v39 }
  0x70   :  { %6991 = vmatpush1.bf16.msra.mxu0 %v6990_v38  ;;  %2638 = vmatprep.mubr.f32.mxu0 %v653_v42 }
  0x71   :  { %6992 = vmatprep.subr.bf16.mxu0 %v8078_v3  ;;  %7115 = vmatpush1.bf16.msra.mxu1 %v8447_v10  ;;  %v2076_v10 = vld [vmem:[%s12139_s2 + $0x2c0] sm:$0xff] }
  0x72   :  { %2254 = vmatmul.mubr.f32.gmra.mrb[20].mxu1 %v651_v23  ;;  %7100 = vmatprep.subr.bf16.mxu1 %v8078_v3  ;;  %v6999_v0 = vpack.c.bf16 %v2077_v58, %v2076_v10  ;;  %v174_v23 = vld [vmem:[%s12137_s0 + $0x168] sm:$0xff]  ;;  %v2091_v58 = vld [vmem:[%s12139_s2 + $0x338] sm:$0xff] }
  0x73   :  { %2639 = vmatmul.mubr.f32.gmra.mrb[20].mxu0 %v8830_v44  ;;  %2258 = vmatprep.mubr.f32.mxu1 %v8832_v47  ;;  %240 = vst.msk [vmem:[#allocation2 + $0x261] sm:$0xff] %vm194_vm0, %v174_v23  ;;  %v9050_v23 = vld [vmem:[#allocation2 + $0x111] sm:$0xff] }
  0x74   :  { %6994 = vmatpush1.bf16.msra.mxu0 %v6993_v45  ;;  %2643 = vmatprep.mubr.f32.mxu0 %v654_v62 }
  0x75   :  { %6995 = vmatprep.subr.bf16.mxu0 %v8078_v3  ;;  %7116 = vmatpush1.bf16.msra.mxu1 %v8471_v20  ;;  %v2078_v20 = vld [vmem:[%s12139_s2 + $0x2d0] sm:$0xff] }
  0x76   :  { %2259 = vmatmul.mubr.f32.gmra.mrb[22].mxu1 %v652_v30  ;;  %7101 = vmatprep.subr.bf16.mxu1 %v8078_v3  ;;  %v7002_v14 = vpack.c.bf16 %v2079_v5, %v2078_v20  ;;  %v2083_v30 = vld [vmem:[%s12139_s2 + $0x2f8] sm:$0xff]  ;;  %v2092_v20 = vld [vmem:[%s12139_s2 + $0x340] sm:$0xff] }
  0x77   :  { %2644 = vmatmul.mubr.f32.gmra.mrb[22].mxu0 %v8849_v52  ;;  %2263 = vmatprep.mubr.f32.mxu1 %v8851_v55  ;;  %v9018_v5 = vld [vmem:[#allocation2 + $0xf9] sm:$0xff] }
  0x78   :  { %6997 = vmatpush1.bf16.msra.mxu0 %v6996_v53  ;;  %2648 = vmatprep.mubr.f32.mxu0 %v655_v19  ;;  %v8986_v53 = vld [vmem:[#allocation2 + $0xe1] sm:$0xff] }
  0x79   :  { %6998 = vmatprep.subr.bf16.mxu0 %v8078_v3  ;;  %7117 = vmatpush1.bf16.msra.mxu1 %v8504_v32  ;;  %v8895_v32 = vld [vmem:[#allocation2 + $0x9a] sm:$0xff] }
  0x7a   :  { %2264 = vmatmul.mubr.f32.gmra.mrb[24].mxu1 %v653_v42  ;;  %7102 = vmatprep.subr.bf16.mxu1 %v8078_v3  ;;  %v2085_v42 = vld [vmem:[%s12139_s2 + $0x308] sm:$0xff] }
  0x7b   :  { %2649 = vmatmul.mubr.f32.gmra.mrb[24].mxu0 %v8868_v60  ;;  %2268 = vmatprep.mubr.f32.mxu1 %v8870_v25 }
  0x7c   :  { %7000 = vmatpush1.bf16.msra.mxu0 %v6999_v0  ;;  %2653 = vmatprep.mubr.f32.mxu0 %v656_v4 }
  0x7d   :  { %7001 = vmatprep.subr.bf16.mxu0 %v8078_v3  ;;  %7118 = vmatpush1.bf16.msra.mxu1 %v8530_v41  ;;  %v2082_v41 = vld [vmem:[%s12139_s2 + $0x2f0] sm:$0xff] }
  0x7e   :  { %2269 = vmatmul.mubr.f32.gmra.mrb[26].mxu1 %v654_v62  ;;  %7103 = vmatprep.subr.bf16.mxu1 %v8078_v3  ;;  %v7008_v38 = vpack.c.bf16 %v2083_v30, %v2082_v41  ;;  %v177_v62 = vld [vmem:[%s12137_s0 + $0x180] sm:$0xff]  ;;  %v2098_v41 = vld [vmem:[%s12139_s2 + $0x370] sm:$0xff] }
  0x7f   :  { %2654 = vmatmul.mubr.f32.gmra.mrb[26].mxu0 %v8895_v32  ;;  %2273 = vmatprep.mubr.f32.mxu1 %v8897_v15  ;;  %243 = vst.msk [vmem:[#allocation2 + $0x289] sm:$0xff] %vm194_vm0, %v177_v62  ;;  %v9066_v30 = vld [vmem:[#allocation2 + $0x121] sm:$0xff] }
  0x80   :  { %7003 = vmatpush1.bf16.msra.mxu0 %v7002_v14  ;;  %2658 = vmatprep.mubr.f32.mxu0 %v657_v21  ;;  %v9034_v14 = vld [vmem:[#allocation2 + $0x109] sm:$0xff] }
  0x81   :  { %7004 = vmatprep.subr.bf16.mxu0 %v8078_v3  ;;  %7119 = vmatpush1.bf16.msra.mxu1 %v8547_v48  ;;  %v2084_v48 = vld [vmem:[%s12139_s2 + $0x300] sm:$0xff] }
  0x82   :  { %2274 = vmatmul.mubr.f32.gmra.mrb[28].mxu1 %v655_v19  ;;  %7104 = vmatprep.subr.bf16.mxu1 %v8078_v3  ;;  %v7011_v45 = vpack.c.bf16 %v2085_v42, %v2084_v48  ;;  %v2090_v19 = vld [vmem:[%s12139_s2 + $0x330] sm:$0xff]  ;;  %v2101_v48 = vld [vmem:[%s12139_s2 + $0x388] sm:$0xff] }
  0x83   :  { %2659 = vmatmul.mubr.f32.gmra.mrb[28].mxu0 %v8914_v24  ;;  %2278 = vmatprep.mubr.f32.mxu1 %v8916_v28  ;;  %v7020_v0 = vpack.c.bf16 %v2091_v58, %v2090_v19  ;;  %v9082_v42 = vld [vmem:[#allocation2 + $0x129] sm:$0xff]  ;;  %v189_v19 = vld [vmem:[%s12137_s0 + $0x1e0] sm:$0xff]  ;;  %v288_v58 = vld [vmem:[#allocation2 + $0x158] sm:$0xff] }
  0x84   :  { %7006 = vmatpush1.bf16.msra.mxu0 %v7005_v26  ;;  %2663 = vmatprep.mubr.f32.mxu0 %v658_v46  ;;  %255 = vst.msk [vmem:[#allocation2 + $0x319] sm:$0xff] %vm194_vm0, %v189_v19  ;;  %v303_v19 = vld [vmem:[#allocation2 + $0x240] sm:$0xff] }
  0x85   :  { %7007 = vmatprep.subr.bf16.mxu0 %v8078_v3  ;;  %7120 = vmatpush1.bf16.msra.mxu1 %v8583_v61  ;;  %v2086_v61 = vld [vmem:[%s12139_s2 + $0x310] sm:$0xff] }
  0x86   :  { %2279 = vmatmul.mubr.f32.gmra.mrb[30].mxu1 %v656_v4  ;;  %7105 = vmatprep.subr.bf16.mxu1 %v8078_v3  ;;  %v7014_v50 = vpack.c.bf16 %v2087_v1, %v2086_v61  ;;  %v2093_v4 = vld [vmem:[%s12139_s2 + $0x348] sm:$0xff]  ;;  %v2103_v61 = vld [vmem:[%s12139_s2 + $0x398] sm:$0xff] }
  0x87   :  { %2664 = vmatmul.mubr.f32.gmra.mrb[30].mxu0 %v8933_v35  ;;  %2283 = vmatprep.mubr.f32.mxu1 %v8935_v56  ;;  %v7023_v6 = vpack.c.bf16 %v2093_v4, %v2092_v20  ;;  %v9098_v1 = vld [vmem:[#allocation2 + $0x139] sm:$0xff] }
  0x88   :  { %7009 = vmatpush1.bf16.msra.mxu0 %v7008_v38  ;;  %2973 = vmatprep.mubr.f32.mxu0 %v8669_v9  ;;  %v8970_v9 = vld [vmem:[#allocation2 + $0xd9] sm:$0xff] }
  0x89   :  { %7010 = vmatprep.subr.bf16.mxu0 %v8078_v3  ;;  %7121 = vmatpush1.bf16.msra.mxu1 %v8626_v16  ;;  %v2089_v16 = vld [vmem:[%s12139_s2 + $0x328] sm:$0xff]  ;;  %v2100_v38 = vld [vmem:[%s12139_s2 + $0x380] sm:$0xff]  ;;  %v2107_v20 = vld [vmem:[%s12139_s2 + $0x3b8] sm:$0xff] }
  0x8a   :  { %2284 = vmatmul.mubr.f32.gmra.mrb[32].mxu1 %v657_v21  ;;  %v7017_v10 = vpack.c.bf16 %v2089_v16, %v2088_v51  ;;  %v2096_v21 = vld [vmem:[%s12139_s2 + $0x360] sm:$0xff]  ;;  %v7035_v43 = vpack.c.bf16 %v2101_v48, %v2100_v38  ;;  %v187_v51 = vld [vmem:[%s12137_s0 + $0x1d0] sm:$0xff]  ;;  %v297_v48 = vld [vmem:[#allocation2 + $0x1f8] sm:$0xff] }
  0x8b   :  { %2974 = vmatmul.mubr.f32.vlgmr.msra.gmra.mrb[0].mxu0 %v8657_v34  ;;  %2288 = vmatprep.mubr.f32.mxu1 %v8953_v8  ;;  %v178_v34 = vld [vmem:[%s12137_s0 + $0x188] sm:$0xff]  ;;  %v7029_v26 = vpack.c.bf16 %v2097_v37, %v2096_v21  ;;  %v2104_v16 = vld [vmem:[%s12139_s2 + $0x3a0] sm:$0xff]  ;;  %253 = vst.msk [vmem:[#allocation2 + $0x301] sm:$0xff] %vm194_vm0, %v187_v51  ;;  %v9192_v21 = vld [vmem:[#allocation2 + $0x1d1] sm:$0xff] }
  0x8c   :  { %2978 = vmatprep.mubr.f32.mxu0 %v8697_v13  ;;  %7012 = vmatpush1.bf16.msra.mxu0 %v7011_v45  ;;  %244 = vst.msk [vmem:[#allocation2 + $0x291] sm:$0xff] %vm194_vm0, %v178_v34  ;;  %v277_v13 = vld [vmem:[#allocation2 + $0xd8] sm:$0xff]  ;;  %v2102_v45 = vld [vmem:[%s12139_s2 + $0x390] sm:$0xff]  ;;  %v301_v51 = vld [vmem:[#allocation2 + $0x228] sm:$0xff] }
  0x8d   :  { %7013 = vmatprep.subr.bf16.mxu0 %v8078_v3  ;;  %v7038_v62 = vpack.c.bf16 %v2103_v61, %v2102_v45  ;;  %v9194_v37 = vld [vmem:[#allocation2 + $0xfa] sm:$0xff]  ;;  %v9240_v61 = vld [vmem:[#allocation2 + $0x211] sm:$0xff] }
  0x8e   :  { %2289 = vmatmul.mubr.f32.gmra.mrb[34].mxu1 %v658_v46  ;;  %v2099_v46 = vld [vmem:[%s12139_s2 + $0x378] sm:$0xff] }
  0x8f   :  { %2979 = vmatmul.mubr.f32.gmra.mrb[2].mxu0 %v8671_v40  ;;  %2293 = vmatprep.mubr.f32.mxu1 %v8970_v9  ;;  %v179_v40 = vld [vmem:[%s12137_s0 + $0x190] sm:$0xff]  ;;  %v7032_v33 = vpack.c.bf16 %v2099_v46, %v2098_v41  ;;  %v9205_v41 = vld [vmem:[#allocation2 + $0x1e1] sm:$0xff]  ;;  %v9220_v38 = vld [vmem:[#allocation2 + $0x1f9] sm:$0xff] }
  0x90   :  { %2983 = vmatprep.mubr.f32.mxu0 %v8716_v54  ;;  %7015 = vmatpush1.bf16.msra.mxu0 %v7014_v50  ;;  %245 = vst.msk [vmem:[#allocation2 + $0x2a1] sm:$0xff] %vm194_vm0, %v179_v40  ;;  %v278_v54 = vld [vmem:[#allocation2 + $0xe0] sm:$0xff]  ;;  %v186_v50 = vld [vmem:[%s12137_s0 + $0x1c8] sm:$0xff] }
  0x91   :  { %7016 = vmatprep.subr.bf16.mxu0 %v8078_v3  ;;  %252 = vst.msk [vmem:[#allocation2 + $0x2f1] sm:$0xff] %vm194_vm0, %v186_v50  ;;  %v9145_v40 = vld [vmem:[#allocation2 + $0xc2] sm:$0xff]  ;;  %v9207_v46 = vld [vmem:[#allocation2 + $0x10a] sm:$0xff]  ;;  %v300_v50 = vld [vmem:[#allocation2 + $0x218] sm:$0xff] }
  0x92   :  { %2294 = vmatmul.mubr.f32.gmra.mrb[36].mxu1 %v277_v13  ;;  %v9124_v13 = vld [vmem:[#allocation2 + $0x151] sm:$0xff] }
  0x93   :  { %2984 = vmatmul.mubr.f32.gmra.mrb[4].mxu0 %v8699_v49  ;;  %2298 = vmatprep.mubr.f32.mxu1 %v8986_v53  ;;  %v180_v49 = vld [vmem:[%s12137_s0 + $0x198] sm:$0xff] }
  0x94   :  { %2988 = vmatprep.mubr.f32.mxu0 %v8735_v63  ;;  %7018 = vmatpush1.bf16.msra.mxu0 %v7017_v10  ;;  %246 = vst.msk [vmem:[#allocation2 + $0x2a9] sm:$0xff] %vm194_vm0, %v180_v49  ;;  %v279_v63 = vld [vmem:[#allocation2 + $0xf0] sm:$0xff]  ;;  %v188_v10 = vld [vmem:[%s12137_s0 + $0x1d8] sm:$0xff] }
  0x95   :  { %7019 = vmatprep.subr.bf16.mxu0 %v8078_v3  ;;  %254 = vst.msk [vmem:[#allocation2 + $0x309] sm:$0xff] %vm194_vm0, %v188_v10  ;;  %v419_v49 = vld [vmem:[#allocation2 + $0x1b1] sm:$0xff]  ;;  %v9275_v10 = vld [vmem:[#allocation2 + $0x241] sm:$0xff] }
  0x96   :  { %2299 = vmatmul.mubr.f32.gmra.mrb[38].mxu1 %v278_v54  ;;  %v9154_v54 = vld [vmem:[#allocation2 + $0x171] sm:$0xff] }
  0x97   :  { %2989 = vmatmul.mubr.f32.gmra.mrb[6].mxu0 %v8718_v57  ;;  %2303 = vmatprep.mubr.f32.mxu1 %v9002_v59  ;;  %v181_v57 = vld [vmem:[%s12137_s0 + $0x1a0] sm:$0xff] }
  0x98   :  { %2993 = vmatprep.mubr.f32.mxu0 %v8754_v7  ;;  %7021 = vmatpush1.bf16.msra.mxu0 %v7020_v0  ;;  %247 = vst.msk [vmem:[#allocation2 + $0x2b9] sm:$0xff] %vm194_vm0, %v181_v57  ;;  %v280_v7 = vld [vmem:[#allocation2 + $0xf8] sm:$0xff]  ;;  %v2106_v0 = vld [vmem:[%s12139_s2 + $0x3b0] sm:$0xff]  ;;  %v2117_v57 = vld [vmem:[%s12139_s2 + $0x408] sm:$0xff] }
  0x99   :  { %7022 = vmatprep.subr.bf16.mxu0 %v8078_v3  ;;  %v7044_v4 = vpack.c.bf16 %v2107_v20, %v2106_v0  ;;  %v929_v0 = vld [vmem:[#allocation2 + $0x182] sm:$0xff]  ;;  %v305_v20 = vld [vmem:[#allocation2 + $0x258] sm:$0xff] }
  0x9a   :  { %2304 = vmatmul.mubr.f32.gmra.mrb[40].mxu1 %v279_v63  ;;  %v9167_v63 = vld [vmem:[#allocation2 + $0xda] sm:$0xff] }
  0x9b   :  { %2994 = vmatmul.mubr.f32.gmra.mrb[8].mxu0 %v8737_v2  ;;  %2308 = vmatprep.mubr.f32.mxu1 %v9018_v5  ;;  %v182_v2 = vld [vmem:[%s12137_s0 + $0x1a8] sm:$0xff] }
  0x9c   :  { %2998 = vmatprep.mubr.f32.mxu0 %v8773_v18  ;;  %7024 = vmatpush1.bf16.msra.mxu0 %v7023_v6  ;;  %248 = vst.msk [vmem:[#allocation2 + $0x2c1] sm:$0xff] %vm194_vm0, %v182_v2  ;;  %v281_v18 = vld [vmem:[#allocation2 + $0x108] sm:$0xff]  ;;  %v420_v6 = vld [vmem:[#allocation2 + $0x1b9] sm:$0xff] }
  0x9d   :  { %7025 = vmatprep.subr.bf16.mxu0 %v8078_v3  ;;  %v2108_v2 = vld [vmem:[%s12139_s2 + $0x3c0] sm:$0xff] }
  0x9e   :  { %2309 = vmatmul.mubr.f32.gmra.mrb[42].mxu1 %v280_v7  ;;  %v9184_v7 = vpack.c.bf16 %v2117_v57, %v2116_v31  ;;  %v802_v31 = vld [vmem:[#allocation2 + $0x189] sm:$0xff]  ;;  %v9311_v57 = vld [vmem:[#allocation2 + $0x271] sm:$0xff] }
  0x9f   :  { %2999 = vmatmul.mubr.f32.gmra.mrb[10].mxu0 %v8756_v12  ;;  %2313 = vmatprep.mubr.f32.mxu1 %v9034_v14  ;;  %v183_v12 = vld [vmem:[%s12137_s0 + $0x1b0] sm:$0xff] }
  0xa0   :  { %3003 = vmatprep.mubr.f32.mxu0 %v8792_v27  ;;  %7027 = vmatpush1.bf16.msra.mxu0 %v7026_v17  ;;  %249 = vst.msk [vmem:[#allocation2 + $0x2d1] sm:$0xff] %vm194_vm0, %v183_v12  ;;  %v282_v27 = vld [vmem:[#allocation2 + $0x110] sm:$0xff]  ;;  %v295_v12 = vld [vmem:[#allocation2 + $0x1e0] sm:$0xff] }
  0xa1   :  { %7028 = vmatprep.subr.bf16.mxu0 %v8078_v3  ;;  %v9186_v17 = vld [vmem:[#allocation2 + $0xf2] sm:$0xff]  ;;  %7059 = vmatprep.subr.bf16.mxu1 %v9184_v7 }
  0xa2   :  { %2314 = vmatmul.mubr.f32.gmra.mrb[44].mxu1 %v281_v18  ;;  %v2109_v18 = vld [vmem:[%s12139_s2 + $0x3c8] sm:$0xff] }
  0xa3   :  { %3004 = vmatmul.mubr.f32.gmra.mrb[12].mxu0 %v8775_v22  ;;  %2318 = vmatprep.mubr.f32.mxu1 %v9050_v23  ;;  %v184_v22 = vld [vmem:[%s12137_s0 + $0x1b8] sm:$0xff] }
  0xa4   :  { %3008 = vmatprep.mubr.f32.mxu0 %v8811_v36  ;;  %7030 = vmatpush1.bf16.msra.mxu0 %v7029_v26  ;;  %250 = vst.msk [vmem:[#allocation2 + $0x2d9] sm:$0xff] %vm194_vm0, %v184_v22  ;;  %v283_v36 = vld [vmem:[#allocation2 + $0x120] sm:$0xff]  ;;  %v7047_v26 = vpack.c.bf16 %v2109_v18, %v2108_v2  ;;  %v307_v2 = vld [vmem:[#allocation2 + $0x270] sm:$0xff] }
  0xa5   :  { %7031 = vmatprep.subr.bf16.mxu0 %v8078_v3  ;;  %v9227_v22 = vld [vmem:[#allocation2 + $0x201] sm:$0xff]  ;;  %v9317_v18 = vld [vmem:[#allocation2 + $0x279] sm:$0xff] }
  0xa6   :  { %2319 = vmatmul.mubr.f32.gmra.mrb[46].mxu1 %v282_v27  ;;  %v9215_v27 = vld [vmem:[#allocation2 + $0x112] sm:$0xff] }
  0xa7   :  { %3009 = vmatmul.mubr.f32.gmra.mrb[14].mxu0 %v8794_v29  ;;  %2323 = vmatprep.mubr.f32.mxu1 %v9066_v30  ;;  %v185_v29 = vld [vmem:[%s12137_s0 + $0x1c0] sm:$0xff] }
  0xa8   :  { %3013 = vmatprep.mubr.f32.mxu0 %v8830_v44  ;;  %7033 = vmatpush1.bf16.msra.mxu0 %v7032_v33  ;;  %251 = vst.msk [vmem:[#allocation2 + $0x2e9] sm:$0xff] %vm194_vm0, %v185_v29  ;;  %v284_v44 = vld [vmem:[#allocation2 + $0x128] sm:$0xff]  ;;  %v9242_v29 = vld [vmem:[#allocation2 + $0x13a] sm:$0xff] }
  0xa9   :  { %7034 = vmatprep.subr.bf16.mxu0 %v8078_v3  ;;  %v296_v33 = vld [vmem:[#allocation2 + $0x1e8] sm:$0xff] }
  0xaa   :  { %2324 = vmatmul.mubr.f32.gmra.mrb[48].mxu1 %v283_v36  ;;  %v2111_v36 = vld [vmem:[%s12139_s2 + $0x3d8] sm:$0xff] }
  0xab   :  { %3014 = vmatmul.mubr.f32.gmra.mrb[16].mxu0 %v8813_v39  ;;  %2328 = vmatprep.mubr.f32.mxu1 %v9082_v42  ;;  %v285_v39 = vld [vmem:[#allocation2 + $0x138] sm:$0xff] }
  0xac   :  { %3018 = vmatprep.mubr.f32.mxu0 %v8849_v52  ;;  %7036 = vmatpush1.bf16.msra.mxu0 %v7035_v43  ;;  %v9108_v52 = vld [vmem:[#allocation2 + $0x141] sm:$0xff]  ;;  %v9235_v43 = vld [vmem:[#allocation2 + $0x12a] sm:$0xff] }
  0xad   :  { %7037 = vmatprep.subr.bf16.mxu0 %v8078_v3 }
  0xae   :  { %2329 = vmatmul.mubr.f32.gmra.mrb[50].mxu1 %v284_v44  ;;  %v299_v44 = vld [vmem:[#allocation2 + $0x210] sm:$0xff] }
  0xaf   :  { %3019 = vmatmul.mubr.f32.gmra.mrb[18].mxu0 %v8832_v47  ;;  %2333 = vmatprep.mubr.f32.mxu1 %v9098_v1  ;;  %v2105_v47 = vld [vmem:[%s12139_s2 + $0x3a8] sm:$0xff] }
  0xb0   :  { %3023 = vmatprep.mubr.f32.mxu0 %v8868_v60  ;;  %7039 = vmatpush1.bf16.msra.mxu0 %v7038_v62  ;;  %v286_v60 = vld [vmem:[#allocation2 + $0x140] sm:$0xff]  ;;  %v7041_v34 = vpack.c.bf16 %v2105_v47, %v2104_v16  ;;  %v9262_v16 = vld [vmem:[#allocation2 + $0x231] sm:$0xff]  ;;  %v2113_v47 = vld [vmem:[%s12139_s2 + $0x3e8] sm:$0xff] }
  0xb1   :  { %7040 = vmatprep.subr.bf16.mxu0 %v8078_v3  ;;  %v9250_v62 = vld [vmem:[#allocation2 + $0x142] sm:$0xff] }
  0xb2   :  { %2334 = vmatmul.mubr.f32.gmra.mrb[52].mxu1 %v285_v39  ;;  %v9255_v39 = vld [vmem:[#allocation2 + $0x229] sm:$0xff] }
  0xb3   :  { %3024 = vmatmul.mubr.f32.gmra.mrb[20].mxu0 %v8851_v55  ;;  %2338 = vmatprep.mubr.f32.mxu1 %v9108_v52  ;;  %v287_v55 = vld [vmem:[#allocation2 + $0x150] sm:$0xff] }
  0xb4   :  { %3028 = vmatprep.mubr.f32.mxu0 %v8895_v32  ;;  %7042 = vmatpush1.bf16.msra.mxu0 %v7041_v34  ;;  %v9134_v32 = vld [vmem:[#allocation2 + $0x159] sm:$0xff] }
  0xb5   :  { %7043 = vmatprep.subr.bf16.mxu0 %v8078_v3 }
  0xb6   :  { %2339 = vmatmul.mubr.f32.gmra.mrb[54].mxu1 %v286_v60  ;;  %v9270_v60 = vld [vmem:[#allocation2 + $0x15a] sm:$0xff] }
  0xb7   :  { %3029 = vmatmul.mubr.f32.gmra.mrb[22].mxu0 %v8870_v25  ;;  %2343 = vmatprep.mubr.f32.mxu1 %v9124_v13  ;;  %v9143_v25 = vld [vmem:[#allocation2 + $0x169] sm:$0xff] }
  0xb8   :  { %3033 = vmatprep.mubr.f32.mxu0 %v8914_v24  ;;  %v190_v24 = vld [vmem:[%s12137_s0 + $0x1e8] sm:$0xff]  ;;  %7045 = vmatpush1.bf16.msra.mxu0 %v7044_v4 }
  0xb9   :  { %256 = vst.msk [vmem:[#allocation2 + $0x321] sm:$0xff] %vm194_vm0, %v190_v24  ;;  %7046 = vmatprep.subr.bf16.mxu0 %v8078_v3  ;;  %v191_v24 = vld [vmem:[%s12137_s0 + $0x1f0] sm:$0xff]  ;;  %v9302_v4 = vld [vmem:[#allocation2 + $0x261] sm:$0xff] }
  0xba   :  { %2344 = vmatmul.mubr.f32.gmra.mrb[56].mxu1 %v287_v55  ;;  %v9277_v55 = vld [vmem:[#allocation2 + $0x16a] sm:$0xff]  ;;  %257 = vst.msk [vmem:[#allocation2 + $0x331] sm:$0xff] %vm194_vm0, %v191_v24 }
  0xbb   :  { %3034 = vmatmul.mubr.f32.gmra.mrb[24].mxu0 %v8897_v15  ;;  %2348 = vmatprep.mubr.f32.mxu1 %v9134_v32  ;;  %v289_v15 = vld [vmem:[#allocation2 + $0x168] sm:$0xff] }
  0xbc   :  { %3038 = vmatprep.mubr.f32.mxu0 %v8933_v35  ;;  %v9156_v35 = vld [vmem:[#allocation2 + $0xca] sm:$0xff]  ;;  %7048 = vmatpush1.bf16.msra.mxu0 %v7047_v26  ;;  %v308_v26 = vld [vmem:[#allocation2 + $0x278] sm:$0xff] }
  0xbd   :  { %7049 = vmatprep.subr.bf16.mxu0 %v8078_v3 }
  0xbe   :  { %2349 = vmatmul.mubr.f32.gmra.mrb[58].mxu1 %v288_v58  ;;  %v9285_v58 = vld [vmem:[#allocation2 + $0x172] sm:$0xff] }
  0xbf   :  { %3039 = vmatmul.mubr.f32.gmra.mrb[26].mxu0 %v8916_v28  ;;  %2353 = vmatprep.mubr.f32.mxu1 %v9143_v25  ;;  %v290_v28 = vld [vmem:[#allocation2 + $0x170] sm:$0xff] }
  0xc0   :  { %3043 = vmatprep.mubr.f32.mxu0 %v9145_v40 }
  0xc2   :  { %2354 = vmatmul.mubr.f32.gmra.mrb[60].mxu1 %v289_v15  ;;  %v9298_v15 = vld [vmem:[#allocation2 + $0x259] sm:$0xff] }
  0xc3   :  { %3044 = vmatmul.mubr.f32.gmra.mrb[28].mxu0 %v8935_v56  ;;  %2358 = vmatprep.mubr.f32.mxu1 %v9154_v54  ;;  %v9172_v56 = vld [vmem:[#allocation2 + $0xe2] sm:$0xff] }
  0xc4   :  { %3048 = vmatprep.mubr.f32.mxu0 %v9156_v35 }
  0xc6   :  { %2359 = vmatmul.mubr.f32.gmra.mrb[62].mxu1 %v290_v28  ;;  %v801_v28 = vld [vmem:[#allocation2 + $0x181] sm:$0xff] }
  0xc7   :  { %3049 = vmatmul.mubr.f32.gmra.mrb[30].mxu0 %v8953_v8  ;;  %2363 = vmatprep.mubr.f32.mxu1 %v419_v49  ;;  %v9182_v8 = vld [vmem:[#allocation2 + $0x1c9] sm:$0xff]  ;;  %v2115_v49 = vld [vmem:[%s12139_s2 + $0x3f8] sm:$0xff] }
  0xc8   :  { %3053 = vmatprep.mubr.f32.mxu0 %v9167_v63 }
  0xca   :  { %2364 = vmatmul.mubr.f32.gmra.mrb[64].mxu1 %v8027_v11 }
  0xcb   :  { %3054 = vmatmul.mubr.f32.gmra.mrb[32].mxu0 %v8970_v9  ;;  %2368 = vmatprep.mubr.f32.mxu1 %v420_v6  ;;  %v293_v9 = vld [vmem:[#allocation2 + $0x1c8] sm:$0xff] }
  0xcc   :  { %3058 = vmatprep.mubr.f32.mxu0 %v9172_v56  ;;  %v930_v6 = vld [vmem:[#allocation2 + $0x18a] sm:$0xff] }
  0xce   :  { %2369 = vmatmul.mubr.f32.gmra.mrb[66].mxu1 %v8027_v11 }
  0xcf   :  { %3059 = vmatmul.mubr.f32.gmra.mrb[34].mxu0 %v8986_v53  ;;  %2373 = vmatprep.mubr.f32.mxu1 %v9182_v8  ;;  %v294_v53 = vld [vmem:[#allocation2 + $0x1d0] sm:$0xff] }
  0xd0   :  { %3063 = vmatprep.mubr.f32.mxu0 %v9186_v17 }
  0xd2   :  { %2374 = vmatmul.mubr.f32.gmra.mrb[68].mxu1 %v293_v9  ;;  %v9313_v9 = vld [vmem:[#allocation2 + $0x1ca] sm:$0xff] }
  0xd3   :  { %3064 = vmatmul.mubr.f32.gmra.mrb[36].mxu0 %v9002_v59  ;;  %2378 = vmatprep.mubr.f32.mxu1 %v9192_v21  ;;  %v9213_v59 = vld [vmem:[#allocation2 + $0x1e9] sm:$0xff] }
  0xd4   :  { %3068 = vmatprep.mubr.f32.mxu0 %v9194_v37 }
  0xd6   :  { %2379 = vmatmul.mubr.f32.gmra.mrb[70].mxu1 %v294_v53  ;;  %v9319_v53 = vld [vmem:[#allocation2 + $0x1d2] sm:$0xff] }
  0xd7   :  { %3069 = vmatmul.mubr.f32.gmra.mrb[38].mxu0 %v9018_v5  ;;  %2383 = vmatprep.mubr.f32.mxu1 %v9205_v41  ;;  %v9222_v5 = vld [vmem:[#allocation2 + $0x122] sm:$0xff] }
  0xd8   :  { %3073 = vmatprep.mubr.f32.mxu0 %v9207_v46 }
  0xda   :  { %2384 = vmatmul.mubr.f32.gmra.mrb[72].mxu1 %v295_v12  ;;  %v9324_v12 = vld [vmem:[#allocation2 + $0x289] sm:$0xff] }
  0xdb   :  { %3074 = vmatmul.mubr.f32.gmra.mrb[40].mxu0 %v9034_v14  ;;  %2388 = vmatprep.mubr.f32.mxu1 %v9213_v59  ;;  %v2110_v14 = vld [vmem:[%s12139_s2 + $0x3d0] sm:$0xff] }
  0xdc   :  { %3078 = vmatprep.mubr.f32.mxu0 %v9215_v27  ;;  %v7050_v45 = vpack.c.bf16 %v2111_v36, %v2110_v14  ;;  %v9331_v14 = vld [vmem:[#allocation2 + $0x291] sm:$0xff] }
  0xdd   :  { %v9337_v36 = vld [vmem:[#allocation2 + $0x290] sm:$0xff] }
  0xde   :  { %2389 = vmatmul.mubr.f32.gmra.mrb[74].mxu1 %v296_v33  ;;  %7051 = vmatpush1.bf16.msra.mxu0 %v7050_v45  ;;  %v9326_v33 = vld [vmem:[#allocation2 + $0x1e2] sm:$0xff] }
  0xdf   :  { %3079 = vmatmul.mubr.f32.gmra.mrb[42].mxu0 %v9050_v23  ;;  %2393 = vmatprep.mubr.f32.mxu1 %v9220_v38  ;;  %v298_v23 = vld [vmem:[#allocation2 + $0x200] sm:$0xff] }
  0xe0   :  { %3083 = vmatprep.mubr.f32.mxu0 %v9222_v5  ;;  %7052 = vmatprep.subr.bf16.mxu0 %v8078_v3  ;;  %v9340_v45 = vld [vmem:[#allocation2 + $0x2a1] sm:$0xff] }
  0xe2   :  { %2394 = vmatmul.mubr.f32.gmra.mrb[76].mxu1 %v297_v48  ;;  %v309_v48 = vld [vmem:[#allocation2 + $0x288] sm:$0xff] }
  0xe3   :  { %3084 = vmatmul.mubr.f32.gmra.mrb[44].mxu0 %v9066_v30  ;;  %2398 = vmatprep.mubr.f32.mxu1 %v9227_v22  ;;  %v9248_v30 = vld [vmem:[#allocation2 + $0x219] sm:$0xff] }
  0xe4   :  { %3088 = vmatprep.mubr.f32.mxu0 %v9235_v43 }
  0xe6   :  { %2399 = vmatmul.mubr.f32.gmra.mrb[78].mxu1 %v298_v23  ;;  %v9347_v23 = vld [vmem:[#allocation2 + $0x2a0] sm:$0xff] }
  0xe7   :  { %3089 = vmatmul.mubr.f32.gmra.mrb[46].mxu0 %v9082_v42  ;;  %2403 = vmatprep.mubr.f32.mxu1 %v9240_v61  ;;  %v9257_v42 = vld [vmem:[#allocation2 + $0x152] sm:$0xff] }
  0xe8   :  { %3093 = vmatprep.mubr.f32.mxu0 %v9242_v29 }
  0xea   :  { %2404 = vmatmul.mubr.f32.gmra.mrb[80].mxu1 %v299_v44  ;;  %v9352_v44 = vld [vmem:[#allocation2 + $0x202] sm:$0xff] }
  0xeb   :  { %3094 = vmatmul.mubr.f32.gmra.mrb[48].mxu0 %v9098_v1  ;;  %2408 = vmatprep.mubr.f32.mxu1 %v9248_v30  ;;  %v2112_v1 = vld [vmem:[%s12139_s2 + $0x3e0] sm:$0xff] }
  0xec   :  { %3098 = vmatprep.mubr.f32.mxu0 %v9250_v62  ;;  %v7053_v34 = vpack.c.bf16 %v2113_v47, %v2112_v1  ;;  %v9364_v1 = vld [vmem:[#allocation2 + $0x212] sm:$0xff] }
  0xee   :  { %2409 = vmatmul.mubr.f32.gmra.mrb[82].mxu1 %v300_v50  ;;  %7054 = vmatpush1.bf16.msra.mxu0 %v7053_v34  ;;  %v9357_v50 = vld [vmem:[#allocation2 + $0x2a8] sm:$0xff] }
  0xef   :  { %3099 = vmatmul.mubr.f32.gmra.mrb[50].mxu0 %v9108_v52  ;;  %2413 = vmatprep.mubr.f32.mxu1 %v9255_v39  ;;  %v302_v52 = vld [vmem:[#allocation2 + $0x230] sm:$0xff]  ;;  %v9372_v34 = vld [vmem:[#allocation2 + $0x2c1] sm:$0xff] }
  0xf0   :  { %3103 = vmatprep.mubr.f32.mxu0 %v9257_v42  ;;  %7055 = vmatprep.subr.bf16.mxu0 %v8078_v3  ;;  %v192_v3 = vld [vmem:[%s12137_s0 + $0x1f8] sm:$0xff] }
  0xf1   :  { %258 = vst.msk [vmem:[#allocation2 + $0x339] sm:$0xff] %vm194_vm0, %v192_v3  ;;  %v9384_v3 = vld [vmem:[#allocation2 + $0x2d1] sm:$0xff] }
  0xf2   :  { %2414 = vmatmul.mubr.f32.gmra.mrb[84].mxu1 %v301_v51 }
  0xf3   :  { %3104 = vmatmul.mubr.f32.gmra.mrb[52].mxu0 %v9124_v13  ;;  %2418 = vmatprep.mubr.f32.mxu1 %v9262_v16  ;;  %v9283_v13 = vld [vmem:[#allocation2 + $0x249] sm:$0xff] }
  0xf4   :  { %3108 = vmatprep.mubr.f32.mxu0 %v9270_v60 }
  0xf6   :  { %2419 = vmatmul.mubr.f32.gmra.mrb[86].mxu1 %v302_v52 }
  0xf7   :  { %3109 = vmatmul.mubr.f32.gmra.mrb[54].mxu0 %v9134_v32  ;;  %2423 = vmatprep.mubr.f32.mxu1 %v9275_v10  ;;  %v304_v32 = vld [vmem:[#allocation2 + $0x248] sm:$0xff] }
  0xf8   :  { %3113 = vmatprep.mubr.f32.mxu0 %v9277_v55 }
  0xfa   :  { %2424 = vmatmul.mubr.f32.gmra.mrb[88].mxu1 %v303_v19  ;;  %v9376_v19 = vld [vmem:[#allocation2 + $0x21a] sm:$0xff] }
  0xfb   :  { %3114 = vmatmul.mubr.f32.gmra.mrb[56].mxu0 %v9143_v25  ;;  %2428 = vmatprep.mubr.f32.mxu1 %v9283_v13  ;;  %v2114_v25 = vld [vmem:[%s12139_s2 + $0x3f0] sm:$0xff] }
  0xfc   :  { %3118 = vmatprep.mubr.f32.mxu0 %v9285_v58  ;;  %v7056_v11 = vpack.c.bf16 %v2115_v49, %v2114_v25  ;;  %v9400_v49 = vld [vmem:[#allocation2 + $0x232] sm:$0xff] }
  0xfe   :  { %2429 = vmatmul.mubr.f32.gmra.mrb[90].mxu1 %v304_v32  ;;  %7057 = vmatpush1.bf16.msra.mxu0 %v7056_v11  ;;  %v9408_v11 = vld [vmem:[#allocation2 + $0x2e9] sm:$0xff] }
  0xff   :  { %3119 = vmatmul.mubr.f32.gmra.mrb[58].mxu0 %v9154_v54  ;;  %2433 = vmatprep.mubr.f32.mxu1 %v9298_v15  ;;  %v306_v54 = vld [vmem:[#allocation2 + $0x260] sm:$0xff] }
 0x100   :  { %3123 = vmatprep.mubr.f32.mxu0 %v929_v0  ;;  %v9388_v0 = vld [vmem:[#allocation2 + $0x22a] sm:$0xff] }
 0x102   :  { %2434 = vmatmul.mubr.f32.gmra.mrb[92].mxu1 %v305_v20 }
 0x103   :  { %3124 = vmatmul.mubr.f32.gmra.mrb[60].mxu0 %v801_v28  ;;  %2438 = vmatprep.mubr.f32.mxu1 %v9302_v4  ;;  %v9396_v28 = vld [vmem:[#allocation2 + $0x2d9] sm:$0xff] }
 0x104   :  { %3128 = vmatprep.mubr.f32.mxu0 %v930_v6 }
 0x106   :  { %2439 = vmatmul.mubr.f32.gmra.mrb[94].mxu1 %v306_v54 }
 0x107   :  { %3129 = vmatmul.mubr.f32.gmra.mrb[62].mxu0 %v802_v31  ;;  %2443 = vmatprep.mubr.f32.mxu1 %v9311_v57  ;;  %v9412_v31 = vld [vmem:[#allocation2 + $0x242] sm:$0xff] }
 0x108   :  { %3133 = vmatprep.mubr.f32.mxu0 %v9313_v9 }
 0x10a   :  { %2444 = vmatmul.mubr.f32.gmra.mrb[96].mxu1 %v307_v2 }
 0x10b   :  { %3134 = vmatmul.mubr.f32.gmra.mrb[64].mxu0 %v9182_v8  ;;  %2448 = vmatprep.mubr.f32.mxu1 %v9317_v18  ;;  %v9333_v8 = vld [vmem:[#allocation2 + $0x1ea] sm:$0xff] }
 0x10c   :  { %3138 = vmatprep.mubr.f32.mxu0 %v9319_v53 }
 0x10e   :  { %2449 = vmatmul.mubr.f32.gmra.mrb[98].mxu1 %v308_v26  ;;  %v9420_v26 = vld [vmem:[#allocation2 + $0x2f1] sm:$0xff] }
 0x10f   :  { %3139 = vmatmul.mubr.f32.gmra.mrb[66].mxu0 %v9192_v21  ;;  %2453 = vmatprep.mubr.f32.mxu1 %v9324_v12  ;;  %v9342_v21 = vld [vmem:[#allocation2 + $0x1fa] sm:$0xff] }
 0x110   :  { %3143 = vmatprep.mubr.f32.mxu0 %v9326_v33 }
 0x112   :  { %2454 = vmatmul.mubr.f32.gmra.mrb[100].mxu1 %v309_v48 }
 0x113   :  { %3144 = vmatmul.mubr.f32.gmra.mrb[68].mxu0 %v9205_v41  ;;  %2458 = vmatprep.mubr.f32.mxu1 %v9331_v14  ;;  %v9350_v41 = vld [vmem:[#allocation2 + $0x2a9] sm:$0xff] }
 0x114   :  { %3148 = vmatprep.mubr.f32.mxu0 %v9333_v8 }
 0x116   :  { %2459 = vmatmul.mubr.f32.gmra.mrb[102].mxu1 %v9337_v36 }
 0x117   :  { %3149 = vmatmul.mubr.f32.gmra.mrb[70].mxu0 %v9213_v59  ;;  %2463 = vmatprep.mubr.f32.mxu1 %v9340_v45  ;;  %v9360_v59 = vld [vmem:[#allocation2 + $0x2b9] sm:$0xff] }
 0x118   :  { %3153 = vmatprep.mubr.f32.mxu0 %v9342_v21 }
 0x11a   :  { %2464 = vmatmul.mubr.f32.gmra.mrb[104].mxu1 %v9347_v23 }
 0x11b   :  { %3154 = vmatmul.mubr.f32.gmra.mrb[72].mxu0 %v9220_v38  ;;  %2468 = vmatprep.mubr.f32.mxu1 %v9350_v41  ;;  %v9369_v38 = vld [vmem:[#allocation2 + $0x2b8] sm:$0xff] }
 0x11c   :  { %3158 = vmatprep.mubr.f32.mxu0 %v9352_v44 }
 0x11d   :  { %v9362_v51 = vpop.f32.mrb[0].mxu1 }
 0x11e   :  { %12242 = vst [vmem:[#allocation10_spill] sm:$0xff] %v9362_v51  ;;  %v2207_v47 = vpop.f32.mrb[1].mxu1  ;;  %2469 = vmatmul.mubr.f32.gmra.mrb[106].mxu1 %v9357_v50 }
 0x11f   :  { %3159 = vmatmul.mubr.f32.gmra.mrb[74].mxu0 %v9227_v22  ;;  %2473 = vmatprep.mubr.f32.mxu1 %v9360_v59  ;;  %v9381_v22 = vld [vmem:[#allocation2 + $0x2c0] sm:$0xff]  ;;  %v9424_v47 = vld [vmem:[#allocation2 + $0x24a] sm:$0xff] }
 0x120   :  { %3163 = vmatprep.mubr.f32.mxu0 %v9364_v1 }
 0x121   :  { %v9374_v52 = vpop.f32.mrb[2].mxu1 }
 0x122   :  { %12243 = vst [vmem:[#allocation11_spill] sm:$0xff] %v9374_v52  ;;  %v2212_v24 = vpop.f32.mrb[3].mxu1  ;;  %2474 = vmatmul.mubr.f32.gmra.mrb[108].mxu1 %v9369_v38  ;;  %v9460_v52 = vld [vmem:[#allocation2 + $0x272] sm:$0xff] }
 0x123   :  { %3164 = vmatmul.mubr.f32.gmra.mrb[76].mxu0 %v9240_v61  ;;  %2478 = vmatprep.mubr.f32.mxu1 %v9372_v34  ;;  %v9393_v61 = vld [vmem:[#allocation2 + $0x2d0] sm:$0xff] }
 0x124   :  { %3168 = vmatprep.mubr.f32.mxu0 %v9376_v19  ;;  %12245 = vst [vmem:[#allocation13_spill] sm:$0xff] %v9393_v61 }
 0x125   :  { %v9386_v32 = vpop.f32.mrb[4].mxu1 }
 0x126   :  { %12244 = vst [vmem:[#allocation12_spill] sm:$0xff] %v9386_v32  ;;  %v2217_v20 = vpop.f32.mrb[5].mxu1  ;;  %2479 = vmatmul.mubr.f32.gmra.mrb[110].mxu1 %v9381_v22 }
 0x127   :  { %3169 = vmatmul.mubr.f32.gmra.mrb[78].mxu0 %v9248_v30  ;;  %2483 = vmatprep.mubr.f32.mxu1 %v9384_v3  ;;  %v9405_v30 = vld [vmem:[#allocation2 + $0x2d8] sm:$0xff]  ;;  %v9432_v20 = vld [vmem:[#allocation2 + $0x301] sm:$0xff] }
 0x128   :  { %3173 = vmatprep.mubr.f32.mxu0 %v9388_v0  ;;  %12247 = vst [vmem:[#allocation15_spill] sm:$0xff] %v9405_v30 }
 0x129   :  { %v9398_v25 = vpop.f32.mrb[6].mxu1 }
 0x12a   :  { %12246 = vst [vmem:[#allocation14_spill] sm:$0xff] %v9398_v25  ;;  %v2222_v6 = vpop.f32.mrb[7].mxu1  ;;  %2484 = vmatmul.mubr.f32.gmra.mrb[112].mxu1 %v9393_v61  ;;  %v9448_v25 = vld [vmem:[#allocation2 + $0x262] sm:$0xff] }
 0x12b   :  { %3174 = vmatmul.mubr.f32.gmra.mrb[80].mxu0 %v9255_v39  ;;  %2488 = vmatprep.mubr.f32.mxu1 %v9396_v28  ;;  %v9417_v39 = vld [vmem:[#allocation2 + $0x2e8] sm:$0xff] }
 0x12c   :  { %3178 = vmatprep.mubr.f32.mxu0 %v9400_v49  ;;  %12249 = vst [vmem:[#allocation17_spill] sm:$0xff] %v9417_v39  ;;  %v2125_v61 = vld [vmem:[%s12139_s2 + $0x448] sm:$0xff] }
 0x12d   :  { %v9410_v54 = vpop.f32.mrb[8].mxu1 }
 0x12e   :  { %12248 = vst [vmem:[#allocation16_spill] sm:$0xff] %v9410_v54  ;;  %v2227_v2 = vpop.f32.mrb[9].mxu1  ;;  %2489 = vmatmul.mubr.f32.gmra.mrb[114].mxu1 %v9405_v30  ;;  %v2120_v30 = vld [vmem:[%s12139_s2 + $0x420] sm:$0xff] }
 0x12f   :  { %3179 = vmatmul.mubr.f32.gmra.mrb[82].mxu0 %v9262_v16  ;;  %2493 = vmatprep.mubr.f32.mxu1 %v9408_v11  ;;  %v9429_v16 = vld [vmem:[#allocation2 + $0x2f0] sm:$0xff]  ;;  %v9436_v2 = vld [vmem:[#allocation2 + $0x25a] sm:$0xff] }
 0x130   :  { %3183 = vmatprep.mubr.f32.mxu0 %v9412_v31  ;;  %12251 = vst [vmem:[#allocation19_spill] sm:$0xff] %v9429_v16 }
 0x131   :  { %v9422_v48 = vpop.f32.mrb[10].mxu1 }
 0x132   :  { %12250 = vst [vmem:[#allocation18_spill] sm:$0xff] %v9422_v48  ;;  %v2232_v24 = vpop.f32.mrb[11].mxu1  ;;  %2494 = vmatmul.mubr.f32.gmra.mrb[116].mxu1 %v9417_v39 }
 0x133   :  { %3184 = vmatmul.mubr.f32.gmra.mrb[84].mxu0 %v9275_v10  ;;  %2498 = vmatprep.mubr.f32.mxu1 %v9420_v26  ;;  %v9441_v10 = vld [vmem:[#allocation2 + $0x300] sm:$0xff]  ;;  %v9444_v24 = vld [vmem:[#allocation2 + $0x309] sm:$0xff] }
 0x134   :  { %3188 = vmatprep.mubr.f32.mxu0 %v9424_v47  ;;  %12253 = vst [vmem:[#allocation21_spill] sm:$0xff] %v9441_v10 }
 0x135   :  { %v9434_v6 = vpop.f32.mrb[12].mxu1 }
 0x136   :  { %12252 = vst [vmem:[#allocation20_spill] sm:$0xff] %v9434_v6  ;;  %v2237_v48 = vpop.f32.mrb[13].mxu1  ;;  %2499 = vmatmul.mubr.f32.gmra.mrb[118].mxu1 %v9429_v16  ;;  %v9484_v16 = vld [vmem:[#allocation2 + $0x28a] sm:$0xff] }
 0x137   :  { %3189 = vmatmul.mubr.f32.gmra.mrb[86].mxu0 %v9283_v13  ;;  %2503 = vmatprep.mubr.f32.mxu1 %v9432_v20  ;;  %v9453_v13 = vld [vmem:[#allocation2 + $0x308] sm:$0xff]  ;;  %v9456_v48 = vld [vmem:[#allocation2 + $0x319] sm:$0xff] }
 0x138   :  { %3193 = vmatprep.mubr.f32.mxu0 %v9436_v2  ;;  %12255 = vst [vmem:[#allocation23_spill] sm:$0xff] %v9453_v13 }
 0x139   :  { %v9446_v54 = vpop.f32.mrb[14].mxu1 }
 0x13a   :  { %12254 = vst [vmem:[#allocation22_spill] sm:$0xff] %v9446_v54  ;;  %v2242_v6 = vpop.f32.mrb[15].mxu1  ;;  %2504 = vmatmul.mubr.f32.gmra.mrb[120].mxu1 %v9441_v10  ;;  %v9472_v10 = vld [vmem:[#allocation2 + $0x27a] sm:$0xff] }
 0x13b   :  { %3194 = vmatmul.mubr.f32.gmra.mrb[88].mxu0 %v9298_v15  ;;  %2508 = vmatprep.mubr.f32.mxu1 %v9444_v24  ;;  %v9465_v15 = vld [vmem:[#allocation2 + $0x318] sm:$0xff]  ;;  %v9468_v6 = vld [vmem:[#allocation2 + $0x321] sm:$0xff] }
 0x13c   :  { %3198 = vmatprep.mubr.f32.mxu0 %v9448_v25  ;;  %12257 = vst [vmem:[#allocation25_spill] sm:$0xff] %v9465_v15 }
 0x13d   :  { %v9458_v32 = vpop.f32.mrb[16].mxu1 }
 0x13e   :  { %12256 = vst [vmem:[#allocation24_spill] sm:$0xff] %v9458_v32  ;;  %v2247_v54 = vpop.f32.mrb[17].mxu1  ;;  %2509 = vmatmul.mubr.f32.gmra.mrb[122].mxu1 %v9453_v13 }
 0x13f   :  { %3199 = vmatmul.mubr.f32.gmra.mrb[90].mxu0 %v9302_v4  ;;  %2513 = vmatprep.mubr.f32.mxu1 %v9456_v48  ;;  %v9477_v4 = vld [vmem:[#allocation2 + $0x320] sm:$0xff]  ;;  %v9480_v54 = vld [vmem:[#allocation2 + $0xd8] sm:$0xff] }
 0x140   :  { %3203 = vmatprep.mubr.f32.mxu0 %v9460_v52  ;;  %12259 = vst [vmem:[#allocation27_spill] sm:$0xff] %v9477_v4 }
 0x141   :  { %v9470_v51 = vpop.f32.mrb[18].mxu1 }
 0x142   :  { %12258 = vst [vmem:[#allocation26_spill] sm:$0xff] %v9470_v51  ;;  %v2252_v32 = vpop.f32.mrb[19].mxu1  ;;  %2514 = vmatmul.mubr.f32.gmra.mrb[124].mxu1 %v9465_v15  ;;  %v9498_v15 = vld [vmem:[#allocation2 + $0xe0] sm:$0xff] }
 0x143   :  { %3204 = vmatmul.mubr.f32.gmra.mrb[92].mxu0 %v9311_v57  ;;  %2518 = vmatprep.mubr.f32.mxu1 %v9468_v6  ;;  %v2118_v32 = vld [vmem:[%s12139_s2 + $0x410] sm:$0xff]  ;;  %v2119_v57 = vld [vmem:[%s12139_s2 + $0x418] sm:$0xff] }
 0x144   :  { %3208 = vmatprep.mubr.f32.mxu0 %v9472_v10 }
 0x145   :  { %v9482_v13 = vpop.f32.mrb[20].mxu1 }
 0x146   :  { %12260 = vst [vmem:[#allocation28_spill] sm:$0xff] %v9482_v13  ;;  %v2257_v51 = vpop.f32.mrb[21].mxu1  ;;  %2519 = vmatmul.mubr.f32.gmra.mrb[126].mxu1 %v9477_v4  ;;  %v7062_v4 = vpack.c.bf16 %v2119_v57, %v2118_v32  ;;  %v9513_v32 = vld [vmem:[#allocation2 + $0xf0] sm:$0xff] }
 0x147   :  { %3209 = vmatmul.mubr.f32.gmra.mrb[94].mxu0 %v9317_v18  ;;  %2668 = vmatprep.mubr.f32.mxu1 %v9480_v54  ;;  %v9500_v51 = vld [vmem:[#allocation2 + $0x292] sm:$0xff]  ;;  %v2121_v18 = vld [vmem:[%s12139_s2 + $0x428] sm:$0xff] }
 0x148   :  { %3213 = vmatprep.mubr.f32.mxu0 %v9484_v16  ;;  %v7066_v57 = vpack.c.bf16 %v2121_v18, %v2120_v30 }
 0x149   :  { %v9496_v13 = vpop.f32.mrb[22].mxu1 }
 0x14a   :  { %12261 = vst [vmem:[#allocation29_spill] sm:$0xff] %v9496_v13  ;;  %v2262_v39 = vpop.f32.mrb[23].mxu1  ;;  %2669 = vmatmul.mubr.f32.vlgmr.msra.gmra.mrb[32].mxu1 %v9145_v40  ;;  %v9517_v40 = vld [vmem:[#allocation2 + $0x2a2] sm:$0xff] }
 0x14b   :  { %3214 = vmatmul.mubr.f32.gmra.mrb[96].mxu0 %v9324_v12  ;;  %7061 = vmatpush3.bf16.msra.mxu1 %v9184_v7  ;;  %v2122_v12 = vld [vmem:[%s12139_s2 + $0x430] sm:$0xff]  ;;  %v2123_v7 = vld [vmem:[%s12139_s2 + $0x438] sm:$0xff] }
 0x14c   :  { %2673 = vmatprep.mubr.f32.mxu1 %v9498_v15  ;;  %3218 = vmatprep.mubr.f32.mxu0 %v9500_v51 }
 0x14d   :  { %v9515_v39 = vpop.f32.mrb[24].mxu1  ;;  %7063 = vmatprep.subr.bf16.mxu1 %v7062_v4 }
 0x14e   :  { %12262 = vst [vmem:[#allocation30_spill] sm:$0xff] %v9515_v39  ;;  %v2267_v13 = vpop.f32.mrb[25].mxu1  ;;  %2674 = vmatmul.mubr.f32.gmra.mrb[34].mxu1 %v9156_v35  ;;  %v9529_v39 = vld [vmem:[#allocation2 + $0xf8] sm:$0xff]  ;;  %v9533_v35 = vld [vmem:[#allocation2 + $0x2aa] sm:$0xff] }
 0x14f   :  { %3219 = vmatmul.mubr.f32.gmra.mrb[98].mxu0 %v9331_v14  ;;  %2678 = vmatprep.mubr.f32.mxu1 %v9513_v32  ;;  %v7070_v13 = vpack.c.bf16 %v2123_v7, %v2122_v12  ;;  %v2124_v14 = vld [vmem:[%s12139_s2 + $0x440] sm:$0xff] }
 0x150   :  { %3223 = vmatprep.mubr.f32.mxu0 %v9517_v40  ;;  %7065 = vmatpush3.bf16.msra.mxu1 %v7062_v4  ;;  %v9545_v4 = vld [vmem:[#allocation2 + $0x108] sm:$0xff]  ;;  %v7074_v7 = vpack.c.bf16 %v2125_v61, %v2124_v14 }
 0x151   :  { %v9531_v30 = vpop.f32.mrb[26].mxu1  ;;  %7067 = vmatprep.subr.bf16.mxu1 %v7066_v57 }
 0x152   :  { %12263 = vst [vmem:[#allocation31_spill] sm:$0xff] %v9531_v30  ;;  %v2272_v18 = vpop.f32.mrb[27].mxu1  ;;  %2679 = vmatmul.mubr.f32.gmra.mrb[36].mxu1 %v9167_v63  ;;  %v9549_v63 = vld [vmem:[#allocation2 + $0x2ba] sm:$0xff] }
 0x153   :  { %3224 = vmatmul.mubr.f32.gmra.mrb[100].mxu0 %v9340_v45  ;;  %2683 = vmatprep.mubr.f32.mxu1 %v9529_v39  ;;  %v2126_v45 = vld [vmem:[%s12139_s2 + $0x450] sm:$0xff]  ;;  %v2127_v30 = vld [vmem:[%s12139_s2 + $0x458] sm:$0xff] }
 0x154   :  { %3228 = vmatprep.mubr.f32.mxu0 %v9533_v35  ;;  %7069 = vmatpush3.bf16.msra.mxu1 %v7066_v57  ;;  %v9561_v57 = vld [vmem:[#allocation2 + $0x110] sm:$0xff]  ;;  %v7078_v14 = vpack.c.bf16 %v2127_v30, %v2126_v45  ;;  %v9587_v45 = vld [vmem:[#allocation2 + $0x2da] sm:$0xff] }
 0x155   :  { %v9547_v12 = vpop.f32.mrb[28].mxu1  ;;  %7071 = vmatprep.subr.bf16.mxu1 %v7070_v13  ;;  %v9579_v30 = vld [vmem:[#allocation2 + $0x2d2] sm:$0xff] }
 0x156   :  { %v2277_v18 = vpop.f32.mrb[29].mxu1  ;;  %2684 = vmatmul.mubr.f32.gmra.mrb[38].mxu1 %v9172_v56  ;;  %v9565_v56 = vld [vmem:[#allocation2 + $0x2c2] sm:$0xff] }
 0x157   :  { %3229 = vmatmul.mubr.f32.gmra.mrb[102].mxu0 %v9350_v41  ;;  %2688 = vmatprep.mubr.f32.mxu1 %v9545_v4  ;;  %v2128_v41 = vld [vmem:[%s12139_s2 + $0x460] sm:$0xff] }
 0x158   :  { %3233 = vmatprep.mubr.f32.mxu0 %v9549_v63  ;;  %7073 = vmatpush3.bf16.msra.mxu1 %v7070_v13  ;;  %v2129_v13 = vld [vmem:[%s12139_s2 + $0x468] sm:$0xff] }
 0x159   :  { %v9563_v61 = vpop.f32.mrb[30].mxu1  ;;  %7075 = vmatprep.subr.bf16.mxu1 %v7074_v7 }
 0x15a   :  { %12264 = vst [vmem:[#allocation32_spill] sm:$0xff] %v9563_v61  ;;  %v2282_v18 = vpop.f32.mrb[31].mxu1  ;;  %2689 = vmatmul.mubr.f32.gmra.mrb[40].mxu1 %v9186_v17  ;;  %v9577_v61 = vld [vmem:[#allocation2 + $0x120] sm:$0xff]  ;;  %v7082_v17 = vpack.c.bf16 %v2129_v13, %v2128_v41  ;;  %v833_v41 = vld [vmem:[#allocation2 + $0x331] sm:$0xff]  ;;  %v9652_v13 = vld [vmem:[#allocation2 + $0x188] sm:$0xff] }
 0x15b   :  { %3234 = vmatmul.mubr.f32.gmra.mrb[104].mxu0 %v9360_v59  ;;  %2693 = vmatprep.mubr.f32.mxu1 %v9561_v57  ;;  %v9585_v59 = vld [vmem:[#allocation2 + $0x128] sm:$0xff]  ;;  %v9633_v18 = vld [vmem:[#allocation2 + $0x31a] sm:$0xff] }
 0x15c   :  { %3238 = vmatprep.mubr.f32.mxu0 %v9565_v56  ;;  %7077 = vmatpush3.bf16.msra.mxu1 %v7074_v7  ;;  %v9609_v7 = vld [vmem:[#allocation2 + $0x150] sm:$0xff] }
 0x15d   :  { %7079 = vmatprep.subr.bf16.mxu1 %v7078_v14 }
 0x15e   :  { %2694 = vmatmul.mubr.f32.gmra.mrb[42].mxu1 %v9194_v37  ;;  %v9593_v37 = vld [vmem:[#allocation2 + $0x138] sm:$0xff] }
 0x15f   :  { %3239 = vmatmul.mubr.f32.gmra.mrb[106].mxu0 %v9372_v34  ;;  %2698 = vmatprep.mubr.f32.mxu1 %v9577_v61  ;;  %v9595_v34 = vld [vmem:[#allocation2 + $0x2ea] sm:$0xff] }
 0x160   :  { %3243 = vmatprep.mubr.f32.mxu0 %v9579_v30  ;;  %7081 = vmatpush3.bf16.msra.mxu1 %v7078_v14 }
 0x161   :  { %7083 = vmatprep.subr.bf16.mxu1 %v7082_v17 }
 0x162   :  { %2699 = vmatmul.mubr.f32.gmra.mrb[44].mxu1 %v9207_v46  ;;  %v9601_v46 = vld [vmem:[#allocation2 + $0x140] sm:$0xff] }
 0x163   :  { %3244 = vmatmul.mubr.f32.gmra.mrb[108].mxu0 %v9384_v3  ;;  %2703 = vmatprep.mubr.f32.mxu1 %v9585_v59  ;;  %v9603_v3 = vld [vmem:[#allocation2 + $0x2f2] sm:$0xff] }
 0x164   :  { %3248 = vmatprep.mubr.f32.mxu0 %v9587_v45  ;;  %7085 = vmatpush3.bf16.msra.mxu1 %v7082_v17  ;;  %v675_v17 = vld [vmem:[#allocation2 + $0x1c8] sm:$0xff] }
 0x166   :  { %2704 = vmatmul.mubr.f32.gmra.mrb[46].mxu1 %v9215_v27  ;;  %v9611_v27 = vld [vmem:[#allocation2 + $0x302] sm:$0xff] }
 0x167   :  { %3249 = vmatmul.mubr.f32.gmra.mrb[110].mxu0 %v9396_v28  ;;  %2708 = vmatprep.mubr.f32.mxu1 %v9593_v37  ;;  %v9617_v28 = vld [vmem:[#allocation2 + $0x158] sm:$0xff] }
 0x168   :  { %3253 = vmatprep.mubr.f32.mxu0 %v9595_v34 }
 0x16a   :  { %2709 = vmatmul.mubr.f32.gmra.mrb[48].mxu1 %v9222_v5  ;;  %v9619_v5 = vld [vmem:[#allocation2 + $0x30a] sm:$0xff] }
 0x16b   :  { %3254 = vmatmul.mubr.f32.gmra.mrb[112].mxu0 %v9408_v11  ;;  %2713 = vmatprep.mubr.f32.mxu1 %v9601_v46  ;;  %v2131_v11 = vld [vmem:[%s12139_s2 + $0x478] sm:$0xff] }
 0x16c   :  { %3258 = vmatprep.mubr.f32.mxu0 %v9603_v3 }
 0x16e   :  { %2714 = vmatmul.mubr.f32.gmra.mrb[50].mxu1 %v9235_v43  ;;  %v2130_v43 = vld [vmem:[%s12139_s2 + $0x470] sm:$0xff] }
 0x16f   :  { %3259 = vmatmul.mubr.f32.gmra.mrb[114].mxu0 %v9420_v26  ;;  %2718 = vmatprep.mubr.f32.mxu1 %v9609_v7  ;;  %v9631_v26 = vld [vmem:[#allocation2 + $0x168] sm:$0xff]  ;;  %v7086_v14 = vpack.c.bf16 %v2131_v11, %v2130_v43  ;;  %v1156_v43 = vld [vmem:[#allocation2 + $0x31] sm:$0xff] }
 0x170   :  { %3263 = vmatprep.mubr.f32.mxu0 %v9611_v27  ;;  %v676_v11 = vld [vmem:[#allocation2 + $0x1d0] sm:$0xff] }
 0x171   :  { %7087 = vmatprep.subr.bf16.mxu1 %v7086_v14 }
 0x172   :  { %2719 = vmatmul.mubr.f32.gmra.mrb[52].mxu1 %v9242_v29  ;;  %v9639_v29 = vld [vmem:[#allocation2 + $0x170] sm:$0xff] }
 0x173   :  { %3264 = vmatmul.mubr.f32.gmra.mrb[116].mxu0 %v9432_v20  ;;  %2723 = vmatprep.mubr.f32.mxu1 %v9617_v28  ;;  %v9641_v20 = vld [vmem:[#allocation2 + $0x322] sm:$0xff] }
 0x174   :  { %3268 = vmatprep.mubr.f32.mxu0 %v9619_v5  ;;  %7089 = vmatpush3.bf16.msra.mxu1 %v7086_v14  ;;  %v1157_v14 = vld [vmem:[#allocation2 + $0x39] sm:$0xff] }
 0x176   :  { %2724 = vmatmul.mubr.f32.gmra.mrb[54].mxu1 %v9250_v62  ;;  %v9647_v62 = vld [vmem:[#allocation2 + $0x180] sm:$0xff] }
 0x177   :  { %3269 = vmatmul.mubr.f32.gmra.mrb[118].mxu0 %v9444_v24  ;;  %2728 = vmatprep.mubr.f32.mxu1 %v9631_v26  ;;  %v961_v24 = vld [vmem:[#allocation2 + $0x332] sm:$0xff] }
 0x178   :  { %3273 = vmatprep.mubr.f32.mxu0 %v9633_v18 }
 0x17a   :  { %2729 = vmatmul.mubr.f32.gmra.mrb[56].mxu1 %v9257_v42  ;;  %v962_v42 = vld [vmem:[#allocation2 + $0x33a] sm:$0xff] }
 0x17b   :  { %3274 = vmatmul.mubr.f32.gmra.mrb[120].mxu0 %v9456_v48  ;;  %2733 = vmatprep.mubr.f32.mxu1 %v9639_v29  ;;  %v834_v48 = vld [vmem:[#allocation2 + $0x339] sm:$0xff] }
 0x17c   :  { %3278 = vmatprep.mubr.f32.mxu0 %v9641_v20 }
 0x17e   :  { %2734 = vmatmul.mubr.f32.gmra.mrb[58].mxu1 %v9270_v60  ;;  %v547_v60 = vld [vmem:[#allocation2 + $0x1b2] sm:$0xff] }
 0x17f   :  { %3279 = vmatmul.mubr.f32.gmra.mrb[122].mxu0 %v9468_v6  ;;  %2738 = vmatprep.mubr.f32.mxu1 %v9647_v62  ;;  %v1028_v6 = vld [vmem:[#allocation2 + $0x30] sm:$0xff] }
 0x180   :  { %3283 = vmatprep.mubr.f32.mxu0 %v961_v24  ;;  %v1029_v24 = vld [vmem:[#allocation2 + $0x38] sm:$0xff] }
 0x182   :  { %2739 = vmatmul.mubr.f32.gmra.mrb[60].mxu1 %v9277_v55  ;;  %v548_v55 = vld [vmem:[#allocation2 + $0x1ba] sm:$0xff] }
 0x183   :  { %3284 = vmatmul.mubr.f32.gmra.mrb[124].mxu0 %v833_v41  ;;  %2743 = vmatprep.mubr.f32.mxu1 %v9652_v13  ;;  %v9657_v41 = vld [vmem:[#allocation2 + $0x1e0] sm:$0xff] }
 0x184   :  { %3288 = vmatprep.mubr.f32.mxu0 %v962_v42  ;;  %v1158_v42 = vld [vmem:[#allocation2 + $0x49] sm:$0xff] }
 0x186   :  { %2744 = vmatmul.mubr.f32.gmra.mrb[62].mxu1 %v9285_v58  ;;  %v1030_v58 = vld [vmem:[#allocation2 + $0x48] sm:$0xff] }
 0x187   :  { %3289 = vmatmul.mubr.f32.gmra.mrb[126].mxu0 %v834_v48  ;;  %2748 = vmatprep.mubr.f32.mxu1 %v675_v17  ;;  %v9660_v48 = vld [vmem:[#allocation2 + $0x1e8] sm:$0xff]  ;;  %v1159_v17 = vld [vmem:[#allocation2 + $0x51] sm:$0xff] }
 0x188   :  { %3358 = vmatprep.mubr.f32.mxu0 %v1156_v43  ;;  %v1031_v43 = vld [vmem:[#allocation2 + $0x50] sm:$0xff] }
 0x18a   :  { %2749 = vmatmul.mubr.f32.gmra.mrb[64].mxu1 %v547_v60  ;;  %v9664_v60 = vld [vmem:[#allocation2 + $0x1f8] sm:$0xff] }
 0x18b   :  { %3359 = vmatmul.mubr.f32.vlgmr.msra.gmra.mrb[0].mxu0 %v1028_v6  ;;  %2753 = vmatprep.mubr.f32.mxu1 %v676_v11  ;;  %v1160_v6 = vld [vmem:[#allocation2 + $0x61] sm:$0xff] }
 0x18c   :  { %3363 = vmatprep.mubr.f32.mxu0 %v1157_v14  ;;  %v1032_v11 = vld [vmem:[#allocation2 + $0x60] sm:$0xff] }
 0x18d   :  { %v9668_v14 = vld [vmem:[#allocation2 + $0x200] sm:$0xff] }
 0x18e   :  { %2754 = vmatmul.mubr.f32.gmra.mrb[66].mxu1 %v548_v55  ;;  %v1161_v55 = vld [vmem:[#allocation2 + $0x69] sm:$0xff] }
 0x18f   :  { %3364 = vmatmul.mubr.f32.gmra.mrb[2].mxu0 %v1029_v24  ;;  %2758 = vmatprep.mubr.f32.mxu1 %v9657_v41  ;;  %v9672_v24 = vld [vmem:[#allocation2 + $0x210] sm:$0xff] }
 0x190   :  { %3368 = vmatprep.mubr.f32.mxu0 %v1158_v42  ;;  %v1162_v42 = vld [vmem:[#allocation2 + $0x79] sm:$0xff] }
 0x192   :  { %2759 = vmatmul.mubr.f32.gmra.mrb[68].mxu1 %v9313_v9  ;;  %v1033_v9 = vld [vmem:[#allocation2 + $0x68] sm:$0xff] }
 0x193   :  { %3369 = vmatmul.mubr.f32.gmra.mrb[4].mxu0 %v1030_v58  ;;  %2763 = vmatprep.mubr.f32.mxu1 %v9660_v48  ;;  %v9676_v58 = vld [vmem:[#allocation2 + $0x218] sm:$0xff] }
 0x194   :  { %3373 = vmatprep.mubr.f32.mxu0 %v1159_v17  ;;  %v1163_v17 = vld [vmem:[#allocation2 + $0x81] sm:$0xff] }
 0x196   :  { %2764 = vmatmul.mubr.f32.gmra.mrb[70].mxu1 %v9319_v53  ;;  %v1034_v53 = vld [vmem:[#allocation2 + $0x78] sm:$0xff] }
 0x197   :  { %3374 = vmatmul.mubr.f32.gmra.mrb[6].mxu0 %v1031_v43  ;;  %2768 = vmatprep.mubr.f32.mxu1 %v9664_v60  ;;  %v9680_v43 = vld [vmem:[#allocation2 + $0x228] sm:$0xff] }
 0x198   :  { %3378 = vmatprep.mubr.f32.mxu0 %v1160_v6  ;;  %v1164_v6 = vld [vmem:[#allocation2 + $0x91] sm:$0xff] }
 0x19a   :  { %2769 = vmatmul.mubr.f32.gmra.mrb[72].mxu1 %v9326_v33  ;;  %v1035_v33 = vld [vmem:[#allocation2 + $0x80] sm:$0xff] }
 0x19b   :  { %3379 = vmatmul.mubr.f32.gmra.mrb[8].mxu0 %v1032_v11  ;;  %2773 = vmatprep.mubr.f32.mxu1 %v9668_v14  ;;  %v9684_v11 = vld [vmem:[#allocation2 + $0x230] sm:$0xff] }
 0x19c   :  { %3383 = vmatprep.mubr.f32.mxu0 %v1161_v55  ;;  %v1165_v55 = vld [vmem:[#allocation2 + $0x99] sm:$0xff] }
 0x19e   :  { %2774 = vmatmul.mubr.f32.gmra.mrb[74].mxu1 %v9333_v8  ;;  %v1036_v8 = vld [vmem:[#allocation2 + $0x90] sm:$0xff] }
 0x19f   :  { %3384 = vmatmul.mubr.f32.gmra.mrb[10].mxu0 %v1033_v9  ;;  %2778 = vmatprep.mubr.f32.mxu1 %v9672_v24  ;;  %v9688_v9 = vld [vmem:[#allocation2 + $0x240] sm:$0xff] }
 0x1a0   :  { %3388 = vmatprep.mubr.f32.mxu0 %v1162_v42  ;;  %v1166_v42 = vld [vmem:[#allocation2 + $0xa9] sm:$0xff] }
 0x1a2   :  { %2779 = vmatmul.mubr.f32.gmra.mrb[76].mxu1 %v9342_v21  ;;  %v1037_v21 = vld [vmem:[#allocation2 + $0x98] sm:$0xff] }
 0x1a3   :  { %3389 = vmatmul.mubr.f32.gmra.mrb[12].mxu0 %v1034_v53  ;;  %2783 = vmatprep.mubr.f32.mxu1 %v9676_v58  ;;  %v9692_v53 = vld [vmem:[#allocation2 + $0x248] sm:$0xff] }
 0x1a4   :  { %3393 = vmatprep.mubr.f32.mxu0 %v1163_v17  ;;  %v1167_v17 = vld [vmem:[#allocation2 + $0xb1] sm:$0xff] }
 0x1a6   :  { %2784 = vmatmul.mubr.f32.gmra.mrb[78].mxu1 %v9352_v44  ;;  %v1038_v44 = vld [vmem:[#allocation2 + $0xa8] sm:$0xff] }
 0x1a7   :  { %3394 = vmatmul.mubr.f32.gmra.mrb[14].mxu0 %v1035_v33  ;;  %2788 = vmatprep.mubr.f32.mxu1 %v9680_v43  ;;  %v9696_v33 = vld [vmem:[#allocation2 + $0x258] sm:$0xff] }
 0x1a8   :  { %3398 = vmatprep.mubr.f32.mxu0 %v1164_v6  ;;  %v1168_v6 = vld [vmem:[#allocation2 + $0xc1] sm:$0xff] }
 0x1aa   :  { %2789 = vmatmul.mubr.f32.gmra.mrb[80].mxu1 %v9364_v1  ;;  %v1039_v1 = vld [vmem:[#allocation2 + $0xb0] sm:$0xff] }
 0x1ab   :  { %3399 = vmatmul.mubr.f32.gmra.mrb[16].mxu0 %v1036_v8  ;;  %2793 = vmatprep.mubr.f32.mxu1 %v9684_v11  ;;  %v9700_v8 = vld [vmem:[#allocation2 + $0x260] sm:$0xff] }
 0x1ac   :  { %3403 = vmatprep.mubr.f32.mxu0 %v1165_v55  ;;  %v1169_v55 = vld [vmem:[#allocation2 + $0xc9] sm:$0xff] }
 0x1ae   :  { %2794 = vmatmul.mubr.f32.gmra.mrb[82].mxu1 %v9376_v19  ;;  %v1040_v19 = vld [vmem:[#allocation2 + $0xc0] sm:$0xff] }
 0x1af   :  { %3404 = vmatmul.mubr.f32.gmra.mrb[18].mxu0 %v1037_v21  ;;  %2798 = vmatprep.mubr.f32.mxu1 %v9688_v9  ;;  %v9704_v21 = vld [vmem:[#allocation2 + $0x270] sm:$0xff] }
 0x1b0   :  { %3408 = vmatprep.mubr.f32.mxu0 %v1166_v42  ;;  %v1170_v42 = vld [vmem:[#allocation2 + $0xd9] sm:$0xff] }
 0x1b2   :  { %2799 = vmatmul.mubr.f32.gmra.mrb[84].mxu1 %v9388_v0  ;;  %v1041_v0 = vld [vmem:[#allocation2 + $0xc8] sm:$0xff] }
 0x1b3   :  { %3409 = vmatmul.mubr.f32.gmra.mrb[20].mxu0 %v1038_v44  ;;  %2803 = vmatprep.mubr.f32.mxu1 %v9692_v53  ;;  %v1171_v44 = vld [vmem:[#allocation2 + $0xe1] sm:$0xff] }
 0x1b4   :  { %3413 = vmatprep.mubr.f32.mxu0 %v1167_v17  ;;  %v1172_v17 = vld [vmem:[#allocation2 + $0xf1] sm:$0xff] }
 0x1b6   :  { %2804 = vmatmul.mubr.f32.gmra.mrb[86].mxu1 %v9400_v49  ;;  %v9708_v49 = vld [vmem:[#allocation2 + $0x278] sm:$0xff] }
 0x1b7   :  { %3414 = vmatmul.mubr.f32.gmra.mrb[22].mxu0 %v1039_v1  ;;  %2808 = vmatprep.mubr.f32.mxu1 %v9696_v33  ;;  %v1187_v1 = vld [vmem:[#allocation2 + $0x1a1] sm:$0xff] }
 0x1b8   :  { %3418 = vmatprep.mubr.f32.mxu0 %v1168_v6  ;;  %v4524_v6 = vld [vmem:[%s12138_s1 + $0x60] sm:$0xff] }
 0x1ba   :  { %2809 = vmatmul.mubr.f32.gmra.mrb[88].mxu1 %v9412_v31  ;;  %v9713_v31 = vld [vmem:[#allocation2 + $0x288] sm:$0xff] }
 0x1bb   :  { %3419 = vmatmul.mubr.f32.gmra.mrb[24].mxu0 %v1040_v19  ;;  %2813 = vmatprep.mubr.f32.mxu1 %v9700_v8  ;;  %v1284_v19 = vld [vmem:[#allocation2 + $0x32] sm:$0xff] }
 0x1bc   :  { %3423 = vmatprep.mubr.f32.mxu0 %v1169_v55  ;;  %v1188_v55 = vld [vmem:[#allocation2 + $0x1e1] sm:$0xff] }
 0x1be   :  { %2814 = vmatmul.mubr.f32.gmra.mrb[90].mxu1 %v9424_v47  ;;  %v1173_v47 = vld [vmem:[#allocation2 + $0xf9] sm:$0xff] }
 0x1bf   :  { %3424 = vmatmul.mubr.f32.gmra.mrb[26].mxu0 %v1041_v0  ;;  %2818 = vmatprep.mubr.f32.mxu1 %v9704_v21  ;;  %v4527_v0 = vld [vmem:[%s12138_s1 + $0x78] sm:$0xff] }
 0x1c0   :  { %3428 = vmatprep.mubr.f32.mxu0 %v1170_v42  ;;  %v4526_v42 = vld [vmem:[%s12138_s1 + $0x70] sm:$0xff] }
 0x1c2   :  { %2819 = vmatmul.mubr.f32.gmra.mrb[92].mxu1 %v9436_v2  ;;  %v1174_v2 = vld [vmem:[#allocation2 + $0x109] sm:$0xff] }
 0x1c3   :  { %3429 = vmatmul.mubr.f32.gmra.mrb[28].mxu0 %v9480_v54  ;;  %2823 = vmatprep.mubr.f32.mxu1 %v9708_v49  ;;  %v12268_v54 = vld [vmem:[#allocation19_spill] sm:$0xff] }
 0x1c4   :  { %3433 = vmatprep.mubr.f32.mxu0 %v1171_v44  ;;  %v1286_v44 = vld [vmem:[#allocation2 + $0x4a] sm:$0xff] }
 0x1c6   :  { %2824 = vmatmul.mubr.f32.gmra.mrb[94].mxu1 %v9448_v25  ;;  %v1175_v25 = vld [vmem:[#allocation2 + $0x111] sm:$0xff] }
 0x1c7   :  { %3434 = vmatmul.mubr.f32.gmra.mrb[30].mxu0 %v9498_v15  ;;  %2828 = vmatprep.mubr.f32.mxu1 %v9713_v31  ;;  %v1181_v15 = vld [vmem:[#allocation2 + $0x159] sm:$0xff] }
 0x1c8   :  { %3438 = vmatprep.mubr.f32.mxu0 %v1172_v17  ;;  %v1189_v17 = vld [vmem:[#allocation2 + $0x1e9] sm:$0xff] }
 0x1ca   :  { %2829 = vmatmul.mubr.f32.gmra.mrb[96].mxu1 %v9460_v52  ;;  %v1176_v52 = vld [vmem:[#allocation2 + $0x121] sm:$0xff] }
 0x1cb   :  { %3439 = vmatmul.mubr.f32.gmra.mrb[32].mxu0 %v9513_v32  ;;  %2833 = vmatprep.mubr.f32.mxu1 %v9337_v36  ;;  %v1177_v36 = vld [vmem:[#allocation2 + $0x129] sm:$0xff]  ;;  %v4512_v32 = vld [vmem:[%s12138_s1] sm:$0xff] }
 0x1cc   :  { %3443 = vmatprep.mubr.f32.mxu0 %v1173_v47  ;;  %4640 = vrot.lane.b32.xlu0 %v4512_v32, %s8080_s10  ;;  %v4529_v47 = vld [vmem:[%s12138_s1 + $0x88] sm:$0xff] }
 0x1cd   :  { %v1294_v32 = vld [vmem:[#allocation2 + $0xaa] sm:$0xff] }
 0x1ce   :  { %2834 = vmatmul.mubr.f32.gmra.mrb[98].mxu1 %v9472_v10  ;;  %v1180_v10 = vld [vmem:[#allocation2 + $0x151] sm:$0xff] }
 0x1cf   :  { %3444 = vmatmul.mubr.f32.gmra.mrb[34].mxu0 %v9529_v39  ;;  %2838 = vmatprep.mubr.f32.mxu1 %v9347_v23  ;;  %v1178_v23 = vld [vmem:[#allocation2 + $0x139] sm:$0xff]  ;;  %v1182_v39 = vld [vmem:[#allocation2 + $0x169] sm:$0xff] }
 0x1d0   :  { %3448 = vmatprep.mubr.f32.mxu0 %v1174_v2  ;;  %v4528_v2 = vld [vmem:[%s12138_s1 + $0x80] sm:$0xff] }
 0x1d2   :  { %2839 = vmatmul.mubr.f32.gmra.mrb[100].mxu1 %v9484_v16  ;;  %v1179_v16 = vld [vmem:[#allocation2 + $0x141] sm:$0xff] }
 0x1d3   :  { %3449 = vmatmul.mubr.f32.gmra.mrb[36].mxu0 %v9545_v4  ;;  %2843 = vmatprep.mubr.f32.mxu1 %v9357_v50  ;;  %v12265_v50 = vld [vmem:[#allocation13_spill] sm:$0xff]  ;;  %v4513_v4 = vld [vmem:[%s12138_s1 + $0x8] sm:$0xff] }
 0x1d4   :  { %3453 = vmatprep.mubr.f32.mxu0 %v1175_v25  ;;  %4642 = vrot.lane.b32.xlu0 %v4513_v4, %s8080_s10  ;;  %v1288_v25 = vld [vmem:[#allocation2 + $0x62] sm:$0xff] }
 0x1d5   :  { %v1296_v4 = vld [vmem:[#allocation2 + $0xc2] sm:$0xff] }
 0x1d6   :  { %2844 = vmatmul.mubr.f32.gmra.mrb[102].mxu1 %v9500_v51  ;;  %v4514_v51 = vld [vmem:[%s12138_s1 + $0x10] sm:$0xff] }
 0x1d7   :  { %3454 = vmatmul.mubr.f32.gmra.mrb[38].mxu0 %v9561_v57  ;;  %2848 = vmatprep.mubr.f32.mxu1 %v9369_v38  ;;  %v12266_v38 = vld [vmem:[#allocation15_spill] sm:$0xff] }
 0x1d8   :  { %3458 = vmatprep.mubr.f32.mxu0 %v1176_v52  ;;  %4644 = vrot.lane.b32.xlu1 %v4514_v51, %s8080_s10  ;;  %v12270_v57 = vld [vmem:[#allocation23_spill] sm:$0xff]  ;;  %v1190_v52 = vld [vmem:[#allocation2 + $0x1f9] sm:$0xff]  ;;  %v4534_v51 = vld [vmem:[%s12138_s1 + $0xb0] sm:$0xff] }
 0x1da   :  { %2849 = vmatmul.mubr.f32.gmra.mrb[104].mxu1 %v9517_v40  ;;  %v12269_v40 = vld [vmem:[#allocation21_spill] sm:$0xff] }
 0x1db   :  { %3459 = vmatmul.mubr.f32.gmra.mrb[40].mxu0 %v9577_v61  ;;  %2853 = vmatprep.mubr.f32.mxu1 %v9381_v22  ;;  %v12267_v22 = vld [vmem:[#allocation17_spill] sm:$0xff]  ;;  %v4517_v61 = vld [vmem:[%s12138_s1 + $0x28] sm:$0xff] }
 0x1dc   :  { %3463 = vmatprep.mubr.f32.mxu0 %v1177_v36  ;;  %v4531_v36 = vld [vmem:[%s12138_s1 + $0x98] sm:$0xff] }
 0x1de   :  { %2854 = vmatmul.mubr.f32.gmra.mrb[106].mxu1 %v9533_v35  ;;  %v4515_v35 = vld [vmem:[%s12138_s1 + $0x18] sm:$0xff] }
 0x1df   :  { %3464 = vmatmul.mubr.f32.gmra.mrb[42].mxu0 %v9585_v59  ;;  %2858 = vmatprep.mubr.f32.mxu1 %v12265_v50  ;;  %v12271_v59 = vld [vmem:[#allocation25_spill] sm:$0xff] }
 0x1e0   :  { %3468 = vmatprep.mubr.f32.mxu0 %v1178_v23  ;;  %4646 = vrot.lane.b32.xlu1 %v4515_v35, %s8080_s10  ;;  %v4530_v23 = vld [vmem:[%s12138_s1 + $0x90] sm:$0xff]  ;;  %v1290_v50 = vld [vmem:[#allocation2 + $0x7a] sm:$0xff] }
 0x1e1   :  { %v4536_v35 = vld [vmem:[%s12138_s1 + $0xc0] sm:$0xff] }
 0x1e2   :  { %2859 = vmatmul.mubr.f32.gmra.mrb[108].mxu1 %v9549_v63  ;;  %v1183_v63 = vld [vmem:[#allocation2 + $0x171] sm:$0xff] }
 0x1e3   :  { %3469 = vmatmul.mubr.f32.gmra.mrb[44].mxu0 %v9593_v37  ;;  %2863 = vmatprep.mubr.f32.mxu1 %v12266_v38  ;;  %v4518_v37 = vld [vmem:[%s12138_s1 + $0x30] sm:$0xff]  ;;  %v4533_v38 = vld [vmem:[%s12138_s1 + $0xa8] sm:$0xff] }
 0x1e4   :  { %3473 = vmatprep.mubr.f32.mxu0 %v1179_v16  ;;  %4650 = vrot.lane.b32.xlu1 %v4517_v61, %s8080_s10  ;;  %v1191_v16 = vld [vmem:[#allocation2 + $0x201] sm:$0xff]  ;;  %v1297_v61 = vld [vmem:[#allocation2 + $0xca] sm:$0xff] }
 0x1e6   :  { %2864 = vmatmul.mubr.f32.gmra.mrb[110].mxu1 %v9565_v56  ;;  %v4516_v56 = vld [vmem:[%s12138_s1 + $0x20] sm:$0xff] }
 0x1e7   :  { %3474 = vmatmul.mubr.f32.gmra.mrb[46].mxu0 %v9601_v46  ;;  %2868 = vmatprep.mubr.f32.mxu1 %v12267_v22  ;;  %v12272_v46 = vld [vmem:[#allocation27_spill] sm:$0xff]  ;;  %v1292_v22 = vld [vmem:[#allocation2 + $0x92] sm:$0xff] }
 0x1e8   :  { %3478 = vmatprep.mubr.f32.mxu0 %v1180_v10  ;;  %4648 = vrot.lane.b32.xlu0 %v4516_v56, %s8080_s10  ;;  %v4532_v10 = vld [vmem:[%s12138_s1 + $0xa0] sm:$0xff]  ;;  %v4539_v56 = vld [vmem:[%s12138_s1 + $0xd8] sm:$0xff] }
 0x1ea   :  { %2869 = vmatmul.mubr.f32.gmra.mrb[112].mxu1 %v9579_v30  ;;  %v1184_v30 = vld [vmem:[#allocation2 + $0x181] sm:$0xff] }
 0x1eb   :  { %3479 = vmatmul.mubr.f32.gmra.mrb[48].mxu0 %v9609_v7  ;;  %2873 = vmatprep.mubr.f32.mxu1 %v12268_v54  ;;  %v4520_v7 = vld [vmem:[%s12138_s1 + $0x40] sm:$0xff]  ;;  %v4535_v54 = vld [vmem:[%s12138_s1 + $0xb8] sm:$0xff] }
 0x1ec   :  { %3483 = vmatprep.mubr.f32.mxu0 %v1181_v15  ;;  %4652 = vrot.lane.b32.xlu0 %v4518_v37, %s8080_s10  ;;  %v1192_v15 = vld [vmem:[#allocation2 + $0x211] sm:$0xff] }
 0x1ed   :  { %v1195_v37 = vld [vmem:[#allocation2 + $0x231] sm:$0xff] }
 0x1ee   :  { %2874 = vmatmul.mubr.f32.gmra.mrb[114].mxu1 %v9587_v45  ;;  %v4519_v45 = vld [vmem:[%s12138_s1 + $0x38] sm:$0xff] }
 0x1ef   :  { %3484 = vmatmul.mubr.f32.gmra.mrb[50].mxu0 %v9617_v28  ;;  %2878 = vmatprep.mubr.f32.mxu1 %v12269_v40  ;;  %v9795_v28 = vld [vmem:[#allocation2 + $0x330] sm:$0xff]  ;;  %v4537_v40 = vld [vmem:[%s12138_s1 + $0xc8] sm:$0xff] }
 0x1f0   :  { %3488 = vmatprep.mubr.f32.mxu0 %v1182_v39  ;;  %4654 = vrot.lane.b32.xlu1 %v4519_v45, %s8080_s10  ;;  %v1193_v39 = vld [vmem:[#allocation2 + $0x219] sm:$0xff] }
 0x1f1   :  { %4656 = vrot.lane.b32.xlu0 %v4520_v7, %s8080_s10  ;;  %v1300_v7 = vld [vmem:[#allocation2 + $0xf2] sm:$0xff] }
 0x1f2   :  { %2879 = vmatmul.mubr.f32.gmra.mrb[116].mxu1 %v9595_v34  ;;  %v1185_v34 = vld [vmem:[#allocation2 + $0x189] sm:$0xff] }
 0x1f3   :  { %3489 = vmatmul.mubr.f32.gmra.mrb[52].mxu0 %v9631_v26  ;;  %2883 = vmatprep.mubr.f32.mxu1 %v12270_v57  ;;  %v1186_v26 = vld [vmem:[#allocation2 + $0x199] sm:$0xff]  ;;  %v1194_v57 = vld [vmem:[#allocation2 + $0x229] sm:$0xff] }
 0x1f4   :  { %3493 = vmatprep.mubr.f32.mxu0 %v1183_v63 }
 0x1f6   :  { %2884 = vmatmul.mubr.f32.gmra.mrb[118].mxu1 %v9603_v3  ;;  %v4521_v3 = vld [vmem:[%s12138_s1 + $0x48] sm:$0xff] }
 0x1f7   :  { %3494 = vmatmul.mubr.f32.gmra.mrb[54].mxu0 %v9639_v29  ;;  %2888 = vmatprep.mubr.f32.mxu1 %v12271_v59  ;;  %v4522_v29 = vld [vmem:[%s12138_s1 + $0x50] sm:$0xff]  ;;  %v1298_v59 = vld [vmem:[#allocation2 + $0xda] sm:$0xff] }
 0x1f8   :  { %3498 = vmatprep.mubr.f32.mxu0 %v1184_v30  ;;  %4658 = vrot.lane.b32.xlu1 %v4521_v3, %s8080_s10  ;;  %v4538_v30 = vld [vmem:[%s12138_s1 + $0xd0] sm:$0xff]  ;;  %v4540_v3 = vld [vmem:[%s12138_s1 + $0xe0] sm:$0xff] }
 0x1f9   :  { %4660 = vrot.lane.b32.xlu0 %v4522_v29, %s8080_s10  ;;  %v1301_v29 = vld [vmem:[#allocation2 + $0xfa] sm:$0xff] }
 0x1fa   :  { %2889 = vmatmul.mubr.f32.gmra.mrb[120].mxu1 %v9611_v27  ;;  %v4523_v27 = vld [vmem:[%s12138_s1 + $0x58] sm:$0xff] }
 0x1fb   :  { %3499 = vmatmul.mubr.f32.gmra.mrb[56].mxu0 %v9647_v62  ;;  %2893 = vmatprep.mubr.f32.mxu1 %v12272_v46  ;;  %v9808_v62 = vld [vmem:[#allocation2 + $0x338] sm:$0xff]  ;;  %v4541_v46 = vld [vmem:[%s12138_s1 + $0xe8] sm:$0xff] }
 0x1fc   :  { %3503 = vmatprep.mubr.f32.mxu0 %v1185_v34  ;;  %4662 = vrot.lane.b32.xlu1 %v4523_v27, %s8080_s10  ;;  %v1299_v34 = vld [vmem:[#allocation2 + $0xe2] sm:$0xff] }
 0x1fd   :  { %4664 = vrot.lane.b32.xlu0 %v4524_v6, %s8080_s10  ;;  %v1196_v27 = vld [vmem:[#allocation2 + $0x241] sm:$0xff]  ;;  %v1302_v6 = vld [vmem:[#allocation2 + $0x10a] sm:$0xff] }
 0x1fe   :  { %2894 = vmatmul.mubr.f32.gmra.mrb[122].mxu1 %v9619_v5  ;;  %v9813_v5 = vld [vmem:[#allocation2] sm:$0xff] }
 0x1ff   :  { %3504 = vmatmul.mubr.f32.gmra.mrb[58].mxu0 %v9652_v13  ;;  %2898 = vmatprep.mubr.f32.mxu1 %v9795_v28  ;;  %v4525_v13 = vld [vmem:[%s12138_s1 + $0x68] sm:$0xff] }
 0x200   :  { %3508 = vmatprep.mubr.f32.mxu0 %v1186_v26  ;;  %4666 = vrot.lane.b32.xlu1 %v4525_v13, %s8080_s10  ;;  %v4542_v13 = vld [vmem:[%s12138_s1 + $0xf0] sm:$0xff] }
 0x201   :  { %4668 = vrot.lane.b32.xlu0 %v4526_v42, %s8080_s10  ;;  %v4544_v42 = vld [vmem:[%s12138_s1 + $0x100] sm:$0xff] }
 0x202   :  { %2899 = vmatmul.mubr.f32.gmra.mrb[124].mxu1 %v9633_v18  ;;  %v1285_v18 = vld [vmem:[#allocation2 + $0x3a] sm:$0xff] }
 0x203   :  { %3509 = vmatmul.mubr.f32.gmra.mrb[60].mxu0 %v9813_v5  ;;  %2903 = vmatprep.mubr.f32.mxu1 %v9808_v62 }
 0x204   :  { %3513 = vmatprep.mubr.f32.mxu0 %v1187_v1  ;;  %4670 = vrot.lane.b32.xlu1 %v4527_v0, %s8080_s10  ;;  %v4543_v1 = vld [vmem:[%s12138_s1 + $0xf8] sm:$0xff]  ;;  %v4545_v0 = vld [vmem:[%s12138_s1 + $0x108] sm:$0xff] }
 0x205   :  { %4672 = vrot.lane.b32.xlu0 %v4528_v2, %s8080_s10  ;;  %v4547_v2 = vld [vmem:[%s12138_s1 + $0x118] sm:$0xff] }
 0x206   :  { %2904 = vmatmul.mubr.f32.gmra.mrb[126].mxu1 %v9641_v20  ;;  %v1287_v20 = vld [vmem:[#allocation2 + $0x52] sm:$0xff] }
 0x207   :  { %3514 = vmatmul.mubr.f32.gmra.mrb[62].mxu0 %v9813_v5  ;;  %6770 = vmatprep.mubr.f32.mxu1 %v1284_v19 }
 0x208   :  { %3518 = vmatprep.mubr.f32.mxu0 %v1188_v55  ;;  %4674 = vrot.lane.b32.xlu1 %v4529_v47, %s8080_s10  ;;  %v1197_v55 = vld [vmem:[#allocation2 + $0x249] sm:$0xff] }
 0x209   :  { %4676 = vrot.lane.b32.xlu0 %v4530_v23, %s8080_s10  ;;  %v1305_v47 = vld [vmem:[#allocation2 + $0x12a] sm:$0xff]  ;;  %v1307_v23 = vld [vmem:[#allocation2 + $0x142] sm:$0xff] }
 0x20a   :  { %6771 = vmatmul.mubr.f32.vlgmr.msra.gmra.mrb[128].mxu1 %v1285_v18  ;;  %v1303_v18 = vld [vmem:[#allocation2 + $0x112] sm:$0xff] }
 0x20b   :  { %3519 = vmatmul.mubr.f32.gmra.mrb[64].mxu0 %v9657_v41  ;;  %6773 = vmatprep.mubr.f32.mxu1 %v1286_v44  ;;  %v1289_v41 = vld [vmem:[#allocation2 + $0x6a] sm:$0xff]  ;;  %v1304_v44 = vld [vmem:[#allocation2 + $0x122] sm:$0xff] }
 0x20c   :  { %3523 = vmatprep.mubr.f32.mxu0 %v1189_v17  ;;  %4678 = vrot.lane.b32.xlu1 %v4531_v36, %s8080_s10  ;;  %v1199_v36 = vld [vmem:[#allocation2 + $0x261] sm:$0xff] }
 0x20d   :  { %4680 = vrot.lane.b32.xlu0 %v4532_v10, %s8080_s10  ;;  %v1200_v10 = vld [vmem:[#allocation2 + $0x271] sm:$0xff] }
 0x20e   :  { %6774 = vmatmul.mubr.f32.gmra.mrb[130].mxu1 %v1287_v20  ;;  %v1198_v20 = vld [vmem:[#allocation2 + $0x259] sm:$0xff] }
 0x20f   :  { %3524 = vmatmul.mubr.f32.gmra.mrb[66].mxu0 %v9660_v48  ;;  %6776 = vmatprep.mubr.f32.mxu1 %v1288_v25  ;;  %v1291_v48 = vld [vmem:[#allocation2 + $0x82] sm:$0xff]  ;;  %v4546_v25 = vld [vmem:[%s12138_s1 + $0x110] sm:$0xff] }
 0x210   :  { %3528 = vmatprep.mubr.f32.mxu0 %v1190_v52  ;;  %4682 = vrot.lane.b32.xlu1 %v4533_v38, %s8080_s10  ;;  %v1306_v52 = vld [vmem:[#allocation2 + $0x13a] sm:$0xff] }
 0x211   :  { %4684 = vrot.lane.b32.xlu0 %v4534_v51, %s8080_s10 }
 0x212   :  { %6777 = vmatmul.mubr.f32.gmra.mrb[132].mxu1 %v1289_v41 }
 0x213   :  { %3529 = vmatmul.mubr.f32.gmra.mrb[68].mxu0 %v9664_v60  ;;  %6779 = vmatprep.mubr.f32.mxu1 %v1290_v50  ;;  %v1293_v60 = vld [vmem:[#allocation2 + $0x9a] sm:$0xff]  ;;  %v4549_v50 = vld [vmem:[%s12138_s1 + $0x128] sm:$0xff] }
 0x214   :  { %3533 = vmatprep.mubr.f32.mxu0 %v1191_v16  ;;  %4686 = vrot.lane.b32.xlu1 %v4535_v54, %s8080_s10  ;;  %v4548_v16 = vld [vmem:[%s12138_s1 + $0x120] sm:$0xff]  ;;  %v1310_v54 = vld [vmem:[#allocation2 + $0x16a] sm:$0xff] }
 0x215   :  { %4688 = vrot.lane.b32.xlu0 %v4536_v35, %s8080_s10  ;;  %v1312_v35 = vld [vmem:[#allocation2 + $0x182] sm:$0xff] }
 0x216   :  { %6780 = vmatmul.mubr.f32.gmra.mrb[134].mxu1 %v1291_v48  ;;  %v1308_v48 = vld [vmem:[#allocation2 + $0x152] sm:$0xff] }
 0x217   :  { %3534 = vmatmul.mubr.f32.gmra.mrb[70].mxu0 %v9668_v14  ;;  %6782 = vmatprep.mubr.f32.mxu1 %v1292_v22  ;;  %v1295_v14 = vld [vmem:[#allocation2 + $0xb2] sm:$0xff]  ;;  %v1309_v22 = vld [vmem:[#allocation2 + $0x15a] sm:$0xff] }
 0x218   :  { %3538 = vmatprep.mubr.f32.mxu0 %v1192_v15  ;;  %4690 = vrot.lane.b32.xlu1 %v4537_v40, %s8080_s10  ;;  %v4551_v15 = vld [vmem:[%s12138_s1 + $0x138] sm:$0xff]  ;;  %v4552_v40 = vld [vmem:[%s12138_s1 + $0x140] sm:$0xff] }
 0x219   :  { %4692 = vrot.lane.b32.xlu0 %v4538_v30, %s8080_s10  ;;  %v1314_v30 = vld [vmem:[#allocation2 + $0x19a] sm:$0xff] }
 0x21a   :  { %6783 = vmatmul.mubr.f32.gmra.mrb[136].mxu1 %v1293_v60  ;;  %v4550_v60 = vld [vmem:[%s12138_s1 + $0x130] sm:$0xff] }
 0x21b   :  { %3539 = vmatmul.mubr.f32.gmra.mrb[72].mxu0 %v9672_v24  ;;  %6785 = vmatprep.mubr.f32.mxu1 %v1294_v32  ;;  %v1201_v32 = vld [vmem:[#allocation2 + $0x279] sm:$0xff] }
 0x21c   :  { %3543 = vmatprep.mubr.f32.mxu0 %v1193_v39  ;;  %4694 = vrot.lane.b32.xlu1 %v4539_v56, %s8080_s10  ;;  %v1311_v39 = vld [vmem:[#allocation2 + $0x172] sm:$0xff] }
 0x21d   :  { %v9879_v63 = vpop.f32.mrb[32].mxu1  ;;  %4696 = vrot.lane.b32.xlu0 %v4540_v3, %s8080_s10  ;;  %v4554_v56 = vld [vmem:[%s12138_s1 + $0x150] sm:$0xff] }
 0x21e   :  { %v2672_v24 = vpop.f32.mrb[33].mxu1  ;;  %6786 = vmatmul.mubr.f32.gmra.mrb[138].mxu1 %v1295_v14  ;;  %v4553_v14 = vld [vmem:[%s12138_s1 + $0x148] sm:$0xff]  ;;  %v1075_v3 = vld [vmem:[#allocation2 + $0x290] sm:$0xff] }
 0x21f   :  { %3544 = vmatmul.mubr.f32.gmra.mrb[74].mxu0 %v9676_v58  ;;  %6788 = vmatprep.mubr.f32.mxu1 %v1296_v4  ;;  %v1313_v24 = vld [vmem:[#allocation2 + $0x18a] sm:$0xff] }
 0x220   :  { %3548 = vmatprep.mubr.f32.mxu0 %v1194_v57  ;;  %4698 = vrot.lane.b32.xlu1 %v4541_v46, %s8080_s10  ;;  %v1202_v57 = vld [vmem:[#allocation2 + $0x289] sm:$0xff]  ;;  %v4556_v46 = vld [vmem:[%s12138_s1 + $0x160] sm:$0xff] }
 0x221   :  { %v9890_v45 = vpop.f32.mrb[34].mxu1  ;;  %4700 = vrot.lane.b32.xlu0 %v4542_v13, %s8080_s10  ;;  %v4558_v13 = vld [vmem:[%s12138_s1 + $0x170] sm:$0xff] }
 0x222   :  { %v2677_v58 = vpop.f32.mrb[35].mxu1  ;;  %6789 = vmatmul.mubr.f32.gmra.mrb[140].mxu1 %v1297_v61  ;;  %v4555_v61 = vld [vmem:[%s12138_s1 + $0x158] sm:$0xff] }
 0x223   :  { %3549 = vmatmul.mubr.f32.gmra.mrb[76].mxu0 %v9680_v43  ;;  %6791 = vmatprep.mubr.f32.mxu1 %v1298_v59  ;;  %v1315_v58 = vld [vmem:[#allocation2 + $0x1a2] sm:$0xff] }
 0x224   :  { %3553 = vmatprep.mubr.f32.mxu0 %v1195_v37  ;;  %4702 = vrot.lane.b32.xlu1 %v4543_v1, %s8080_s10  ;;  %v1203_v37 = vld [vmem:[#allocation2 + $0x291] sm:$0xff] }
 0x225   :  { %v9901_v26 = vpop.f32.mrb[36].mxu1  ;;  %4704 = vrot.lane.b32.xlu0 %v4544_v42, %s8080_s10  ;;  %v4559_v1 = vld [vmem:[%s12138_s1 + $0x178] sm:$0xff]  ;;  %v1319_v42 = vld [vmem:[#allocation2 + $0x202] sm:$0xff] }
 0x226   :  { %v2682_v43 = vpop.f32.mrb[37].mxu1  ;;  %6792 = vmatmul.mubr.f32.gmra.mrb[142].mxu1 %v1299_v34  ;;  %v4557_v34 = vld [vmem:[%s12138_s1 + $0x168] sm:$0xff] }
 0x227   :  { %3554 = vmatmul.mubr.f32.gmra.mrb[78].mxu0 %v9684_v11  ;;  %6794 = vmatprep.mubr.f32.mxu1 %v1300_v7  ;;  %v1316_v7 = vld [vmem:[#allocation2 + $0x1e2] sm:$0xff] }
 0x228   :  { %3558 = vmatprep.mubr.f32.mxu0 %v1196_v27  ;;  %4706 = vrot.lane.b32.xlu1 %v4545_v0, %s8080_s10  ;;  %v1204_v43 = vld [vmem:[#allocation2 + $0x2a1] sm:$0xff] }
 0x229   :  { %v9912_v19 = vpop.f32.mrb[38].mxu1  ;;  %4708 = vrot.lane.b32.xlu0 %v4546_v25, %s8080_s10  ;;  %v1206_v25 = vld [vmem:[#allocation2 + $0x2b9] sm:$0xff] }
 0x22a   :  { %v2687_v11 = vpop.f32.mrb[39].mxu1  ;;  %6795 = vmatmul.mubr.f32.gmra.mrb[144].mxu1 %v1301_v29  ;;  %v1317_v29 = vld [vmem:[#allocation2 + $0x1ea] sm:$0xff] }
 0x22b   :  { %3559 = vmatmul.mubr.f32.gmra.mrb[80].mxu0 %v9688_v9  ;;  %6797 = vmatprep.mubr.f32.mxu1 %v1302_v6  ;;  %v1076_v6 = vld [vmem:[#allocation2 + $0x2a0] sm:$0xff] }
 0x22c   :  { %3563 = vmatprep.mubr.f32.mxu0 %v1197_v55  ;;  %4710 = vrot.lane.b32.xlu1 %v4547_v2, %s8080_s10  ;;  %v1318_v55 = vld [vmem:[#allocation2 + $0x1fa] sm:$0xff] }
 0x22d   :  { %v9923_v17 = vpop.f32.mrb[40].mxu1  ;;  %4712 = vrot.lane.b32.xlu0 %v4548_v16, %s8080_s10  ;;  %v1322_v16 = vld [vmem:[#allocation2 + $0x22a] sm:$0xff] }
 0x22e   :  { %v2692_v9 = vpop.f32.mrb[41].mxu1  ;;  %6798 = vmatmul.mubr.f32.gmra.mrb[146].mxu1 %v1303_v18  ;;  %v1205_v18 = vld [vmem:[#allocation2 + $0x2a9] sm:$0xff] }
 0x22f   :  { %3564 = vmatmul.mubr.f32.gmra.mrb[82].mxu0 %v9692_v53  ;;  %6800 = vmatprep.mubr.f32.mxu1 %v1304_v44  ;;  %v4561_v44 = vld [vmem:[%s12138_s1 + $0x188] sm:$0xff] }
 0x230   :  { %3568 = vmatprep.mubr.f32.mxu0 %v1198_v20  ;;  %4714 = vrot.lane.b32.xlu1 %v4549_v50, %s8080_s10  ;;  %v4560_v20 = vld [vmem:[%s12138_s1 + $0x180] sm:$0xff]  ;;  %v1077_v9 = vld [vmem:[#allocation2 + $0x2a8] sm:$0xff]  ;;  %v1078_v50 = vld [vmem:[#allocation2 + $0x2b8] sm:$0xff] }
 0x231   :  { %v9934_v41 = vpop.f32.mrb[42].mxu1  ;;  %4716 = vrot.lane.b32.xlu0 %v4550_v60, %s8080_s10  ;;  %v4564_v60 = vld [vmem:[%s12138_s1 + $0x1a0] sm:$0xff] }
 0x232   :  { %v2697_v53 = vpop.f32.mrb[43].mxu1  ;;  %6801 = vmatmul.mubr.f32.gmra.mrb[148].mxu1 %v1305_v47  ;;  %v1320_v47 = vld [vmem:[#allocation2 + $0x212] sm:$0xff] }
 0x233   :  { %3569 = vmatmul.mubr.f32.gmra.mrb[84].mxu0 %v9696_v33  ;;  %6803 = vmatprep.mubr.f32.mxu1 %v1306_v52  ;;  %v4563_v53 = vld [vmem:[%s12138_s1 + $0x198] sm:$0xff] }
 0x234   :  { %3573 = vmatprep.mubr.f32.mxu0 %v1199_v36  ;;  %4718 = vrot.lane.b32.xlu1 %v4551_v15, %s8080_s10  ;;  %v1321_v36 = vld [vmem:[#allocation2 + $0x21a] sm:$0xff]  ;;  %v4565_v15 = vld [vmem:[%s12138_s1 + $0x1a8] sm:$0xff] }
 0x235   :  { %v9945_v38 = vpop.f32.mrb[44].mxu1  ;;  %4720 = vrot.lane.b32.xlu0 %v4552_v40, %s8080_s10  ;;  %v1325_v40 = vld [vmem:[#allocation2 + $0x24a] sm:$0xff] }
 0x236   :  { %v2702_v33 = vpop.f32.mrb[45].mxu1  ;;  %6804 = vmatmul.mubr.f32.gmra.mrb[150].mxu1 %v1307_v23  ;;  %v4562_v23 = vld [vmem:[%s12138_s1 + $0x190] sm:$0xff] }
 0x237   :  { %3574 = vmatmul.mubr.f32.gmra.mrb[86].mxu0 %v9700_v8  ;;  %6806 = vmatprep.mubr.f32.mxu1 %v1308_v48 }
 0x238   :  { %3578 = vmatprep.mubr.f32.mxu0 %v1200_v10  ;;  %4722 = vrot.lane.b32.xlu1 %v4553_v14, %s8080_s10  ;;  %v1207_v10 = vld [vmem:[#allocation2 + $0x2c1] sm:$0xff] }
 0x239   :  { %v9956_v51 = vpop.f32.mrb[46].mxu1  ;;  %4724 = vrot.lane.b32.xlu0 %v4554_v56, %s8080_s10  ;;  %v1209_v56 = vld [vmem:[#allocation2 + $0x2d9] sm:$0xff] }
 0x23a   :  { %v2707_v8 = vpop.f32.mrb[47].mxu1  ;;  %6807 = vmatmul.mubr.f32.gmra.mrb[152].mxu1 %v1309_v22  ;;  %v1323_v22 = vld [vmem:[#allocation2 + $0x232] sm:$0xff] }
 0x23b   :  { %3579 = vmatmul.mubr.f32.gmra.mrb[88].mxu0 %v9704_v21  ;;  %6809 = vmatprep.mubr.f32.mxu1 %v1310_v54  ;;  %v1079_v54 = vld [vmem:[#allocation2 + $0x2c0] sm:$0xff] }
 0x23c   :  { %3583 = vmatprep.mubr.f32.mxu0 %v1201_v32  ;;  %4726 = vrot.lane.b32.xlu1 %v4555_v61, %s8080_s10  ;;  %v1324_v32 = vld [vmem:[#allocation2 + $0x242] sm:$0xff] }
 0x23d   :  { %v9967_v4 = vpop.f32.mrb[48].mxu1  ;;  %4728 = vrot.lane.b32.xlu0 %v4556_v46, %s8080_s10  ;;  %v1081_v46 = vld [vmem:[#allocation2 + $0x2d8] sm:$0xff] }
 0x23e   :  { %v2712_v21 = vpop.f32.mrb[49].mxu1  ;;  %6810 = vmatmul.mubr.f32.gmra.mrb[154].mxu1 %v1311_v39  ;;  %v1208_v39 = vld [vmem:[#allocation2 + $0x2d1] sm:$0xff] }
 0x23f   :  { %3584 = vmatmul.mubr.f32.gmra.mrb[90].mxu0 %v9708_v49  ;;  %6812 = vmatprep.mubr.f32.mxu1 %v1312_v35  ;;  %v4567_v35 = vld [vmem:[%s12138_s1 + $0x1b8] sm:$0xff]  ;;  %v1080_v21 = vld [vmem:[#allocation2 + $0x2d0] sm:$0xff] }
 0x240   :  { %3588 = vmatprep.mubr.f32.mxu0 %v1202_v57  ;;  %4730 = vrot.lane.b32.xlu1 %v4557_v34, %s8080_s10  ;;  %v4566_v57 = vld [vmem:[%s12138_s1 + $0x1b0] sm:$0xff]  ;;  %v4568_v34 = vld [vmem:[%s12138_s1 + $0x1c0] sm:$0xff] }
 0x241   :  { %v9978_v59 = vpop.f32.mrb[50].mxu1  ;;  %4732 = vrot.lane.b32.xlu0 %v4558_v13, %s8080_s10 }
 0x242   :  { %v2717_v49 = vpop.f32.mrb[51].mxu1  ;;  %6813 = vmatmul.mubr.f32.gmra.mrb[156].mxu1 %v1313_v24  ;;  %v1326_v24 = vld [vmem:[#allocation2 + $0x25a] sm:$0xff] }
 0x243   :  { %3589 = vmatmul.mubr.f32.gmra.mrb[92].mxu0 %v9713_v31  ;;  %6815 = vmatprep.mubr.f32.mxu1 %v1314_v30  ;;  %v10045_v30 = vld [vmem:[%s12140_s3] ss:$0 sm:$0xff]  ;;  %v1327_v49 = vld [vmem:[#allocation2 + $0x262] sm:$0xff] }
 0x244   :  { %3593 = vmatprep.mubr.f32.mxu0 %v1203_v37  ;;  %4734 = vrot.lane.b32.xlu1 %v4559_v1, %s8080_s10 }
 0x245   :  { %v9989_v27 = vpop.f32.mrb[52].mxu1  ;;  %4736 = vrot.lane.b32.xlu0 %v4560_v20, %s8080_s10  ;;  %v4570_v20 = vld [vmem:[%s12138_s1 + $0x1d0] sm:$0xff] }
 0x246   :  { %v2722_v31 = vpop.f32.mrb[53].mxu1  ;;  %6816 = vmatmul.mubr.f32.gmra.mrb[158].mxu1 %v1315_v58  ;;  %v4569_v58 = vld [vmem:[%s12138_s1 + $0x1c8] sm:$0xff] }
 0x247   :  { %3594 = vmatmul.mubr.f32.gmra.mrb[94].mxu0 %v1075_v3  ;;  %6818 = vmatprep.mubr.f32.mxu1 %v1316_v7  ;;  %v1328_v3 = vld [vmem:[#allocation2 + $0x272] sm:$0xff]  ;;  %v12273_v7 = vld [vmem:[#allocation10_spill] sm:$0xff] }
 0x248   :  { %3598 = vmatprep.mubr.f32.mxu0 %v1204_v43  ;;  %4738 = vrot.lane.b32.xlu1 %v4561_v44, %s8080_s10  ;;  %v2206_v43 = vadd.f32 %v10045_v30, %v12273_v7  ;;  %v1330_v44 = vld [vmem:[#allocation2 + $0x28a] sm:$0xff] }
 0x249   :  { %v9999_v11 = vpop.f32.mrb[54].mxu1  ;;  %4740 = vrot.lane.b32.xlu0 %v4562_v23, %s8080_s10 }
 0x24a   :  { %v2727_v0 = vpop.f32.mrb[55].mxu1  ;;  %6819 = vmatmul.mubr.f32.gmra.mrb[160].mxu1 %v1317_v29  ;;  %v1210_v29 = vld [vmem:[#allocation2 + $0x2e9] sm:$0xff] }
 0x24b   :  { %3599 = vmatmul.mubr.f32.gmra.mrb[96].mxu0 %v1076_v6  ;;  %6821 = vmatprep.mubr.f32.mxu1 %v1318_v55  ;;  %v4571_v0 = vld [vmem:[%s12138_s1 + $0x1d8] sm:$0xff] }
 0x24c   :  { %3603 = vmatprep.mubr.f32.mxu0 %v1205_v18  ;;  %4742 = vrot.lane.b32.xlu1 %v4563_v53, %s8080_s10  ;;  %v1329_v18 = vld [vmem:[#allocation2 + $0x27a] sm:$0xff] }
 0x24d   :  { %v10009_v2 = vpop.f32.mrb[56].mxu1  ;;  %4744 = vrot.lane.b32.xlu0 %v4564_v60, %s8080_s10  ;;  %v12275_v60 = vld [vmem:[#allocation12_spill] sm:$0xff] }
 0x24e   :  { %v2732_v52 = vpop.f32.mrb[57].mxu1  ;;  %6822 = vmatmul.mubr.f32.gmra.mrb[162].mxu1 %v1319_v42  ;;  %v1082_v42 = vld [vmem:[#allocation2 + $0x2e8] sm:$0xff] }
 0x24f   :  { %3604 = vmatmul.mubr.f32.gmra.mrb[98].mxu0 %v1077_v9  ;;  %6824 = vmatprep.mubr.f32.mxu1 %v1320_v47  ;;  %v12274_v9 = vld [vmem:[#allocation11_spill] sm:$0xff]  ;;  %v1211_v52 = vld [vmem:[#allocation2 + $0x2f1] sm:$0xff] }
 0x250   :  { %3608 = vmatprep.mubr.f32.mxu0 %v1206_v25  ;;  %4746 = vrot.lane.b32.xlu1 %v4565_v15, %s8080_s10  ;;  %v2211_v47 = vadd.f32 %v10045_v30, %v12274_v9  ;;  %v4572_v15 = vld [vmem:[%s12138_s1 + $0x1e0] sm:$0xff] }
 0x251   :  { %v10019_v48 = vpop.f32.mrb[58].mxu1  ;;  %4748 = vrot.lane.b32.xlu0 %v4566_v57, %s8080_s10 }
 0x252   :  { %v2737_v33 = vpop.f32.mrb[59].mxu1  ;;  %6825 = vmatmul.mubr.f32.gmra.mrb[164].mxu1 %v1321_v36 }
 0x253   :  { %3609 = vmatmul.mubr.f32.gmra.mrb[100].mxu0 %v1078_v50  ;;  %6827 = vmatprep.mubr.f32.mxu1 %v1322_v16  ;;  %v1331_v16 = vld [vmem:[#allocation2 + $0x292] sm:$0xff] }
 0x254   :  { %3613 = vmatprep.mubr.f32.mxu0 %v1207_v10  ;;  %4750 = vrot.lane.b32.xlu1 %v4567_v35, %s8080_s10  ;;  %v4573_v10 = vld [vmem:[%s12138_s1 + $0x1e8] sm:$0xff]  ;;  %v1083_v33 = vld [vmem:[#allocation2 + $0x2f0] sm:$0xff] }
 0x255   :  { %v10029_v8 = vpop.f32.mrb[60].mxu1  ;;  %4752 = vrot.lane.b32.xlu0 %v4568_v34, %s8080_s10 }
 0x256   :  { %v2742_v14 = vpop.f32.mrb[61].mxu1  ;;  %6828 = vmatmul.mubr.f32.gmra.mrb[166].mxu1 %v1323_v22  ;;  %v1332_v22 = vld [vmem:[#allocation2 + $0x2a2] sm:$0xff] }
 0x257   :  { %3614 = vmatmul.mubr.f32.gmra.mrb[102].mxu0 %v1079_v54  ;;  %6830 = vmatprep.mubr.f32.mxu1 %v1324_v32  ;;  %v2216_v54 = vadd.f32 %v10045_v30, %v12275_v60 }
 0x258   :  { %3618 = vmatprep.mubr.f32.mxu0 %v1208_v39  ;;  %4754 = vrot.lane.b32.xlu1 %v4569_v58, %s8080_s10  ;;  %v1212_v39 = vld [vmem:[#allocation2 + $0x301] sm:$0xff] }
 0x259   :  { %v10039_v61 = vpop.f32.mrb[62].mxu1  ;;  %4756 = vrot.lane.b32.xlu0 %v4570_v20, %s8080_s10  ;;  %v12276_v58 = vld [vmem:[#allocation14_spill] sm:$0xff] }
 0x25a   :  { %v2747_v37 = vpop.f32.mrb[63].mxu1  ;;  %6831 = vmatmul.mubr.f32.gmra.mrb[168].mxu1 %v1325_v40  ;;  %v2221_v34 = vadd.f32 %v10045_v30, %v12276_v58  ;;  %v1214_v20 = vld [vmem:[#allocation2 + $0x319] sm:$0xff] }
 0x25b   :  { %3619 = vmatmul.mubr.f32.gmra.mrb[104].mxu0 %v1080_v21  ;;  %6833 = vmatprep.mubr.f32.mxu1 %v1326_v24  ;;  %v1333_v21 = vld [vmem:[#allocation2 + $0x2aa] sm:$0xff]  ;;  %v4575_v24 = vld [vmem:[%s12138_s1 + $0x1f8] sm:$0xff] }
 0x25c   :  { %3623 = vmatprep.mubr.f32.mxu0 %v1209_v56  ;;  %4758 = vrot.lane.b32.xlu1 %v4571_v0, %s8080_s10  ;;  %v1084_v56 = vld [vmem:[#allocation2 + $0x300] sm:$0xff]  ;;  %v12277_v0 = vld [vmem:[#allocation16_spill] sm:$0xff] }
 0x25d   :  { %v10056_v31 = vpop.f32.mrb[64].mxu1  ;;  %4760 = vrot.lane.b32.xlu0 %v4572_v15, %s8080_s10  ;;  %v1334_v37 = vld [vmem:[#allocation2 + $0x2ba] sm:$0xff] }
 0x25e   :  { %v3360_v1 = vpop.f32.mrb[0].mxu0  ;;  %v2752_v13 = vpop.f32.mrb[65].mxu1  ;;  %6834 = vmatmul.mubr.f32.gmra.mrb[170].mxu1 %v1327_v49  ;;  %v4574_v49 = vld [vmem:[%s12138_s1 + $0x1f0] sm:$0xff]  ;;  %v1215_v15 = vld [vmem:[#allocation2 + $0x321] sm:$0xff] }
 0x25f   :  { %v10059_v6 = vadd.f32 %v3360_v1, %v2206_v43  ;;  %v3362_v55 = vpop.f32.mrb[1].mxu0  ;;  %3624 = vmatmul.mubr.f32.gmra.mrb[106].mxu0 %v1081_v46  ;;  %6836 = vmatprep.mubr.f32.mxu1 %v1328_v3  ;;  %v1213_v3 = vld [vmem:[#allocation2 + $0x309] sm:$0xff] }
 0x260   :  { %3628 = vmatprep.mubr.f32.mxu0 %v1210_v29  ;;  %4762 = vrot.lane.b32.xlu1 %v4573_v10, %s8080_s10  ;;  %v1335_v13 = vld [vmem:[#allocation2 + $0x2c2] sm:$0xff] }
 0x261   :  { %v10070_v25 = vpop.f32.mrb[66].mxu1  ;;  %4764 = vrot.lane.b32.xlu0 %v4574_v49, %s8080_s10  ;;  %v1085_v55 = vld [vmem:[#allocation2 + $0x308] sm:$0xff]  ;;  %v12278_v10 = vld [vmem:[#allocation18_spill] sm:$0xff]  ;;  %v1216_v49 = vld [vmem:[#allocation2 + $0x331] sm:$0xff] }
 0x262   :  { %v3365_v36 = vpop.f32.mrb[2].mxu0  ;;  %v2757_v53 = vpop.f32.mrb[67].mxu1  ;;  %6837 = vmatmul.mubr.f32.gmra.mrb[172].mxu1 %v1329_v18  ;;  %v1336_v18 = vld [vmem:[#allocation2 + $0x2d2] sm:$0xff] }
 0x263   :  { %v10073_v23 = vadd.f32 %v3365_v36, %v2211_v47  ;;  %v3367_v50 = vpop.f32.mrb[3].mxu0  ;;  %3629 = vmatmul.mubr.f32.gmra.mrb[108].mxu0 %v1082_v42  ;;  %6839 = vmatprep.mubr.f32.mxu1 %v1330_v44  ;;  %v2226_v42 = vadd.f32 %v10045_v30, %v12277_v0  ;;  %v1337_v53 = vld [vmem:[#allocation2 + $0x2da] sm:$0xff] }
 0x264   :  { %3633 = vmatprep.mubr.f32.mxu0 %v1211_v52  ;;  %4766 = vrot.lane.b32.xlu1 %v4575_v24, %s8080_s10  ;;  %v1086_v50 = vld [vmem:[#allocation2 + $0x318] sm:$0xff]  ;;  %v12279_v24 = vld [vmem:[#allocation20_spill] sm:$0xff] }
 0x265   :  { %v10084_v32 = vpop.f32.mrb[68].mxu1  ;;  %v1217_v0 = vld [vmem:[#allocation2 + $0x339] sm:$0xff] }
 0x266   :  { %v3370_v14 = vpop.f32.mrb[4].mxu0  ;;  %v2762_v40 = vpop.f32.mrb[69].mxu1  ;;  %6840 = vmatmul.mubr.f32.gmra.mrb[174].mxu1 %v1331_v16  ;;  %v1338_v16 = vld [vmem:[#allocation2 + $0x2ea] sm:$0xff] }
 0x267   :  { %v10087_v35 = vadd.f32 %v3370_v14, %v2216_v54  ;;  %v3372_v57 = vpop.f32.mrb[5].mxu0  ;;  %3634 = vmatmul.mubr.f32.gmra.mrb[110].mxu0 %v1083_v33  ;;  %6842 = vmatprep.mubr.f32.mxu1 %v1332_v22  ;;  %v2231_v33 = vadd.f32 %v10045_v30, %v12278_v10  ;;  %v1339_v40 = vld [vmem:[#allocation2 + $0x2f2] sm:$0xff] }
 0x268   :  { %3638 = vmatprep.mubr.f32.mxu0 %v1212_v39  ;;  %v1087_v57 = vld [vmem:[#allocation2 + $0x320] sm:$0xff] }
 0x269   :  { %v10098_v46 = vpop.f32.mrb[70].mxu1 }
 0x26a   :  { %v3375_v7 = vpop.f32.mrb[6].mxu0  ;;  %v2767_v43 = vpop.f32.mrb[71].mxu1  ;;  %6843 = vmatmul.mubr.f32.gmra.mrb[176].mxu1 %v1333_v21  ;;  %v1340_v21 = vld [vmem:[#allocation2 + $0x302] sm:$0xff] }
 0x26b   :  { %v10101_v29 = vadd.f32 %v3375_v7, %v2221_v34  ;;  %v3377_v1 = vpop.f32.mrb[7].mxu0  ;;  %3639 = vmatmul.mubr.f32.gmra.mrb[112].mxu0 %v1084_v56  ;;  %6845 = vmatprep.mubr.f32.mxu1 %v1334_v37  ;;  %v2236_v56 = vadd.f32 %v10045_v30, %v12279_v24  ;;  %v1341_v43 = vld [vmem:[#allocation2 + $0x30a] sm:$0xff] }
 0x26c   :  { %3643 = vmatprep.mubr.f32.mxu0 %v1213_v3  ;;  %v1342_v1 = vld [vmem:[#allocation2 + $0x31a] sm:$0xff] }
 0x26d   :  { %v10105_v44 = vpop.f32.mrb[72].mxu1 }
 0x26e   :  { %v3380_v9 = vpop.f32.mrb[8].mxu0  ;;  %v2772_v47 = vpop.f32.mrb[73].mxu1  ;;  %6846 = vmatmul.mubr.f32.gmra.mrb[178].mxu1 %v1335_v13  ;;  %v12280_v13 = vld [vmem:[#allocation22_spill] sm:$0xff] }
 0x26f   :  { %v10107_v52 = vadd.f32 %v3380_v9, %v2226_v42  ;;  %v3382_v36 = vpop.f32.mrb[9].mxu0  ;;  %3644 = vmatmul.mubr.f32.gmra.mrb[114].mxu0 %v1085_v55  ;;  %6848 = vmatprep.mubr.f32.mxu1 %v1336_v18  ;;  %v2241_v55 = vadd.f32 %v10045_v30, %v12280_v13 }
 0x270   :  { %3648 = vmatprep.mubr.f32.mxu0 %v1214_v20  ;;  %v1343_v36 = vld [vmem:[#allocation2 + $0x322] sm:$0xff] }
 0x271   :  { %v10111_v22 = vpop.f32.mrb[74].mxu1 }
 0x272   :  { %v3385_v60 = vpop.f32.mrb[10].mxu0  ;;  %v2777_v54 = vpop.f32.mrb[75].mxu1  ;;  %6849 = vmatmul.mubr.f32.gmra.mrb[180].mxu1 %v1337_v53  ;;  %v1344_v53 = vld [vmem:[#allocation2 + $0x332] sm:$0xff] }
 0x273   :  { %v10113_v39 = vadd.f32 %v3385_v60, %v2231_v33  ;;  %v3387_v14 = vpop.f32.mrb[11].mxu0  ;;  %3649 = vmatmul.mubr.f32.gmra.mrb[116].mxu0 %v1086_v50  ;;  %6851 = vmatprep.mubr.f32.mxu1 %v1338_v16  ;;  %v12281_v50 = vld [vmem:[#allocation24_spill] sm:$0xff] }
 0x274   :  { %3653 = vmatprep.mubr.f32.mxu0 %v1215_v15  ;;  %v2246_v16 = vadd.f32 %v10045_v30, %v12281_v50  ;;  %v1218_v33 = vld [vmem:[#allocation2 + $0x349] sm:$0xff] }
 0x275   :  { %v10117_v37 = vpop.f32.mrb[76].mxu1 }
 0x276   :  { %v3390_v58 = vpop.f32.mrb[12].mxu0  ;;  %v2782_v34 = vpop.f32.mrb[77].mxu1  ;;  %6852 = vmatmul.mubr.f32.gmra.mrb[182].mxu1 %v1339_v40  ;;  %v1346_v40 = vld [vmem:[#allocation2 + $0x34a] sm:$0xff] }
 0x277   :  { %v10119_v3 = vadd.f32 %v3390_v58, %v2236_v56  ;;  %v3392_v7 = vpop.f32.mrb[13].mxu0  ;;  %3654 = vmatmul.mubr.f32.gmra.mrb[118].mxu0 %v1087_v57  ;;  %6854 = vmatprep.mubr.f32.mxu1 %v1340_v21  ;;  %v12282_v57 = vld [vmem:[#allocation26_spill] sm:$0xff]  ;;  %v1219_v56 = vld [vmem:[#allocation2 + $0x351] sm:$0xff] }
 0x278   :  { %3658 = vmatprep.mubr.f32.mxu0 %v1216_v49  ;;  %v2251_v21 = vadd.f32 %v10045_v30, %v12282_v57 }
 0x279   :  { %v10123_v18 = vpop.f32.mrb[78].mxu1 }
 0x27a   :  { %v3395_v42 = vpop.f32.mrb[14].mxu0  ;;  %v2787_v20 = vpop.f32.mrb[79].mxu1  ;;  %6855 = vmatmul.mubr.f32.gmra.mrb[184].mxu1 %v1341_v43  ;;  %v12283_v43 = vld [vmem:[#allocation28_spill] sm:$0xff] }
 0x27b   :  { %v10125_v9 = vadd.f32 %v3395_v42, %v2241_v55  ;;  %v3397_v47 = vpop.f32.mrb[15].mxu0  ;;  %3659 = vmatmul.mubr.f32.gmra.mrb[120].mxu0 %v9795_v28  ;;  %6857 = vmatprep.mubr.f32.mxu1 %v1342_v1  ;;  %v1345_v28 = vld [vmem:[#allocation2 + $0x33a] sm:$0xff]  ;;  %v2256_v1 = vadd.f32 %v10045_v30, %v12283_v43 }
 0x27c   :  { %3663 = vmatprep.mubr.f32.mxu0 %v1217_v0  ;;  %v12284_v47 = vld [vmem:[#allocation29_spill] sm:$0xff] }
 0x27d   :  { %v10130_v10 = vpop.f32.mrb[80].mxu1 }
 0x27e   :  { %v3400_v15 = vpop.f32.mrb[16].mxu0  ;;  %v2792_v60 = vpop.f32.mrb[81].mxu1  ;;  %6858 = vmatmul.mubr.f32.gmra.mrb[186].mxu1 %v1343_v36  ;;  %v2261_v36 = vadd.f32 %v10045_v30, %v12284_v47 }
 0x27f   :  { %v10132_v54 = vadd.f32 %v3400_v15, %v2246_v16  ;;  %v3402_v14 = vpop.f32.mrb[17].mxu0  ;;  %3664 = vmatmul.mubr.f32.gmra.mrb[122].mxu0 %v9808_v62  ;;  %6860 = vmatprep.mubr.f32.mxu1 %v1344_v53  ;;  %v1347_v62 = vld [vmem:[#allocation2 + $0x352] sm:$0xff]  ;;  %v12285_v60 = vld [vmem:[#allocation30_spill] sm:$0xff] }
 0x280   :  { %3668 = vmatprep.mubr.f32.mxu0 %v1218_v33  ;;  %v2266_v14 = vadd.f32 %v10045_v30, %v12285_v60 }
 0x281   :  { %v10137_v24 = vpop.f32.mrb[82].mxu1 }
 0x282   :  { %v3405_v49 = vpop.f32.mrb[18].mxu0  ;;  %v2797_v58 = vpop.f32.mrb[83].mxu1  ;;  %6861 = vmatmul.mubr.f32.gmra.mrb[188].mxu1 %v1345_v28 }
 0x283   :  { %v10139_v34 = vadd.f32 %v3405_v49, %v2251_v21  ;;  %v3407_v7 = vpop.f32.mrb[19].mxu0  ;;  %3669 = vmatmul.mubr.f32.gmra.mrb[124].mxu0 %v9813_v5  ;;  %6863 = vmatprep.mubr.f32.mxu1 %v1346_v40 }
 0x284   :  { %3673 = vmatprep.mubr.f32.mxu0 %v1219_v56  ;;  %v12286_v56 = vld [vmem:[#allocation31_spill] sm:$0xff] }
 0x285   :  { %v10144_v13 = vpop.f32.mrb[84].mxu1  ;;  %v2271_v49 = vadd.f32 %v10045_v30, %v12286_v56 }
 0x286   :  { %v3410_v55 = vpop.f32.mrb[20].mxu0  ;;  %v2802_v0 = vpop.f32.mrb[85].mxu1  ;;  %6864 = vmatmul.mubr.f32.gmra.mrb[190].mxu1 %v1347_v62 }
 0x287   :  { %v10146_v42 = vadd.f32 %v3410_v55, %v2256_v1  ;;  %v3412_v20 = vpop.f32.mrb[21].mxu0  ;;  %3674 = vmatmul.mubr.f32.gmra.mrb[126].mxu0 %v9813_v5  ;;  %v2276_v55 = vadd.f32 %v10045_v30, %v9547_v12  ;;  %v7154_v12 = vadd.f32 %v10045_v30, %v9879_v63 }
 0x289   :  { %v10151_v53 = vpop.f32.mrb[86].mxu1 }
 0x28a   :  { %v3415_v50 = vpop.f32.mrb[22].mxu0  ;;  %v2807_v16 = vpop.f32.mrb[87].mxu1 }
 0x28b   :  { %v10153_v33 = vadd.f32 %v3415_v50, %v2261_v36  ;;  %v3417_v15 = vpop.f32.mrb[23].mxu0  ;;  %v12287_v16 = vld [vmem:[#allocation32_spill] sm:$0xff] }
 0x28c   :  { %v2281_v15 = vadd.f32 %v10045_v30, %v12287_v16 }
 0x28d   :  { %v10157_v28 = vpop.f32.mrb[88].mxu1 }
 0x28e   :  { %v3420_v40 = vpop.f32.mrb[24].mxu0  ;;  %v2812_v57 = vpop.f32.mrb[89].mxu1 }
 0x28f   :  { %v10159_v21 = vadd.f32 %v3420_v40, %v2266_v14  ;;  %v3422_v5 = vpop.f32.mrb[25].mxu0 }
 0x291   :  { %v10163_v58 = vpop.f32.mrb[90].mxu1 }
 0x292   :  { %v3425_v7 = vpop.f32.mrb[26].mxu0  ;;  %v2817_v62 = vpop.f32.mrb[91].mxu1 }
 0x293   :  { %v10165_v43 = vadd.f32 %v3425_v7, %v2271_v49  ;;  %v3427_v1 = vpop.f32.mrb[27].mxu0  ;;  %v10183_v49 = vpop.permute.xlu1 %4644 }
 0x294   :  { %12288 = vst [vmem:[#allocation13_spill] sm:$0xff] %v10183_v49 }
 0x295   :  { %v10169_v0 = vpop.f32.mrb[92].mxu1 }
 0x296   :  { %v3430_v20 = vpop.f32.mrb[28].mxu0  ;;  %v2822_v47 = vpop.f32.mrb[93].mxu1 }
 0x297   :  { %v10171_v36 = vadd.f32 %v3430_v20, %v2276_v55  ;;  %v3432_v50 = vpop.f32.mrb[29].mxu0  ;;  %v10187_v20 = vpop.permute.xlu0 %4640  ;;  %v7156_v47 = vadd.f32 %v10045_v30, %v9890_v45 }
 0x298   :  { %12289 = vst [vmem:[#allocation15_spill] sm:$0xff] %v10187_v20 }
 0x299   :  { %v10175_v60 = vpop.f32.mrb[94].mxu1 }
 0x29a   :  { %v3435_v14 = vpop.f32.mrb[30].mxu0  ;;  %v2827_v40 = vpop.f32.mrb[95].mxu1 }
 0x29b   :  { %v10177_v57 = vadd.f32 %v3435_v14, %v2281_v15  ;;  %v3437_v5 = vpop.f32.mrb[31].mxu0  ;;  %v10195_v40 = vpop.permute.xlu1 %4646 }
 0x29c   :  { %12290 = vst [vmem:[#allocation17_spill] sm:$0xff] %v10195_v40  ;;  %v7158_v5 = vadd.f32 %v10045_v30, %v9901_v26 }
 0x29d   :  { %v10181_v56 = vpop.f32.mrb[96].mxu1 }
 0x29e   :  { %v3440_v7 = vpop.f32.mrb[32].mxu0  ;;  %v2832_v62 = vpop.f32.mrb[97].mxu1 }
 0x29f   :  { %v10185_v1 = vadd.f32 %v7154_v12, %v3440_v7  ;;  %v3442_v55 = vpop.f32.mrb[33].mxu0  ;;  %v10201_v7 = vpop.permute.xlu0 %4642 }
 0x2a0   :  { %12292 = vst [vmem:[#allocation21_spill] sm:$0xff] %v10201_v7 }
 0x2a1   :  { %v10191_v50 = vpop.f32.mrb[98].mxu1 }
 0x2a2   :  { %v3445_v16 = vpop.f32.mrb[34].mxu0  ;;  %v2837_v15 = vpop.f32.mrb[99].mxu1 }
 0x2a3   :  { %v10193_v14 = vadd.f32 %v7156_v47, %v3445_v16  ;;  %v3447_v63 = vpop.f32.mrb[35].mxu0  ;;  %v7160_v15 = vadd.f32 %v10045_v30, %v9912_v19  ;;  %v10209_v16 = vpop.permute.xlu1 %4650 }
 0x2a4   :  { %12294 = vst [vmem:[#allocation25_spill] sm:$0xff] %v10209_v16 }
 0x2a5   :  { %v10199_v12 = vpop.f32.mrb[100].mxu1 }
 0x2a6   :  { %12291 = vst [vmem:[#allocation19_spill] sm:$0xff] %v10199_v12  ;;  %v3450_v62 = vpop.f32.mrb[36].mxu0  ;;  %v2842_v55 = vpop.f32.mrb[101].mxu1 }
 0x2a7   :  { %v10203_v49 = vadd.f32 %v7158_v5, %v3450_v62  ;;  %v3452_v45 = vpop.f32.mrb[37].mxu0  ;;  %v10213_v12 = vpop.permute.xlu0 %4648  ;;  %v7162_v55 = vadd.f32 %v10045_v30, %v9923_v17 }
 0x2a8   :  { %12295 = vst [vmem:[#allocation27_spill] sm:$0xff] %v10213_v12 }
 0x2a9   :  { %v10207_v47 = vpop.f32.mrb[102].mxu1 }
 0x2aa   :  { %12293 = vst [vmem:[#allocation23_spill] sm:$0xff] %v10207_v47  ;;  %v3455_v63 = vpop.f32.mrb[38].mxu0  ;;  %v2847_v40 = vpop.f32.mrb[103].mxu1 }
 0x2ab   :  { %v10211_v20 = vadd.f32 %v7160_v15, %v3455_v63  ;;  %v3457_v26 = vpop.f32.mrb[39].mxu0  ;;  %v10221_v47 = vpop.permute.xlu1 %4654  ;;  %v7164_v40 = vadd.f32 %v10045_v30, %v9934_v41 }
 0x2ac   :  { %12297 = vst [vmem:[#allocation11_spill] sm:$0xff] %v10221_v47  ;;  %v10227_v63 = vpop.permute.xlu0 %4652 }
 0x2ad   :  { %v10217_v5 = vpop.f32.mrb[104].mxu1  ;;  %12299 = vst [vmem:[#allocation14_spill] sm:$0xff] %v10227_v63 }
 0x2ae   :  { %12296 = vst [vmem:[#allocation10_spill] sm:$0xff] %v10217_v5  ;;  %v3460_v62 = vpop.f32.mrb[40].mxu0  ;;  %v2852_v45 = vpop.f32.mrb[105].mxu1 }
 0x2af   :  { %v10219_v7 = vadd.f32 %v7162_v55, %v3460_v62  ;;  %v3462_v19 = vpop.f32.mrb[41].mxu0  ;;  %v7166_v45 = vadd.f32 %v10045_v30, %v9945_v38  ;;  %v10235_v62 = vpop.permute.xlu1 %4658 }
 0x2b0   :  { %12301 = vst [vmem:[#allocation18_spill] sm:$0xff] %v10235_v62 }
 0x2b1   :  { %v10225_v15 = vpop.f32.mrb[106].mxu1 }
 0x2b2   :  { %12298 = vst [vmem:[#allocation12_spill] sm:$0xff] %v10225_v15  ;;  %v3465_v26 = vpop.f32.mrb[42].mxu0  ;;  %v2857_v12 = vpop.f32.mrb[107].mxu1 }
 0x2b3   :  { %v10229_v16 = vadd.f32 %v7164_v40, %v3465_v26  ;;  %v3467_v17 = vpop.f32.mrb[43].mxu0  ;;  %v10239_v15 = vpop.permute.xlu0 %4656  ;;  %v7168_v12 = vadd.f32 %v10045_v30, %v9956_v51 }
 0x2b4   :  { %12302 = vst [vmem:[#allocation20_spill] sm:$0xff] %v10239_v15 }
 0x2b5   :  { %v10233_v55 = vpop.f32.mrb[108].mxu1 }
 0x2b6   :  { %12300 = vst [vmem:[#allocation16_spill] sm:$0xff] %v10233_v55  ;;  %v3470_v19 = vpop.f32.mrb[44].mxu0  ;;  %v2862_v47 = vpop.f32.mrb[109].mxu1 }
 0x2b7   :  { %v10237_v5 = vadd.f32 %v7166_v45, %v3470_v19  ;;  %v3472_v41 = vpop.f32.mrb[45].mxu0  ;;  %v10247_v55 = vpop.permute.xlu1 %4662  ;;  %v7170_v47 = vadd.f32 %v10045_v30, %v9967_v4 }
 0x2b8   :  { %12304 = vst [vmem:[#allocation24_spill] sm:$0xff] %v10247_v55  ;;  %v10253_v19 = vpop.permute.xlu0 %4660 }
 0x2b9   :  { %v10243_v40 = vpop.f32.mrb[110].mxu1  ;;  %12306 = vst [vmem:[#allocation28_spill] sm:$0xff] %v10253_v19 }
 0x2ba   :  { %12303 = vst [vmem:[#allocation22_spill] sm:$0xff] %v10243_v40  ;;  %v3475_v26 = vpop.f32.mrb[46].mxu0  ;;  %v2867_v17 = vpop.f32.mrb[111].mxu1 }
 0x2bb   :  { %v10245_v63 = vadd.f32 %v7168_v12, %v3475_v26  ;;  %v3477_v38 = vpop.f32.mrb[47].mxu0  ;;  %v7172_v17 = vadd.f32 %v10045_v30, %v9978_v59  ;;  %v10261_v26 = vpop.permute.xlu1 %4666 }
 0x2bc   :  { %12308 = vst [vmem:[#allocation30_spill] sm:$0xff] %v10261_v26 }
 0x2bd   :  { %v10251_v45 = vpop.f32.mrb[112].mxu1 }
 0x2be   :  { %12305 = vst [vmem:[#allocation26_spill] sm:$0xff] %v10251_v45  ;;  %v3480_v41 = vpop.f32.mrb[48].mxu0  ;;  %v2872_v15 = vpop.f32.mrb[113].mxu1 }
 0x2bf   :  { %v10255_v62 = vadd.f32 %v7170_v47, %v3480_v41  ;;  %v3482_v51 = vpop.f32.mrb[49].mxu0  ;;  %v10265_v45 = vpop.permute.xlu0 %4664  ;;  %v7174_v15 = vadd.f32 %v10045_v30, %v9989_v27 }
 0x2c0   :  { %12309 = vst [vmem:[#allocation31_spill] sm:$0xff] %v10265_v45 }
 0x2c1   :  { %v10259_v12 = vpop.f32.mrb[114].mxu1 }
 0x2c2   :  { %12307 = vst [vmem:[#allocation29_spill] sm:$0xff] %v10259_v12  ;;  %v3485_v38 = vpop.f32.mrb[50].mxu0  ;;  %v2877_v55 = vpop.f32.mrb[115].mxu1 }
 0x2c3   :  { %v10263_v40 = vadd.f32 %v7172_v17, %v3485_v38  ;;  %v3487_v4 = vpop.f32.mrb[51].mxu0  ;;  %v10273_v12 = vpop.permute.xlu1 %4670  ;;  %v7176_v55 = vadd.f32 %v10045_v30, %v9999_v11 }
 0x2c4   :  { %12311 = vst [vmem:[#allocation33_spill] sm:$0xff] %v10273_v12  ;;  %v10279_v38 = vpop.permute.xlu0 %4668 }
 0x2c5   :  { %v10269_v47 = vpop.f32.mrb[116].mxu1  ;;  %12313 = vst [vmem:[#allocation35_spill] sm:$0xff] %v10279_v38 }
 0x2c6   :  { %12310 = vst [vmem:[#allocation32_spill] sm:$0xff] %v10269_v47  ;;  %v3490_v41 = vpop.f32.mrb[52].mxu0  ;;  %v2882_v51 = vpop.f32.mrb[117].mxu1 }
 0x2c7   :  { %v10271_v19 = vadd.f32 %v7174_v15, %v3490_v41  ;;  %v3492_v59 = vpop.f32.mrb[53].mxu0  ;;  %v7178_v51 = vadd.f32 %v10045_v30, %v10009_v2  ;;  %v10287_v41 = vpop.permute.xlu1 %4674 }
 0x2c8   :  { %12315 = vst [vmem:[#allocation37_spill] sm:$0xff] %v10287_v41 }
 0x2c9   :  { %v10277_v17 = vpop.f32.mrb[118].mxu1 }
 0x2ca   :  { %12312 = vst [vmem:[#allocation34_spill] sm:$0xff] %v10277_v17  ;;  %v3495_v4 = vpop.f32.mrb[54].mxu0  ;;  %v2887_v45 = vpop.f32.mrb[119].mxu1 }
 0x2cb   :  { %v10281_v26 = vadd.f32 %v7176_v55, %v3495_v4  ;;  %v3497_v27 = vpop.f32.mrb[55].mxu0  ;;  %v10291_v17 = vpop.permute.xlu0 %4672  ;;  %v7180_v45 = vadd.f32 %v10045_v30, %v10019_v48 }
 0x2cc   :  { %12316 = vst [vmem:[#allocation38_spill] sm:$0xff] %v10291_v17 }
 0x2cd   :  { %v10285_v15 = vpop.f32.mrb[120].mxu1 }
 0x2ce   :  { %12314 = vst [vmem:[#allocation36_spill] sm:$0xff] %v10285_v15  ;;  %v3500_v59 = vpop.f32.mrb[56].mxu0  ;;  %v2892_v12 = vpop.f32.mrb[121].mxu1 }
 0x2cf   :  { %v10289_v47 = vadd.f32 %v7178_v51, %v3500_v59  ;;  %v3502_v11 = vpop.f32.mrb[57].mxu0  ;;  %v10299_v15 = vpop.permute.xlu1 %4678  ;;  %v7182_v12 = vadd.f32 %v10045_v30, %v10029_v8 }
 0x2d0   :  { %12318 = vst [vmem:[#allocation40_spill] sm:$0xff] %v10299_v15  ;;  %v10305_v59 = vpop.permute.xlu0 %4676 }
 0x2d1   :  { %v10295_v55 = vpop.f32.mrb[122].mxu1  ;;  %12320 = vst [vmem:[#allocation42_spill] sm:$0xff] %v10305_v59 }
 0x2d2   :  { %12317 = vst [vmem:[#allocation39_spill] sm:$0xff] %v10295_v55  ;;  %v3505_v4 = vpop.f32.mrb[58].mxu0  ;;  %v2897_v27 = vpop.f32.mrb[123].mxu1 }
 0x2d3   :  { %v10297_v38 = vadd.f32 %v7180_v45, %v3505_v4  ;;  %v3507_v2 = vpop.f32.mrb[59].mxu0  ;;  %v7184_v27 = vadd.f32 %v10045_v30, %v10039_v61  ;;  %v10313_v4 = vpop.permute.xlu1 %4682 }
 0x2d4   :  { %12322 = vst [vmem:[#allocation44_spill] sm:$0xff] %v10313_v4 }
 0x2d5   :  { %v10303_v51 = vpop.f32.mrb[124].mxu1 }
 0x2d6   :  { %12319 = vst [vmem:[#allocation41_spill] sm:$0xff] %v10303_v51  ;;  %v3510_v11 = vpop.f32.mrb[60].mxu0  ;;  %v2902_v17 = vpop.f32.mrb[125].mxu1 }
 0x2d7   :  { %v10307_v41 = vadd.f32 %v7182_v12, %v3510_v11  ;;  %v3512_v48 = vpop.f32.mrb[61].mxu0  ;;  %v10317_v51 = vpop.permute.xlu0 %4680  ;;  %v7186_v17 = vadd.f32 %v10045_v30, %v10056_v31 }
 0x2d8   :  { %12323 = vst [vmem:[#allocation45_spill] sm:$0xff] %v10317_v51 }
 0x2d9   :  { %v10311_v45 = vpop.f32.mrb[126].mxu1 }
 0x2da   :  { %12321 = vst [vmem:[#allocation43_spill] sm:$0xff] %v10311_v45  ;;  %v3515_v2 = vpop.f32.mrb[62].mxu0  ;;  %v2907_v15 = vpop.f32.mrb[127].mxu1 }
 0x2db   :  { %v10315_v55 = vadd.f32 %v7184_v27, %v3515_v2  ;;  %v3517_v8 = vpop.f32.mrb[63].mxu0  ;;  %v10329_v15 = vpop.permute.xlu1 %4686  ;;  %v7188_v27 = vadd.f32 %v10045_v30, %v10070_v25  ;;  %v7190_v25 = vadd.f32 %v10045_v30, %v10084_v32  ;;  %v7192_v32 = vadd.f32 %v10045_v30, %v10098_v46 }
 0x2dc   :  { %12324 = vst [vmem:[#allocation46_spill] sm:$0xff] %v10329_v15  ;;  %v10335_v2 = vpop.permute.xlu0 %4684  ;;  %v7194_v46 = vadd.f32 %v10045_v30, %v10105_v44  ;;  %v7196_v44 = vadd.f32 %v10045_v30, %v10111_v22  ;;  %v7198_v22 = vadd.f32 %v10045_v30, %v10117_v37  ;;  %v7200_v37 = vadd.f32 %v10045_v30, %v10123_v18 }
 0x2dd   :  { %v6772_v12 = vpop.f32.mrb[128].mxu1  ;;  %12325 = vst [vmem:[#allocation47_spill] sm:$0xff] %v10335_v2  ;;  %v7202_v18 = vadd.f32 %v10045_v30, %v10130_v10  ;;  %v7204_v10 = vadd.f32 %v10045_v30, %v10137_v24  ;;  %v7206_v24 = vadd.f32 %v10045_v30, %v10144_v13  ;;  %v7208_v13 = vadd.f32 %v10045_v30, %v10151_v53 }
 0x2de   :  { %v3520_v11 = vpop.f32.mrb[64].mxu0  ;;  %v10322_v48 = vadd.f32 %v10073_v23, %v6772_v12  ;;  %v3745_v61 = vpop.f32.mrb[129].mxu1 }
 0x2df   :  { %v10324_v59 = vadd.f32 %v7186_v17, %v3520_v11  ;;  %v3522_v45 = vpop.f32.mrb[65].mxu0  ;;  %v10327_v4 = vadd.f32 %v10059_v6, %v3745_v61  ;;  %v10349_v61 = vpop.permute.xlu1 %4690 }
 0x2e0   :  { %7515 = vtanh.f32 %v10322_v48  ;;  %12326 = vst [vmem:[#allocation48_spill] sm:$0xff] %v10349_v61 }
 0x2e1   :  { %7517 = vtanh.f32 %v10327_v4  ;;  %v6775_v31 = vpop.f32.mrb[130].mxu1 }
 0x2e2   :  { %v3525_v23 = vpop.f32.mrb[66].mxu0  ;;  %v10338_v8 = vadd.f32 %v10101_v29, %v6775_v31  ;;  %v3755_v45 = vpop.f32.mrb[131].mxu1 }
 0x2e3   :  { %v10340_v17 = vadd.f32 %v7188_v27, %v3525_v23  ;;  %v3527_v6 = vpop.f32.mrb[67].mxu0  ;;  %v10343_v12 = vadd.f32 %v10087_v35, %v3755_v45  ;;  %v10359_v45 = vpop.permute.xlu0 %4688 }
 0x2e4   :  { %7519 = vtanh.f32 %v10338_v8  ;;  %12327 = vst [vmem:[#allocation49_spill] sm:$0xff] %v10359_v45  ;;  %v10374_v45 = vpop.permute.xlu1 %4694 }
 0x2e5   :  { %7521 = vtanh.f32 %v10343_v12  ;;  %v6778_v11 = vpop.f32.mrb[132].mxu1  ;;  %12328 = vst [vmem:[#allocation50_spill] sm:$0xff] %v10374_v45 }
 0x2e6   :  { %v3530_v2 = vpop.f32.mrb[68].mxu0  ;;  %v10352_v29 = vadd.f32 %v10113_v39, %v6778_v11  ;;  %v3765_v27 = vpop.f32.mrb[133].mxu1 }
 0x2e7   :  { %v10354_v31 = vadd.f32 %v7190_v25, %v3530_v2  ;;  %v3532_v23 = vpop.f32.mrb[69].mxu0  ;;  %v10357_v35 = vadd.f32 %v10107_v52, %v3765_v27 }
 0x2e8   :  { %7523 = vtanh.f32 %v10352_v29  ;;  %v10395_v15 = vpop.permute.xlu1 %4698 }
 0x2e9   :  { %7525 = vtanh.f32 %v10357_v35  ;;  %v6781_v6 = vpop.f32.mrb[134].mxu1  ;;  %12330 = vst [vmem:[#allocation52_spill] sm:$0xff] %v10395_v15 }
 0x2ea   :  { %v7516_v61 = vpop.eup %7515  ;;  %v3535_v39 = vpop.f32.mrb[70].mxu0  ;;  %v10366_v11 = vadd.f32 %v10125_v9, %v6781_v6 }
 0x2eb   :  { %v3775_v2 = vpop.f32.mrb[135].mxu1  ;;  %v7518_v25 = vpop.eup %7517  ;;  %v10368_v23 = vadd.f32 %v7192_v32, %v3535_v39  ;;  %4962 = vrot.lane.b32.xlu1 %v7516_v61, %s8080_s10 }
 0x2ec   :  { %v3537_v52 = vpop.f32.mrb[71].mxu0  ;;  %v10371_v27 = vadd.f32 %v10119_v3, %v3775_v2  ;;  %7527 = vtanh.f32 %v10366_v11  ;;  %4960 = vrot.lane.b32.xlu0 %v7518_v25, %s8080_s10  ;;  %v10381_v32 = vpop.permute.xlu0 %4692 }
 0x2ed   :  { %v6784_v9 = vpop.f32.mrb[136].mxu1  ;;  %12329 = vst [vmem:[#allocation51_spill] sm:$0xff] %v10381_v32 }
 0x2ee   :  { %7529 = vtanh.f32 %v10371_v27  ;;  %v7520_v6 = vpop.eup %7519  ;;  %v3540_v39 = vpop.f32.mrb[72].mxu0  ;;  %v10384_v3 = vadd.f32 %v10139_v34, %v6784_v9 }
 0x2ef   :  { %v3785_v61 = vpop.f32.mrb[137].mxu1  ;;  %v7522_v2 = vpop.eup %7521  ;;  %v10386_v52 = vadd.f32 %v7194_v46, %v3540_v39  ;;  %4966 = vrot.lane.b32.xlu1 %v7520_v6, %s8080_s10 }
 0x2f0   :  { %v3542_v45 = vpop.f32.mrb[73].mxu0  ;;  %v10389_v25 = vadd.f32 %v10132_v54, %v3785_v61  ;;  %4964 = vrot.lane.b32.xlu0 %v7522_v2, %s8080_s10  ;;  %v10406_v61 = vpop.permute.xlu0 %4696  ;;  %7531 = vtanh.f32 %v10384_v3 }
 0x2f1   :  { %v6787_v32 = vpop.f32.mrb[138].mxu1  ;;  %12331 = vst [vmem:[#allocation53_spill] sm:$0xff] %v10406_v61 }
 0x2f2   :  { %v7524_v34 = vpop.eup %7523  ;;  %v3545_v9 = vpop.f32.mrb[74].mxu0  ;;  %v10398_v51 = vadd.f32 %v10153_v33, %v6787_v32  ;;  %7533 = vtanh.f32 %v10389_v25 }
 0x2f3   :  { %v3795_v46 = vpop.f32.mrb[139].mxu1  ;;  %v7526_v45 = vpop.eup %7525  ;;  %v10400_v39 = vadd.f32 %v7196_v44, %v3545_v9  ;;  %4970 = vrot.lane.b32.xlu1 %v7524_v34, %s8080_s10 }
 0x2f4   :  { %v3547_v54 = vpop.f32.mrb[75].mxu0  ;;  %v10403_v6 = vadd.f32 %v10146_v42, %v3795_v46  ;;  %4968 = vrot.lane.b32.xlu0 %v7526_v45, %s8080_s10  ;;  %v10421_v45 = vpop.permute.xlu1 %4702  ;;  %7535 = vtanh.f32 %v10398_v51 }
 0x2f5   :  { %v6790_v33 = vpop.f32.mrb[140].mxu1  ;;  %12332 = vst [vmem:[#allocation54_spill] sm:$0xff] %v10421_v45 }
 0x2f6   :  { %v7528_v32 = vpop.eup %7527  ;;  %v3550_v2 = vpop.f32.mrb[76].mxu0  ;;  %v10413_v44 = vadd.f32 %v10165_v43, %v6790_v33  ;;  %7537 = vtanh.f32 %v10403_v6 }
 0x2f7   :  { %v3805_v9 = vpop.f32.mrb[141].mxu1  ;;  %v10415_v46 = vadd.f32 %v7198_v22, %v3550_v2  ;;  %v3552_v34 = vpop.f32.mrb[77].mxu0  ;;  %4974 = vrot.lane.b32.xlu1 %v7528_v32, %s8080_s10 }
 0x2f8   :  { %v7530_v42 = vpop.eup %7529  ;;  %v10418_v54 = vadd.f32 %v10159_v21, %v3805_v9  ;;  %v10427_v33 = vpop.permute.xlu0 %4700  ;;  %7539 = vtanh.f32 %v10413_v44 }
 0x2f9   :  { %4972 = vrot.lane.b32.xlu0 %v7530_v42, %s8080_s10  ;;  %v6793_v43 = vpop.f32.mrb[142].mxu1  ;;  %12333 = vst [vmem:[#allocation55_spill] sm:$0xff] %v10427_v33  ;;  %v10440_v45 = vpop.permute.xlu1 %4706 }
 0x2fa   :  { %v3555_v22 = vpop.f32.mrb[78].mxu0  ;;  %v10430_v2 = vadd.f32 %v10177_v57, %v6793_v43  ;;  %v3815_v21 = vpop.f32.mrb[143].mxu1  ;;  %12334 = vst [vmem:[#allocation56_spill] sm:$0xff] %v10440_v45  ;;  %7541 = vtanh.f32 %v10418_v54 }
 0x2fb   :  { %v10432_v9 = vadd.f32 %v7200_v37, %v3555_v22  ;;  %v3557_v32 = vpop.f32.mrb[79].mxu0  ;;  %v10435_v34 = vadd.f32 %v10171_v36, %v3815_v21  ;;  %v7532_v43 = vpop.eup %7531 }
 0x2fc   :  { %v10450_v21 = vpop.permute.xlu0 %4704  ;;  %4978 = vrot.lane.b32.xlu1 %v7532_v43, %s8080_s10  ;;  %7543 = vtanh.f32 %v10430_v2 }
 0x2fd   :  { %v6796_v42 = vpop.f32.mrb[144].mxu1  ;;  %12335 = vst [vmem:[#allocation57_spill] sm:$0xff] %v10450_v21  ;;  %v10465_v21 = vpop.permute.xlu1 %4710  ;;  %7545 = vtanh.f32 %v10435_v34 }
 0x2fe   :  { %v3560_v33 = vpop.f32.mrb[80].mxu0  ;;  %v10443_v61 = vadd.f32 %v10193_v14, %v6796_v42  ;;  %v3825_v57 = vpop.f32.mrb[145].mxu1  ;;  %12336 = vst [vmem:[#allocation58_spill] sm:$0xff] %v10465_v21 }
 0x2ff   :  { %v10445_v37 = vadd.f32 %v7202_v18, %v3560_v33  ;;  %v3562_v22 = vpop.f32.mrb[81].mxu0  ;;  %v10448_v36 = vadd.f32 %v10185_v1, %v3825_v57  ;;  %v7534_v42 = vpop.eup %7533 }
 0x300   :  { %4976 = vrot.lane.b32.xlu0 %v7534_v42, %s8080_s10  ;;  %7547 = vtanh.f32 %v10443_v61 }
 0x301   :  { %v6799_v32 = vpop.f32.mrb[146].mxu1  ;;  %7549 = vtanh.f32 %v10448_v36 }
 0x302   :  { %v3565_v14 = vpop.f32.mrb[82].mxu0  ;;  %v10458_v33 = vadd.f32 %v10211_v20, %v6799_v32  ;;  %v3835_v18 = vpop.f32.mrb[147].mxu1 }
 0x303   :  { %v10460_v1 = vadd.f32 %v7204_v10, %v3565_v14  ;;  %v3567_v57 = vpop.f32.mrb[83].mxu0  ;;  %v10463_v22 = vadd.f32 %v10203_v49, %v3835_v18  ;;  %v10471_v20 = vpop.permute.xlu0 %4708 }
 0x304   :  { %12337 = vst [vmem:[#allocation59_spill] sm:$0xff] %v10471_v20  ;;  %v7536_v32 = vpop.eup %7535  ;;  %v10485_v20 = vpop.permute.xlu1 %4714  ;;  %7551 = vtanh.f32 %v10458_v33 }
 0x305   :  { %v6802_v43 = vpop.f32.mrb[148].mxu1  ;;  %4982 = vrot.lane.b32.xlu1 %v7536_v32, %s8080_s10  ;;  %12338 = vst [vmem:[#allocation60_spill] sm:$0xff] %v10485_v20  ;;  %v7538_v21 = vpop.eup %7537  ;;  %7553 = vtanh.f32 %v10463_v22 }
 0x306   :  { %v3570_v45 = vpop.f32.mrb[84].mxu0  ;;  %v10474_v10 = vadd.f32 %v10229_v16, %v6802_v43  ;;  %v3845_v14 = vpop.f32.mrb[149].mxu1  ;;  %4980 = vrot.lane.b32.xlu0 %v7538_v21, %s8080_s10 }
 0x307   :  { %v10477_v49 = vadd.f32 %v7206_v24, %v3570_v45  ;;  %v3572_v18 = vpop.f32.mrb[85].mxu0  ;;  %v10480_v42 = vadd.f32 %v10219_v7, %v3845_v14  ;;  %v10497_v53 = vpop.permute.xlu0 %4712 }
 0x308   :  { %12339 = vst [vmem:[#allocation61_spill] sm:$0xff] %v10497_v53  ;;  %v7540_v14 = vpop.eup %7539  ;;  %v7210_v18 = vadd.f32 %v10045_v30, %v10157_v28  ;;  %v10511_v53 = vpop.permute.xlu1 %4718  ;;  %v7212_v28 = vadd.f32 %v10045_v30, %v10163_v58  ;;  %7555 = vtanh.f32 %v10474_v10 }
 0x309   :  { %v6805_v57 = vpop.f32.mrb[150].mxu1  ;;  %4986 = vrot.lane.b32.xlu1 %v7540_v14, %s8080_s10  ;;  %12342 = vst [vmem:[#allocation64_spill] sm:$0xff] %v10511_v53  ;;  %7557 = vtanh.f32 %v10480_v42 }
 0x30a   :  { %v3575_v16 = vpop.f32.mrb[86].mxu0  ;;  %v10488_v43 = vadd.f32 %v10245_v63, %v6805_v57  ;;  %v3855_v32 = vpop.f32.mrb[151].mxu1 }
 0x30b   :  { %v10492_v7 = vadd.f32 %v7208_v13, %v3575_v16  ;;  %v3577_v45 = vpop.f32.mrb[87].mxu0  ;;  %v10495_v24 = vadd.f32 %v10237_v5, %v3855_v32  ;;  %v7542_v16 = vpop.eup %7541 }
 0x30c   :  { %4984 = vrot.lane.b32.xlu0 %v7542_v16, %s8080_s10  ;;  %v7214_v16 = vadd.f32 %v10045_v30, %v10169_v0  ;;  %v10531_v53 = vpop.permute.xlu1 %4722  ;;  %7559 = vtanh.f32 %v10488_v43 }
 0x30d   :  { %v6808_v63 = vpop.f32.mrb[152].mxu1  ;;  %12345 = vst [vmem:[#allocation67_spill] sm:$0xff] %v10531_v53  ;;  %7561 = vtanh.f32 %v10495_v24 }
 0x30e   :  { %v3580_v57 = vpop.f32.mrb[88].mxu0  ;;  %v10504_v21 = vadd.f32 %v10263_v40, %v6808_v63  ;;  %v3865_v13 = vpop.f32.mrb[153].mxu1 }
 0x30f   :  { %v10506_v45 = vadd.f32 %v7210_v18, %v3580_v57  ;;  %v3582_v5 = vpop.f32.mrb[89].mxu0  ;;  %v10509_v32 = vadd.f32 %v10255_v62, %v3865_v13  ;;  %v10517_v40 = vpop.permute.xlu0 %4716 }
 0x310   :  { %12340 = vst [vmem:[#allocation62_spill] sm:$0xff] %v10504_v21  ;;  %12343 = vst [vmem:[#allocation65_spill] sm:$0xff] %v10517_v40  ;;  %v7544_v63 = vpop.eup %7543  ;;  %7563 = vtanh.f32 %v10504_v21 }
 0x311   :  { %12341 = vst [vmem:[#allocation63_spill] sm:$0xff] %v10509_v32  ;;  %v6811_v14 = vpop.f32.mrb[154].mxu1  ;;  %4990 = vrot.lane.b32.xlu1 %v7544_v63, %s8080_s10  ;;  %v7546_v58 = vpop.eup %7545  ;;  %7565 = vtanh.f32 %v10509_v32 }
 0x312   :  { %v3585_v20 = vpop.f32.mrb[90].mxu0  ;;  %v10520_v18 = vadd.f32 %v10281_v26, %v6811_v14  ;;  %v3875_v57 = vpop.f32.mrb[155].mxu1  ;;  %4988 = vrot.lane.b32.xlu0 %v7546_v58, %s8080_s10 }
 0x313   :  { %v10523_v62 = vadd.f32 %v7212_v28, %v3585_v20  ;;  %v3587_v13 = vpop.f32.mrb[91].mxu0  ;;  %v10526_v5 = vadd.f32 %v10271_v19, %v3875_v57  ;;  %v7548_v28 = vpop.eup %7547 }
 0x314   :  { %v10543_v0 = vpop.permute.xlu0 %4720  ;;  %v7216_v13 = vadd.f32 %v10045_v30, %v10175_v60  ;;  %v10563_v30 = vld [vmem:[%s12140_s3] ss:$0 sm:$0xff]  ;;  %7567 = vtanh.f32 %v10520_v18  ;;  %s8081_s3 = smov 96  }
 0x315   :  { %12344 = vst [vmem:[#allocation66_spill] sm:$0xff] %v10526_v5  ;;  %v6814_v40 = vpop.f32.mrb[156].mxu1  ;;  %12348 = vst [vmem:[#allocation70_spill] sm:$0xff] %v10543_v0  ;;  %4994 = vrot.lane.b32.xlu1 %v7548_v28, %s8080_s10  ;;  %v10558_v28 = vpop.permute.xlu1 %4726  ;;  %v7218_v60 = vadd.f32 %v10563_v30, %v10181_v56  ;;  %7569 = vtanh.f32 %v10526_v5 }
 0x316   :  { %v3590_v26 = vpop.f32.mrb[92].mxu0  ;;  %v10535_v14 = vadd.f32 %v10297_v38, %v6814_v40  ;;  %v3885_v20 = vpop.f32.mrb[157].mxu1  ;;  %12350 = vst [vmem:[#allocation72_spill] sm:$0xff] %v10558_v28 }
 0x317   :  { %v10538_v19 = vadd.f32 %v7214_v16, %v3590_v26  ;;  %v3592_v63 = vpop.f32.mrb[93].mxu0  ;;  %v10541_v57 = vadd.f32 %v10289_v47, %v3885_v20  ;;  %v7550_v38 = vpop.eup %7549 }
 0x318   :  { %12346 = vst [vmem:[#allocation68_spill] sm:$0xff] %v10535_v14  ;;  %4992 = vrot.lane.b32.xlu0 %v7550_v38, %s8080_s10  ;;  %v10568_v63 = vpop.permute.xlu0 %4724  ;;  %7571 = vtanh.f32 %v10535_v14 }
 0x319   :  { %12347 = vst [vmem:[#allocation69_spill] sm:$0xff] %v10541_v57  ;;  %v6817_v58 = vpop.f32.mrb[158].mxu1  ;;  %12351 = vst [vmem:[#allocation73_spill] sm:$0xff] %v10568_v63  ;;  %v7220_v63 = vadd.f32 %v10563_v30, %v10191_v50  ;;  %v10582_v0 = vpop.permute.xlu1 %4730  ;;  %7573 = vtanh.f32 %v10541_v57 }
 0x31a   :  { %v3595_v40 = vpop.f32.mrb[94].mxu0  ;;  %v10550_v53 = vadd.f32 %v10315_v55, %v6817_v58  ;;  %v3895_v16 = vpop.f32.mrb[159].mxu1  ;;  %12354 = vst [vmem:[#allocation76_spill] sm:$0xff] %v10582_v0 }
 0x31b   :  { %v10553_v47 = vadd.f32 %v7216_v13, %v3595_v40  ;;  %v3597_v26 = vpop.f32.mrb[95].mxu0  ;;  %v10556_v20 = vadd.f32 %v10307_v41, %v3895_v16  ;;  %v7552_v13 = vpop.eup %7551 }
 0x31c   :  { %4998 = vrot.lane.b32.xlu1 %v7552_v13, %s8080_s10  ;;  %v7554_v56 = vpop.eup %7553  ;;  %7575 = vtanh.f32 %v10550_v53 }
 0x31d   :  { %12349 = vst [vmem:[#allocation71_spill] sm:$0xff] %v10556_v20  ;;  %v6820_v55 = vpop.f32.mrb[160].mxu1  ;;  %4996 = vrot.lane.b32.xlu0 %v7554_v56, %s8080_s10  ;;  %v7556_v50 = vpop.eup %7555  ;;  %7577 = vtanh.f32 %v10556_v20 }
 0x31e   :  { %v3600_v58 = vpop.f32.mrb[96].mxu0  ;;  %v10571_v41 = vadd.f32 %v10340_v17, %v6820_v55  ;;  %v3905_v38 = vpop.f32.mrb[161].mxu1 }
 0x31f   :  { %v10574_v40 = vadd.f32 %v7218_v60, %v3600_v58  ;;  %v3602_v16 = vpop.f32.mrb[97].mxu0  ;;  %v10577_v26 = vadd.f32 %v10324_v59, %v3905_v38  ;;  %v10594_v38 = vpop.permute.xlu0 %4728 }
 0x320   :  { %12352 = vst [vmem:[#allocation74_spill] sm:$0xff] %v10571_v41  ;;  %12357 = vst [vmem:[#allocation79_spill] sm:$0xff] %v10594_v38  ;;  %v12358_v16 = vld [vmem:[#allocation19_spill] sm:$0xff]  ;;  %5002 = vrot.lane.b32.xlu1 %v7556_v50, %s8080_s10  ;;  %v10608_v38 = vpop.permute.xlu1 %4734  ;;  %7579 = vtanh.f32 %v10571_v41 }
 0x321   :  { %12353 = vst [vmem:[#allocation75_spill] sm:$0xff] %v10577_v26  ;;  %v6823_v28 = vpop.f32.mrb[162].mxu1  ;;  %v7222_v0 = vadd.f32 %v10563_v30, %v12358_v16  ;;  %12361 = vst [vmem:[#allocation81_spill] sm:$0xff] %v10608_v38  ;;  %v12362_v50 = vld [vmem:[#allocation23_spill] sm:$0xff]  ;;  %7581 = vtanh.f32 %v10577_v26 }
 0x322   :  { %v3605_v17 = vpop.f32.mrb[98].mxu0  ;;  %v10586_v55 = vadd.f32 %v10368_v23, %v6823_v28  ;;  %v3915_v60 = vpop.f32.mrb[163].mxu1  ;;  %v7224_v16 = vadd.f32 %v10563_v30, %v12362_v50  ;;  %v12365_v50 = vld [vmem:[#allocation10_spill] sm:$0xff] }
 0x323   :  { %v10589_v59 = vadd.f32 %v7220_v63, %v3605_v17  ;;  %v3607_v13 = vpop.f32.mrb[99].mxu0  ;;  %v10592_v58 = vadd.f32 %v10354_v31, %v3915_v60  ;;  %v7558_v17 = vpop.eup %7557 }
 0x324   :  { %12355 = vst [vmem:[#allocation77_spill] sm:$0xff] %v10586_v55  ;;  %5000 = vrot.lane.b32.xlu0 %v7558_v17, %s8080_s10  ;;  %v10628_v32 = vpop.permute.xlu1 %4738  ;;  %7583 = vtanh.f32 %v10586_v55 }
 0x325   :  { %12356 = vst [vmem:[#allocation78_spill] sm:$0xff] %v10592_v58  ;;  %v6826_v56 = vpop.f32.mrb[164].mxu1  ;;  %12366 = vst [vmem:[#allocation10_spill] sm:$0xff] %v10628_v32  ;;  %7585 = vtanh.f32 %v10592_v58 }
 0x326   :  { %v3610_v23 = vpop.f32.mrb[100].mxu0  ;;  %v10601_v28 = vadd.f32 %v10400_v39, %v6826_v56  ;;  %v3925_v63 = vpop.f32.mrb[165].mxu1 }
 0x327   :  { %v10603_v13 = vadd.f32 %v7222_v0, %v3610_v23  ;;  %v3612_v31 = vpop.f32.mrb[101].mxu0  ;;  %v10606_v60 = vadd.f32 %v10386_v52, %v3925_v63  ;;  %v10614_v39 = vpop.permute.xlu0 %4732 }
 0x328   :  { %12359 = vst [vmem:[#allocation19_spill] sm:$0xff] %v10601_v28  ;;  %12363 = vst [vmem:[#allocation23_spill] sm:$0xff] %v10614_v39  ;;  %v7560_v56 = vpop.eup %7559  ;;  %v7226_v39 = vadd.f32 %v10563_v30, %v12365_v50  ;;  %v12369_v50 = vld [vmem:[#allocation12_spill] sm:$0xff]  ;;  %7587 = vtanh.f32 %v10601_v28 }
 0x329   :  { %12360 = vst [vmem:[#allocation80_spill] sm:$0xff] %v10606_v60  ;;  %v6829_v15 = vpop.f32.mrb[166].mxu1  ;;  %5006 = vrot.lane.b32.xlu1 %v7560_v56, %s8080_s10  ;;  %v7562_v31 = vpop.eup %7561  ;;  %v7228_v32 = vadd.f32 %v10563_v30, %v12369_v50  ;;  %7589 = vtanh.f32 %v10606_v60 }
 0x32a   :  { %v3615_v21 = vpop.f32.mrb[102].mxu0  ;;  %v10617_v0 = vadd.f32 %v10432_v9, %v6829_v15  ;;  %v3935_v23 = vpop.f32.mrb[167].mxu1  ;;  %5004 = vrot.lane.b32.xlu0 %v7562_v31, %s8080_s10 }
 0x32b   :  { %v10620_v52 = vadd.f32 %v7224_v16, %v3615_v21  ;;  %v3617_v63 = vpop.f32.mrb[103].mxu0  ;;  %v10623_v17 = vadd.f32 %v10415_v46, %v3935_v23  ;;  %v10640_v23 = vpop.permute.xlu0 %4736 }
 0x32c   :  { %12368 = vst [vmem:[#allocation84_spill] sm:$0xff] %v10640_v23  ;;  %v7564_v63 = vpop.eup %7563  ;;  %v10654_v23 = vpop.permute.xlu1 %4742  ;;  %7591 = vtanh.f32 %v10617_v0 }
 0x32d   :  { %12364 = vst [vmem:[#allocation82_spill] sm:$0xff] %v10623_v17  ;;  %v6832_v38 = vpop.f32.mrb[168].mxu1  ;;  %5010 = vrot.lane.b32.xlu1 %v7564_v63, %s8080_s10  ;;  %12370 = vst [vmem:[#allocation12_spill] sm:$0xff] %v10654_v23  ;;  %v12371_v63 = vld [vmem:[#allocation16_spill] sm:$0xff]  ;;  %7593 = vtanh.f32 %v10623_v17 }
 0x32e   :  { %v3620_v15 = vpop.f32.mrb[104].mxu0  ;;  %v10632_v9 = vadd.f32 %v10460_v1, %v6832_v38  ;;  %v3945_v21 = vpop.f32.mrb[169].mxu1  ;;  %v7230_v50 = vadd.f32 %v10563_v30, %v12371_v63  ;;  %v12373_v63 = vld [vmem:[#allocation22_spill] sm:$0xff] }
 0x32f   :  { %v10635_v46 = vadd.f32 %v7226_v39, %v3620_v15  ;;  %v3622_v16 = vpop.f32.mrb[105].mxu0  ;;  %v10638_v56 = vadd.f32 %v10445_v37, %v3945_v21  ;;  %v7566_v15 = vpop.eup %7565 }
 0x330   :  { %12367 = vst [vmem:[#allocation83_spill] sm:$0xff] %v10632_v9  ;;  %5008 = vrot.lane.b32.xlu0 %v7566_v15, %s8080_s10  ;;  %v10674_v57 = vpop.permute.xlu1 %4746  ;;  %7595 = vtanh.f32 %v10632_v9 }
 0x331   :  { %v6835_v31 = vpop.f32.mrb[170].mxu1  ;;  %12374 = vst [vmem:[#allocation22_spill] sm:$0xff] %v10674_v57  ;;  %7597 = vtanh.f32 %v10638_v56 }
 0x332   :  { %v3625_v1 = vpop.f32.mrb[106].mxu0  ;;  %v10647_v38 = vadd.f32 %v10492_v7, %v6835_v31  ;;  %v3955_v39 = vpop.f32.mrb[171].mxu1 }
 0x333   :  { %v10649_v16 = vadd.f32 %v7228_v32, %v3625_v1  ;;  %v3627_v37 = vpop.f32.mrb[107].mxu0  ;;  %v10652_v21 = vadd.f32 %v10477_v49, %v3955_v39  ;;  %v10660_v7 = vpop.permute.xlu0 %4740 }
 0x334   :  { %12372 = vst [vmem:[#allocation16_spill] sm:$0xff] %v10660_v7  ;;  %v7568_v31 = vpop.eup %7567  ;;  %v7232_v7 = vadd.f32 %v10563_v30, %v12373_v63  ;;  %v12376_v63 = vld [vmem:[#allocation26_spill] sm:$0xff]  ;;  %7599 = vtanh.f32 %v10647_v38 }
 0x335   :  { %v6838_v14 = vpop.f32.mrb[172].mxu1  ;;  %5014 = vrot.lane.b32.xlu1 %v7568_v31, %s8080_s10  ;;  %v7570_v37 = vpop.eup %7569  ;;  %v7234_v57 = vadd.f32 %v10563_v30, %v12376_v63  ;;  %v12380_v63 = vld [vmem:[#allocation29_spill] sm:$0xff]  ;;  %7601 = vtanh.f32 %v10652_v21 }
 0x336   :  { %v3630_v5 = vpop.f32.mrb[108].mxu0  ;;  %v10663_v32 = vadd.f32 %v10523_v62, %v6838_v14  ;;  %v3965_v1 = vpop.f32.mrb[173].mxu1  ;;  %5012 = vrot.lane.b32.xlu0 %v7570_v37, %s8080_s10 }
 0x337   :  { %v10666_v49 = vadd.f32 %v7230_v50, %v3630_v5  ;;  %v3632_v39 = vpop.f32.mrb[109].mxu0  ;;  %v10669_v15 = vadd.f32 %v10506_v45, %v3965_v1  ;;  %v10684_v1 = vpop.permute.xlu0 %4744 }
 0x338   :  { %12375 = vst [vmem:[#allocation85_spill] sm:$0xff] %v10684_v1  ;;  %v7572_v39 = vpop.eup %7571  ;;  %v10696_v1 = vpop.permute.xlu1 %4750  ;;  %7603 = vtanh.f32 %v10663_v32 }
 0x339   :  { %v6841_v23 = vpop.f32.mrb[174].mxu1  ;;  %5018 = vrot.lane.b32.xlu1 %v7572_v39, %s8080_s10  ;;  %12379 = vst [vmem:[#allocation87_spill] sm:$0xff] %v10696_v1  ;;  %v7236_v39 = vadd.f32 %v10563_v30, %v12380_v63  ;;  %v12384_v63 = vld [vmem:[#allocation32_spill] sm:$0xff] }
 0x33a   :  { %v3635_v62 = vpop.f32.mrb[110].mxu0  ;;  %v10678_v14 = vadd.f32 %v10553_v47, %v6841_v23  ;;  %v3975_v5 = vpop.f32.mrb[175].mxu1  ;;  %v7238_v1 = vadd.f32 %v10563_v30, %v12384_v63  ;;  %v12387_v63 = vld [vmem:[#allocation34_spill] sm:$0xff] }
 0x33b   :  { %v7233_v45 = vadd.f32 %v7232_v7, %v3635_v62  ;;  %v3637_v50 = vpop.f32.mrb[111].mxu0  ;;  %v10682_v31 = vadd.f32 %v10538_v19, %v3975_v5  ;;  %v7574_v62 = vpop.eup %7573  ;;  %7605 = vtanh.f32 %v10669_v15 }
 0x33c   :  { %5016 = vrot.lane.b32.xlu0 %v7574_v62, %s8080_s10  ;;  %v10702_v20 = vpop.permute.xlu0 %4748  ;;  %v10714_v26 = vpop.permute.xlu1 %4754 }
 0x33d   :  { %v6844_v37 = vpop.f32.mrb[176].mxu1  ;;  %12381 = vst [vmem:[#allocation29_spill] sm:$0xff] %v10702_v20  ;;  %12385 = vst [vmem:[#allocation32_spill] sm:$0xff] %v10714_v26  ;;  %v7240_v26 = vadd.f32 %v10563_v30, %v12387_v63  ;;  %v12391_v63 = vld [vmem:[#allocation36_spill] sm:$0xff] }
 0x33e   :  { %v3640_v47 = vpop.f32.mrb[112].mxu0  ;;  %v10691_v23 = vadd.f32 %v10589_v59, %v6844_v37  ;;  %v3985_v7 = vpop.f32.mrb[177].mxu1 }
 0x33f   :  { %v7235_v50 = vadd.f32 %v7234_v57, %v3640_v47  ;;  %v3642_v19 = vpop.f32.mrb[113].mxu0  ;;  %v10694_v5 = vadd.f32 %v10574_v40, %v3985_v7  ;;  %v7576_v59 = vpop.eup %7575  ;;  %7607 = vtanh.f32 %v10678_v14 }
 0x340   :  { %12377 = vst [vmem:[#allocation26_spill] sm:$0xff] %v10691_v23  ;;  %5022 = vrot.lane.b32.xlu1 %v7576_v59, %s8080_s10  ;;  %v7578_v19 = vpop.eup %7577  ;;  %7609 = vtanh.f32 %v10682_v31 }
 0x341   :  { %12378 = vst [vmem:[#allocation86_spill] sm:$0xff] %v10694_v5  ;;  %v6847_v41 = vpop.f32.mrb[178].mxu1  ;;  %5020 = vrot.lane.b32.xlu0 %v7578_v19, %s8080_s10 }
 0x342   :  { %v3645_v37 = vpop.f32.mrb[114].mxu0  ;;  %v10705_v57 = vadd.f32 %v10620_v52, %v6847_v41  ;;  %v3995_v47 = vpop.f32.mrb[179].mxu1 }
 0x343   :  { %v7237_v40 = vadd.f32 %v7236_v39, %v3645_v37  ;;  %v3647_v7 = vpop.f32.mrb[115].mxu0  ;;  %v10709_v62 = vadd.f32 %v10603_v13, %v3995_v47  ;;  %v10724_v47 = vpop.permute.xlu0 %4752 }
 0x344   :  { %12382 = vst [vmem:[#allocation88_spill] sm:$0xff] %v10705_v57  ;;  %12386 = vst [vmem:[#allocation90_spill] sm:$0xff] %v10724_v47  ;;  %v7580_v7 = vpop.eup %7579  ;;  %7611 = vtanh.f32 %v10691_v23  ;;  %v6594_v23 = vmul.f32 -1.442695, %v10327_v4 }
 0x345   :  { %12383 = vst [vmem:[#allocation89_spill] sm:$0xff] %v10709_v62  ;;  %v6850_v20 = vpop.f32.mrb[180].mxu1  ;;  %5026 = vrot.lane.b32.xlu1 %v7580_v7, %s8080_s10  ;;  %v7242_v7 = vadd.f32 %v10563_v30, %v12391_v63 }
 0x346   :  { %v3650_v41 = vpop.f32.mrb[116].mxu0  ;;  %v10718_v52 = vadd.f32 %v10649_v16, %v6850_v20  ;;  %v4005_v39 = vpop.f32.mrb[181].mxu1 }
 0x347   :  { %v7239_v13 = vadd.f32 %v7238_v1, %v3650_v41  ;;  %v3652_v59 = vpop.f32.mrb[117].mxu0  ;;  %v10722_v37 = vadd.f32 %v10635_v46, %v4005_v39  ;;  %v7582_v1 = vpop.eup %7581  ;;  %7613 = vtanh.f32 %v10694_v5 }
 0x348   :  { %v10735_v39 = vpop.permute.xlu1 %4758  ;;  %5024 = vrot.lane.b32.xlu0 %v7582_v1, %s8080_s10  ;;  %v10741_v28 = vpop.permute.xlu0 %4756 }
 0x349   :  { %v6853_v19 = vpop.f32.mrb[182].mxu1  ;;  %12390 = vst [vmem:[#allocation92_spill] sm:$0xff] %v10735_v39  ;;  %12392 = vst [vmem:[#allocation36_spill] sm:$0xff] %v10741_v28 }
 0x34a   :  { %v3655_v20 = vpop.f32.mrb[118].mxu0  ;;  %v10730_v16 = vadd.f32 %v7233_v45, %v6853_v19  ;;  %v4015_v58 = vpop.f32.mrb[183].mxu1 }
 0x34b   :  { %v7241_v41 = vadd.f32 %v7240_v26, %v3655_v20  ;;  %v3657_v59 = vpop.f32.mrb[119].mxu0  ;;  %v10733_v46 = vadd.f32 %v10666_v49, %v4015_v58  ;;  %v7584_v45 = vpop.eup %7583  ;;  %7615 = vtanh.f32 %v10705_v57  ;;  %v6597_v57 = vmul.f32 -1.442695, %v10338_v8 }
 0x34c   :  { %12388 = vst [vmem:[#allocation34_spill] sm:$0xff] %v10730_v16  ;;  %5030 = vrot.lane.b32.xlu1 %v7584_v45, %s8080_s10  ;;  %v7586_v1 = vpop.eup %7585  ;;  %v12395_v59 = vld [vmem:[#allocation39_spill] sm:$0xff]  ;;  %v10751_v60 = vpop.permute.xlu1 %4762  ;;  %7617 = vtanh.f32 %v10709_v62 }
 0x34d   :  { %12389 = vst [vmem:[#allocation91_spill] sm:$0xff] %v10733_v46  ;;  %v6856_v47 = vpop.f32.mrb[184].mxu1  ;;  %v7244_v63 = vadd.f32 %v10563_v30, %v12395_v59  ;;  %12396 = vst [vmem:[#allocation39_spill] sm:$0xff] %v10751_v60  ;;  %5028 = vrot.lane.b32.xlu0 %v7586_v1, %s8080_s10 }
 0x34e   :  { %v3660_v19 = vpop.f32.mrb[120].mxu0  ;;  %v10743_v55 = vadd.f32 %v7237_v40, %v6856_v47  ;;  %v4025_v26 = vpop.f32.mrb[185].mxu1 }
 0x34f   :  { %v7243_v58 = vadd.f32 %v7242_v7, %v3660_v19  ;;  %v3662_v49 = vpop.f32.mrb[121].mxu0  ;;  %v10746_v20 = vadd.f32 %v7235_v50, %v4025_v26  ;;  %v10759_v19 = vpop.permute.xlu0 %4760 }
 0x350   :  { %12393 = vst [vmem:[#allocation93_spill] sm:$0xff] %v10743_v55  ;;  %12398 = vst [vmem:[#allocation96_spill] sm:$0xff] %v10759_v19  ;;  %v7588_v26 = vpop.eup %7587  ;;  %v12399_v49 = vld [vmem:[#allocation41_spill] sm:$0xff]  ;;  %7619 = vtanh.f32 %v10718_v52 }
 0x351   :  { %12394 = vst [vmem:[#allocation94_spill] sm:$0xff] %v10746_v20  ;;  %v6859_v39 = vpop.f32.mrb[186].mxu1  ;;  %v7246_v59 = vadd.f32 %v10563_v30, %v12399_v49  ;;  %5034 = vrot.lane.b32.xlu1 %v7588_v26, %s8080_s10  ;;  %v7590_v17 = vpop.eup %7589 }
 0x352   :  { %v3665_v40 = vpop.f32.mrb[122].mxu0  ;;  %v10754_v47 = vadd.f32 %v7241_v41, %v6859_v39  ;;  %v4035_v28 = vpop.f32.mrb[187].mxu1  ;;  %5032 = vrot.lane.b32.xlu0 %v7590_v17, %s8080_s10 }
 0x353   :  { %v7245_v7 = vadd.f32 %v7244_v63, %v3665_v40  ;;  %v3667_v50 = vpop.f32.mrb[123].mxu0  ;;  %v10757_v45 = vadd.f32 %v7239_v13, %v4035_v28  ;;  %v10769_v13 = vpop.permute.xlu1 %4766 }
 0x354   :  { %12397 = vst [vmem:[#allocation95_spill] sm:$0xff] %v10754_v47  ;;  %12400 = vst [vmem:[#allocation41_spill] sm:$0xff] %v10769_v13  ;;  %v12401_v50 = vld [vmem:[#allocation43_spill] sm:$0xff]  ;;  %v10775_v19 = vpop.permute.xlu0 %4764 }
 0x355   :  { %v6862_v60 = vpop.f32.mrb[188].mxu1  ;;  %v7248_v49 = vadd.f32 %v10563_v30, %v12401_v50  ;;  %12402 = vst [vmem:[#allocation43_spill] sm:$0xff] %v10775_v19 }
 0x356   :  { %v3670_v41 = vpop.f32.mrb[124].mxu0  ;;  %v10765_v39 = vadd.f32 %v7245_v7, %v6862_v60  ;;  %v4045_v1 = vpop.f32.mrb[189].mxu1 }
 0x357   :  { %v7247_v63 = vadd.f32 %v7246_v59, %v3670_v41  ;;  %v3672_v40 = vpop.f32.mrb[125].mxu0  ;;  %v10767_v28 = vadd.f32 %v7243_v58, %v4045_v1  ;;  %v7592_v60 = vpop.eup %7591 }
 0x358   :  { %5038 = vrot.lane.b32.xlu1 %v7592_v60, %s8080_s10  ;;  %v7594_v17 = vpop.eup %7593 }
 0x359   :  { %v6865_v26 = vpop.f32.mrb[190].mxu1  ;;  %5036 = vrot.lane.b32.xlu0 %v7594_v17, %s8080_s10  ;;  %v7596_v50 = vpop.eup %7595 }
 0x35a   :  { %v3675_v7 = vpop.f32.mrb[126].mxu0  ;;  %v4055_v9 = vpop.f32.mrb[191].mxu1 }
 0x35b   :  { %v7249_v59 = vadd.f32 %v7248_v49, %v3675_v7  ;;  %v3677_v58 = vpop.f32.mrb[127].mxu0  ;;  %v10778_v41 = vadd.f32 %v7247_v63, %v4055_v9  ;;  %v7598_v9 = vpop.eup %7597 }
 0x35c   :  { %5042 = vrot.lane.b32.xlu1 %v7596_v50, %s8080_s10 }
 0x35d   :  { %v10781_v1 = vadd.f32 %v7249_v59, %v6865_v26  ;;  %v10783_v30 = vpop.permute.xlu1 %4962  ;;  %5040 = vrot.lane.b32.xlu0 %v7598_v9, %s8080_s10  ;;  %v7600_v26 = vpop.eup %7599 }
 0x35e   :  { %v10787_v40 = vpop.permute.xlu0 %4960  ;;  %v7602_v7 = vpop.eup %7601 }
 0x35f   :  { %v7604_v58 = vpop.eup %7603 }
 0x360   :  { %5046 = vrot.lane.b32.xlu1 %v7600_v26, %s8080_s10  ;;  %v7606_v50 = vpop.eup %7605 }
 0x361   :  { %v10790_v49 = vpop.permute.xlu1 %4966  ;;  %5044 = vrot.lane.b32.xlu0 %v7602_v7, %s8080_s10  ;;  %v7608_v26 = vpop.eup %7607 }
 0x362   :  { %v10795_v63 = vpop.permute.xlu0 %4964  ;;  %v7610_v13 = vpop.eup %7609 }
 0x363   :  { %v7612_v19 = vpop.eup %7611 }
 0x364   :  { %5050 = vrot.lane.b32.xlu1 %v7604_v58, %s8080_s10 }
 0x365   :  { %v10798_v60 = vpop.permute.xlu1 %4970  ;;  %5048 = vrot.lane.b32.xlu0 %v7606_v50, %s8080_s10  ;;  %v6595_v50 = vmul.f32 -1.442695, %v10322_v48 }
 0x366   :  { %v10803_v59 = vpop.permute.xlu0 %4968 }
 0x367   :  { %7621 = vpow2.f32 %v6595_v50 }
 0x368   :  { %5054 = vrot.lane.b32.xlu1 %v7608_v26, %s8080_s10  ;;  %v7614_v26 = vpop.eup %7613  ;;  %7623 = vtanh.f32 %v10722_v37 }
 0x369   :  { %v10806_v17 = vpop.permute.xlu1 %4974  ;;  %5052 = vrot.lane.b32.xlu0 %v7610_v13, %s8080_s10  ;;  %v7616_v62 = vpop.eup %7615  ;;  %7625 = vpow2.f32 %v6594_v23  ;;  %v6598_v23 = vmul.f32 -1.442695, %v10357_v35 }
 0x36a   :  { %7627 = vtanh.f32 %v10730_v16  ;;  %v7618_v4 = vpop.eup %7617 }
 0x36b   :  { %v10811_v9 = vpop.permute.xlu0 %4972  ;;  %7629 = vpow2.f32 %v6597_v57  ;;  %v7620_v8 = vpop.eup %7619 }
 0x36c   :  { %5058 = vrot.lane.b32.xlu1 %v7612_v19, %s8080_s10  ;;  %v6596_v19 = vmul.f32 -1.442695, %v10343_v12  ;;  %7631 = vtanh.f32 %v10733_v46 }
 0x36d   :  { %5056 = vrot.lane.b32.xlu0 %v7614_v26, %s8080_s10  ;;  %v6599_v26 = vmul.f32 -1.442695, %v10352_v29 }
 0x36e   :  { %v10814_v7 = vpop.permute.xlu1 %4978  ;;  %7633 = vpow2.f32 %v6596_v19 }
 0x36f   :  { %7635 = vtanh.f32 %v10743_v55 }
 0x370   :  { %5062 = vrot.lane.b32.xlu1 %v7616_v62, %s8080_s10  ;;  %7637 = vpow2.f32 %v6599_v26  ;;  %v6600_v26 = vmul.f32 -1.442695, %v10371_v27 }
 0x371   :  { %5060 = vrot.lane.b32.xlu0 %v7618_v4, %s8080_s10  ;;  %v7622_v12 = vpop.eup %7621  ;;  %v6601_v4 = vmul.f32 -1.442695, %v10366_v11  ;;  %7639 = vpow2.f32 %v6598_v23 }
 0x372   :  { %v10819_v58 = vpop.permute.xlu0 %4976  ;;  %v7624_v57 = vpop.eup %7623  ;;  %7641 = vtanh.f32 %v10746_v20  ;;  %v4257_v19 = vadd.f32 1.0, %v7622_v12 }
 0x373   :  { %v7626_v46 = vpop.eup %7625  ;;  %7643 = vpow2.f32 %v6601_v4 }
 0x374   :  { %5066 = vrot.lane.b32.xlu1 %v7620_v8, %s8080_s10  ;;  %v7628_v35 = vpop.eup %7627  ;;  %v4256_v16 = vadd.f32 1.0, %v7626_v46  ;;  %7645 = vtanh.f32 %v10754_v47 }
 0x375   :  { %5064 = vrot.lane.b32.xlu0 %v7624_v57, %s8080_s10  ;;  %v7630_v55 = vpop.eup %7629  ;;  %7647 = vrcp.f32 %v4257_v19  ;;  %v6603_v57 = vmul.f32 -1.442695, %v10384_v3  ;;  %v6602_v3 = vmul.f32 -1.442695, %v10389_v25 }
 0x376   :  { %v7632_v11 = vpop.eup %7631  ;;  %v4259_v12 = vadd.f32 1.0, %v7630_v55  ;;  %7649 = vtanh.f32 %v10757_v45 }
 0x377   :  { %v10823_v5 = vpop.permute.xlu1 %4982  ;;  %7651 = vrcp.f32 %v4256_v16 }
 0x378   :  { %v10829_v13 = vpop.permute.xlu0 %4980  ;;  %5070 = vrot.lane.b32.xlu1 %v7628_v35, %s8080_s10  ;;  %v7634_v23 = vpop.eup %7633  ;;  %7653 = vpow2.f32 %v6600_v26  ;;  %v6605_v26 = vmul.f32 -1.442695, %v10398_v51 }
 0x379   :  { %5068 = vrot.lane.b32.xlu0 %v7632_v11, %s8080_s10  ;;  %v7636_v4 = vpop.eup %7635  ;;  %v4258_v46 = vadd.f32 1.0, %v7634_v23  ;;  %7655 = vpow2.f32 %v6603_v57  ;;  %v6604_v57 = vmul.f32 -1.442695, %v10403_v6  ;;  %v6606_v6 = vmul.f32 -1.442695, %v10418_v54 }
 0x37a   :  { %v7638_v35 = vpop.eup %7637  ;;  %7657 = vrcp.f32 %v4259_v12 }
 0x37b   :  { %v10833_v48 = vpop.permute.xlu1 %4986  ;;  %v7640_v27 = vpop.eup %7639  ;;  %v4261_v11 = vadd.f32 1.0, %v7638_v35  ;;  %7659 = vtanh.f32 %v10765_v39 }
 0x37c   :  { %5074 = vrot.lane.b32.xlu1 %v7636_v4, %s8080_s10  ;;  %v7642_v19 = vpop.eup %7641  ;;  %7661 = vrcp.f32 %v4258_v46  ;;  %v4260_v4 = vadd.f32 1.0, %v7640_v27  ;;  %v6607_v46 = vmul.f32 -1.442695, %v10413_v44 }
 0x37d   :  { %5072 = vrot.lane.b32.xlu0 %v7642_v19, %s8080_s10  ;;  %v7644_v16 = vpop.eup %7643  ;;  %7663 = vpow2.f32 %v6602_v3 }
 0x37e   :  { %v10838_v50 = vpop.permute.xlu0 %4984  ;;  %v7646_v23 = vpop.eup %7645  ;;  %7665 = vtanh.f32 %v10767_v28  ;;  %v4263_v35 = vadd.f32 1.0, %v7644_v16 }
 0x37f   :  { %v10876_v12 = vpop.eup %7647  ;;  %7667 = vrcp.f32 %v4261_v11 }
 0x380   :  { %5078 = vrot.lane.b32.xlu1 %v7646_v23, %s8080_s10  ;;  %12403 = vst [vmem:[#allocation97_spill] sm:$0xff] %v10876_v12  ;;  %v7650_v19 = vpop.eup %7649  ;;  %7669 = vpow2.f32 %v6605_v26  ;;  %v5153_v51 = vmul.f32 %v10876_v12, %v10783_v30  ;;  %v6609_v30 = vmul.f32 -1.442695, %v10430_v2 }
 0x381   :  { %v10881_v27 = vpop.eup %7651  ;;  %7671 = vrcp.f32 %v4260_v4  ;;  %5076 = vrot.lane.b32.xlu0 %v7650_v19, %s8080_s10  ;;  %v6608_v4 = vmul.f32 -1.442695, %v10435_v34  ;;  %v6610_v34 = vmul.f32 -1.442695, %v10448_v36  ;;  %v6613_v36 = vmul.f32 -1.442695, %v10458_v33 }
 0x382   :  { %12404 = vst [vmem:[#allocation98_spill] sm:$0xff] %v10881_v27  ;;  %v7654_v23 = vpop.eup %7653  ;;  %7673 = vpow2.f32 %v6604_v57  ;;  %v5152_v44 = vmul.f32 %v10881_v27, %v10787_v40  ;;  %v6615_v33 = vmul.f32 -1.442695, %v10474_v10 }
 0x383   :  { %v10844_v62 = vpop.permute.xlu1 %4990  ;;  %v7656_v11 = vpop.eup %7655  ;;  %7675 = vrcp.f32 %v4263_v35  ;;  %v6611_v35 = vmul.f32 -1.442695, %v10443_v61  ;;  %v4262_v19 = vadd.f32 1.0, %v7654_v23 }
 0x384   :  { %v10849_v29 = vpop.permute.xlu0 %4988  ;;  %5282 = vrot.lane.b32.xlu1 %v5153_v51, %s8080_s10  ;;  %v10890_v16 = vpop.eup %7657  ;;  %7677 = vpow2.f32 %v6607_v46  ;;  %v4265_v61 = vadd.f32 1.0, %v7656_v11  ;;  %v6612_v11 = vmul.f32 -1.442695, %v10463_v22 }
 0x385   :  { %12405 = vst [vmem:[#allocation99_spill] sm:$0xff] %v10890_v16  ;;  %v7660_v54 = vpop.eup %7659  ;;  %7679 = vpow2.f32 %v6606_v6  ;;  %5280 = vrot.lane.b32.xlu0 %v5152_v44, %s8080_s10  ;;  %v5155_v51 = vmul.f32 %v10890_v16, %v10790_v49 }
 0x386   :  { %v10897_v57 = vpop.eup %7661  ;;  %7681 = vtanh.f32 %v10778_v41 }
 0x387   :  { %v10853_v8 = vpop.permute.xlu1 %4994  ;;  %12406 = vst [vmem:[#allocation100_spill] sm:$0xff] %v10897_v57  ;;  %v7664_v40 = vpop.eup %7663  ;;  %7683 = vtanh.f32 %v10781_v1  ;;  %v5154_v49 = vmul.f32 %v10897_v57, %v10795_v63 }
 0x388   :  { %5082 = vrot.lane.b32.xlu1 %v7660_v54, %s8080_s10  ;;  %v7666_v46 = vpop.eup %7665  ;;  %7685 = vpow2.f32 %v6609_v30  ;;  %v4264_v54 = vadd.f32 1.0, %v7664_v40 }
 0x389   :  { %v10908_v6 = vpop.eup %7667  ;;  %7687 = vpow2.f32 %v6608_v4  ;;  %5080 = vrot.lane.b32.xlu0 %v7666_v46, %s8080_s10 }
 0x38a   :  { %v10859_v20 = vpop.permute.xlu0 %4992  ;;  %12407 = vst [vmem:[#allocation101_spill] sm:$0xff] %v10908_v6  ;;  %v7670_v44 = vpop.eup %7669  ;;  %7689 = vpow2.f32 %v6611_v35  ;;  %v5157_v4 = vmul.f32 %v10908_v6, %v10798_v60  ;;  %v6614_v60 = vmul.f32 -1.442695, %v10480_v42 }
 0x38b   :  { %v10914_v27 = vpop.eup %7671  ;;  %7691 = vrcp.f32 %v4262_v19  ;;  %v4267_v40 = vadd.f32 1.0, %v7670_v44 }
 0x38c   :  { %5286 = vrot.lane.b32.xlu1 %v5155_v51, %s8080_s10  ;;  %12408 = vst [vmem:[#allocation102_spill] sm:$0xff] %v10914_v27  ;;  %v7674_v30 = vpop.eup %7673  ;;  %7693 = vpow2.f32 %v6610_v34 }
 0x38d   :  { %v10922_v35 = vpop.eup %7675  ;;  %7695 = vrcp.f32 %v4265_v61  ;;  %5284 = vrot.lane.b32.xlu0 %v5154_v49, %s8080_s10  ;;  %v4266_v34 = vadd.f32 1.0, %v7674_v30  ;;  %v5156_v30 = vmul.f32 %v10914_v27, %v10803_v59 }
 0x38e   :  { %v10863_v47 = vpop.permute.xlu1 %4998  ;;  %12409 = vst [vmem:[#allocation103_spill] sm:$0xff] %v10922_v35  ;;  %v7678_v19 = vpop.eup %7677  ;;  %7697 = vrcp.f32 %v4264_v54 }
 0x38f   :  { %v10868_v55 = vpop.permute.xlu0 %4996  ;;  %v7680_v63 = vpop.eup %7679  ;;  %7699 = vpow2.f32 %v6613_v36  ;;  %v4269_v44 = vadd.f32 1.0, %v7678_v19  ;;  %v6617_v36 = vmul.f32 -1.442695, %v10488_v43 }
 0x390   :  { %5290 = vrot.lane.b32.xlu1 %v5157_v4, %s8080_s10  ;;  %v7682_v22 = vpop.eup %7681  ;;  %7701 = vpow2.f32 %v6612_v11  ;;  %v4268_v54 = vadd.f32 1.0, %v7680_v63  ;;  %v6616_v4 = vmul.f32 -1.442695, %v10495_v24 }
 0x391   :  { %v7684_v61 = vpop.eup %7683  ;;  %7703 = vrcp.f32 %v4267_v40  ;;  %5084 = vrot.lane.b32.xlu0 %v7682_v22, %s8080_s10  ;;  %v5159_v40 = vmul.f32 %v10922_v35, %v10806_v17 }
 0x392   :  { %v10874_v25 = vpop.permute.xlu1 %5002  ;;  %v7686_v49 = vpop.eup %7685  ;;  %7705 = vpow2.f32 %v6615_v33 }
 0x393   :  { %v7688_v10 = vpop.eup %7687  ;;  %7707 = vrcp.f32 %v4266_v34  ;;  %v4271_v33 = vadd.f32 1.0, %v7686_v49 }
 0x394   :  { %5086 = vrot.lane.b32.xlu1 %v7684_v61, %s8080_s10  ;;  %v7690_v11 = vpop.eup %7689  ;;  %7709 = vpow2.f32 %v6614_v60  ;;  %v4270_v43 = vadd.f32 1.0, %v7688_v10  ;;  %v12413_v60 = vld [vmem:[#allocation62_spill] sm:$0xff] }
 0x395   :  { %v10942_v19 = vpop.eup %7691  ;;  %7711 = vrcp.f32 %v4269_v44  ;;  %5288 = vrot.lane.b32.xlu0 %v5156_v30, %s8080_s10  ;;  %v4273_v22 = vadd.f32 1.0, %v7690_v11  ;;  %v6619_v61 = vmul.f32 -1.442695, %v12413_v60 }
 0x396   :  { %v10885_v3 = vpop.permute.xlu0 %5000  ;;  %12410 = vst [vmem:[#allocation104_spill] sm:$0xff] %v10942_v19  ;;  %v7694_v63 = vpop.eup %7693  ;;  %7713 = vrcp.f32 %v4268_v54  ;;  %v5158_v24 = vmul.f32 %v10942_v19, %v10811_v9 }
 0x397   :  { %v10948_v34 = vpop.eup %7695  ;;  %7715 = vpow2.f32 %v6617_v36  ;;  %v4272_v54 = vadd.f32 1.0, %v7694_v63  ;;  %v12414_v36 = vld [vmem:[#allocation63_spill] sm:$0xff] }
 0x398   :  { %5294 = vrot.lane.b32.xlu1 %v5159_v40, %s8080_s10  ;;  %12411 = vst [vmem:[#allocation105_spill] sm:$0xff] %v10948_v34  ;;  %v10952_v17 = vpop.eup %7697  ;;  %7717 = vpow2.f32 %v6616_v4  ;;  %v5161_v44 = vmul.f32 %v10948_v34, %v10814_v7  ;;  %v6618_v11 = vmul.f32 -1.442695, %v12414_v36  ;;  %v6621_v4 = vmul.f32 -1.442695, %v10520_v18  ;;  %v12417_v18 = vld [vmem:[#allocation66_spill] sm:$0xff] }
 0x399   :  { %12412 = vst [vmem:[#allocation106_spill] sm:$0xff] %v10952_v17  ;;  %v7700_v49 = vpop.eup %7699  ;;  %7719 = vrcp.f32 %v4271_v33  ;;  %5292 = vrot.lane.b32.xlu0 %v5158_v24, %s8080_s10  ;;  %v5160_v7 = vmul.f32 %v10952_v17, %v10819_v58 }
 0x39a   :  { %v7702_v30 = vpop.eup %7701  ;;  %7721 = vrcp.f32 %v4270_v43  ;;  %v4275_v33 = vadd.f32 1.0, %v7700_v49 }
 0x39b   :  { %v10893_v26 = vpop.permute.xlu1 %5006  ;;  %v10962_v9 = vpop.eup %7703  ;;  %7723 = vrcp.f32 %v4273_v22  ;;  %v4274_v60 = vadd.f32 1.0, %v7702_v30 }
 0x39c   :  { %v10903_v2 = vpop.permute.xlu0 %5004  ;;  %5298 = vrot.lane.b32.xlu1 %v5161_v44, %s8080_s10  ;;  %12415 = vst [vmem:[#allocation62_spill] sm:$0xff] %v10962_v9  ;;  %v7706_v40 = vpop.eup %7705  ;;  %7725 = vpow2.f32 %v6619_v61  ;;  %v5163_v63 = vmul.f32 %v10962_v9, %v10823_v5  ;;  %v6620_v44 = vmul.f32 -1.442695, %v12417_v18 }
 0x39d   :  { %v10971_v43 = vpop.eup %7707  ;;  %7727 = vrcp.f32 %v4272_v54  ;;  %5296 = vrot.lane.b32.xlu0 %v5160_v7, %s8080_s10  ;;  %v4277_v61 = vadd.f32 1.0, %v7706_v40  ;;  %v12420_v54 = vld [vmem:[#allocation68_spill] sm:$0xff] }
 0x39e   :  { %12416 = vst [vmem:[#allocation63_spill] sm:$0xff] %v10971_v43  ;;  %v7710_v22 = vpop.eup %7709  ;;  %7729 = vpow2.f32 %v6618_v11  ;;  %v5162_v5 = vmul.f32 %v10971_v43, %v10829_v13  ;;  %v6623_v30 = vmul.f32 -1.442695, %v12420_v54 }
 0x39f   :  { %v10912_v23 = vpop.permute.xlu1 %5010  ;;  %v10976_v58 = vpop.eup %7711  ;;  %7731 = vpow2.f32 %v6621_v4  ;;  %v12421_v4 = vld [vmem:[#allocation69_spill] sm:$0xff] }
 0x3a0   :  { %5302 = vrot.lane.b32.xlu1 %v5163_v63, %s8080_s10  ;;  %12418 = vst [vmem:[#allocation66_spill] sm:$0xff] %v10976_v58  ;;  %v10982_v36 = vpop.eup %7713  ;;  %7733 = vrcp.f32 %v4275_v33  ;;  %v5165_v11 = vmul.f32 %v10976_v58, %v10833_v48  ;;  %v4276_v63 = vadd.f32 1.0, %v7710_v22  ;;  %v6622_v18 = vmul.f32 -1.442695, %v12421_v4 }
 0x3a1   :  { %12419 = vst [vmem:[#allocation107_spill] sm:$0xff] %v10982_v36  ;;  %v7716_v7 = vpop.eup %7715  ;;  %7735 = vrcp.f32 %v4274_v60  ;;  %5300 = vrot.lane.b32.xlu0 %v5162_v5, %s8080_s10  ;;  %v6625_v33 = vmul.f32 -1.442695, %v10550_v53  ;;  %v5164_v48 = vmul.f32 %v10982_v36, %v10838_v50  ;;  %v12425_v53 = vld [vmem:[#allocation71_spill] sm:$0xff] }
 0x3a2   :  { %v10925_v46 = vpop.permute.xlu0 %5008  ;;  %v7718_v40 = vpop.eup %7717  ;;  %7737 = vpow2.f32 %v6620_v44  ;;  %v4279_v22 = vadd.f32 1.0, %v7716_v7  ;;  %v6624_v4 = vmul.f32 -1.442695, %v12425_v53 }
 0x3a3   :  { %v10992_v43 = vpop.eup %7719  ;;  %7739 = vrcp.f32 %v4277_v61  ;;  %v4278_v54 = vadd.f32 1.0, %v7718_v40  ;;  %v12428_v40 = vld [vmem:[#allocation75_spill] sm:$0xff] }
 0x3a4   :  { %5306 = vrot.lane.b32.xlu1 %v5165_v11, %s8080_s10  ;;  %12422 = vst [vmem:[#allocation68_spill] sm:$0xff] %v10992_v43  ;;  %v10997_v60 = vpop.eup %7721  ;;  %7741 = vpow2.f32 %v6623_v30  ;;  %v5167_v44 = vmul.f32 %v10992_v43, %v10844_v62  ;;  %v12427_v30 = vld [vmem:[#allocation74_spill] sm:$0xff] }
 0x3a5   :  { %12423 = vst [vmem:[#allocation69_spill] sm:$0xff] %v10997_v60  ;;  %v11001_v5 = vpop.eup %7723  ;;  %7743 = vrcp.f32 %v4276_v63  ;;  %5304 = vrot.lane.b32.xlu0 %v5164_v48, %s8080_s10  ;;  %v6627_v7 = vmul.f32 -1.442695, %v12427_v30  ;;  %v5166_v62 = vmul.f32 %v10997_v60, %v10849_v29  ;;  %v6626_v48 = vmul.f32 -1.442695, %v12428_v40  ;;  %v12430_v30 = vld [vmem:[#allocation77_spill] sm:$0xff] }
 0x3a6   :  { %12424 = vst [vmem:[#allocation108_spill] sm:$0xff] %v11001_v5  ;;  %v7726_v61 = vpop.eup %7725  ;;  %7745 = vpow2.f32 %v6622_v18  ;;  %v5169_v43 = vmul.f32 %v11001_v5, %v10853_v8  ;;  %v6629_v36 = vmul.f32 -1.442695, %v12430_v30  ;;  %v12433_v30 = vld [vmem:[#allocation78_spill] sm:$0xff] }
 0x3a7   :  { %v10930_v51 = vpop.permute.xlu1 %5014  ;;  %v11008_v50 = vpop.eup %7727  ;;  %7747 = vpow2.f32 %v6625_v33 }
 0x3a8   :  { %v10937_v42 = vpop.permute.xlu0 %5012  ;;  %5310 = vrot.lane.b32.xlu1 %v5167_v44, %s8080_s10  ;;  %12426 = vst [vmem:[#allocation71_spill] sm:$0xff] %v11008_v50  ;;  %v7730_v63 = vpop.eup %7729  ;;  %7749 = vrcp.f32 %v4279_v22  ;;  %v4281_v44 = vadd.f32 1.0, %v7726_v61  ;;  %v5168_v8 = vmul.f32 %v11008_v50, %v10859_v20 }
 0x3a9   :  { %v7732_v53 = vpop.eup %7731  ;;  %7751 = vrcp.f32 %v4278_v54  ;;  %5308 = vrot.lane.b32.xlu0 %v5166_v62, %s8080_s10  ;;  %v4280_v22 = vadd.f32 1.0, %v7730_v63 }
 0x3aa   :  { %v11019_v33 = vpop.eup %7733  ;;  %7753 = vpow2.f32 %v6624_v4  ;;  %v4283_v61 = vadd.f32 1.0, %v7732_v53 }
 0x3ab   :  { %v10946_v59 = vpop.permute.xlu1 %5018  ;;  %12429 = vst [vmem:[#allocation74_spill] sm:$0xff] %v11019_v33  ;;  %v11023_v29 = vpop.eup %7735  ;;  %7755 = vpow2.f32 %v6627_v7  ;;  %v5171_v62 = vmul.f32 %v11019_v33, %v10863_v47  ;;  %v12434_v7 = vld [vmem:[#allocation19_spill] sm:$0xff] }
 0x3ac   :  { %5314 = vrot.lane.b32.xlu1 %v5169_v43, %s8080_s10  ;;  %12431 = vst [vmem:[#allocation75_spill] sm:$0xff] %v11023_v29  ;;  %v7738_v54 = vpop.eup %7737  ;;  %7757 = vpow2.f32 %v6626_v48  ;;  %v6628_v43 = vmul.f32 -1.442695, %v12433_v30  ;;  %v6631_v5 = vmul.f32 -1.442695, %v12434_v7  ;;  %v5170_v47 = vmul.f32 %v11023_v29, %v10868_v55  ;;  %v12436_v30 = vld [vmem:[#allocation80_spill] sm:$0xff] }
 0x3ad   :  { %v11031_v4 = vpop.eup %7739  ;;  %7759 = vrcp.f32 %v4281_v44  ;;  %5312 = vrot.lane.b32.xlu0 %v5168_v8, %s8080_s10  ;;  %v4282_v48 = vadd.f32 1.0, %v7738_v54  ;;  %v6630_v33 = vmul.f32 -1.442695, %v12436_v30 }
 0x3ae   :  { %v10958_v10 = vpop.permute.xlu0 %5016  ;;  %12432 = vst [vmem:[#allocation77_spill] sm:$0xff] %v11031_v4  ;;  %v7742_v63 = vpop.eup %7741  ;;  %7761 = vpow2.f32 %v6629_v36  ;;  %v5173_v36 = vmul.f32 %v11031_v4, %v10874_v25 }
 0x3af   :  { %v11039_v53 = vpop.eup %7743  ;;  %7763 = vrcp.f32 %v4280_v22  ;;  %v4285_v7 = vadd.f32 1.0, %v7742_v63  ;;  %v6633_v22 = vmul.f32 -1.442695, %v10617_v0  ;;  %v12439_v0 = vld [vmem:[#allocation82_spill] sm:$0xff] }
 0x3b0   :  { %5318 = vrot.lane.b32.xlu1 %v5171_v62, %s8080_s10  ;;  %12435 = vst [vmem:[#allocation78_spill] sm:$0xff] %v11039_v53  ;;  %v7746_v44 = vpop.eup %7745  ;;  %7765 = vrcp.f32 %v4283_v61  ;;  %v5172_v25 = vmul.f32 %v11039_v53, %v10885_v3  ;;  %v6632_v30 = vmul.f32 -1.442695, %v12439_v0 }
 0x3b1   :  { %v7748_v8 = vpop.eup %7747  ;;  %7767 = vpow2.f32 %v6628_v43  ;;  %5316 = vrot.lane.b32.xlu0 %v5170_v47, %s8080_s10  ;;  %v4284_v54 = vadd.f32 1.0, %v7746_v44 }
 0x3b2   :  { %v10969_v24 = vpop.permute.xlu1 %5022  ;;  %v11049_v50 = vpop.eup %7749  ;;  %7769 = vpow2.f32 %v6631_v5  ;;  %v4287_v43 = vadd.f32 1.0, %v7748_v8 }
 0x3b3   :  { %v10980_v49 = vpop.permute.xlu0 %5020  ;;  %12437 = vst [vmem:[#allocation19_spill] sm:$0xff] %v11049_v50  ;;  %v11053_v55 = vpop.eup %7751  ;;  %7771 = vrcp.f32 %v4282_v48  ;;  %v5175_v63 = vmul.f32 %v11049_v50, %v10893_v26  ;;  %v12440_v48 = vld [vmem:[#allocation83_spill] sm:$0xff] }
 0x3b4   :  { %5322 = vrot.lane.b32.xlu1 %v5173_v36, %s8080_s10  ;;  %12438 = vst [vmem:[#allocation80_spill] sm:$0xff] %v11053_v55  ;;  %v7754_v61 = vpop.eup %7753  ;;  %7773 = vpow2.f32 %v6630_v33  ;;  %v6635_v44 = vmul.f32 -1.442695, %v12440_v48  ;;  %v5174_v26 = vmul.f32 %v11053_v55, %v10903_v2 }
 0x3b5   :  { %v7756_v5 = vpop.eup %7755  ;;  %7775 = vrcp.f32 %v4285_v7  ;;  %5320 = vrot.lane.b32.xlu0 %v5172_v25, %s8080_s10  ;;  %v4286_v33 = vadd.f32 1.0, %v7754_v61 }
 0x3b6   :  { %v7758_v36 = vpop.eup %7757  ;;  %7777 = vpow2.f32 %v6633_v22  ;;  %v4289_v0 = vadd.f32 1.0, %v7756_v5 }
 0x3b7   :  { %v10990_v13 = vpop.permute.xlu1 %5026  ;;  %v11065_v3 = vpop.eup %7759  ;;  %7779 = vrcp.f32 %v4284_v54  ;;  %v4288_v48 = vadd.f32 1.0, %v7758_v36  ;;  %v6634_v54 = vmul.f32 -1.442695, %v10638_v56  ;;  %v6636_v56 = vmul.f32 -1.442695, %v10652_v21 }
 0x3b8   :  { %5326 = vrot.lane.b32.xlu1 %v5175_v63, %s8080_s10  ;;  %12441 = vst [vmem:[#allocation82_spill] sm:$0xff] %v11065_v3  ;;  %v7762_v7 = vpop.eup %7761  ;;  %7781 = vrcp.f32 %v4287_v43  ;;  %v5177_v25 = vmul.f32 %v11065_v3, %v10912_v23  ;;  %v6639_v21 = vmul.f32 -1.442695, %v10663_v32 }
 0x3b9   :  { %v11073_v22 = vpop.eup %7763  ;;  %7783 = vpow2.f32 %v6632_v30  ;;  %5324 = vrot.lane.b32.xlu0 %v5174_v26, %s8080_s10  ;;  %v4291_v43 = vadd.f32 1.0, %v7762_v7  ;;  %v6637_v30 = vmul.f32 -1.442695, %v10647_v38 }
 0x3ba   :  { %v11004_v11 = vpop.permute.xlu0 %5024  ;;  %12442 = vst [vmem:[#allocation83_spill] sm:$0xff] %v11073_v22  ;;  %v11076_v63 = vpop.eup %7765  ;;  %7785 = vpow2.f32 %v6635_v44  ;;  %v5176_v23 = vmul.f32 %v11073_v22, %v10925_v46 }
 0x3bb   :  { %12443 = vst [vmem:[#allocation109_spill] sm:$0xff] %v11076_v63  ;;  %v7768_v61 = vpop.eup %7767  ;;  %7787 = vrcp.f32 %v4286_v33  ;;  %v5179_v36 = vmul.f32 %v11076_v63, %v10930_v51 }
 0x3bc   :  { %5330 = vrot.lane.b32.xlu1 %v5177_v25, %s8080_s10  ;;  %v7770_v5 = vpop.eup %7769  ;;  %7789 = vrcp.f32 %v4289_v0  ;;  %v4290_v7 = vadd.f32 1.0, %v7768_v61 }
 0x3bd   :  { %v11087_v44 = vpop.eup %7771  ;;  %7791 = vrcp.f32 %v4288_v48  ;;  %5328 = vrot.lane.b32.xlu0 %v5176_v23, %s8080_s10  ;;  %v4293_v38 = vadd.f32 1.0, %v7770_v5 }
 0x3be   :  { %v11016_v18 = vpop.permute.xlu1 %5030  ;;  %12444 = vst [vmem:[#allocation110_spill] sm:$0xff] %v11087_v44  ;;  %v7774_v33 = vpop.eup %7773  ;;  %7793 = vpow2.f32 %v6634_v54  ;;  %v5178_v51 = vmul.f32 %v11087_v44, %v10937_v42  ;;  %v6638_v42 = vmul.f32 -1.442695, %v10669_v15  ;;  %v6640_v15 = vmul.f32 -1.442695, %v10682_v31  ;;  %v12447_v31 = vld [vmem:[#allocation26_spill] sm:$0xff] }
 0x3bf   :  { %v11027_v40 = vpop.permute.xlu0 %5028  ;;  %v11094_v46 = vpop.eup %7775  ;;  %7795 = vrcp.f32 %v4291_v43  ;;  %v4292_v54 = vadd.f32 1.0, %v7774_v33 }
 0x3c0   :  { %5334 = vrot.lane.b32.xlu1 %v5179_v36, %s8080_s10  ;;  %12445 = vst [vmem:[#allocation111_spill] sm:$0xff] %v11094_v46  ;;  %v7778_v0 = vpop.eup %7777  ;;  %7797 = vpow2.f32 %v6637_v30  ;;  %v5181_v25 = vmul.f32 %v11094_v46, %v10946_v59  ;;  %v6641_v36 = vmul.f32 -1.442695, %v10678_v14 }
 0x3c1   :  { %v11103_v61 = vpop.eup %7779  ;;  %7799 = vpow2.f32 %v6636_v56  ;;  %5332 = vrot.lane.b32.xlu0 %v5178_v51, %s8080_s10  ;;  %v4295_v32 = vadd.f32 1.0, %v7778_v0 }
 0x3c2   :  { %12446 = vst [vmem:[#allocation112_spill] sm:$0xff] %v11103_v61  ;;  %v11106_v43 = vpop.eup %7781  ;;  %7801 = vrcp.f32 %v4290_v7  ;;  %v5180_v59 = vmul.f32 %v11103_v61, %v10958_v10 }
 0x3c3   :  { %v11037_v20 = vpop.permute.xlu1 %5034  ;;  %v7784_v23 = vpop.eup %7783  ;;  %7803 = vrcp.f32 %v4293_v38  ;;  %v5183_v56 = vmul.f32 %v11106_v43, %v10969_v24 }
 0x3c4   :  { %v11047_v62 = vpop.permute.xlu0 %5032  ;;  %5338 = vrot.lane.b32.xlu1 %v5181_v25, %s8080_s10  ;;  %v7786_v30 = vpop.eup %7785  ;;  %7805 = vpow2.f32 %v6639_v21  ;;  %v4294_v38 = vadd.f32 1.0, %v7784_v23  ;;  %v6643_v21 = vmul.f32 -1.442695, %v12447_v31 }
 0x3c5   :  { %v11117_v33 = vpop.eup %7787  ;;  %7807 = vrcp.f32 %v4292_v54  ;;  %5336 = vrot.lane.b32.xlu0 %v5180_v59, %s8080_s10  ;;  %v4297_v14 = vadd.f32 1.0, %v7786_v30 }
 0x3c6   :  { %v11121_v7 = vpop.eup %7789  ;;  %7809 = vpow2.f32 %v6638_v42  ;;  %v5182_v24 = vmul.f32 %v11117_v33, %v10980_v49  ;;  %v12449_v42 = vld [vmem:[#allocation86_spill] sm:$0xff] }
 0x3c7   :  { %v11126_v51 = vpop.eup %7791  ;;  %7811 = vrcp.f32 %v4295_v32  ;;  %v5185_v25 = vmul.f32 %v11121_v7, %v10990_v13  ;;  %v6642_v23 = vmul.f32 -1.442695, %v12449_v42 }
 0x3c8   :  { %5342 = vrot.lane.b32.xlu1 %v5183_v56, %s8080_s10  ;;  %v7794_v0 = vpop.eup %7793  ;;  %7813 = vpow2.f32 %v6641_v36  ;;  %v5184_v36 = vmul.f32 %v11126_v51, %v11004_v11  ;;  %v12451_v56 = vld [vmem:[#allocation88_spill] sm:$0xff] }
 0x3c9   :  { %v11133_v54 = vpop.eup %7795  ;;  %7815 = vpow2.f32 %v6640_v15  ;;  %5340 = vrot.lane.b32.xlu0 %v5182_v24, %s8080_s10  ;;  %v4296_v30 = vadd.f32 1.0, %v7794_v0  ;;  %v6645_v15 = vmul.f32 -1.442695, %v12451_v56 }
 0x3ca   :  { %v11059_v47 = vpop.permute.xlu1 %5038  ;;  %12448 = vst [vmem:[#allocation26_spill] sm:$0xff] %v11133_v54  ;;  %v7798_v32 = vpop.eup %7797  ;;  %7817 = vrcp.f32 %v4294_v38  ;;  %v5187_v24 = vmul.f32 %v11133_v54, %v11016_v18 }
 0x3cb   :  { %v11069_v8 = vpop.permute.xlu0 %5036  ;;  %v7800_v49 = vpop.eup %7799  ;;  %7819 = vrcp.f32 %v4297_v14  ;;  %v4299_v38 = vadd.f32 1.0, %v7798_v32 }
 0x3cc   :  { %5346 = vrot.lane.b32.xlu1 %v5185_v25, %s8080_s10  ;;  %v11142_v13 = vpop.eup %7801  ;;  %7821 = vpow2.f32 %v6643_v21  ;;  %v4298_v0 = vadd.f32 1.0, %v7800_v49  ;;  %v12453_v21 = vld [vmem:[#allocation89_spill] sm:$0xff] }
 0x3cd   :  { %12450 = vst [vmem:[#allocation86_spill] sm:$0xff] %v11142_v13  ;;  %v11149_v42 = vpop.eup %7803  ;;  %7823 = vpow2.f32 %v6642_v23  ;;  %5344 = vrot.lane.b32.xlu0 %v5184_v36, %s8080_s10  ;;  %v6644_v25 = vmul.f32 -1.442695, %v12453_v21  ;;  %v5186_v18 = vmul.f32 %v11142_v13, %v11027_v40  ;;  %v6647_v23 = vmul.f32 -1.442695, %v10718_v52 }
 0x3ce   :  { %v11080_v2 = vpop.permute.xlu1 %5042  ;;  %v7806_v14 = vpop.eup %7805  ;;  %7825 = vrcp.f32 %v4296_v30  ;;  %v5189_v32 = vmul.f32 %v11149_v42, %v11037_v20 }
 0x3cf   :  { %v11091_v26 = vpop.permute.xlu0 %5040  ;;  %v11153_v11 = vpop.eup %7807  ;;  %7827 = vpow2.f32 %v6645_v15  ;;  %v4301_v36 = vadd.f32 1.0, %v7806_v14 }
 0x3d0   :  { %5350 = vrot.lane.b32.xlu1 %v5187_v24, %s8080_s10  ;;  %12452 = vst [vmem:[#allocation88_spill] sm:$0xff] %v11153_v11  ;;  %v7810_v54 = vpop.eup %7809  ;;  %7829 = vrcp.f32 %v4299_v38  ;;  %v6646_v24 = vmul.f32 -1.442695, %v10722_v37  ;;  %v5188_v52 = vmul.f32 %v11153_v11, %v11047_v62  ;;  %v12455_v38 = vld [vmem:[#allocation34_spill] sm:$0xff] }
 0x3d1   :  { %v11163_v49 = vpop.eup %7811  ;;  %5348 = vrot.lane.b32.xlu0 %v5186_v18, %s8080_s10  ;;  %7831 = vrcp.f32 %v4298_v0  ;;  %v4300_v21 = vadd.f32 1.0, %v7810_v54  ;;  %v6649_v14 = vmul.f32 -1.442695, %v12455_v38 }
 0x3d2   :  { %v11101_v48 = vpop.permute.xlu1 %5046  ;;  %12454 = vst [vmem:[#allocation89_spill] sm:$0xff] %v11163_v49  ;;  %v7814_v30 = vpop.eup %7813  ;;  %7833 = vpow2.f32 %v6644_v25  ;;  %v5191_v0 = vmul.f32 %v11163_v49, %v11059_v47  ;;  %v12457_v49 = vld [vmem:[#allocation93_spill] sm:$0xff] }
 0x3d3   :  { %v11112_v5 = vpop.permute.xlu0 %5044  ;;  %v7816_v15 = vpop.eup %7815  ;;  %7835 = vpow2.f32 %v6647_v23  ;;  %v4303_v37 = vadd.f32 1.0, %v7814_v30  ;;  %v12456_v23 = vld [vmem:[#allocation91_spill] sm:$0xff] }
 0x3d4   :  { %5354 = vrot.lane.b32.xlu1 %v5189_v32, %s8080_s10  ;;  %v11172_v20 = vpop.eup %7817  ;;  %7837 = vrcp.f32 %v4301_v36  ;;  %v4302_v25 = vadd.f32 1.0, %v7816_v15  ;;  %v6648_v38 = vmul.f32 -1.442695, %v12456_v23  ;;  %v6651_v36 = vmul.f32 -1.442695, %v12457_v49  ;;  %v12458_v49 = vld [vmem:[#allocation94_spill] sm:$0xff] }
 0x3d5   :  { %v11177_v18 = vpop.eup %7819  ;;  %5352 = vrot.lane.b32.xlu0 %v5188_v52, %s8080_s10  ;;  %7839 = vpow2.f32 %v6646_v24  ;;  %v5190_v47 = vmul.f32 %v11172_v20, %v11069_v8 }
 0x3d6   :  { %v11124_v10 = vpop.permute.xlu1 %5050  ;;  %v7822_v54 = vpop.eup %7821  ;;  %7841 = vrcp.f32 %v4300_v21  ;;  %v5193_v30 = vmul.f32 %v11177_v18, %v11080_v2 }
 0x3d7   :  { %v11137_v59 = vpop.permute.xlu0 %5048  ;;  %v7824_v62 = vpop.eup %7823  ;;  %7843 = vpow2.f32 %v6649_v14  ;;  %v4305_v24 = vadd.f32 1.0, %v7822_v54  ;;  %v6650_v14 = vmul.f32 -1.442695, %v12458_v49 }
 0x3d8   :  { %5358 = vrot.lane.b32.xlu1 %v5191_v0, %s8080_s10  ;;  %v11191_v11 = vpop.eup %7825  ;;  %7845 = vrcp.f32 %v4303_v37  ;;  %v4304_v21 = vadd.f32 1.0, %v7824_v62  ;;  %v12459_v37 = vld [vmem:[#allocation95_spill] sm:$0xff] }
 0x3d9   :  { %5356 = vrot.lane.b32.xlu0 %v5190_v47, %s8080_s10  ;;  %v7828_v15 = vpop.eup %7827  ;;  %7847 = vrcp.f32 %v4302_v25  ;;  %v5192_v2 = vmul.f32 %v11191_v11, %v11091_v26  ;;  %v6653_v54 = vmul.f32 -1.442695, %v12459_v37 }
 0x3da   :  { %v11147_v31 = vpop.permute.xlu1 %5054  ;;  %v11195_v8 = vpop.eup %7829  ;;  %7849 = vpow2.f32 %v6648_v38  ;;  %v4307_v47 = vadd.f32 1.0, %v7828_v15 }
 0x3db   :  { %v11158_v56 = vpop.permute.xlu0 %5052  ;;  %v11202_v23 = vpop.eup %7831  ;;  %7851 = vpow2.f32 %v6651_v36  ;;  %v5195_v25 = vmul.f32 %v11195_v8, %v11101_v48  ;;  %v6652_v36 = vmul.f32 -1.442695, %v10757_v45 }
 0x3dc   :  { %5362 = vrot.lane.b32.xlu1 %v5193_v30, %s8080_s10  ;;  %v7834_v62 = vpop.eup %7833  ;;  %7853 = vrcp.f32 %v4305_v24  ;;  %v5194_v49 = vmul.f32 %v11202_v23, %v11112_v5 }
 0x3dd   :  { %5360 = vrot.lane.b32.xlu0 %v5192_v2, %s8080_s10  ;;  %v7836_v38 = vpop.eup %7835  ;;  %7855 = vrcp.f32 %v4304_v21  ;;  %v4306_v37 = vadd.f32 1.0, %v7834_v62 }
 0x3de   :  { %v11168_v40 = vpop.permute.xlu1 %5058  ;;  %v11211_v30 = vpop.eup %7837  ;;  %7857 = vpow2.f32 %v6650_v14  ;;  %v4309_v21 = vadd.f32 1.0, %v7836_v38 }
 0x3df   :  { %v11180_v32 = vpop.permute.xlu0 %5056  ;;  %v7840_v48 = vpop.eup %7839  ;;  %7859 = vpow2.f32 %v6653_v54  ;;  %v5197_v24 = vmul.f32 %v11211_v30, %v11124_v10  ;;  %v6655_v10 = vmul.f32 -1.442695, %v10765_v39 }
 0x3e0   :  { %5366 = vrot.lane.b32.xlu1 %v5195_v25, %s8080_s10  ;;  %v11218_v15 = vpop.eup %7841  ;;  %7861 = vrcp.f32 %v4307_v47  ;;  %v4308_v5 = vadd.f32 1.0, %v7840_v48 }
 0x3e1   :  { %5364 = vrot.lane.b32.xlu0 %v5194_v49, %s8080_s10  ;;  %v7844_v14 = vpop.eup %7843  ;;  %7863 = vpow2.f32 %v6652_v36  ;;  %v5196_v54 = vmul.f32 %v11218_v15, %v11137_v59  ;;  %v6654_v59 = vmul.f32 -1.442695, %v10767_v28 }
 0x3e2   :  { %v11189_v52 = vpop.permute.xlu1 %5062  ;;  %v11224_v45 = vpop.eup %7845  ;;  %7865 = vrcp.f32 %v4306_v37  ;;  %v4311_v49 = vadd.f32 1.0, %v7844_v14 }
 0x3e3   :  { %v11200_v0 = vpop.permute.xlu0 %5060  ;;  %v11228_v25 = vpop.eup %7847  ;;  %v5199_v62 = vmul.f32 %v11224_v45, %v11147_v31  ;;  %7867 = vrcp.f32 %v4309_v21 }
 0x3e4   :  { %5370 = vrot.lane.b32.xlu1 %v5197_v24, %s8080_s10  ;;  %v7850_v38 = vpop.eup %7849  ;;  %7869 = vrcp.f32 %v4308_v5  ;;  %v5198_v39 = vmul.f32 %v11228_v25, %v11158_v56 }
 0x3e5   :  { %5368 = vrot.lane.b32.xlu0 %v5196_v54, %s8080_s10  ;;  %v7852_v24 = vpop.eup %7851  ;;  %v4310_v31 = vadd.f32 1.0, %v7850_v38  ;;  %7871 = vpow2.f32 %v6655_v10 }
 0x3e6   :  { %v11209_v26 = vpop.permute.xlu1 %5066  ;;  %v11235_v36 = vpop.eup %7853  ;;  %7873 = vrcp.f32 %v4311_v49  ;;  %v4313_v54 = vadd.f32 1.0, %v7852_v24 }
 0x3e7   :  { %v11221_v2 = vpop.permute.xlu0 %5064  ;;  %v11240_v37 = vpop.eup %7855  ;;  %v5201_v21 = vmul.f32 %v11235_v36, %v11168_v40  ;;  %7875 = vpow2.f32 %v6654_v59 }
 0x3e8   :  { %5374 = vrot.lane.b32.xlu1 %v5199_v62, %s8080_s10  ;;  %v7858_v14 = vpop.eup %7857  ;;  %v5200_v56 = vmul.f32 %v11240_v37, %v11180_v32  ;;  %7877 = vrcp.f32 %v4310_v31  ;;  %v6656_v32 = vmul.f32 -1.442695, %v10778_v41 }
 0x3e9   :  { %5372 = vrot.lane.b32.xlu0 %v5198_v39, %s8080_s10  ;;  %v7860_v62 = vpop.eup %7859  ;;  %v4312_v10 = vadd.f32 1.0, %v7858_v14  ;;  %7879 = vrcp.f32 %v4313_v54 }
 0x3ea   :  { %v5071_v47 = vpop.permute.xlu1 %5070  ;;  %v11246_v5 = vpop.eup %7861  ;;  %v4315_v49 = vadd.f32 1.0, %v7860_v62 }
 0x3eb   :  { %v5069_v48 = vpop.permute.xlu0 %5068  ;;  %12460 = vst [vmem:[#allocation34_spill] sm:$0xff] %v11246_v5  ;;  %v5203_v40 = vmul.f32 %v11246_v5, %v11189_v52  ;;  %v7864_v38 = vpop.eup %7863  ;;  %7881 = vrcp.f32 %v4312_v10 }
 0x3ec   :  { %5378 = vrot.lane.b32.xlu1 %v5201_v21, %s8080_s10  ;;  %v11253_v39 = vpop.eup %7865  ;;  %v6657_v21 = vmul.f32 -1.442695, %v10781_v1  ;;  %v4314_v52 = vadd.f32 1.0, %v7864_v38  ;;  %7883 = vrcp.f32 %v4315_v49 }
 0x3ed   :  { %5376 = vrot.lane.b32.xlu0 %v5200_v56, %s8080_s10  ;;  %12461 = vst [vmem:[#allocation91_spill] sm:$0xff] %v11253_v39  ;;  %v11257_v59 = vpop.eup %7867  ;;  %v5202_v31 = vmul.f32 %v11253_v39, %v11200_v0 }
 0x3ee   :  { %v5075_v28 = vpop.permute.xlu1 %5074  ;;  %12462 = vst [vmem:[#allocation93_spill] sm:$0xff] %v11257_v59  ;;  %v5205_v14 = vmul.f32 %v11257_v59, %v11209_v26  ;;  %v11264_v62 = vpop.eup %7869  ;;  %7885 = vpow2.f32 %v6657_v21  ;;  %v12471_v59 = vld [vmem:[#allocation15_spill] sm:$0xff] }
 0x3ef   :  { %v5073_v24 = vpop.permute.xlu0 %5072  ;;  %12463 = vst [vmem:[#allocation94_spill] sm:$0xff] %v11264_v62  ;;  %v7872_v1 = vpop.eup %7871  ;;  %7887 = vpow2.f32 %v6656_v32  ;;  %v5204_v41 = vmul.f32 %v11264_v62, %v11221_v2 }
 0x3f0   :  { %5382 = vrot.lane.b32.xlu1 %v5203_v40, %s8080_s10  ;;  %v11268_v56 = vpop.eup %7873  ;;  %7889 = vrcp.f32 %v4314_v52  ;;  %v4317_v38 = vadd.f32 1.0, %v7872_v1 }
 0x3f1   :  { %5380 = vrot.lane.b32.xlu0 %v5202_v31, %s8080_s10  ;;  %12464 = vst [vmem:[#allocation95_spill] sm:$0xff] %v11268_v56  ;;  %v5207_v26 = vmul.f32 %v11268_v56, %v5071_v47  ;;  %v7876_v40 = vpop.eup %7875 }
 0x3f2   :  { %v5079_v54 = vpop.permute.xlu1 %5078  ;;  %v11274_v49 = vpop.eup %7877  ;;  %7891 = vrcp.f32 %v4317_v38  ;;  %v12470_v38 = vld [vmem:[#allocation21_spill] sm:$0xff] }
 0x3f3   :  { %v5077_v0 = vpop.permute.xlu0 %5076  ;;  %12465 = vst [vmem:[#allocation113_spill] sm:$0xff] %v11274_v49  ;;  %v11277_v21 = vpop.eup %7879  ;;  %v5206_v32 = vmul.f32 %v11274_v49, %v5069_v48 }
 0x3f4   :  { %5386 = vrot.lane.b32.xlu1 %v5205_v14, %s8080_s10  ;;  %12466 = vst [vmem:[#allocation114_spill] sm:$0xff] %v11277_v21  ;;  %v4316_v14 = vadd.f32 1.0, %v7876_v40  ;;  %v5209_v2 = vmul.f32 %v11277_v21, %v5075_v28 }
 0x3f5   :  { %5384 = vrot.lane.b32.xlu0 %v5204_v41, %s8080_s10  ;;  %v11282_v47 = vpop.eup %7881 }
 0x3f6   :  { %v5283_v10 = vpop.permute.xlu1 %5282  ;;  %12467 = vst [vmem:[#allocation115_spill] sm:$0xff] %v11282_v47  ;;  %v11285_v1 = vpop.eup %7883  ;;  %v5208_v41 = vmul.f32 %v11282_v47, %v5073_v24  ;;  %7893 = vrcp.f32 %v4316_v14 }
 0x3f7   :  { %v5281_v31 = vpop.permute.xlu0 %5280  ;;  %12468 = vst [vmem:[#allocation116_spill] sm:$0xff] %v11285_v1  ;;  %v5211_v48 = vmul.f32 %v11285_v1, %v5079_v54  ;;  %v12472_v54 = vld [vmem:[#allocation98_spill] sm:$0xff] }
 0x3f8   :  { %5390 = vrot.lane.b32.xlu1 %v5207_v26, %s8080_s10  ;;  %v7886_v56 = vpop.eup %7885  ;;  %v4832_v1 = vmul.f32 %v12472_v54, %v12471_v59 }
 0x3f9   :  { %5388 = vrot.lane.b32.xlu0 %v5206_v32, %s8080_s10  ;;  %v7888_v49 = vpop.eup %7887  ;;  %v4833_v32 = vmul.f32 %v10876_v12, %v12470_v38  ;;  %v4319_v14 = vadd.f32 1.0, %v7886_v56 }
 0x3fa   :  { %v5083_v52 = vpop.permute.xlu1 %5082  ;;  %v11290_v28 = vpop.eup %7889  ;;  %v4318_v24 = vadd.f32 1.0, %v7888_v49  ;;  %v5472_v38 = vadd.f32 %v5281_v31, %v4832_v1  ;;  %v12476_v1 = vld [vmem:[#allocation13_spill] sm:$0xff] }
 0x3fb   :  { %v5081_v26 = vpop.permute.xlu0 %5080  ;;  %12469 = vst [vmem:[#allocation117_spill] sm:$0xff] %v11290_v28  ;;  %v5473_v47 = vadd.f32 %v5283_v10, %v4833_v32  ;;  %v12475_v10 = vld [vmem:[#allocation17_spill] sm:$0xff] }
 0x3fc   :  { %5394 = vrot.lane.b32.xlu1 %v5209_v2, %s8080_s10  ;;  %v5210_v2 = vmul.f32 %v11290_v28, %v5077_v0  ;;  %7895 = vrcp.f32 %v4318_v24  ;;  %v4835_v59 = vmul.f32 %v10890_v16, %v12475_v10  ;;  %v4834_v24 = vmul.f32 %v10897_v57, %v12476_v1 }
 0x3fd   :  { %5392 = vrot.lane.b32.xlu0 %v5208_v41, %s8080_s10  ;;  %v11300_v41 = vpop.eup %7891  ;;  %7897 = vrcp.f32 %v4319_v14 }
 0x3fe   :  { %v5287_v40 = vpop.permute.xlu1 %5286  ;;  %12473 = vst [vmem:[#allocation21_spill] sm:$0xff] %v11300_v41  ;;  %v5213_v0 = vmul.f32 %v11300_v41, %v5083_v52  ;;  %v12477_v52 = vld [vmem:[#allocation25_spill] sm:$0xff]  ;;  %7899 = vtanh.f32 %v5473_v47 }
 0x3ff   :  { %v5285_v21 = vpop.permute.xlu0 %5284  ;;  %v4837_v14 = vmul.f32 %v10908_v6, %v12477_v52  ;;  %7901 = vtanh.f32 %v5472_v38 }
 0x400   :  { %5398 = vrot.lane.b32.xlu1 %v5211_v48, %s8080_s10  ;;  %v11304_v56 = vpop.eup %7893  ;;  %v5474_v54 = vadd.f32 %v5285_v21, %v4834_v24 }
 0x401   :  { %5396 = vrot.lane.b32.xlu0 %v5210_v2, %s8080_s10  ;;  %12474 = vst [vmem:[#allocation15_spill] sm:$0xff] %v11304_v56  ;;  %v5212_v49 = vmul.f32 %v11304_v56, %v5081_v26  ;;  %v5475_v2 = vadd.f32 %v5287_v40, %v4835_v59 }
 0x402   :  { %v5291_v62 = vpop.permute.xlu1 %5290 }
 0x403   :  { %v5085_v12 = vpop.permute.xlu0 %5084  ;;  %v5477_v16 = vadd.f32 %v5291_v62, %v4837_v14  ;;  %7903 = vtanh.f32 %v5475_v2 }
 0x404   :  { %6307 = vrot.lane.b32.xlu1 %v5473_v47, %s8081_s3  ;;  %v12480_v47 = vld [vmem:[#allocation27_spill] sm:$0xff]  ;;  %7905 = vtanh.f32 %v5474_v54 }
 0x405   :  { %6305 = vrot.lane.b32.xlu0 %v5472_v38, %s8081_s3  ;;  %v4836_v21 = vmul.f32 %v10914_v27, %v12480_v47  ;;  %7907 = vtanh.f32 %v5477_v16 }
 0x406   :  { %v5087_v48 = vpop.permute.xlu1 %5086  ;;  %v11317_v26 = vpop.eup %7895 }
 0x407   :  { %v5289_v32 = vpop.permute.xlu0 %5288  ;;  %12478 = vst [vmem:[#allocation17_spill] sm:$0xff] %v11317_v26  ;;  %v11320_v40 = vpop.eup %7897  ;;  %v5214_v59 = vmul.f32 %v11317_v26, %v5085_v12  ;;  %v12481_v12 = vld [vmem:[#allocation11_spill] sm:$0xff] }
 0x408   :  { %5402 = vrot.lane.b32.xlu1 %v5213_v0, %s8080_s10  ;;  %12479 = vst [vmem:[#allocation13_spill] sm:$0xff] %v11320_v40  ;;  %v5215_v1 = vmul.f32 %v11320_v40, %v5087_v48  ;;  %v5476_v62 = vadd.f32 %v5289_v32, %v4836_v21  ;;  %v7900_v14 = vpop.eup %7899  ;;  %v4839_v6 = vmul.f32 %v10922_v35, %v12481_v12 }
 0x409   :  { %5400 = vrot.lane.b32.xlu0 %v5212_v49, %s8080_s10  ;;  %v7902_v57 = vpop.eup %7901 }
 0x40a   :  { %v5295_v31 = vpop.permute.xlu1 %5294  ;;  %7909 = vtanh.f32 %v5476_v62 }
 0x40b   :  { %v5293_v10 = vpop.permute.xlu0 %5292  ;;  %v5479_v47 = vadd.f32 %v5295_v31, %v4839_v6  ;;  %v12483_v6 = vld [vmem:[#allocation18_spill] sm:$0xff] }
 0x40c   :  { %6311 = vrot.lane.b32.xlu1 %v5475_v2, %s8081_s3  ;;  %v4841_v31 = vmul.f32 %v10948_v34, %v12483_v6 }
 0x40d   :  { %6309 = vrot.lane.b32.xlu0 %v5474_v54, %s8081_s3  ;;  %v7904_v21 = vpop.eup %7903  ;;  %7911 = vtanh.f32 %v5479_v47 }
 0x40e   :  { %v5299_v0 = vpop.permute.xlu1 %5298 }
 0x40f   :  { %v5297_v49 = vpop.permute.xlu0 %5296  ;;  %v5481_v12 = vadd.f32 %v5299_v0, %v4841_v31  ;;  %v12485_v0 = vld [vmem:[#allocation24_spill] sm:$0xff] }
 0x410   :  { %6315 = vrot.lane.b32.xlu1 %v5477_v16, %s8081_s3  ;;  %v12484_v16 = vld [vmem:[#allocation20_spill] sm:$0xff]  ;;  %v4843_v31 = vmul.f32 %v10962_v9, %v12485_v0 }
 0x411   :  { %5404 = vrot.lane.b32.xlu0 %v5214_v59, %s8080_s10  ;;  %v12482_v59 = vld [vmem:[#allocation14_spill] sm:$0xff] }
 0x412   :  { %v5303_v52 = vpop.permute.xlu1 %5302  ;;  %v4838_v2 = vmul.f32 %v10942_v19, %v12482_v59 }
 0x413   :  { %v5301_v38 = vpop.permute.xlu0 %5300 }
 0x414   :  { %5406 = vrot.lane.b32.xlu1 %v5215_v1, %s8080_s10  ;;  %v5478_v32 = vadd.f32 %v5293_v10, %v4838_v2  ;;  %v4840_v10 = vmul.f32 %v10952_v17, %v12484_v16  ;;  %v5483_v17 = vadd.f32 %v5303_v52, %v4843_v31  ;;  %v12488_v52 = vld [vmem:[#allocation30_spill] sm:$0xff] }
 0x415   :  { %6313 = vrot.lane.b32.xlu0 %v5476_v62, %s8081_s3  ;;  %v4845_v31 = vmul.f32 %v10976_v58, %v12488_v52 }
 0x416   :  { %v5307_v24 = vpop.permute.xlu1 %5306  ;;  %v5480_v62 = vadd.f32 %v5297_v49, %v4840_v10  ;;  %7913 = vtanh.f32 %v5478_v32  ;;  %v12486_v49 = vld [vmem:[#allocation28_spill] sm:$0xff] }
 0x417   :  { %v5305_v48 = vpop.permute.xlu0 %5304  ;;  %7915 = vtanh.f32 %v5481_v12 }
 0x418   :  { %5666 = vrot.lane.b32.xlu1 %v7900_v14, %s8080_s10  ;;  %7917 = vtanh.f32 %v5480_v62 }
 0x419   :  { %5664 = vrot.lane.b32.xlu0 %v7902_v57, %s8080_s10  ;;  %v7906_v57 = vpop.eup %7905  ;;  %7919 = vtanh.f32 %v5483_v17 }
 0x41a   :  { %v11332_v27 = vpop.permute.xlu1 %5310 }
 0x41b   :  { %v11338_v54 = vpop.permute.xlu0 %5308 }
 0x41c   :  { %6319 = vrot.lane.b32.xlu1 %v5479_v47, %s8081_s3  ;;  %v12487_v47 = vld [vmem:[#allocation63_spill] sm:$0xff] }
 0x41d   :  { %6317 = vrot.lane.b32.xlu0 %v5478_v32, %s8081_s3  ;;  %v4842_v10 = vmul.f32 %v12487_v47, %v12486_v49  ;;  %v5485_v47 = vadd.f32 %v5307_v24, %v4845_v31  ;;  %v12491_v24 = vld [vmem:[#allocation33_spill] sm:$0xff]  ;;  %v12492_v31 = vld [vmem:[#allocation68_spill] sm:$0xff] }
 0x41e   :  { %v11340_v1 = vpop.permute.xlu1 %5314  ;;  %v4847_v58 = vmul.f32 %v12492_v31, %v12491_v24 }
 0x41f   :  { %v11346_v14 = vpop.permute.xlu0 %5312  ;;  %v5482_v32 = vadd.f32 %v5301_v38, %v4842_v10  ;;  %v12489_v38 = vld [vmem:[#allocation31_spill] sm:$0xff] }
 0x420   :  { %5670 = vrot.lane.b32.xlu1 %v7904_v21, %s8080_s10  ;;  %v7908_v21 = vpop.eup %7907 }
 0x421   :  { %5668 = vrot.lane.b32.xlu0 %v7906_v57, %s8080_s10  ;;  %v7910_v57 = vpop.eup %7909  ;;  %7921 = vtanh.f32 %v5482_v32 }
 0x422   :  { %v11348_v59 = vpop.permute.xlu1 %5318  ;;  %7923 = vtanh.f32 %v5485_v47 }
 0x423   :  { %v11354_v2 = vpop.permute.xlu0 %5316 }
 0x424   :  { %6323 = vrot.lane.b32.xlu1 %v5481_v12, %s8081_s3  ;;  %v12490_v12 = vld [vmem:[#allocation107_spill] sm:$0xff] }
 0x425   :  { %6321 = vrot.lane.b32.xlu0 %v5480_v62, %s8081_s3  ;;  %v4844_v10 = vmul.f32 %v12490_v12, %v12489_v38  ;;  %v5487_v12 = vadd.f32 %v11332_v27, %v4847_v58  ;;  %v12494_v27 = vld [vmem:[#allocation37_spill] sm:$0xff]  ;;  %v12495_v58 = vld [vmem:[#allocation108_spill] sm:$0xff] }
 0x426   :  { %v11356_v6 = vpop.permute.xlu1 %5322  ;;  %v4849_v40 = vmul.f32 %v12495_v58, %v12494_v27 }
 0x427   :  { %v11362_v16 = vpop.permute.xlu0 %5320  ;;  %v5484_v62 = vadd.f32 %v5305_v48, %v4844_v10  ;;  %v12493_v48 = vld [vmem:[#allocation35_spill] sm:$0xff] }
 0x428   :  { %5674 = vrot.lane.b32.xlu1 %v7908_v21, %s8080_s10  ;;  %v7912_v21 = vpop.eup %7911  ;;  %v4846_v10 = vmul.f32 %v10997_v60, %v12493_v48 }
 0x429   :  { %5672 = vrot.lane.b32.xlu0 %v7910_v57, %s8080_s10  ;;  %v7914_v57 = vpop.eup %7913  ;;  %7925 = vtanh.f32 %v5484_v62 }
 0x42a   :  { %v11364_v34 = vpop.permute.xlu1 %5326  ;;  %7927 = vtanh.f32 %v5487_v12 }
 0x42b   :  { %v11370_v19 = vpop.permute.xlu0 %5324 }
 0x42c   :  { %6327 = vrot.lane.b32.xlu1 %v5483_v17, %s8081_s3 }
 0x42d   :  { %6325 = vrot.lane.b32.xlu0 %v5482_v32, %s8081_s3  ;;  %v5486_v32 = vadd.f32 %v11338_v54, %v4846_v10  ;;  %v12496_v54 = vld [vmem:[#allocation38_spill] sm:$0xff]  ;;  %v12497_v10 = vld [vmem:[#allocation71_spill] sm:$0xff] }
 0x42e   :  { %v11372_v0 = vpop.permute.xlu1 %5330  ;;  %v4848_v26 = vmul.f32 %v12497_v10, %v12496_v54 }
 0x42f   :  { %v11378_v49 = vpop.permute.xlu0 %5328  ;;  %7929 = vtanh.f32 %v5486_v32 }
 0x430   :  { %5678 = vrot.lane.b32.xlu1 %v7912_v21, %s8080_s10  ;;  %v7916_v21 = vpop.eup %7915 }
 0x431   :  { %5676 = vrot.lane.b32.xlu0 %v7914_v57, %s8080_s10  ;;  %v7918_v57 = vpop.eup %7917 }
 0x432   :  { %v11380_v9 = vpop.permute.xlu1 %5334  ;;  %v7920_v31 = vpop.eup %7919 }
 0x433   :  { %v11386_v35 = vpop.permute.xlu0 %5332 }
 0x434   :  { %6331 = vrot.lane.b32.xlu1 %v5485_v47, %s8081_s3  ;;  %v5489_v47 = vadd.f32 %v11340_v1, %v4849_v40  ;;  %v12498_v40 = vld [vmem:[#allocation40_spill] sm:$0xff]  ;;  %v12499_v1 = vld [vmem:[#allocation74_spill] sm:$0xff] }
 0x435   :  { %6329 = vrot.lane.b32.xlu0 %v5484_v62, %s8081_s3  ;;  %v5488_v62 = vadd.f32 %v11346_v14, %v4848_v26  ;;  %v4851_v56 = vmul.f32 %v12499_v1, %v12498_v40  ;;  %v12500_v26 = vld [vmem:[#allocation42_spill] sm:$0xff] }
 0x436   :  { %v11388_v52 = vpop.permute.xlu1 %5338  ;;  %v4850_v14 = vmul.f32 %v11023_v29, %v12500_v26  ;;  %7931 = vtanh.f32 %v5489_v47 }
 0x437   :  { %v11394_v38 = vpop.permute.xlu0 %5336  ;;  %7933 = vtanh.f32 %v5488_v62 }
 0x438   :  { %5682 = vrot.lane.b32.xlu1 %v7916_v21, %s8080_s10 }
 0x439   :  { %5680 = vrot.lane.b32.xlu0 %v7918_v57, %s8080_s10  ;;  %v7922_v57 = vpop.eup %7921 }
 0x43a   :  { %v11397_v17 = vpop.permute.xlu1 %5342  ;;  %v7924_v58 = vpop.eup %7923 }
 0x43b   :  { %v11404_v24 = vpop.permute.xlu0 %5340 }
 0x43c   :  { %6335 = vrot.lane.b32.xlu1 %v5487_v12, %s8081_s3  ;;  %v5491_v12 = vadd.f32 %v11348_v59, %v4851_v56  ;;  %v12501_v56 = vld [vmem:[#allocation44_spill] sm:$0xff] }
 0x43d   :  { %6333 = vrot.lane.b32.xlu0 %v5486_v32, %s8081_s3  ;;  %v5490_v32 = vadd.f32 %v11354_v2, %v4850_v14  ;;  %v4853_v59 = vmul.f32 %v11031_v4, %v12501_v56  ;;  %v12502_v2 = vld [vmem:[#allocation45_spill] sm:$0xff] }
 0x43e   :  { %v11406_v21 = vpop.permute.xlu1 %5346  ;;  %v4852_v14 = vmul.f32 %v11039_v53, %v12502_v2  ;;  %7935 = vtanh.f32 %v5491_v12 }
 0x43f   :  { %v11412_v48 = vpop.permute.xlu0 %5344  ;;  %7937 = vtanh.f32 %v5490_v32 }
 0x440   :  { %5686 = vrot.lane.b32.xlu1 %v7920_v31, %s8080_s10 }
 0x441   :  { %5684 = vrot.lane.b32.xlu0 %v7922_v57, %s8080_s10  ;;  %v7926_v57 = vpop.eup %7925 }
 0x442   :  { %v11415_v60 = vpop.permute.xlu1 %5350  ;;  %v7928_v1 = vpop.eup %7927 }
 0x443   :  { %v11422_v27 = vpop.permute.xlu0 %5348 }
 0x444   :  { %6339 = vrot.lane.b32.xlu1 %v5489_v47, %s8081_s3  ;;  %v5493_v47 = vadd.f32 %v11356_v6, %v4853_v59  ;;  %v12503_v6 = vld [vmem:[#allocation46_spill] sm:$0xff] }
 0x445   :  { %6337 = vrot.lane.b32.xlu0 %v5488_v62, %s8081_s3  ;;  %v5492_v62 = vadd.f32 %v11362_v16, %v4852_v14  ;;  %v4855_v59 = vmul.f32 %v11049_v50, %v12503_v6  ;;  %v12504_v16 = vld [vmem:[#allocation47_spill] sm:$0xff] }
 0x446   :  { %v11424_v31 = vpop.permute.xlu1 %5354  ;;  %v4854_v14 = vmul.f32 %v11053_v55, %v12504_v16  ;;  %7939 = vtanh.f32 %v5493_v47 }
 0x447   :  { %v11430_v54 = vpop.permute.xlu0 %5352  ;;  %7941 = vtanh.f32 %v5492_v62 }
 0x448   :  { %5690 = vrot.lane.b32.xlu1 %v7924_v58, %s8080_s10 }
 0x449   :  { %5688 = vrot.lane.b32.xlu0 %v7926_v57, %s8080_s10  ;;  %v7930_v57 = vpop.eup %7929 }
 0x44a   :  { %v11433_v10 = vpop.permute.xlu1 %5358  ;;  %v7932_v4 = vpop.eup %7931 }
 0x44b   :  { %v11440_v40 = vpop.permute.xlu0 %5356 }
 0x44c   :  { %6343 = vrot.lane.b32.xlu1 %v5491_v12, %s8081_s3  ;;  %v5495_v12 = vadd.f32 %v11364_v34, %v4855_v59  ;;  %v12505_v34 = vld [vmem:[#allocation48_spill] sm:$0xff] }
 0x44d   :  { %6341 = vrot.lane.b32.xlu0 %v5490_v32, %s8081_s3  ;;  %v5494_v32 = vadd.f32 %v11370_v19, %v4854_v14  ;;  %v4857_v59 = vmul.f32 %v11065_v3, %v12505_v34  ;;  %v12506_v19 = vld [vmem:[#allocation49_spill] sm:$0xff] }
 0x44e   :  { %v11442_v58 = vpop.permute.xlu1 %5362  ;;  %v4856_v14 = vmul.f32 %v11073_v22, %v12506_v19  ;;  %7943 = vtanh.f32 %v5495_v12 }
 0x44f   :  { %v11448_v26 = vpop.permute.xlu0 %5360  ;;  %7945 = vtanh.f32 %v5494_v32 }
 0x450   :  { %5694 = vrot.lane.b32.xlu1 %v7928_v1, %s8080_s10 }
 0x451   :  { %5692 = vrot.lane.b32.xlu0 %v7930_v57, %s8080_s10  ;;  %v7934_v57 = vpop.eup %7933 }
 0x452   :  { %v11451_v29 = vpop.permute.xlu1 %5366  ;;  %v7936_v50 = vpop.eup %7935 }
 0x453   :  { %v11458_v56 = vpop.permute.xlu0 %5364 }
 0x454   :  { %6347 = vrot.lane.b32.xlu1 %v5493_v47, %s8081_s3  ;;  %v5497_v47 = vadd.f32 %v11372_v0, %v4857_v59  ;;  %v12507_v0 = vld [vmem:[#allocation50_spill] sm:$0xff] }
 0x455   :  { %6345 = vrot.lane.b32.xlu0 %v5492_v62, %s8081_s3  ;;  %v5496_v62 = vadd.f32 %v11378_v49, %v4856_v14  ;;  %v4859_v59 = vmul.f32 %v11076_v63, %v12507_v0  ;;  %v12508_v49 = vld [vmem:[#allocation51_spill] sm:$0xff] }
 0x456   :  { %v11460_v1 = vpop.permute.xlu1 %5370  ;;  %v4858_v14 = vmul.f32 %v11087_v44, %v12508_v49  ;;  %7947 = vtanh.f32 %v5497_v47 }
 0x457   :  { %v11466_v2 = vpop.permute.xlu0 %5368  ;;  %7949 = vtanh.f32 %v5496_v62 }
 0x458   :  { %5698 = vrot.lane.b32.xlu1 %v7932_v4, %s8080_s10 }
 0x459   :  { %5696 = vrot.lane.b32.xlu0 %v7934_v57, %s8080_s10  ;;  %v7938_v57 = vpop.eup %7937 }
 0x45a   :  { %v11469_v53 = vpop.permute.xlu1 %5374  ;;  %v7940_v3 = vpop.eup %7939 }
 0x45b   :  { %v11476_v6 = vpop.permute.xlu0 %5372 }
 0x45c   :  { %6351 = vrot.lane.b32.xlu1 %v5495_v12, %s8081_s3  ;;  %v5499_v12 = vadd.f32 %v11380_v9, %v4859_v59  ;;  %v12509_v9 = vld [vmem:[#allocation52_spill] sm:$0xff] }
 0x45d   :  { %6349 = vrot.lane.b32.xlu0 %v5494_v32, %s8081_s3  ;;  %v5498_v32 = vadd.f32 %v11386_v35, %v4858_v14  ;;  %v4861_v59 = vmul.f32 %v11094_v46, %v12509_v9  ;;  %v12510_v35 = vld [vmem:[#allocation53_spill] sm:$0xff] }
 0x45e   :  { %v11478_v4 = vpop.permute.xlu1 %5378  ;;  %v4860_v14 = vmul.f32 %v11103_v61, %v12510_v35  ;;  %7951 = vtanh.f32 %v5499_v12 }
 0x45f   :  { %v11484_v16 = vpop.permute.xlu0 %5376  ;;  %7953 = vtanh.f32 %v5498_v32 }
 0x460   :  { %5702 = vrot.lane.b32.xlu1 %v7936_v50, %s8080_s10 }
 0x461   :  { %5700 = vrot.lane.b32.xlu0 %v7938_v57, %s8080_s10  ;;  %v7942_v57 = vpop.eup %7941 }
 0x462   :  { %v11487_v55 = vpop.permute.xlu1 %5382  ;;  %v7944_v63 = vpop.eup %7943 }
 0x463   :  { %v11494_v34 = vpop.permute.xlu0 %5380 }
 0x464   :  { %6355 = vrot.lane.b32.xlu1 %v5497_v47, %s8081_s3  ;;  %v5501_v47 = vadd.f32 %v11388_v52, %v4861_v59  ;;  %v12511_v52 = vld [vmem:[#allocation54_spill] sm:$0xff] }
 0x465   :  { %6353 = vrot.lane.b32.xlu0 %v5496_v62, %s8081_s3  ;;  %v5500_v62 = vadd.f32 %v11394_v38, %v4860_v14  ;;  %v4863_v59 = vmul.f32 %v11106_v43, %v12511_v52  ;;  %v12512_v14 = vld [vmem:[#allocation55_spill] sm:$0xff] }
 0x466   :  { %v11496_v50 = vpop.permute.xlu1 %5386  ;;  %v4862_v61 = vmul.f32 %v11117_v33, %v12512_v14  ;;  %7955 = vtanh.f32 %v5501_v47 }
 0x467   :  { %v11502_v19 = vpop.permute.xlu0 %5384  ;;  %7957 = vtanh.f32 %v5500_v62 }
 0x468   :  { %5706 = vrot.lane.b32.xlu1 %v7940_v3, %s8080_s10 }
 0x469   :  { %5704 = vrot.lane.b32.xlu0 %v7942_v57, %s8080_s10  ;;  %v7946_v57 = vpop.eup %7945 }
 0x46a   :  { %v11505_v22 = vpop.permute.xlu1 %5390  ;;  %v7948_v46 = vpop.eup %7947 }
 0x46b   :  { %v11512_v0 = vpop.permute.xlu0 %5388  ;;  %v7950_v35 = vpop.eup %7949 }
 0x46c   :  { %6359 = vrot.lane.b32.xlu1 %v5499_v12, %s8081_s3  ;;  %v5503_v12 = vadd.f32 %v11397_v17, %v4863_v59  ;;  %v7952_v52 = vpop.eup %7951  ;;  %v12513_v17 = vld [vmem:[#allocation56_spill] sm:$0xff] }
 0x46d   :  { %6357 = vrot.lane.b32.xlu0 %v5498_v32, %s8081_s3  ;;  %v5502_v32 = vadd.f32 %v11404_v24, %v4862_v61  ;;  %v4865_v59 = vmul.f32 %v11121_v7, %v12513_v17  ;;  %v12514_v24 = vld [vmem:[#allocation57_spill] sm:$0xff]  ;;  %v12515_v17 = vld [vmem:[#allocation58_spill] sm:$0xff] }
 0x46e   :  { %v11514_v3 = vpop.permute.xlu1 %5394  ;;  %v4864_v14 = vmul.f32 %v11126_v51, %v12514_v24  ;;  %7959 = vtanh.f32 %v5503_v12 }
 0x46f   :  { %v11520_v49 = vpop.permute.xlu0 %5392  ;;  %7961 = vtanh.f32 %v5502_v32 }
 0x470   :  { %5710 = vrot.lane.b32.xlu1 %v7944_v63, %s8080_s10 }
 0x471   :  { %5708 = vrot.lane.b32.xlu0 %v7946_v57, %s8080_s10 }
 0x472   :  { %v11523_v44 = vpop.permute.xlu1 %5398 }
 0x473   :  { %v11530_v9 = vpop.permute.xlu0 %5396 }
 0x474   :  { %6363 = vrot.lane.b32.xlu1 %v5501_v47, %s8081_s3  ;;  %v5505_v47 = vadd.f32 %v11406_v21, %v4865_v59  ;;  %v12516_v59 = vld [vmem:[#allocation26_spill] sm:$0xff] }
 0x475   :  { %6361 = vrot.lane.b32.xlu0 %v5500_v62, %s8081_s3  ;;  %v5504_v62 = vadd.f32 %v11412_v48, %v4864_v14 }
 0x476   :  { %v6308_v63 = vpop.permute.xlu1 %6307  ;;  %7963 = vtanh.f32 %v5505_v47 }
 0x477   :  { %6498 = vst.msk [vmem:[#allocation6 + $0x8] sm:$0xff] %vm6176_vm1, %v6308_v63  ;;  %v6306_v57 = vpop.permute.xlu0 %6305  ;;  %7965 = vtanh.f32 %v5504_v62 }
 0x478   :  { %5714 = vrot.lane.b32.xlu1 %v7948_v46, %s8080_s10  ;;  %6497 = vst.msk [vmem:[#allocation6] sm:$0xff] %vm6176_vm1, %v6306_v57 }
 0x479   :  { %5712 = vrot.lane.b32.xlu0 %v7950_v35, %s8080_s10  ;;  %v7954_v35 = vpop.eup %7953 }
 0x47a   :  { %v11539_v38 = vpop.permute.xlu1 %5402  ;;  %v7956_v21 = vpop.eup %7955 }
 0x47b   :  { %v11546_v63 = vpop.permute.xlu0 %5400 }
 0x47c   :  { %6367 = vrot.lane.b32.xlu1 %v5503_v12, %s8081_s3  ;;  %v12517_v12 = vld [vmem:[#allocation59_spill] sm:$0xff] }
 0x47d   :  { %6365 = vrot.lane.b32.xlu0 %v5502_v32, %s8081_s3  ;;  %v4866_v14 = vmul.f32 %v11142_v13, %v12517_v12  ;;  %v12519_v12 = vld [vmem:[#allocation61_spill] sm:$0xff] }
 0x47e   :  { %v6312_v46 = vpop.permute.xlu1 %6311 }
 0x47f   :  { %6500 = vst.msk [vmem:[#allocation6 + $0x18] sm:$0xff] %vm6176_vm1, %v6312_v46  ;;  %v6310_v57 = vpop.permute.xlu0 %6309  ;;  %v5506_v32 = vadd.f32 %v11422_v27, %v4866_v14  ;;  %v12520_v14 = vld [vmem:[#allocation88_spill] sm:$0xff] }
 0x480   :  { %5718 = vrot.lane.b32.xlu1 %v7952_v52, %s8080_s10  ;;  %6499 = vst.msk [vmem:[#allocation6 + $0x10] sm:$0xff] %vm6176_vm1, %v6310_v57  ;;  %v4867_v57 = vmul.f32 %v12516_v59, %v12515_v17  ;;  %v4868_v13 = vmul.f32 %v12520_v14, %v12519_v12 }
 0x481   :  { %5716 = vrot.lane.b32.xlu0 %v7954_v35, %s8080_s10 }
 0x482   :  { %v6316_v61 = vpop.permute.xlu1 %6315  ;;  %v5507_v24 = vadd.f32 %v11415_v60, %v4867_v57  ;;  %v12518_v60 = vld [vmem:[#allocation60_spill] sm:$0xff] }
 0x483   :  { %6502 = vst.msk [vmem:[#allocation6 + $0x28] sm:$0xff] %vm6176_vm1, %v6316_v61  ;;  %v11561_v46 = vpop.permute.xlu0 %5404  ;;  %v7958_v61 = vpop.eup %7957  ;;  %v4869_v57 = vmul.f32 %v11149_v42, %v12518_v60 }
 0x484   :  { %6371 = vrot.lane.b32.xlu1 %v5505_v47, %s8081_s3  ;;  %v7960_v59 = vpop.eup %7959  ;;  %7967 = vtanh.f32 %v5507_v24 }
 0x485   :  { %6369 = vrot.lane.b32.xlu0 %v5504_v62, %s8081_s3  ;;  %v5509_v47 = vadd.f32 %v11424_v31, %v4869_v57  ;;  %v5508_v62 = vadd.f32 %v11430_v54, %v4868_v13  ;;  %7969 = vtanh.f32 %v5506_v32  ;;  %v12521_v31 = vld [vmem:[#allocation64_spill] sm:$0xff]  ;;  %v12522_v57 = vld [vmem:[#allocation89_spill] sm:$0xff] }
 0x486   :  { %v11563_v52 = vpop.permute.xlu1 %5406  ;;  %v12523_v54 = vld [vmem:[#allocation65_spill] sm:$0xff] }
 0x487   :  { %v6314_v35 = vpop.permute.xlu0 %6313  ;;  %v4870_v14 = vmul.f32 %v11172_v20, %v12523_v54  ;;  %7971 = vtanh.f32 %v5509_v47 }
 0x488   :  { %5722 = vrot.lane.b32.xlu1 %v7956_v21, %s8080_s10  ;;  %6501 = vst.msk [vmem:[#allocation6 + $0x20] sm:$0xff] %vm6176_vm1, %v6314_v35  ;;  %7973 = vtanh.f32 %v5508_v62 }
 0x489   :  { %5720 = vrot.lane.b32.xlu0 %v7958_v61, %s8080_s10  ;;  %v7962_v61 = vpop.eup %7961 }
 0x48a   :  { %v11571_v48 = vpop.permute.xlu1 %5666  ;;  %v7964_v60 = vpop.eup %7963 }
 0x48b   :  { %v11578_v17 = vpop.permute.xlu0 %5664  ;;  %v7966_v12 = vpop.eup %7965 }
 0x48c   :  { %6375 = vrot.lane.b32.xlu1 %v5507_v24, %s8081_s3 }
 0x48d   :  { %6373 = vrot.lane.b32.xlu0 %v5506_v32, %s8081_s3  ;;  %v5510_v32 = vadd.f32 %v11440_v40, %v4870_v14  ;;  %v12525_v14 = vld [vmem:[#allocation70_spill] sm:$0xff] }
 0x48e   :  { %v6320_v21 = vpop.permute.xlu1 %6319  ;;  %v4872_v54 = vmul.f32 %v11191_v11, %v12525_v14  ;;  %v12527_v14 = vld [vmem:[#allocation73_spill] sm:$0xff] }
 0x48f   :  { %6504 = vst.msk [vmem:[#allocation6 + $0x38] sm:$0xff] %vm6176_vm1, %v6320_v21  ;;  %v6318_v35 = vpop.permute.xlu0 %6317 }
 0x490   :  { %5726 = vrot.lane.b32.xlu1 %v7960_v59, %s8080_s10  ;;  %6503 = vst.msk [vmem:[#allocation6 + $0x30] sm:$0xff] %vm6176_vm1, %v6318_v35  ;;  %v4871_v35 = vmul.f32 %v12522_v57, %v12521_v31  ;;  %v7968_v31 = vpop.eup %7967 }
 0x491   :  { %5724 = vrot.lane.b32.xlu0 %v7962_v61, %s8080_s10 }
 0x492   :  { %v11587_v27 = vpop.permute.xlu1 %5670  ;;  %v5511_v24 = vadd.f32 %v11433_v10, %v4871_v35  ;;  %v12524_v10 = vld [vmem:[#allocation67_spill] sm:$0xff] }
 0x493   :  { %v11594_v21 = vpop.permute.xlu0 %5668  ;;  %v4873_v35 = vmul.f32 %v11177_v18, %v12524_v10 }
 0x494   :  { %6379 = vrot.lane.b32.xlu1 %v5509_v47, %s8081_s3  ;;  %7975 = vtanh.f32 %v5511_v24 }
 0x495   :  { %6377 = vrot.lane.b32.xlu0 %v5508_v62, %s8081_s3  ;;  %v5513_v47 = vadd.f32 %v11442_v58, %v4873_v35  ;;  %v5512_v62 = vadd.f32 %v11448_v26, %v4872_v54  ;;  %7977 = vtanh.f32 %v5510_v32  ;;  %v12526_v58 = vld [vmem:[#allocation72_spill] sm:$0xff]  ;;  %v4874_v54 = vmul.f32 %v11202_v23, %v12527_v14  ;;  %v12529_v14 = vld [vmem:[#allocation79_spill] sm:$0xff] }
 0x496   :  { %v6324_v59 = vpop.permute.xlu1 %6323  ;;  %v4875_v35 = vmul.f32 %v11195_v8, %v12526_v58 }
 0x497   :  { %6506 = vst.msk [vmem:[#allocation6 + $0x48] sm:$0xff] %vm6176_vm1, %v6324_v59  ;;  %v6322_v61 = vpop.permute.xlu0 %6321  ;;  %7979 = vtanh.f32 %v5513_v47 }
 0x498   :  { %5730 = vrot.lane.b32.xlu1 %v7964_v60, %s8080_s10  ;;  %6505 = vst.msk [vmem:[#allocation6 + $0x40] sm:$0xff] %vm6176_vm1, %v6322_v61  ;;  %7981 = vtanh.f32 %v5512_v62 }
 0x499   :  { %5728 = vrot.lane.b32.xlu0 %v7966_v12, %s8080_s10  ;;  %v7970_v12 = vpop.eup %7969 }
 0x49a   :  { %v11603_v13 = vpop.permute.xlu1 %5674  ;;  %v7972_v10 = vpop.eup %7971 }
 0x49b   :  { %v11610_v59 = vpop.permute.xlu0 %5672 }
 0x49c   :  { %6383 = vrot.lane.b32.xlu1 %v5511_v24, %s8081_s3  ;;  %v5515_v24 = vadd.f32 %v11451_v29, %v4875_v35  ;;  %v12528_v29 = vld [vmem:[#allocation76_spill] sm:$0xff] }
 0x49d   :  { %6381 = vrot.lane.b32.xlu0 %v5510_v32, %s8081_s3  ;;  %v5514_v32 = vadd.f32 %v11458_v56, %v4874_v54  ;;  %v4877_v35 = vmul.f32 %v11211_v30, %v12528_v29  ;;  %v4876_v54 = vmul.f32 %v11218_v15, %v12529_v14  ;;  %v12531_v14 = vld [vmem:[#allocation23_spill] sm:$0xff] }
 0x49e   :  { %v6328_v60 = vpop.permute.xlu1 %6327  ;;  %7983 = vtanh.f32 %v5515_v24 }
 0x49f   :  { %6508 = vst.msk [vmem:[#allocation6 + $0x58] sm:$0xff] %vm6176_vm1, %v6328_v60  ;;  %v6326_v61 = vpop.permute.xlu0 %6325  ;;  %7985 = vtanh.f32 %v5514_v32 }
 0x4a0   :  { %5734 = vrot.lane.b32.xlu1 %v7968_v31, %s8080_s10  ;;  %6507 = vst.msk [vmem:[#allocation6 + $0x50] sm:$0xff] %vm6176_vm1, %v6326_v61 }
 0x4a1   :  { %5732 = vrot.lane.b32.xlu0 %v7970_v12, %s8080_s10  ;;  %v7974_v12 = vpop.eup %7973 }
 0x4a2   :  { %v11619_v40 = vpop.permute.xlu1 %5678  ;;  %v7976_v58 = vpop.eup %7975 }
 0x4a3   :  { %v11626_v60 = vpop.permute.xlu0 %5676 }
 0x4a4   :  { %6387 = vrot.lane.b32.xlu1 %v5513_v47, %s8081_s3  ;;  %v5517_v47 = vadd.f32 %v11460_v1, %v4877_v35  ;;  %v12530_v1 = vld [vmem:[#allocation81_spill] sm:$0xff] }
 0x4a5   :  { %6385 = vrot.lane.b32.xlu0 %v5512_v62, %s8081_s3  ;;  %v5516_v62 = vadd.f32 %v11466_v2, %v4876_v54  ;;  %v4879_v35 = vmul.f32 %v11224_v45, %v12530_v1  ;;  %v4878_v54 = vmul.f32 %v11228_v25, %v12531_v14  ;;  %v12533_v14 = vld [vmem:[#allocation84_spill] sm:$0xff] }
 0x4a6   :  { %v6332_v31 = vpop.permute.xlu1 %6331  ;;  %7987 = vtanh.f32 %v5517_v47 }
 0x4a7   :  { %6510 = vst.msk [vmem:[#allocation6 + $0x68] sm:$0xff] %vm6176_vm1, %v6332_v31  ;;  %v6330_v61 = vpop.permute.xlu0 %6329  ;;  %7989 = vtanh.f32 %v5516_v62 }
 0x4a8   :  { %5738 = vrot.lane.b32.xlu1 %v7972_v10, %s8080_s10  ;;  %6509 = vst.msk [vmem:[#allocation6 + $0x60] sm:$0xff] %vm6176_vm1, %v6330_v61 }
 0x4a9   :  { %5736 = vrot.lane.b32.xlu0 %v7974_v12, %s8080_s10  ;;  %v7978_v12 = vpop.eup %7977 }
 0x4aa   :  { %v11635_v26 = vpop.permute.xlu1 %5682  ;;  %v7980_v29 = vpop.eup %7979 }
 0x4ab   :  { %v11642_v31 = vpop.permute.xlu0 %5680 }
 0x4ac   :  { %6391 = vrot.lane.b32.xlu1 %v5515_v24, %s8081_s3  ;;  %v5519_v24 = vadd.f32 %v11469_v53, %v4879_v35  ;;  %v12532_v53 = vld [vmem:[#allocation10_spill] sm:$0xff] }
 0x4ad   :  { %6389 = vrot.lane.b32.xlu0 %v5514_v32, %s8081_s3  ;;  %v5518_v32 = vadd.f32 %v11476_v6, %v4878_v54  ;;  %v4881_v35 = vmul.f32 %v11235_v36, %v12532_v53  ;;  %v4880_v54 = vmul.f32 %v11240_v37, %v12533_v14  ;;  %v12535_v14 = vld [vmem:[#allocation16_spill] sm:$0xff] }
 0x4ae   :  { %v6336_v10 = vpop.permute.xlu1 %6335  ;;  %7991 = vtanh.f32 %v5519_v24 }
 0x4af   :  { %6512 = vst.msk [vmem:[#allocation6 + $0x78] sm:$0xff] %vm6176_vm1, %v6336_v10  ;;  %v6334_v61 = vpop.permute.xlu0 %6333  ;;  %7993 = vtanh.f32 %v5518_v32 }
 0x4b0   :  { %5742 = vrot.lane.b32.xlu1 %v7976_v58, %s8080_s10  ;;  %6511 = vst.msk [vmem:[#allocation6 + $0x70] sm:$0xff] %vm6176_vm1, %v6334_v61 }
 0x4b1   :  { %5740 = vrot.lane.b32.xlu0 %v7978_v12, %s8080_s10  ;;  %v7982_v12 = vpop.eup %7981 }
 0x4b2   :  { %v11651_v56 = vpop.permute.xlu1 %5686  ;;  %v7984_v1 = vpop.eup %7983 }
 0x4b3   :  { %v11658_v10 = vpop.permute.xlu0 %5684 }
 0x4b4   :  { %6395 = vrot.lane.b32.xlu1 %v5517_v47, %s8081_s3  ;;  %v5521_v47 = vadd.f32 %v11478_v4, %v4881_v35  ;;  %v12534_v4 = vld [vmem:[#allocation12_spill] sm:$0xff] }
 0x4b5   :  { %6393 = vrot.lane.b32.xlu0 %v5516_v62, %s8081_s3  ;;  %v5520_v62 = vadd.f32 %v11484_v16, %v4880_v54  ;;  %v4883_v35 = vmul.f32 %v11246_v5, %v12534_v4  ;;  %v4882_v54 = vmul.f32 %v11253_v39, %v12535_v14  ;;  %v12539_v39 = vld [vmem:[#allocation94_spill] sm:$0xff] }
 0x4b6   :  { %v6340_v58 = vpop.permute.xlu1 %6339  ;;  %7995 = vtanh.f32 %v5521_v47 }
 0x4b7   :  { %6514 = vst.msk [vmem:[#allocation6 + $0x88] sm:$0xff] %vm6176_vm1, %v6340_v58  ;;  %v6338_v61 = vpop.permute.xlu0 %6337  ;;  %7997 = vtanh.f32 %v5520_v62 }
 0x4b8   :  { %5746 = vrot.lane.b32.xlu1 %v7980_v29, %s8080_s10  ;;  %6513 = vst.msk [vmem:[#allocation6 + $0x80] sm:$0xff] %vm6176_vm1, %v6338_v61 }
 0x4b9   :  { %5744 = vrot.lane.b32.xlu0 %v7982_v12, %s8080_s10  ;;  %v7986_v12 = vpop.eup %7985 }
 0x4ba   :  { %v11667_v2 = vpop.permute.xlu1 %5690  ;;  %v7988_v53 = vpop.eup %7987 }
 0x4bb   :  { %v11674_v58 = vpop.permute.xlu0 %5688 }
 0x4bc   :  { %6399 = vrot.lane.b32.xlu1 %v5519_v24, %s8081_s3  ;;  %v5523_v24 = vadd.f32 %v11487_v55, %v4883_v35  ;;  %v12536_v55 = vld [vmem:[#allocation22_spill] sm:$0xff]  ;;  %v12537_v35 = vld [vmem:[#allocation93_spill] sm:$0xff] }
 0x4bd   :  { %6397 = vrot.lane.b32.xlu0 %v5518_v32, %s8081_s3  ;;  %v5522_v32 = vadd.f32 %v11494_v34, %v4882_v54  ;;  %v12538_v54 = vld [vmem:[#allocation85_spill] sm:$0xff] }
 0x4be   :  { %v6344_v29 = vpop.permute.xlu1 %6343  ;;  %v4884_v5 = vmul.f32 %v12539_v39, %v12538_v54  ;;  %7999 = vtanh.f32 %v5523_v24  ;;  %v12543_v39 = vld [vmem:[#allocation113_spill] sm:$0xff] }
 0x4bf   :  { %6516 = vst.msk [vmem:[#allocation6 + $0x98] sm:$0xff] %vm6176_vm1, %v6344_v29  ;;  %v6342_v61 = vpop.permute.xlu0 %6341  ;;  %8001 = vtanh.f32 %v5522_v32 }
 0x4c0   :  { %5750 = vrot.lane.b32.xlu1 %v7984_v1, %s8080_s10  ;;  %6515 = vst.msk [vmem:[#allocation6 + $0x90] sm:$0xff] %vm6176_vm1, %v6342_v61 }
 0x4c1   :  { %5748 = vrot.lane.b32.xlu0 %v7986_v12, %s8080_s10  ;;  %v7990_v12 = vpop.eup %7989 }
 0x4c2   :  { %v11683_v6 = vpop.permute.xlu1 %5694  ;;  %v7992_v4 = vpop.eup %7991 }
 0x4c3   :  { %v11690_v29 = vpop.permute.xlu0 %5692  ;;  %v7994_v14 = vpop.eup %7993 }
 0x4c4   :  { %6403 = vrot.lane.b32.xlu1 %v5521_v47, %s8081_s3 }
 0x4c5   :  { %6401 = vrot.lane.b32.xlu0 %v5520_v62, %s8081_s3  ;;  %v5524_v62 = vadd.f32 %v11502_v19, %v4884_v5  ;;  %v12542_v19 = vld [vmem:[#allocation29_spill] sm:$0xff] }
 0x4c6   :  { %v6348_v1 = vpop.permute.xlu1 %6347 }
 0x4c7   :  { %6518 = vst.msk [vmem:[#allocation6 + $0xa8] sm:$0xff] %vm6176_vm1, %v6348_v1  ;;  %v6346_v61 = vpop.permute.xlu0 %6345 }
 0x4c8   :  { %5754 = vrot.lane.b32.xlu1 %v7988_v53, %s8080_s10  ;;  %6517 = vst.msk [vmem:[#allocation6 + $0xa0] sm:$0xff] %vm6176_vm1, %v6346_v61  ;;  %v4885_v61 = vmul.f32 %v12537_v35, %v12536_v55  ;;  %v7996_v55 = vpop.eup %7995  ;;  %v4886_v35 = vmul.f32 %v12543_v39, %v12542_v19  ;;  %v12547_v39 = vld [vmem:[#allocation115_spill] sm:$0xff] }
 0x4c9   :  { %5752 = vrot.lane.b32.xlu0 %v7990_v12, %s8080_s10  ;;  %v7998_v54 = vpop.eup %7997 }
 0x4ca   :  { %v11699_v16 = vpop.permute.xlu1 %5698  ;;  %v5525_v47 = vadd.f32 %v11496_v50, %v4885_v61  ;;  %v12540_v50 = vld [vmem:[#allocation87_spill] sm:$0xff] }
 0x4cb   :  { %v11706_v1 = vpop.permute.xlu0 %5696  ;;  %v12541_v61 = vld [vmem:[#allocation95_spill] sm:$0xff] }
 0x4cc   :  { %6407 = vrot.lane.b32.xlu1 %v5523_v24, %s8081_s3  ;;  %8003 = vtanh.f32 %v5525_v47 }
 0x4cd   :  { %6405 = vrot.lane.b32.xlu0 %v5522_v32, %s8081_s3  ;;  %v5526_v32 = vadd.f32 %v11512_v0, %v4886_v35  ;;  %8005 = vtanh.f32 %v5524_v62  ;;  %v12546_v35 = vld [vmem:[#allocation90_spill] sm:$0xff] }
 0x4ce   :  { %v6352_v53 = vpop.permute.xlu1 %6351 }
 0x4cf   :  { %6520 = vst.msk [vmem:[#allocation6 + $0xb8] sm:$0xff] %vm6176_vm1, %v6352_v53  ;;  %v6350_v12 = vpop.permute.xlu0 %6349 }
 0x4d0   :  { %5758 = vrot.lane.b32.xlu1 %v7992_v4, %s8080_s10  ;;  %6519 = vst.msk [vmem:[#allocation6 + $0xb0] sm:$0xff] %vm6176_vm1, %v6350_v12  ;;  %v4887_v12 = vmul.f32 %v12541_v61, %v12540_v50  ;;  %v8000_v50 = vpop.eup %7999  ;;  %v4888_v61 = vmul.f32 %v12547_v39, %v12546_v35 }
 0x4d1   :  { %5756 = vrot.lane.b32.xlu0 %v7994_v14, %s8080_s10  ;;  %v8002_v19 = vpop.eup %8001 }
 0x4d2   :  { %v11715_v34 = vpop.permute.xlu1 %5702  ;;  %v5527_v24 = vadd.f32 %v11505_v22, %v4887_v12  ;;  %v12544_v22 = vld [vmem:[#allocation32_spill] sm:$0xff]  ;;  %v12545_v12 = vld [vmem:[#allocation114_spill] sm:$0xff] }
 0x4d3   :  { %v11722_v53 = vpop.permute.xlu0 %5700 }
 0x4d4   :  { %6411 = vrot.lane.b32.xlu1 %v5525_v47, %s8081_s3  ;;  %8007 = vtanh.f32 %v5527_v24 }
 0x4d5   :  { %6409 = vrot.lane.b32.xlu0 %v5524_v62, %s8081_s3  ;;  %v5528_v62 = vadd.f32 %v11520_v49, %v4888_v61  ;;  %8009 = vtanh.f32 %v5526_v32  ;;  %v12550_v61 = vld [vmem:[#allocation36_spill] sm:$0xff] }
 0x4d6   :  { %v6356_v4 = vpop.permute.xlu1 %6355  ;;  %v4890_v39 = vmul.f32 %v11290_v28, %v12550_v61  ;;  %v12553_v61 = vld [vmem:[#allocation15_spill] sm:$0xff] }
 0x4d7   :  { %6522 = vst.msk [vmem:[#allocation6 + $0xc8] sm:$0xff] %vm6176_vm1, %v6356_v4  ;;  %v6354_v14 = vpop.permute.xlu0 %6353 }
 0x4d8   :  { %5762 = vrot.lane.b32.xlu1 %v7996_v55, %s8080_s10  ;;  %6521 = vst.msk [vmem:[#allocation6 + $0xc0] sm:$0xff] %vm6176_vm1, %v6354_v14  ;;  %v4889_v14 = vmul.f32 %v12545_v12, %v12544_v22  ;;  %v8004_v22 = vpop.eup %8003 }
 0x4d9   :  { %5760 = vrot.lane.b32.xlu0 %v7998_v54, %s8080_s10  ;;  %v8006_v35 = vpop.eup %8005 }
 0x4da   :  { %v11731_v5 = vpop.permute.xlu1 %5706  ;;  %v5529_v47 = vadd.f32 %v11514_v3, %v4889_v14  ;;  %v12548_v3 = vld [vmem:[#allocation92_spill] sm:$0xff] }
 0x4db   :  { %v11738_v4 = vpop.permute.xlu0 %5704  ;;  %v12549_v14 = vld [vmem:[#allocation116_spill] sm:$0xff] }
 0x4dc   :  { %6415 = vrot.lane.b32.xlu1 %v5527_v24, %s8081_s3  ;;  %8011 = vtanh.f32 %v5529_v47 }
 0x4dd   :  { %6413 = vrot.lane.b32.xlu0 %v5526_v32, %s8081_s3  ;;  %v5530_v32 = vadd.f32 %v11530_v9, %v4890_v39  ;;  %8013 = vtanh.f32 %v5528_v62  ;;  %v12552_v9 = vld [vmem:[#allocation96_spill] sm:$0xff] }
 0x4de   :  { %v6360_v55 = vpop.permute.xlu1 %6359  ;;  %v4892_v28 = vmul.f32 %v12553_v61, %v12552_v9  ;;  %v12557_v61 = vld [vmem:[#allocation41_spill] sm:$0xff] }
 0x4df   :  { %6524 = vst.msk [vmem:[#allocation6 + $0xd8] sm:$0xff] %vm6176_vm1, %v6360_v55  ;;  %v6358_v54 = vpop.permute.xlu0 %6357 }
 0x4e0   :  { %5766 = vrot.lane.b32.xlu1 %v8000_v50, %s8080_s10  ;;  %6523 = vst.msk [vmem:[#allocation6 + $0xd0] sm:$0xff] %vm6176_vm1, %v6358_v54  ;;  %v4891_v54 = vmul.f32 %v12549_v14, %v12548_v3  ;;  %v8008_v3 = vpop.eup %8007 }
 0x4e1   :  { %5764 = vrot.lane.b32.xlu0 %v8002_v19, %s8080_s10 }
 0x4e2   :  { %v11747_v0 = vpop.permute.xlu1 %5710  ;;  %v5531_v24 = vadd.f32 %v11523_v44, %v4891_v54  ;;  %v12551_v44 = vld [vmem:[#allocation39_spill] sm:$0xff] }
 0x4e3   :  { %v11754_v55 = vpop.permute.xlu0 %5708  ;;  %v4893_v54 = vmul.f32 %v11300_v41, %v12551_v44 }
 0x4e4   :  { %6419 = vrot.lane.b32.xlu1 %v5529_v47, %s8081_s3  ;;  %8015 = vtanh.f32 %v5531_v24 }
 0x4e5   :  { %6417 = vrot.lane.b32.xlu0 %v5528_v62, %s8081_s3  ;;  %v5533_v47 = vadd.f32 %v11539_v38, %v4893_v54  ;;  %8017 = vtanh.f32 %v5530_v32  ;;  %v5532_v62 = vadd.f32 %v11546_v63, %v4892_v28 }
 0x4e6   :  { %v6364_v50 = vpop.permute.xlu1 %6363 }
 0x4e7   :  { %6526 = vst.msk [vmem:[#allocation6 + $0xe8] sm:$0xff] %vm6176_vm1, %v6364_v50  ;;  %v6362_v19 = vpop.permute.xlu0 %6361  ;;  %8019 = vtanh.f32 %v5533_v47 }
 0x4e8   :  { %5770 = vrot.lane.b32.xlu1 %v8004_v22, %s8080_s10  ;;  %6525 = vst.msk [vmem:[#allocation6 + $0xe0] sm:$0xff] %vm6176_vm1, %v6362_v19  ;;  %8021 = vtanh.f32 %v5532_v62 }
 0x4e9   :  { %5768 = vrot.lane.b32.xlu0 %v8006_v35, %s8080_s10  ;;  %v8010_v35 = vpop.eup %8009 }
 0x4ea   :  { %v11763_v49 = vpop.permute.xlu1 %5714 }
 0x4eb   :  { %v11770_v50 = vpop.permute.xlu0 %5712 }
 0x4ec   :  { %6423 = vrot.lane.b32.xlu1 %v5531_v24, %s8081_s3 }
 0x4ed   :  { %6421 = vrot.lane.b32.xlu0 %v5530_v32, %s8081_s3 }
 0x4ee   :  { %v6368_v22 = vpop.permute.xlu1 %6367 }
 0x4ef   :  { %6528 = vst.msk [vmem:[#allocation6 + $0xf8] sm:$0xff] %vm6176_vm1, %v6368_v22  ;;  %v6366_v19 = vpop.permute.xlu0 %6365 }
 0x4f0   :  { %5774 = vrot.lane.b32.xlu1 %v8008_v3, %s8080_s10  ;;  %6527 = vst.msk [vmem:[#allocation6 + $0xf0] sm:$0xff] %vm6176_vm1, %v6366_v19  ;;  %v8012_v3 = vpop.eup %8011  ;;  %v12554_v19 = vld [vmem:[#allocation43_spill] sm:$0xff] }
 0x4f1   :  { %5772 = vrot.lane.b32.xlu0 %v8010_v35, %s8080_s10  ;;  %v8014_v44 = vpop.eup %8013  ;;  %v12555_v35 = vld [vmem:[#allocation17_spill] sm:$0xff] }
 0x4f2   :  { %v11779_v39 = vpop.permute.xlu1 %5718  ;;  %v8016_v54 = vpop.eup %8015  ;;  %v4894_v9 = vmul.f32 %v12555_v35, %v12554_v19 }
 0x4f3   :  { %v11786_v22 = vpop.permute.xlu0 %5716  ;;  %v8018_v63 = vpop.eup %8017 }
 0x4f4   :  { %6427 = vrot.lane.b32.xlu1 %v5533_v47, %s8081_s3  ;;  %v12556_v47 = vld [vmem:[#allocation97_spill] sm:$0xff] }
 0x4f5   :  { %6425 = vrot.lane.b32.xlu0 %v5532_v62, %s8081_s3  ;;  %v11807_v62 = vadd.f32 %v11561_v46, %v4894_v9 }
 0x4f6   :  { %v6372_v24 = vpop.permute.xlu1 %6371 }
 0x4f7   :  { %6530 = vst.msk [vmem:[#allocation6 + $0x108] sm:$0xff] %vm6176_vm1, %v6372_v24  ;;  %v6370_v38 = vpop.permute.xlu0 %6369  ;;  %v5857_v24 = vmul.f32 %v12556_v47, %v11571_v48  ;;  %8023 = vtanh.f32 %v11807_v62  ;;  %v12561_v47 = vld [vmem:[#allocation100_spill] sm:$0xff] }
 0x4f8   :  { %5778 = vrot.lane.b32.xlu1 %v8012_v3, %s8080_s10  ;;  %6529 = vst.msk [vmem:[#allocation6 + $0x100] sm:$0xff] %vm6176_vm1, %v6370_v38  ;;  %v12558_v38 = vld [vmem:[#allocation13_spill] sm:$0xff] }
 0x4f9   :  { %5776 = vrot.lane.b32.xlu0 %v8014_v44, %s8080_s10  ;;  %v4895_v41 = vmul.f32 %v12558_v38, %v12557_v61 }
 0x4fa   :  { %v11792_v32 = vpop.permute.xlu1 %5722 }
 0x4fb   :  { %v11796_v28 = vpop.permute.xlu0 %5720  ;;  %v11811_v44 = vadd.f32 %v11563_v52, %v4895_v41  ;;  %v12560_v52 = vld [vmem:[#allocation99_spill] sm:$0xff] }
 0x4fc   :  { %5782 = vrot.lane.b32.xlu1 %v8016_v54, %s8080_s10  ;;  %v12559_v54 = vld [vmem:[#allocation98_spill] sm:$0xff] }
 0x4fd   :  { %5780 = vrot.lane.b32.xlu0 %v8018_v63, %s8080_s10  ;;  %v5856_v48 = vmul.f32 %v12559_v54, %v11578_v17  ;;  %v8020_v63 = vpop.eup %8019  ;;  %8025 = vtanh.f32 %v11811_v44  ;;  %v5859_v17 = vmul.f32 %v12560_v52, %v11587_v27  ;;  %v12562_v54 = vld [vmem:[#allocation101_spill] sm:$0xff] }
 0x4fe   :  { %v6376_v3 = vpop.permute.xlu1 %6375  ;;  %v8022_v41 = vpop.eup %8021 }
 0x4ff   :  { %6532 = vst.msk [vmem:[#allocation6 + $0x118] sm:$0xff] %vm6176_vm1, %v6376_v3  ;;  %v6374_v19 = vpop.permute.xlu0 %6373 }
 0x500   :  { %5986 = vrot.lane.b32.xlu1 %v5857_v24, %s8082_s7  ;;  %6531 = vst.msk [vmem:[#allocation6 + $0x110] sm:$0xff] %vm6176_vm1, %v6374_v19  ;;  %v5858_v24 = vmul.f32 %v12561_v47, %v11594_v21  ;;  %v12563_v21 = vld [vmem:[#allocation102_spill] sm:$0xff] }
 0x501   :  { %5984 = vrot.lane.b32.xlu0 %v5856_v48, %s8082_s7  ;;  %v5861_v48 = vmul.f32 %v12562_v54, %v11603_v13  ;;  %v5860_v13 = vmul.f32 %v12563_v21, %v11610_v59 }
 0x502   :  { %v11816_v61 = vpop.permute.xlu1 %5726 }
 0x503   :  { %v11822_v46 = vpop.permute.xlu0 %5724 }
 0x504   :  { %5786 = vrot.lane.b32.xlu1 %v8020_v63, %s8080_s10  ;;  %v8024_v63 = vpop.eup %8023 }
 0x505   :  { %5784 = vrot.lane.b32.xlu0 %v8022_v41, %s8080_s10 }
 0x506   :  { %v6380_v9 = vpop.permute.xlu1 %6379 }
 0x507   :  { %6534 = vst.msk [vmem:[#allocation6 + $0x128] sm:$0xff] %vm6176_vm1, %v6380_v9  ;;  %v6378_v3 = vpop.permute.xlu0 %6377  ;;  %v8026_v52 = vpop.eup %8025  ;;  %v12564_v9 = vld [vmem:[#allocation103_spill] sm:$0xff] }
 0x508   :  { %5990 = vrot.lane.b32.xlu1 %v5859_v17, %s8082_s7  ;;  %6533 = vst.msk [vmem:[#allocation6 + $0x120] sm:$0xff] %vm6176_vm1, %v6378_v3  ;;  %v5863_v47 = vmul.f32 %v12564_v9, %v11619_v40  ;;  %v12565_v3 = vld [vmem:[#allocation104_spill] sm:$0xff]  ;;  %v12567_v40 = vld [vmem:[#allocation106_spill] sm:$0xff] }
 0x509   :  { %5988 = vrot.lane.b32.xlu0 %v5858_v24, %s8082_s7  ;;  %v5862_v54 = vmul.f32 %v12565_v3, %v11626_v60  ;;  %v12570_v3 = vld [vmem:[#allocation66_spill] sm:$0xff] }
 0x50a   :  { %v11834_v19 = vpop.permute.xlu1 %5730 }
 0x50b   :  { %v11838_v27 = vpop.permute.xlu0 %5728 }
 0x50c   :  { %5994 = vrot.lane.b32.xlu1 %v5861_v48, %s8082_s7 }
 0x50d   :  { %5788 = vrot.lane.b32.xlu0 %v8024_v63, %s8080_s10  ;;  %v12566_v63 = vld [vmem:[#allocation105_spill] sm:$0xff] }
 0x50e   :  { %v6384_v41 = vpop.permute.xlu1 %6383  ;;  %v5865_v59 = vmul.f32 %v12566_v63, %v11635_v26  ;;  %v12569_v26 = vld [vmem:[#allocation63_spill] sm:$0xff] }
 0x50f   :  { %6536 = vst.msk [vmem:[#allocation6 + $0x138] sm:$0xff] %vm6176_vm1, %v6384_v41  ;;  %v6382_v17 = vpop.permute.xlu0 %6381  ;;  %v5866_v9 = vmul.f32 %v12569_v26, %v11658_v10 }
 0x510   :  { %5790 = vrot.lane.b32.xlu1 %v8026_v52, %s8080_s10  ;;  %6535 = vst.msk [vmem:[#allocation6 + $0x130] sm:$0xff] %vm6176_vm1, %v6382_v17  ;;  %v5864_v52 = vmul.f32 %v12567_v40, %v11642_v31  ;;  %v5869_v31 = vmul.f32 %v12570_v3, %v11667_v2  ;;  %v12573_v2 = vld [vmem:[#allocation69_spill] sm:$0xff]  ;;  %v12576_v3 = vld [vmem:[#allocation74_spill] sm:$0xff]  ;;  %s8083_s10 = smov [#allocation4]  }
 0x511   :  { %5992 = vrot.lane.b32.xlu0 %v5860_v13, %s8082_s7  ;;  %v12568_v13 = vld [vmem:[#allocation62_spill] sm:$0xff]  ;;  %s6566_s8 = sshll.u32 %s8083_s10, 4  ;;  %s6567_s8 = int_to_ptr.vmem [resolvable:$true] %s6566_s8 }
 0x512   :  { %v11848_v24 = vpop.permute.xlu1 %5734  ;;  %v5867_v17 = vmul.f32 %v12568_v13, %v11651_v56  ;;  %v12571_v56 = vld [vmem:[#allocation107_spill] sm:$0xff]  ;;  %v12574_v13 = vld [vmem:[#allocation108_spill] sm:$0xff]  ;;  %s8030_s12 = scalar_lea.vmem %s6567_s8, 8192  ;;  %p8035_p1 = scmp.lt.s32.totalorder %s6567_s8, %s6567_s8 }
 0x513   :  { %v11854_v48 = vpop.permute.xlu0 %5732  ;;  %v5868_v63 = vmul.f32 %v12571_v56, %v11674_v58  ;;  %v5873_v58 = vmul.f32 %v12574_v13, %v11699_v16  ;;  %v12577_v16 = vld [vmem:[#allocation75_spill] sm:$0xff]  ;;  %p8031_p0 = scmp.ne.s32.totalorder %s6567_s8, %s8030_s12  ;;  %p8036_p2 = scmp.lt.s32.totalorder %s8030_s12, %s8030_s12 }
 0x514   :  { %5998 = vrot.lane.b32.xlu1 %v5863_v47, %s8082_s7 }
 0x515   :  { %5996 = vrot.lane.b32.xlu0 %v5862_v54, %s8082_s7  ;;  %p8037_p3 = por %p8036_p2, %p8035_p1 }
 0x516   :  { %v6388_v41 = vpop.permute.xlu1 %6387 }
 0x517   :  { %6538 = vst.msk [vmem:[#allocation6 + $0x148] sm:$0xff] %vm6176_vm1, %v6388_v41  ;;  %v6386_v21 = vpop.permute.xlu0 %6385  ;;  %v12572_v41 = vld [vmem:[#allocation68_spill] sm:$0xff]  ;;  %p8038_p4 = pnand %p8037_p3, %p8031_p0 }
 0x518   :  { %6002 = vrot.lane.b32.xlu1 %v5865_v59, %s8082_s7  ;;  %6537 = vst.msk [vmem:[#allocation6 + $0x140] sm:$0xff] %vm6176_vm1, %v6386_v21  ;;  %v5871_v40 = vmul.f32 %v12572_v41, %v11683_v6  ;;  %v12575_v6 = vld [vmem:[#allocation71_spill] sm:$0xff] }
 0x519   :  { %6000 = vrot.lane.b32.xlu0 %v5864_v52, %s8082_s7  ;;  %v5870_v52 = vmul.f32 %v12573_v2, %v11690_v29  ;;  %v5872_v26 = vmul.f32 %v12575_v6, %v11706_v1  ;;  %v12580_v2 = vld [vmem:[#allocation19_spill] sm:$0xff] }
 0x51a   :  { %v11866_v60 = vpop.permute.xlu1 %5738 }
 0x51b   :  { %v11872_v47 = vpop.permute.xlu0 %5736 }
 0x51c   :  { %6006 = vrot.lane.b32.xlu1 %v5867_v17, %s8082_s7 }
 0x51d   :  { %6004 = vrot.lane.b32.xlu0 %v5866_v9, %s8082_s7 }
 0x51e   :  { %v6392_v54 = vpop.permute.xlu1 %6391 }
 0x51f   :  { %6540 = vst.msk [vmem:[#allocation6 + $0x158] sm:$0xff] %vm6176_vm1, %v6392_v54  ;;  %v6390_v59 = vpop.permute.xlu0 %6389  ;;  %v5874_v54 = vmul.f32 %v12577_v16, %v11722_v53 }
 0x520   :  { %6010 = vrot.lane.b32.xlu1 %v5869_v31, %s8082_s7  ;;  %6539 = vst.msk [vmem:[#allocation6 + $0x150] sm:$0xff] %vm6176_vm1, %v6390_v59  ;;  %v5875_v31 = vmul.f32 %v12576_v3, %v11715_v34  ;;  %v12579_v34 = vld [vmem:[#allocation78_spill] sm:$0xff]  ;;  %v12584_v3 = vld [vmem:[#allocation109_spill] sm:$0xff] }
 0x521   :  { %6008 = vrot.lane.b32.xlu0 %v5868_v63, %s8082_s7  ;;  %v12578_v63 = vld [vmem:[#allocation77_spill] sm:$0xff]  ;;  %v5876_v41 = vmul.f32 %v12579_v34, %v11738_v4 }
 0x522   :  { %v11884_v10 = vpop.permute.xlu1 %5742  ;;  %v5877_v1 = vmul.f32 %v12578_v63, %v11731_v5  ;;  %v12581_v5 = vld [vmem:[#allocation80_spill] sm:$0xff]  ;;  %v12586_v63 = vld [vmem:[#allocation111_spill] sm:$0xff] }
 0x523   :  { %v11890_v21 = vpop.permute.xlu0 %5740  ;;  %v5878_v13 = vmul.f32 %v12581_v5, %v11754_v55 }
 0x524   :  { %6014 = vrot.lane.b32.xlu1 %v5871_v40, %s8082_s7 }
 0x525   :  { %6012 = vrot.lane.b32.xlu0 %v5870_v52, %s8082_s7  ;;  %v5879_v52 = vmul.f32 %v12580_v2, %v11747_v0  ;;  %v12583_v0 = vld [vmem:[#allocation83_spill] sm:$0xff]  ;;  %v5889_v2 = vmul.f32 %v11121_v7, %v11834_v19  ;;  %v12589_v7 = vld [vmem:[#allocation86_spill] sm:$0xff] }
 0x526   :  { %v6396_v17 = vpop.permute.xlu1 %6395 }
 0x527   :  { %6542 = vst.msk [vmem:[#allocation6 + $0x168] sm:$0xff] %vm6176_vm1, %v6396_v17  ;;  %v6394_v9 = vpop.permute.xlu0 %6393  ;;  %v12582_v17 = vld [vmem:[#allocation82_spill] sm:$0xff] }
 0x528   :  { %6018 = vrot.lane.b32.xlu1 %v5873_v58, %s8082_s7  ;;  %6541 = vst.msk [vmem:[#allocation6 + $0x160] sm:$0xff] %vm6176_vm1, %v6394_v9  ;;  %v5881_v4 = vmul.f32 %v12582_v17, %v11763_v49  ;;  %v12585_v49 = vld [vmem:[#allocation110_spill] sm:$0xff] }
 0x529   :  { %6016 = vrot.lane.b32.xlu0 %v5872_v26, %s8082_s7  ;;  %v5880_v26 = vmul.f32 %v12583_v0, %v11770_v50  ;;  %v5882_v16 = vmul.f32 %v12585_v49, %v11786_v22  ;;  %v12587_v50 = vld [vmem:[#allocation112_spill] sm:$0xff] }
 0x52a   :  { %v11902_v29 = vpop.permute.xlu1 %5746 }
 0x52b   :  { %v11908_v56 = vpop.permute.xlu0 %5744 }
 0x52c   :  { %6022 = vrot.lane.b32.xlu1 %v5875_v31, %s8082_s7  ;;  %v5883_v31 = vmul.f32 %v12584_v3, %v11779_v39  ;;  %v5884_v39 = vmul.f32 %v12587_v50, %v11796_v28  ;;  %v12591_v3 = vld [vmem:[#allocation34_spill] sm:$0xff]  ;;  %v12595_v50 = vld [vmem:[#allocation95_spill] sm:$0xff] }
 0x52d   :  { %6020 = vrot.lane.b32.xlu0 %v5874_v54, %s8082_s7 }
 0x52e   :  { %v6400_v59 = vpop.permute.xlu1 %6399 }
 0x52f   :  { %6544 = vst.msk [vmem:[#allocation6 + $0x178] sm:$0xff] %vm6176_vm1, %v6400_v59  ;;  %v6398_v40 = vpop.permute.xlu0 %6397 }
 0x530   :  { %6026 = vrot.lane.b32.xlu1 %v5877_v1, %s8082_s7  ;;  %6543 = vst.msk [vmem:[#allocation6 + $0x170] sm:$0xff] %vm6176_vm1, %v6398_v40  ;;  %v5885_v1 = vmul.f32 %v12586_v63, %v11792_v32  ;;  %v5886_v32 = vmul.f32 %v11117_v33, %v11822_v46  ;;  %v5890_v46 = vmul.f32 %v12589_v7, %v11854_v48 }
 0x531   :  { %6024 = vrot.lane.b32.xlu0 %v5876_v41, %s8082_s7  ;;  %v5887_v41 = vmul.f32 %v11106_v43, %v11816_v61  ;;  %v5888_v43 = vmul.f32 %v11126_v51, %v11838_v27  ;;  %v12588_v61 = vld [vmem:[#allocation26_spill] sm:$0xff]  ;;  %v12590_v51 = vld [vmem:[#allocation88_spill] sm:$0xff] }
 0x532   :  { %v11920_v53 = vpop.permute.xlu1 %5750  ;;  %v5891_v5 = vmul.f32 %v12588_v61, %v11848_v24  ;;  %v5892_v27 = vmul.f32 %v12590_v51, %v11872_v47 }
 0x533   :  { %v11926_v58 = vpop.permute.xlu0 %5748 }
 0x534   :  { %6030 = vrot.lane.b32.xlu1 %v5879_v52, %s8082_s7 }
 0x535   :  { %6028 = vrot.lane.b32.xlu0 %v5878_v13, %s8082_s7  ;;  %v5893_v13 = vmul.f32 %v11149_v42, %v11866_v60  ;;  %v5894_v42 = vmul.f32 %v11172_v20, %v11890_v21 }
 0x536   :  { %v6404_v6 = vpop.permute.xlu1 %6403 }
 0x537   :  { %6546 = vst.msk [vmem:[#allocation6 + $0x188] sm:$0xff] %vm6176_vm1, %v6404_v6  ;;  %v6402_v9 = vpop.permute.xlu0 %6401  ;;  %v5897_v6 = vmul.f32 %v11177_v18, %v11902_v29  ;;  %v5898_v18 = vmul.f32 %v11202_v23, %v11926_v58 }
 0x538   :  { %6034 = vrot.lane.b32.xlu1 %v5881_v4, %s8082_s7  ;;  %6545 = vst.msk [vmem:[#allocation6 + $0x180] sm:$0xff] %vm6176_vm1, %v6402_v9  ;;  %v5895_v4 = vmul.f32 %v12522_v57, %v11884_v10  ;;  %v5896_v57 = vmul.f32 %v11191_v11, %v11908_v56  ;;  %v5899_v10 = vmul.f32 %v11195_v8, %v11920_v53 }
 0x539   :  { %6032 = vrot.lane.b32.xlu0 %v5880_v26, %s8082_s7 }
 0x53a   :  { %v5755_v55 = vpop.permute.xlu1 %5754 }
 0x53b   :  { %v5753_v54 = vpop.permute.xlu0 %5752  ;;  %v5901_v29 = vmul.f32 %v11211_v30, %v5755_v55 }
 0x53c   :  { %6038 = vrot.lane.b32.xlu1 %v5883_v31, %s8082_s7  ;;  %v5900_v11 = vmul.f32 %v11218_v15, %v5753_v54 }
 0x53d   :  { %6036 = vrot.lane.b32.xlu0 %v5882_v16, %s8082_s7  ;;  %v12593_v16 = vld [vmem:[#allocation93_spill] sm:$0xff] }
 0x53e   :  { %v6408_v59 = vpop.permute.xlu1 %6407 }
 0x53f   :  { %6548 = vst.msk [vmem:[#allocation6 + $0x198] sm:$0xff] %vm6176_vm1, %v6408_v59  ;;  %v6406_v34 = vpop.permute.xlu0 %6405 }
 0x540   :  { %6042 = vrot.lane.b32.xlu1 %v5885_v1, %s8082_s7  ;;  %6547 = vst.msk [vmem:[#allocation6 + $0x190] sm:$0xff] %vm6176_vm1, %v6406_v34 }
 0x541   :  { %6040 = vrot.lane.b32.xlu0 %v5884_v39, %s8082_s7 }
 0x542   :  { %v5759_v22 = vpop.permute.xlu1 %5758 }
 0x543   :  { %v5757_v40 = vpop.permute.xlu0 %5756  ;;  %v5903_v56 = vmul.f32 %v11224_v45, %v5759_v22 }
 0x544   :  { %6046 = vrot.lane.b32.xlu1 %v5887_v41, %s8082_s7  ;;  %v5902_v23 = vmul.f32 %v11228_v25, %v5757_v40  ;;  %v12592_v25 = vld [vmem:[#allocation91_spill] sm:$0xff]  ;;  %v12596_v41 = vld [vmem:[#allocation113_spill] sm:$0xff] }
 0x545   :  { %6044 = vrot.lane.b32.xlu0 %v5886_v32, %s8082_s7 }
 0x546   :  { %v6412_v52 = vpop.permute.xlu1 %6411 }
 0x547   :  { %6550 = vst.msk [vmem:[#allocation6 + $0x1a8] sm:$0xff] %vm6176_vm1, %v6412_v52  ;;  %v6410_v28 = vpop.permute.xlu0 %6409  ;;  %v12597_v52 = vld [vmem:[#allocation115_spill] sm:$0xff] }
 0x548   :  { %6050 = vrot.lane.b32.xlu1 %v5889_v2, %s8082_s7  ;;  %6549 = vst.msk [vmem:[#allocation6 + $0x1a0] sm:$0xff] %vm6176_vm1, %v6410_v28 }
 0x549   :  { %6048 = vrot.lane.b32.xlu0 %v5888_v43, %s8082_s7 }
 0x54a   :  { %v5763_v33 = vpop.permute.xlu1 %5762 }
 0x54b   :  { %v5761_v19 = vpop.permute.xlu0 %5760  ;;  %v5905_v58 = vmul.f32 %v11235_v36, %v5763_v33 }
 0x54c   :  { %6054 = vrot.lane.b32.xlu1 %v5891_v5, %s8082_s7  ;;  %v5904_v15 = vmul.f32 %v11240_v37, %v5761_v19  ;;  %v12594_v37 = vld [vmem:[#allocation94_spill] sm:$0xff] }
 0x54d   :  { %6052 = vrot.lane.b32.xlu0 %v5890_v46, %s8082_s7  ;;  %v12599_v46 = vld [vmem:[#allocation21_spill] sm:$0xff] }
 0x54e   :  { %v6416_v17 = vpop.permute.xlu1 %6415 }
 0x54f   :  { %6552 = vst.msk [vmem:[#allocation6 + $0x1b8] sm:$0xff] %vm6176_vm1, %v6416_v17  ;;  %v6414_v24 = vpop.permute.xlu0 %6413 }
 0x550   :  { %6058 = vrot.lane.b32.xlu1 %v5893_v13, %s8082_s7  ;;  %6551 = vst.msk [vmem:[#allocation6 + $0x1b0] sm:$0xff] %vm6176_vm1, %v6414_v24 }
 0x551   :  { %6056 = vrot.lane.b32.xlu0 %v5892_v27, %s8082_s7 }
 0x552   :  { %v5767_v48 = vpop.permute.xlu1 %5766 }
 0x553   :  { %v5765_v60 = vpop.permute.xlu0 %5764  ;;  %v5907_v31 = vmul.f32 %v12591_v3, %v5767_v48 }
 0x554   :  { %6062 = vrot.lane.b32.xlu1 %v5895_v4, %s8082_s7  ;;  %v5906_v36 = vmul.f32 %v12592_v25, %v5765_v60 }
 0x555   :  { %6060 = vrot.lane.b32.xlu0 %v5894_v42, %s8082_s7 }
 0x556   :  { %v6420_v0 = vpop.permute.xlu1 %6419 }
 0x557   :  { %6554 = vst.msk [vmem:[#allocation6 + $0x1c8] sm:$0xff] %vm6176_vm1, %v6420_v0  ;;  %v6418_v47 = vpop.permute.xlu0 %6417 }
 0x558   :  { %6066 = vrot.lane.b32.xlu1 %v5897_v6, %s8082_s7  ;;  %6553 = vst.msk [vmem:[#allocation6 + $0x1c0] sm:$0xff] %vm6176_vm1, %v6418_v47 }
 0x559   :  { %6064 = vrot.lane.b32.xlu0 %v5896_v57, %s8082_s7 }
 0x55a   :  { %v5771_v20 = vpop.permute.xlu1 %5770 }
 0x55b   :  { %v5769_v21 = vpop.permute.xlu0 %5768  ;;  %v5909_v54 = vmul.f32 %v12593_v16, %v5771_v20 }
 0x55c   :  { %6070 = vrot.lane.b32.xlu1 %v5899_v10, %s8082_s7  ;;  %v5908_v1 = vmul.f32 %v12594_v37, %v5769_v21 }
 0x55d   :  { %6068 = vrot.lane.b32.xlu0 %v5898_v18, %s8082_s7 }
 0x55e   :  { %v6424_v26 = vpop.permute.xlu1 %6423 }
 0x55f   :  { %6556 = vst.msk [vmem:[#allocation6 + $0x1d8] sm:$0xff] %vm6176_vm1, %v6424_v26  ;;  %v6422_v8 = vpop.permute.xlu0 %6421 }
 0x560   :  { %6074 = vrot.lane.b32.xlu1 %v5901_v29, %s8082_s7  ;;  %6555 = vst.msk [vmem:[#allocation6 + $0x1d0] sm:$0xff] %vm6176_vm1, %v6422_v8 }
 0x561   :  { %6072 = vrot.lane.b32.xlu0 %v5900_v11, %s8082_s7 }
 0x562   :  { %v5775_v53 = vpop.permute.xlu1 %5774 }
 0x563   :  { %v5773_v30 = vpop.permute.xlu0 %5772  ;;  %v5911_v39 = vmul.f32 %v12595_v50, %v5775_v53 }
 0x564   :  { %6078 = vrot.lane.b32.xlu1 %v5903_v56, %s8082_s7  ;;  %v5910_v22 = vmul.f32 %v12596_v41, %v5773_v30 }
 0x565   :  { %6076 = vrot.lane.b32.xlu0 %v5902_v23, %s8082_s7 }
 0x566   :  { %v6428_v9 = vpop.permute.xlu1 %6427 }
 0x567   :  { %6558 = vst.msk [vmem:[#allocation6 + $0x1e8] sm:$0xff] %vm6176_vm1, %v6428_v9  ;;  %v6426_v45 = vpop.permute.xlu0 %6425 }
 0x568   :  { %6082 = vrot.lane.b32.xlu1 %v5905_v58, %s8082_s7  ;;  %6557 = vst.msk [vmem:[#allocation6 + $0x1e0] sm:$0xff] %vm6176_vm1, %v6426_v45 }
 0x569   :  { %6080 = vrot.lane.b32.xlu0 %v5904_v15, %s8082_s7 }
 0x56a   :  { %v5779_v55 = vpop.permute.xlu1 %5778 }
 0x56b   :  { %v5777_v49 = vpop.permute.xlu0 %5776  ;;  %v5913_v40 = vmul.f32 %v12545_v12, %v5779_v55  ;;  %v12598_v12 = vld [vmem:[#allocation117_spill] sm:$0xff] }
 0x56c   :  { %6086 = vrot.lane.b32.xlu1 %v5907_v31, %s8082_s7  ;;  %v5912_v43 = vmul.f32 %v12597_v52, %v5777_v49 }
 0x56d   :  { %6084 = vrot.lane.b32.xlu0 %v5906_v36, %s8082_s7 }
 0x56e   :  { %v5783_v63 = vpop.permute.xlu1 %5782 }
 0x56f   :  { %v5781_v59 = vpop.permute.xlu0 %5780  ;;  %v5915_v61 = vmul.f32 %v12549_v14, %v5783_v63  ;;  %v12600_v14 = vld [vmem:[#allocation15_spill] sm:$0xff] }
 0x570   :  { %6090 = vrot.lane.b32.xlu1 %v5909_v54, %s8082_s7  ;;  %v5914_v33 = vmul.f32 %v12598_v12, %v5781_v59 }
 0x571   :  { %6088 = vrot.lane.b32.xlu0 %v5908_v1, %s8082_s7 }
 0x572   :  { %v5987_v34 = vpop.permute.xlu1 %5986 }
 0x573   :  { %6178 = vst.msk [vmem:[#allocation4 + $0x8] sm:$0xff] %vm6176_vm1, %v5987_v34  ;;  %v5985_v32 = vpop.permute.xlu0 %5984 }
 0x574   :  { %6094 = vrot.lane.b32.xlu1 %v5911_v39, %s8082_s7  ;;  %6177 = vst.msk [vmem:[#allocation4] sm:$0xff] %vm6176_vm1, %v5985_v32 }
 0x575   :  { %6092 = vrot.lane.b32.xlu0 %v5910_v22, %s8082_s7 }
 0x576   :  { %v5787_v2 = vpop.permute.xlu1 %5786 }
 0x577   :  { %v5785_v28 = vpop.permute.xlu0 %5784  ;;  %v5917_v19 = vmul.f32 %v12599_v46, %v5787_v2 }
 0x578   :  { %6098 = vrot.lane.b32.xlu1 %v5913_v40, %s8082_s7  ;;  %v5916_v17 = vmul.f32 %v12600_v14, %v5785_v28 }
 0x579   :  { %6096 = vrot.lane.b32.xlu0 %v5912_v43, %s8082_s7 }
 0x57a   :  { %v5991_v5 = vpop.permute.xlu1 %5990 }
 0x57b   :  { %6180 = vst.msk [vmem:[#allocation4 + $0x18] sm:$0xff] %vm6176_vm1, %v5991_v5  ;;  %v5989_v7 = vpop.permute.xlu0 %5988 }
 0x57c   :  { %6102 = vrot.lane.b32.xlu1 %v5915_v61, %s8082_s7  ;;  %6179 = vst.msk [vmem:[#allocation4 + $0x10] sm:$0xff] %vm6176_vm1, %v5989_v7 }
 0x57d   :  { %6100 = vrot.lane.b32.xlu0 %v5914_v33, %s8082_s7 }
 0x57e   :  { %v5995_v13 = vpop.permute.xlu1 %5994 }
 0x57f   :  { %6182 = vst.msk [vmem:[#allocation4 + $0x28] sm:$0xff] %vm6176_vm1, %v5995_v13  ;;  %v5789_v51 = vpop.permute.xlu0 %5788 }
 0x580   :  { %6106 = vrot.lane.b32.xlu1 %v5917_v19, %s8082_s7  ;;  %v5918_v4 = vmul.f32 %v12555_v35, %v5789_v51 }
 0x581   :  { %6104 = vrot.lane.b32.xlu0 %v5916_v17, %s8082_s7 }
 0x582   :  { %v5791_v27 = vpop.permute.xlu1 %5790 }
 0x583   :  { %v5919_v24 = vmul.f32 %v12558_v38, %v5791_v27  ;;  %v5993_v48 = vpop.permute.xlu0 %5992 }
 0x584   :  { %6181 = vst.msk [vmem:[#allocation4 + $0x20] sm:$0xff] %vm6176_vm1, %v5993_v48 }
 0x585   :  { %6110 = vrot.lane.b32.xlu1 %v5919_v24, %s8082_s7  ;;  %6108 = vrot.lane.b32.xlu0 %v5918_v4, %s8082_s7 }
 0x586   :  { %v5999_v42 = vpop.permute.xlu1 %5998 }
 0x587   :  { %6184 = vst.msk [vmem:[#allocation4 + $0x38] sm:$0xff] %vm6176_vm1, %v5999_v42  ;;  %v5997_v60 = vpop.permute.xlu0 %5996 }
 0x588   :  { %6183 = vst.msk [vmem:[#allocation4 + $0x30] sm:$0xff] %vm6176_vm1, %v5997_v60 }
 0x589   :  { %6431 = vrot.lane.b32.xlu1 %v11811_v44, %s8081_s3  ;;  %6429 = vrot.lane.b32.xlu0 %v11807_v62, %s8081_s3 }
 0x58a   :  { %v6003_v6 = vpop.permute.xlu1 %6002 }
 0x58b   :  { %6186 = vst.msk [vmem:[#allocation4 + $0x48] sm:$0xff] %vm6176_vm1, %v6003_v6  ;;  %v6001_v35 = vpop.permute.xlu0 %6000 }
 0x58c   :  { %6185 = vst.msk [vmem:[#allocation4 + $0x40] sm:$0xff] %vm6176_vm1, %v6001_v35 }
 0x58e   :  { %v6007_v38 = vpop.permute.xlu1 %6006 }
 0x58f   :  { %6188 = vst.msk [vmem:[#allocation4 + $0x58] sm:$0xff] %vm6176_vm1, %v6007_v38  ;;  %v6005_v0 = vpop.permute.xlu0 %6004 }
 0x590   :  { %6187 = vst.msk [vmem:[#allocation4 + $0x50] sm:$0xff] %vm6176_vm1, %v6005_v0 }
 0x592   :  { %v6011_v57 = vpop.permute.xlu1 %6010 }
 0x593   :  { %6190 = vst.msk [vmem:[#allocation4 + $0x68] sm:$0xff] %vm6176_vm1, %v6011_v57  ;;  %v6009_v44 = vpop.permute.xlu0 %6008 }
 0x594   :  { %6189 = vst.msk [vmem:[#allocation4 + $0x60] sm:$0xff] %vm6176_vm1, %v6009_v44 }
 0x596   :  { %v6015_v47 = vpop.permute.xlu1 %6014 }
 0x597   :  { %6192 = vst.msk [vmem:[#allocation4 + $0x78] sm:$0xff] %vm6176_vm1, %v6015_v47  ;;  %v6013_v62 = vpop.permute.xlu0 %6012 }
 0x598   :  { %6191 = vst.msk [vmem:[#allocation4 + $0x70] sm:$0xff] %vm6176_vm1, %v6013_v62 }
 0x59a   :  { %v6019_v10 = vpop.permute.xlu1 %6018 }
 0x59b   :  { %6194 = vst.msk [vmem:[#allocation4 + $0x88] sm:$0xff] %vm6176_vm1, %v6019_v10  ;;  %v6017_v20 = vpop.permute.xlu0 %6016 }
 0x59c   :  { %6193 = vst.msk [vmem:[#allocation4 + $0x80] sm:$0xff] %vm6176_vm1, %v6017_v20 }
 0x59e   :  { %v6023_v18 = vpop.permute.xlu1 %6022 }
 0x59f   :  { %6196 = vst.msk [vmem:[#allocation4 + $0x98] sm:$0xff] %vm6176_vm1, %v6023_v18  ;;  %v6021_v21 = vpop.permute.xlu0 %6020 }
 0x5a0   :  { %6195 = vst.msk [vmem:[#allocation4 + $0x90] sm:$0xff] %vm6176_vm1, %v6021_v21 }
 0x5a2   :  { %v6027_v29 = vpop.permute.xlu1 %6026 }
 0x5a3   :  { %6198 = vst.msk [vmem:[#allocation4 + $0xa8] sm:$0xff] %vm6176_vm1, %v6027_v29  ;;  %v6025_v26 = vpop.permute.xlu0 %6024 }
 0x5a4   :  { %6197 = vst.msk [vmem:[#allocation4 + $0xa0] sm:$0xff] %vm6176_vm1, %v6025_v26 }
 0x5a6   :  { %v6031_v11 = vpop.permute.xlu1 %6030 }
 0x5a7   :  { %6200 = vst.msk [vmem:[#allocation4 + $0xb8] sm:$0xff] %vm6176_vm1, %v6031_v11  ;;  %v6029_v8 = vpop.permute.xlu0 %6028 }
 0x5a8   :  { %6199 = vst.msk [vmem:[#allocation4 + $0xb0] sm:$0xff] %vm6176_vm1, %v6029_v8 }
 0x5aa   :  { %v6035_v56 = vpop.permute.xlu1 %6034 }
 0x5ab   :  { %6202 = vst.msk [vmem:[#allocation4 + $0xc8] sm:$0xff] %vm6176_vm1, %v6035_v56  ;;  %v6033_v53 = vpop.permute.xlu0 %6032 }
 0x5ac   :  { %6201 = vst.msk [vmem:[#allocation4 + $0xc0] sm:$0xff] %vm6176_vm1, %v6033_v53 }
 0x5ae   :  { %v6039_v23 = vpop.permute.xlu1 %6038 }
 0x5af   :  { %6204 = vst.msk [vmem:[#allocation4 + $0xd8] sm:$0xff] %vm6176_vm1, %v6039_v23  ;;  %v6037_v30 = vpop.permute.xlu0 %6036 }
 0x5b0   :  { %6203 = vst.msk [vmem:[#allocation4 + $0xd0] sm:$0xff] %vm6176_vm1, %v6037_v30 }
 0x5b2   :  { %v6043_v58 = vpop.permute.xlu1 %6042 }
 0x5b3   :  { %6206 = vst.msk [vmem:[#allocation4 + $0xe8] sm:$0xff] %vm6176_vm1, %v6043_v58  ;;  %v6041_v9 = vpop.permute.xlu0 %6040 }
 0x5b4   :  { %6205 = vst.msk [vmem:[#allocation4 + $0xe0] sm:$0xff] %vm6176_vm1, %v6041_v9 }
 0x5b6   :  { %v6047_v15 = vpop.permute.xlu1 %6046 }
 0x5b7   :  { %6208 = vst.msk [vmem:[#allocation4 + $0xf8] sm:$0xff] %vm6176_vm1, %v6047_v15  ;;  %v6045_v45 = vpop.permute.xlu0 %6044 }
 0x5b8   :  { %6207 = vst.msk [vmem:[#allocation4 + $0xf0] sm:$0xff] %vm6176_vm1, %v6045_v45 }
 0x5ba   :  { %v6051_v3 = vpop.permute.xlu1 %6050 }
 0x5bb   :  { %6210 = vst.msk [vmem:[#allocation4 + $0x108] sm:$0xff] %vm6176_vm1, %v6051_v3  ;;  %v6049_v31 = vpop.permute.xlu0 %6048 }
 0x5bc   :  { %6209 = vst.msk [vmem:[#allocation4 + $0x100] sm:$0xff] %vm6176_vm1, %v6049_v31 }
 0x5be   :  { %v6055_v55 = vpop.permute.xlu1 %6054 }
 0x5bf   :  { %6212 = vst.msk [vmem:[#allocation4 + $0x118] sm:$0xff] %vm6176_vm1, %v6055_v55  ;;  %v6053_v25 = vpop.permute.xlu0 %6052 }
 0x5c0   :  { %6211 = vst.msk [vmem:[#allocation4 + $0x110] sm:$0xff] %vm6176_vm1, %v6053_v25 }
 0x5c2   :  { %v6059_v36 = vpop.permute.xlu1 %6058 }
 0x5c3   :  { %6214 = vst.msk [vmem:[#allocation4 + $0x128] sm:$0xff] %vm6176_vm1, %v6059_v36  ;;  %v6057_v49 = vpop.permute.xlu0 %6056 }
 0x5c4   :  { %6213 = vst.msk [vmem:[#allocation4 + $0x120] sm:$0xff] %vm6176_vm1, %v6057_v49 }
 0x5c6   :  { %v6063_v16 = vpop.permute.xlu1 %6062 }
 0x5c7   :  { %6216 = vst.msk [vmem:[#allocation4 + $0x138] sm:$0xff] %vm6176_vm1, %v6063_v16  ;;  %v6061_v54 = vpop.permute.xlu0 %6060 }
 0x5c8   :  { %6215 = vst.msk [vmem:[#allocation4 + $0x130] sm:$0xff] %vm6176_vm1, %v6061_v54 }
 0x5ca   :  { %v6067_v63 = vpop.permute.xlu1 %6066 }
 0x5cb   :  { %6218 = vst.msk [vmem:[#allocation4 + $0x148] sm:$0xff] %vm6176_vm1, %v6067_v63  ;;  %v6065_v37 = vpop.permute.xlu0 %6064 }
 0x5cc   :  { %6217 = vst.msk [vmem:[#allocation4 + $0x140] sm:$0xff] %vm6176_vm1, %v6065_v37 }
 0x5ce   :  { %v6071_v1 = vpop.permute.xlu1 %6070 }
 0x5cf   :  { %6220 = vst.msk [vmem:[#allocation4 + $0x158] sm:$0xff] %vm6176_vm1, %v6071_v1  ;;  %v6069_v59 = vpop.permute.xlu0 %6068 }
 0x5d0   :  { %6219 = vst.msk [vmem:[#allocation4 + $0x150] sm:$0xff] %vm6176_vm1, %v6069_v59 }
 0x5d2   :  { %v6075_v50 = vpop.permute.xlu1 %6074 }
 0x5d3   :  { %6222 = vst.msk [vmem:[#allocation4 + $0x168] sm:$0xff] %vm6176_vm1, %v6075_v50  ;;  %v6073_v39 = vpop.permute.xlu0 %6072 }
 0x5d4   :  { %6221 = vst.msk [vmem:[#allocation4 + $0x160] sm:$0xff] %vm6176_vm1, %v6073_v39 }
 0x5d6   :  { %v6079_v34 = vpop.permute.xlu1 %6078 }
 0x5d7   :  { %6224 = vst.msk [vmem:[#allocation4 + $0x178] sm:$0xff] %vm6176_vm1, %v6079_v34  ;;  %v6077_v41 = vpop.permute.xlu0 %6076 }
 0x5d8   :  { %6223 = vst.msk [vmem:[#allocation4 + $0x170] sm:$0xff] %vm6176_vm1, %v6077_v41 }
 0x5da   :  { %v6083_v22 = vpop.permute.xlu1 %6082 }
 0x5db   :  { %6226 = vst.msk [vmem:[#allocation4 + $0x188] sm:$0xff] %vm6176_vm1, %v6083_v22  ;;  %v6081_v32 = vpop.permute.xlu0 %6080 }
 0x5dc   :  { %6225 = vst.msk [vmem:[#allocation4 + $0x180] sm:$0xff] %vm6176_vm1, %v6081_v32 }
 0x5de   :  { %v6087_v40 = vpop.permute.xlu1 %6086 }
 0x5df   :  { %6228 = vst.msk [vmem:[#allocation4 + $0x198] sm:$0xff] %vm6176_vm1, %v6087_v40  ;;  %v6085_v2 = vpop.permute.xlu0 %6084 }
 0x5e0   :  { %6227 = vst.msk [vmem:[#allocation4 + $0x190] sm:$0xff] %vm6176_vm1, %v6085_v2 }
 0x5e2   :  { %v6091_v52 = vpop.permute.xlu1 %6090 }
 0x5e3   :  { %6230 = vst.msk [vmem:[#allocation4 + $0x1a8] sm:$0xff] %vm6176_vm1, %v6091_v52  ;;  %v6089_v43 = vpop.permute.xlu0 %6088 }
 0x5e4   :  { %6229 = vst.msk [vmem:[#allocation4 + $0x1a0] sm:$0xff] %vm6176_vm1, %v6089_v43 }
 0x5e6   :  { %v6095_v28 = vpop.permute.xlu1 %6094 }
 0x5e7   :  { %6232 = vst.msk [vmem:[#allocation4 + $0x1b8] sm:$0xff] %vm6176_vm1, %v6095_v28  ;;  %v6093_v61 = vpop.permute.xlu0 %6092 }
 0x5e8   :  { %6231 = vst.msk [vmem:[#allocation4 + $0x1b0] sm:$0xff] %vm6176_vm1, %v6093_v61 }
 0x5ea   :  { %v6099_v5 = vpop.permute.xlu1 %6098 }
 0x5eb   :  { %6234 = vst.msk [vmem:[#allocation4 + $0x1c8] sm:$0xff] %vm6176_vm1, %v6099_v5  ;;  %v6097_v12 = vpop.permute.xlu0 %6096 }
 0x5ec   :  { %6233 = vst.msk [vmem:[#allocation4 + $0x1c0] sm:$0xff] %vm6176_vm1, %v6097_v12 }
 0x5ee   :  { %v6103_v33 = vpop.permute.xlu1 %6102 }
 0x5ef   :  { %6236 = vst.msk [vmem:[#allocation4 + $0x1d8] sm:$0xff] %vm6176_vm1, %v6103_v33  ;;  %v6101_v7 = vpop.permute.xlu0 %6100 }
 0x5f0   :  { %6235 = vst.msk [vmem:[#allocation4 + $0x1d0] sm:$0xff] %vm6176_vm1, %v6101_v7 }
 0x5f2   :  { %v6107_v46 = vpop.permute.xlu1 %6106 }
 0x5f3   :  { %6238 = vst.msk [vmem:[#allocation4 + $0x1e8] sm:$0xff] %vm6176_vm1, %v6107_v46  ;;  %v6105_v19 = vpop.permute.xlu0 %6104 }
 0x5f4   :  { %6237 = vst.msk [vmem:[#allocation4 + $0x1e0] sm:$0xff] %vm6176_vm1, %v6105_v19 }
 0x5f7   :  { %v6111_v13 = vpop.permute.xlu1 %6110  ;;  %v6109_v14 = vpop.permute.xlu0 %6108 }
 0x5f8   :  { %6240 = vst.msk [vmem:[#allocation4 + $0x1f8] sm:$0xff] %vm6176_vm1, %v6111_v13  ;;  %6239 = vst.msk [vmem:[#allocation4 + $0x1f0] sm:$0xff] %vm6176_vm1, %v6109_v14 }
 0x5fb   :  { %v6432_v17 = vpop.permute.xlu1 %6431 }
 0x5fc   :  { %8041 = shalt.err (!%p8038_p4)
}
 0x5fd   :  { %s8042_s15 = scalar_lea.hbm %s12141_s4, 8192 }
 0x5fe   :  { %p8043_p5 = scmp.ne.s32.totalorder %s12141_s4, %s8042_s15  ;;  %p8046_p6 = scmp.lt.u32.totalorder %s8042_s15, %s12141_s4 }
 0x600   :  { %p8048_p7 = pnand %p8046_p6, %p8043_p5 }
 0x602   :  { %8051 = shalt.err (!%p8048_p7)
}
 0x603   :  { %s8085_s20 = smov 128   ;;  %s8086_s21 = smov 8   ;;  %6560 = vst.msk [vmem:[#allocation6 + $0x1f8] sm:$0xff] %vm6176_vm1, %v6432_v17  ;;  %v6430_v51 = vpop.permute.xlu0 %6429 }
 0x604   :  { %6572 = dma.vmem_to_hbm [thread:$0]  %s6567_s8, 8192, %s12141_s4, [#allocation5], %s8085_s20, %s8085_s20, %s8086_s21   ;;  %6559 = vst.msk [vmem:[#allocation6 + $0x1f0] sm:$0xff] %vm6176_vm1, %v6430_v51 }
 0x605   :  { %s8052_s24 = scalar_lea.vmem %s6579_s11, 8192  ;;  %p8057_p9 = scmp.lt.s32.totalorder %s6579_s11, %s6579_s11 }
 0x606   :  { %p8053_p8 = scmp.ne.s32.totalorder %s6579_s11, %s8052_s24  ;;  %p8058_p10 = scmp.lt.s32.totalorder %s8052_s24, %s8052_s24 }
 0x608   :  { %p8059_p11 = por %p8058_p10, %p8057_p9 }
 0x60a   :  { %p8060_p12 = pnand %p8059_p11, %p8053_p8 }
 0x60c   :  { %8063 = shalt.err (!%p8060_p12)
}
 0x60d   :  { %s8064_s0 = scalar_lea.hbm %s12142_s5, 8192 }
 0x60e   :  { %p8065_p13 = scmp.ne.s32.totalorder %s12142_s5, %s8064_s0  ;;  %p8068_p0 = scmp.lt.u32.totalorder %s8064_s0, %s12142_s5 }
 0x610   :  { %p8070_p1 = pnand %p8068_p0, %p8065_p13 }
 0x612   :  { %8073 = shalt.err (!%p8070_p1)
}
 0x613   :  { %6584 = dma.vmem_to_hbm [thread:$0]  %s6579_s11, 8192, %s12142_s5, [#allocation7], %s8085_s20, %s8085_s20, %s8086_s21  }
 0x614   :  { %8074 = dma.done.wait [#allocation5], 8192  }
 0x615   :  { %8075 = vsyncadd [#allocation5], 4294959104 }
 0x616   :  { %8076 = dma.done.wait [#allocation7], 8192  }
 0x617   :  { %8077 = vsyncadd [#allocation7], 4294959104 }
 0x618   :  { %6591 = vsyncpa [#allocation5], 1 }
 0x619   :  { %6592 = vsyncpa [#allocation7], 1 }

</bundles_post_ra>
